<compile_context>
chip_gen: v6e
topology: v6e:2x2x1
jax: 0.10.0
libtpu: 0.0.40
codegen_flags: <defaults>
</compile_context>

<pallas_src>
import functools

import jax
import jax.numpy as jnp
from jax.experimental import pallas as pl
from jax.experimental.pallas import tpu as pltpu

LANE = 128
MAX_TILE_M = 512                    # max output rows (ho-chunk * wo) per grid step
VMEM_LIMIT = 64 * 1024 * 1024


def _round_up(x, m):
    return (x + m - 1) // m * m


def _pick_th(ho, wo, max_m=MAX_TILE_M):
    """Largest divisor `th` of ho with th*wo <= max_m and an (8,·)-friendly block."""
    cands = [t for t in range(1, ho + 1)
             if ho % t == 0 and ((t * wo) % 8 == 0 or t == ho)]
    fitting = [t for t in cands if t * wo <= max_m]
    return max(fitting) if fitting else min(cands)


# ----------------------------------------------------------------------------
# Pallas kernels
# ----------------------------------------------------------------------------
def _conv_bn_kernel(x_ref, w_ref, b_ref, *rest,
                    kh, kw, stride, th, wo, hph, n_chunks, relu, pool):
    """Direct conv + folded BN (+residual) (+ReLU) (+GAP) for one
    (Cout-tile, image, output-row-chunk) grid step.

    x_ref: (1, ss*hph, wph, cin_p)   padded activation, stride phases stacked on rows
    w_ref: (kh*kw*cin_p, tn)         BN-scale-folded weights (bf16), im2col layout
    b_ref: (1, tn)                   folded BN bias (f32)
    rest : [res_ref (1, th*wo, tn)], o_ref
    """
    if len(rest) == 2:
        res_ref, o_ref = rest
    else:
        (o_ref,) = rest
        res_ref = None

    cin = x_ref.shape[-1]
    tn = o_ref.shape[-1]

    # im2col-in-VMEM: gather the kh*kw shifted windows once, concat on the lane
    # dim (all pieces 128-aligned), then ONE big-K MXU matmul.
    taps = []
    for ky in range(kh):
        dy, py = divmod(ky, stride)
        for kx in range(kw):
            dx, qx = divmod(kx, stride)
            base = (py * stride + qx) * hph + dy
            if n_chunks > 1:
                start = base + pl.program_id(2) * th
                xs = x_ref[0, pl.ds(start, th), dx:dx + wo, :]
            else:
                xs = x_ref[0, base:base + th, dx:dx + wo, :]
            taps.append(xs)                                   # (th, wo, cin_p)
    xim = taps[0] if len(taps) == 1 else jnp.concatenate(taps, axis=-1)
    xim = xim.reshape(th * wo, kh * kw * cin)                 # (M, K)

    acc = jnp.dot(xim, w_ref[...], preferred_element_type=jnp.float32)
    out = acc + b_ref[...]
    if res_ref is not None:
        out = out + res_ref[0].astype(jnp.float32)
    if relu:
        out = jnp.maximum(out, 0.0)
    if pool:
        # fused global average pool: per-image channel means
        o_ref[0] = jnp.mean(out, axis=0, keepdims=True).astype(o_ref.dtype)
    else:
        o_ref[0] = out.astype(o_ref.dtype)


def _linear_kernel(f_ref, w_ref, b_ref, o_ref):
    """Final Linear for the whole batch in one MXU matmul."""
    o_ref[...] = jnp.dot(f_ref[...], w_ref[...],
                         preferred_element_type=jnp.float32) + b_ref[...]


# ----------------------------------------------------------------------------
# Wrappers (plain-JAX glue: padding, phase split, BN folding)
# ----------------------------------------------------------------------------
def fold_bn(bn, eps=1e-5):
    scale = bn["gamma"] / jnp.sqrt(bn["var"] + eps)
    bias = bn["beta"] - bn["mean"] * scale
    return scale, bias


def _make_phases(xp, stride):
    """(N, Hp, Wp, C) -> (N, s*s, Hph, Wph, C); phase (p, q) holds xp[:, p::s, q::s]."""
    if stride == 1:
        return xp[:, None]
    n, hp, wp, c = xp.shape
    hph = -(-hp // stride)
    wph = -(-wp // stride)
    phases = []
    for p in range(stride):
        for q in range(stride):
            ph = xp[:, p::stride, q::stride, :]
            ph = jnp.pad(ph, ((0, 0), (0, hph - ph.shape[1]),
                              (0, wph - ph.shape[2]), (0, 0)))
            phases.append(ph)
    return jnp.stack(phases, axis=1)


def conv_bn(x_nhwc, w_oihw, bn, stride, relu, residual=None, pool=False,
            out_dtype=jnp.bfloat16):
    """Fused Conv2d(bias=False) + BatchNorm (+residual) (+ReLU) (+GAP)."""
    cout, cin, kh, kw = w_oihw.shape
    n, h, w_sz, cin_x = x_nhwc.shape
    assert cin_x >= cin, (cin_x, cin)          # activation may carry padded channels

    # A 1x1 stride-s conv is a 1x1 stride-1 conv on the subsampled input.
    if kh == 1 and kw == 1 and stride != 1:
        x_nhwc = x_nhwc[:, ::stride, ::stride, :]
        n, h, w_sz, cin_x = x_nhwc.shape
        stride = 1

    pad = (kh - 1) // 2
    ho = (h + 2 * pad - kh) // stride + 1
    wo = (w_sz + 2 * pad - kw) // stride + 1
    m = ho * wo

    cin_p = _round_up(max(cin, cin_x), LANE)   # lane-dense contraction channels
    cp = _round_up(cout, LANE)                 # lane-dense output channels
    tn = LANE                                  # portable tile (128 also fine on v5e)

    # Fold BN scale into the weights; im2col layout (kh*kw*cin_p, cp); bf16.
    scale, bias = fold_bn(bn)
    w_mat = jnp.transpose(w_oihw, (2, 3, 1, 0)).reshape(kh * kw, cin, cout)
    w_mat = w_mat * scale[None, None, :]
    w_mat = jnp.pad(w_mat, ((0, 0), (0, cin_p - cin), (0, cp - cout)))
    w_mat = w_mat.reshape(kh * kw * cin_p, cp).astype(jnp.bfloat16)
    b_vec = jnp.pad(bias, (0, cp - cout)).astype(jnp.float32).reshape(1, cp)

    # Spatial + channel pad, bf16, stride-phase split, flatten (phase, row) dims.
    xpad = jnp.pad(x_nhwc.astype(jnp.bfloat16),
                   ((0, 0), (pad, pad), (pad, pad), (0, cin_p - cin_x)))
    xph = _make_phases(xpad, stride)                     # (N, s*s, Hph, Wph, Cin_p)
    _, ss, hph, wph, _ = xph.shape
    xph = xph.reshape(n, ss * hph, wph, cin_p)

    # Spatial (output-row) tiling; GAP fusion needs the whole image in one step.
    th = ho if pool else _pick_th(ho, wo)
    n_chunks = ho // th

    args = [xph, w_mat, b_vec]
    in_specs = [
        pl.BlockSpec((1, ss * hph, wph, cin_p), lambda j, i, c: (i, 0, 0, 0)),
        pl.BlockSpec((kh * kw * cin_p, tn), lambda j, i, c: (0, j)),
        pl.BlockSpec((1, tn), lambda j, i, c: (0, j)),
    ]
    if residual is not None:
        assert residual.shape == (n, ho, wo, cp), (residual.shape, (n, ho, wo, cp))
        args.append(residual.reshape(n, m, cp).astype(jnp.bfloat16))
        in_specs.append(pl.BlockSpec((1, th * wo, tn), lambda j, i, c: (i, c, j)))

    kernel = functools.partial(_conv_bn_kernel, kh=kh, kw=kw, stride=stride,
                               th=th, wo=wo, hph=hph, n_chunks=n_chunks,
                               relu=relu, pool=pool)

    if pool:
        out_shape = jax.ShapeDtypeStruct((n, 1, cp), jnp.float32)
        out_spec = pl.BlockSpec((1, 1, tn), lambda j, i, c: (i, 0, j))
    else:
        out_shape = jax.ShapeDtypeStruct((n, m, cp), out_dtype)
        out_spec = pl.BlockSpec((1, th * wo, tn), lambda j, i, c: (i, c, j))

    out = pl.pallas_call(
        kernel,
        out_shape=out_shape,
        grid=(cp // tn, n, n_chunks),          # Cout-tile outer -> weights resident
        in_specs=in_specs,
        out_specs=out_spec,
        compiler_params=pltpu.CompilerParams(
            dimension_semantics=("parallel", "parallel", "arbitrary"),
            vmem_limit_bytes=VMEM_LIMIT),
    )(*args)

    if pool:
        return out.reshape(n, cp)              # pooled features (padded ch = 0)
    return out.reshape(n, ho, wo, cp)


def linear_head(feats, w_lin, b_lin):
    """Final Linear on the (already globally pooled) features, whole batch at once."""
    n, cp = feats.shape
    num_classes, real_c = w_lin.shape
    ncp = _round_up(num_classes, LANE)

    w = jnp.zeros((cp, ncp), jnp.float32)
    w = w.at[:real_c, :num_classes].set(jnp.transpose(w_lin).astype(jnp.float32))
    b = jnp.zeros((1, ncp), jnp.float32)
    b = b.at[0, :num_classes].set(b_lin.astype(jnp.float32))

    out = pl.pallas_call(
        _linear_kernel,
        out_shape=jax.ShapeDtypeStruct((n, ncp), jnp.float32),
        grid=(1,),
        in_specs=[pl.BlockSpec((n, cp), lambda i: (0, 0)),
                  pl.BlockSpec((cp, ncp), lambda i: (0, 0)),
                  pl.BlockSpec((1, ncp), lambda i: (0, 0))],
        out_specs=pl.BlockSpec((n, ncp), lambda i: (0, 0)),
        compiler_params=pltpu.CompilerParams(
            dimension_semantics=("arbitrary",),
            vmem_limit_bytes=VMEM_LIMIT),
    )(feats, w, b)
    return out[:, :num_classes]


# ----------------------------------------------------------------------------
# Parameter init (BasicBlock assumed for the undeclared `block` argument)
# ----------------------------------------------------------------------------
def init_conv(key, cout, cin, k):
    return jax.random.normal(key, (cout, cin, k, k), jnp.float32) * 0.1


def init_bn(key, c):
    k1, k2, k3, k4 = jax.random.split(key, 4)
    return {
        "gamma": 1.0 + 0.1 * jax.random.normal(k1, (c,), jnp.float32),
        "beta": 0.1 * jax.random.normal(k2, (c,), jnp.float32),
        "mean": 0.05 * jax.random.normal(k3, (c,), jnp.float32),
        "var": 1.0 + 0.1 * jnp.abs(jax.random.normal(k4, (c,), jnp.float32)),
    }


def init_block(key, c_in, c_mid, c_out, stride):
    keys = jax.random.split(key, 6)
    p = {
        "conv1_w": init_conv(keys[0], c_mid, c_in, 3),
        "bn1": init_bn(keys[1], c_mid),
        "conv2_w": init_conv(keys[2], c_out, c_mid, 3),
        "bn2": init_bn(keys[3], c_out),
        "stride": stride,
        "shortcut": None,
    }
    if stride != 1 or c_in != c_out:
        p["shortcut"] = {
            "w": init_conv(keys[4], c_out, c_in, 1),
            "bn": init_bn(keys[5], c_out),
        }
    return p


def basic_block_forward(x, p, pool=False):
    out = conv_bn(x, p["conv1_w"], p["bn1"], p["stride"], relu=True)
    if p["shortcut"] is not None:
        sc = conv_bn(x, p["shortcut"]["w"], p["shortcut"]["bn"], p["stride"], relu=False)
    else:
        sc = x
    # out = relu(bn2(conv2(out)) + shortcut(x)); residual (and GAP for the last
    # block) fused in the conv2 epilogue.
    return conv_bn(out, p["conv2_w"], p["bn2"], 1, relu=True, residual=sc, pool=pool)


# ----------------------------------------------------------------------------
# ResNet
# ----------------------------------------------------------------------------
def init_resnet(key, index, image_channels=3, num_classes=10):
    """`index` is the flat channel plan (== concatenation of the superblock lists)."""
    keys = jax.random.split(key, 4 + len(index))
    params = {
        "conv1_w": init_conv(keys[0], index[0], image_channels, 3),
        "bn1": init_bn(keys[1], index[0]),
        "blocks": [],
        "lin_w": jax.random.normal(keys[2], (num_classes, index[-1]), jnp.float32) * 0.1,
        "lin_b": jax.random.normal(keys[3], (num_classes,), jnp.float32) * 0.1,
    }
    # mirrors ResNet._create_network
    kidx = 4
    params["blocks"].append(init_block(keys[kidx], index[0], index[1], index[2], stride=1))
    kidx += 1
    for i in range(2, len(index) - 2, 2):
        stride = 2 if index[i] != index[i + 2] else 1
        params["blocks"].append(
            init_block(keys[kidx], index[i], index[i + 1], index[i + 2], stride=stride))
        kidx += 1
    return params


def resnet_forward(params, y_nchw):
    # input is NCHW (PyTorch); convert to NHWC for the Pallas pipeline
    x = jnp.transpose(y_nchw, (0, 2, 3, 1)).astype(jnp.float32)
    x = conv_bn(x, params["conv1_w"], params["bn1"], stride=1, relu=True)   # conv1+bn1+relu
    blocks = params["blocks"]
    for blk in blocks[:-1]:                                                 # self.network
        x = basic_block_forward(x, blk)
    feats = basic_block_forward(x, blocks[-1], pool=True)   # last block + fused avgpool
    return linear_head(feats, params["lin_w"], params["lin_b"])             # flatten+linear


# ----------------------------------------------------------------------------
if __name__ == "__main__":
    key = jax.random.PRNGKey(0)
    kp, kx = jax.random.split(key)

    # Small channel plan consistent with ResNet._create_network:
    # block0: (8,8,8) stride 1 (identity shortcut); block1: (8,16,16) stride 2 (conv shortcut)
    index = [8, 8, 8, 16, 16]
    image_channels = 3
    num_classes = 10

    params = init_resnet(kp, index, image_channels=image_channels, num_classes=num_classes)

    # NCHW input, like the PyTorch module
    x = jax.random.normal(kx, (2, image_channels, 16, 16), jnp.float32)

    fwd = jax.jit(lambda inp: resnet_forward(params, inp))
    logits = jax.block_until_ready(fwd(x))

    assert logits.shape == (2, num_classes), logits.shape
    assert logits.dtype == jnp.float32
    assert bool(jnp.all(jnp.isfinite(logits)))
    print("KERNEL_OK")
</pallas_src>

<mosaic_0001>
module attributes {stable_mosaic.version = 11 : i64} {
  func.func @_conv_bn_kernel(%arg0: i32, %arg1: i32, %arg2: i32, %arg3: memref<1x18x18x128xbf16, #tpu.memory_space<vmem>>, %arg4: memref<1152x128xbf16, #tpu.memory_space<vmem>>, %arg5: memref<1x128xf32, #tpu.memory_space<vmem>>, %arg6: memref<1x256x128xbf16, #tpu.memory_space<vmem>>) attributes {dimension_semantics = [#tpu.dimension_semantics<parallel>, #tpu.dimension_semantics<parallel>, #tpu.dimension_semantics<arbitrary>], iteration_bounds = array<i64: 1, 2, 1>, scalar_prefetch = 0 : i64, scratch_operands = 0 : i64, tpu.core_type = #tpu.core_type<tc>, window_params = [{transform_indices = @transform_0, window_bounds = array<i64: 1, 18, 18, 128>}, {transform_indices = @transform_1, window_bounds = array<i64: 1152, 128>}, {transform_indices = @transform_2, window_bounds = array<i64: 1, 128>}, {transform_indices = @transform_3, window_bounds = array<i64: 1, 256, 128>}]} {
    %c0 = arith.constant 0 : index
    %c0_0 = arith.constant 0 : index
    %c0_1 = arith.constant 0 : index
    %c0_2 = arith.constant 0 : index
    %0 = vector.load %arg3[%c0, %c0_0, %c0_1, %c0_2] : memref<1x18x18x128xbf16, #tpu.memory_space<vmem>>, vector<1x16x16x128xbf16>
    %1 = vector.shape_cast %0 : vector<1x16x16x128xbf16> to vector<16x16x128xbf16>
    %c0_3 = arith.constant 0 : index
    %c0_4 = arith.constant 0 : index
    %c1 = arith.constant 1 : index
    %c0_5 = arith.constant 0 : index
    %2 = vector.load %arg3[%c0_3, %c0_4, %c1, %c0_5] : memref<1x18x18x128xbf16, #tpu.memory_space<vmem>>, vector<1x16x16x128xbf16>
    %3 = vector.shape_cast %2 : vector<1x16x16x128xbf16> to vector<16x16x128xbf16>
    %c0_6 = arith.constant 0 : index
    %c0_7 = arith.constant 0 : index
    %c2 = arith.constant 2 : index
    %c0_8 = arith.constant 0 : index
    %4 = vector.load %arg3[%c0_6, %c0_7, %c2, %c0_8] : memref<1x18x18x128xbf16, #tpu.memory_space<vmem>>, vector<1x16x16x128xbf16>
    %5 = vector.shape_cast %4 : vector<1x16x16x128xbf16> to vector<16x16x128xbf16>
    %c0_9 = arith.constant 0 : index
    %c1_10 = arith.constant 1 : index
    %c0_11 = arith.constant 0 : index
    %c0_12 = arith.constant 0 : index
    %6 = vector.load %arg3[%c0_9, %c1_10, %c0_11, %c0_12] : memref<1x18x18x128xbf16, #tpu.memory_space<vmem>>, vector<1x16x16x128xbf16>
    %7 = vector.shape_cast %6 : vector<1x16x16x128xbf16> to vector<16x16x128xbf16>
    %c0_13 = arith.constant 0 : index
    %c1_14 = arith.constant 1 : index
    %c1_15 = arith.constant 1 : index
    %c0_16 = arith.constant 0 : index
    %8 = vector.load %arg3[%c0_13, %c1_14, %c1_15, %c0_16] : memref<1x18x18x128xbf16, #tpu.memory_space<vmem>>, vector<1x16x16x128xbf16>
    %9 = vector.shape_cast %8 : vector<1x16x16x128xbf16> to vector<16x16x128xbf16>
    %c0_17 = arith.constant 0 : index
    %c1_18 = arith.constant 1 : index
    %c2_19 = arith.constant 2 : index
    %c0_20 = arith.constant 0 : index
    %10 = vector.load %arg3[%c0_17, %c1_18, %c2_19, %c0_20] : memref<1x18x18x128xbf16, #tpu.memory_space<vmem>>, vector<1x16x16x128xbf16>
    %11 = vector.shape_cast %10 : vector<1x16x16x128xbf16> to vector<16x16x128xbf16>
    %c0_21 = arith.constant 0 : index
    %c2_22 = arith.constant 2 : index
    %c0_23 = arith.constant 0 : index
    %c0_24 = arith.constant 0 : index
    %12 = vector.load %arg3[%c0_21, %c2_22, %c0_23, %c0_24] : memref<1x18x18x128xbf16, #tpu.memory_space<vmem>>, vector<1x16x16x128xbf16>
    %13 = vector.shape_cast %12 : vector<1x16x16x128xbf16> to vector<16x16x128xbf16>
    %c0_25 = arith.constant 0 : index
    %c2_26 = arith.constant 2 : index
    %c1_27 = arith.constant 1 : index
    %c0_28 = arith.constant 0 : index
    %14 = vector.load %arg3[%c0_25, %c2_26, %c1_27, %c0_28] : memref<1x18x18x128xbf16, #tpu.memory_space<vmem>>, vector<1x16x16x128xbf16>
    %15 = vector.shape_cast %14 : vector<1x16x16x128xbf16> to vector<16x16x128xbf16>
    %c0_29 = arith.constant 0 : index
    %c2_30 = arith.constant 2 : index
    %c2_31 = arith.constant 2 : index
    %c0_32 = arith.constant 0 : index
    %16 = vector.load %arg3[%c0_29, %c2_30, %c2_31, %c0_32] : memref<1x18x18x128xbf16, #tpu.memory_space<vmem>>, vector<1x16x16x128xbf16>
    %17 = vector.shape_cast %16 : vector<1x16x16x128xbf16> to vector<16x16x128xbf16>
    %18 = tpu.concatenate %1, %3, %5, %7, %9, %11, %13, %15, %17 in 2 : vector<16x16x128xbf16>, vector<16x16x128xbf16>, vector<16x16x128xbf16>, vector<16x16x128xbf16>, vector<16x16x128xbf16>, vector<16x16x128xbf16>, vector<16x16x128xbf16>, vector<16x16x128xbf16>, vector<16x16x128xbf16> -> vector<16x16x1152xbf16>
    %19 = vector.shape_cast %18 : vector<16x16x1152xbf16> to vector<256x1152xbf16>
    %c0_33 = arith.constant 0 : index
    %c0_34 = arith.constant 0 : index
    %20 = vector.load %arg4[%c0_33, %c0_34] : memref<1152x128xbf16, #tpu.memory_space<vmem>>, vector<1152x128xbf16>
    %cst = arith.constant dense<0.000000e+00> : vector<256x128xf32>
    %21 = tpu.matmul %19, %20, %cst {dimension_numbers = #tpu.dot_dimension_numbers<[1], [0], [0], [1], [0, 0, 1, 1], [], []>} : vector<256x1152xbf16>, vector<1152x128xbf16>, vector<256x128xf32> -> vector<256x128xf32>
    %c0_35 = arith.constant 0 : index
    %c0_36 = arith.constant 0 : index
    %22 = vector.load %arg5[%c0_35, %c0_36] : memref<1x128xf32, #tpu.memory_space<vmem>>, vector<1x128xf32>
    %23 = vector.broadcast %22 : vector<1x128xf32> to vector<256x128xf32>
    %24 = arith.addf %21, %23 : vector<256x128xf32>
    %cst_37 = arith.constant 0.000000e+00 : f32
    %25 = vector.broadcast %cst_37 : f32 to vector<256x128xf32>
    %26 = arith.maximumf %24, %25 : vector<256x128xf32>
    %27 = arith.truncf %26 : vector<256x128xf32> to vector<256x128xbf16>
    %c0_38 = arith.constant 0 : index
    %c0_39 = arith.constant 0 : index
    %c0_40 = arith.constant 0 : index
    %28 = vector.load %arg6[%c0_38, %c0_39, %c0_40] : memref<1x256x128xbf16, #tpu.memory_space<vmem>>, vector<1x256x128xbf16>
    %29 = vector.shape_cast %28 : vector<1x256x128xbf16> to vector<256x128xbf16>
    %30 = vector.shape_cast %27 : vector<256x128xbf16> to vector<1x256x128xbf16>
    tpu.vector_store %arg6[%c0_38, %c0_39, %c0_40], %30 {strides = array<i32>} : memref<1x256x128xbf16, #tpu.memory_space<vmem>>, vector<1x256x128xbf16>,
    return
  }
  func.func @transform_0(%arg0: i32, %arg1: i32, %arg2: i32) -> (i32, i32, i32, i32) {
    %c0_i32 = arith.constant 0 : i32
    %c0_i32_0 = arith.constant 0 : i32
    %c0_i32_1 = arith.constant 0 : i32
    %c0_i32_2 = arith.constant 0 : i32
    return %arg1, %c0_i32, %c0_i32_0, %c0_i32_1 : i32, i32, i32, i32
  }
  func.func @transform_1(%arg0: i32, %arg1: i32, %arg2: i32) -> (i32, i32) {
    %c0_i32 = arith.constant 0 : i32
    %c0_i32_0 = arith.constant 0 : i32
    return %c0_i32, %arg0 : i32, i32
  }
  func.func @transform_2(%arg0: i32, %arg1: i32, %arg2: i32) -> (i32, i32) {
    %c0_i32 = arith.constant 0 : i32
    %c0_i32_0 = arith.constant 0 : i32
    return %c0_i32, %arg0 : i32, i32
  }
  func.func @transform_3(%arg0: i32, %arg1: i32, %arg2: i32) -> (i32, i32, i32) {
    %c0_i32 = arith.constant 0 : i32
    return %arg1, %arg2, %arg0 : i32, i32, i32
  }
}

module attributes {stable_mosaic.version = 11 : i64} {
  func.func @_conv_bn_kernel(%arg0: i32, %arg1: i32, %arg2: i32, %arg3: memref<1x18x18x128xbf16, #tpu.memory_space<vmem>>, %arg4: memref<1152x128xbf16, #tpu.memory_space<vmem>>, %arg5: memref<1x128xf32, #tpu.memory_space<vmem>>, %arg6: memref<1x256x128xbf16, #tpu.memory_space<vmem>>, %arg7: memref<1x256x128xbf16, #tpu.memory_space<vmem>>) attributes {dimension_semantics = [#tpu.dimension_semantics<parallel>, #tpu.dimension_semantics<parallel>, #tpu.dimension_semantics<arbitrary>], iteration_bounds = array<i64: 1, 2, 1>, scalar_prefetch = 0 : i64, scratch_operands = 0 : i64, tpu.core_type = #tpu.core_type<tc>, window_params = [{transform_indices = @transform_0, window_bounds = array<i64: 1, 18, 18, 128>}, {transform_indices = @transform_1, window_bounds = array<i64: 1152, 128>}, {transform_indices = @transform_2, window_bounds = array<i64: 1, 128>}, {transform_indices = @transform_3, window_bounds = array<i64: 1, 256, 128>}, {transform_indices = @transform_4, window_bounds = array<i64: 1, 256, 128>}]} {
    %c0 = arith.constant 0 : index
    %c0_0 = arith.constant 0 : index
    %c0_1 = arith.constant 0 : index
    %c0_2 = arith.constant 0 : index
    %0 = vector.load %arg3[%c0, %c0_0, %c0_1, %c0_2] : memref<1x18x18x128xbf16, #tpu.memory_space<vmem>>, vector<1x16x16x128xbf16>
    %1 = vector.shape_cast %0 : vector<1x16x16x128xbf16> to vector<16x16x128xbf16>
    %c0_3 = arith.constant 0 : index
    %c0_4 = arith.constant 0 : index
    %c1 = arith.constant 1 : index
    %c0_5 = arith.constant 0 : index
    %2 = vector.load %arg3[%c0_3, %c0_4, %c1, %c0_5] : memref<1x18x18x128xbf16, #tpu.memory_space<vmem>>, vector<1x16x16x128xbf16>
    %3 = vector.shape_cast %2 : vector<1x16x16x128xbf16> to vector<16x16x128xbf16>
    %c0_6 = arith.constant 0 : index
    %c0_7 = arith.constant 0 : index
    %c2 = arith.constant 2 : index
    %c0_8 = arith.constant 0 : index
    %4 = vector.load %arg3[%c0_6, %c0_7, %c2, %c0_8] : memref<1x18x18x128xbf16, #tpu.memory_space<vmem>>, vector<1x16x16x128xbf16>
    %5 = vector.shape_cast %4 : vector<1x16x16x128xbf16> to vector<16x16x128xbf16>
    %c0_9 = arith.constant 0 : index
    %c1_10 = arith.constant 1 : index
    %c0_11 = arith.constant 0 : index
    %c0_12 = arith.constant 0 : index
    %6 = vector.load %arg3[%c0_9, %c1_10, %c0_11, %c0_12] : memref<1x18x18x128xbf16, #tpu.memory_space<vmem>>, vector<1x16x16x128xbf16>
    %7 = vector.shape_cast %6 : vector<1x16x16x128xbf16> to vector<16x16x128xbf16>
    %c0_13 = arith.constant 0 : index
    %c1_14 = arith.constant 1 : index
    %c1_15 = arith.constant 1 : index
    %c0_16 = arith.constant 0 : index
    %8 = vector.load %arg3[%c0_13, %c1_14, %c1_15, %c0_16] : memref<1x18x18x128xbf16, #tpu.memory_space<vmem>>, vector<1x16x16x128xbf16>
    %9 = vector.shape_cast %8 : vector<1x16x16x128xbf16> to vector<16x16x128xbf16>
    %c0_17 = arith.constant 0 : index
    %c1_18 = arith.constant 1 : index
    %c2_19 = arith.constant 2 : index
    %c0_20 = arith.constant 0 : index
    %10 = vector.load %arg3[%c0_17, %c1_18, %c2_19, %c0_20] : memref<1x18x18x128xbf16, #tpu.memory_space<vmem>>, vector<1x16x16x128xbf16>
    %11 = vector.shape_cast %10 : vector<1x16x16x128xbf16> to vector<16x16x128xbf16>
    %c0_21 = arith.constant 0 : index
    %c2_22 = arith.constant 2 : index
    %c0_23 = arith.constant 0 : index
    %c0_24 = arith.constant 0 : index
    %12 = vector.load %arg3[%c0_21, %c2_22, %c0_23, %c0_24] : memref<1x18x18x128xbf16, #tpu.memory_space<vmem>>, vector<1x16x16x128xbf16>
    %13 = vector.shape_cast %12 : vector<1x16x16x128xbf16> to vector<16x16x128xbf16>
    %c0_25 = arith.constant 0 : index
    %c2_26 = arith.constant 2 : index
    %c1_27 = arith.constant 1 : index
    %c0_28 = arith.constant 0 : index
    %14 = vector.load %arg3[%c0_25, %c2_26, %c1_27, %c0_28] : memref<1x18x18x128xbf16, #tpu.memory_space<vmem>>, vector<1x16x16x128xbf16>
    %15 = vector.shape_cast %14 : vector<1x16x16x128xbf16> to vector<16x16x128xbf16>
    %c0_29 = arith.constant 0 : index
    %c2_30 = arith.constant 2 : index
    %c2_31 = arith.constant 2 : index
    %c0_32 = arith.constant 0 : index
    %16 = vector.load %arg3[%c0_29, %c2_30, %c2_31, %c0_32] : memref<1x18x18x128xbf16, #tpu.memory_space<vmem>>, vector<1x16x16x128xbf16>
    %17 = vector.shape_cast %16 : vector<1x16x16x128xbf16> to vector<16x16x128xbf16>
    %18 = tpu.concatenate %1, %3, %5, %7, %9, %11, %13, %15, %17 in 2 : vector<16x16x128xbf16>, vector<16x16x128xbf16>, vector<16x16x128xbf16>, vector<16x16x128xbf16>, vector<16x16x128xbf16>, vector<16x16x128xbf16>, vector<16x16x128xbf16>, vector<16x16x128xbf16>, vector<16x16x128xbf16> -> vector<16x16x1152xbf16>
    %19 = vector.shape_cast %18 : vector<16x16x1152xbf16> to vector<256x1152xbf16>
    %c0_33 = arith.constant 0 : index
    %c0_34 = arith.constant 0 : index
    %20 = vector.load %arg4[%c0_33, %c0_34] : memref<1152x128xbf16, #tpu.memory_space<vmem>>, vector<1152x128xbf16>
    %cst = arith.constant dense<0.000000e+00> : vector<256x128xf32>
    %21 = tpu.matmul %19, %20, %cst {dimension_numbers = #tpu.dot_dimension_numbers<[1], [0], [0], [1], [0, 0, 1, 1], [], []>} : vector<256x1152xbf16>, vector<1152x128xbf16>, vector<256x128xf32> -> vector<256x128xf32>
    %c0_35 = arith.constant 0 : index
    %c0_36 = arith.constant 0 : index
    %22 = vector.load %arg5[%c0_35, %c0_36] : memref<1x128xf32, #tpu.memory_space<vmem>>, vector<1x128xf32>
    %23 = vector.broadcast %22 : vector<1x128xf32> to vector<256x128xf32>
    %24 = arith.addf %21, %23 : vector<256x128xf32>
    %c0_37 = arith.constant 0 : index
    %c0_38 = arith.constant 0 : index
    %c0_39 = arith.constant 0 : index
    %25 = vector.load %arg6[%c0_37, %c0_38, %c0_39] : memref<1x256x128xbf16, #tpu.memory_space<vmem>>, vector<1x256x128xbf16>
    %26 = vector.shape_cast %25 : vector<1x256x128xbf16> to vector<256x128xbf16>
    %27 = arith.extf %26 : vector<256x128xbf16> to vector<256x128xf32>
    %28 = arith.addf %24, %27 : vector<256x128xf32>
    %cst_40 = arith.constant 0.000000e+00 : f32
    %29 = vector.broadcast %cst_40 : f32 to vector<256x128xf32>
    %30 = arith.maximumf %28, %29 : vector<256x128xf32>
    %31 = arith.truncf %30 : vector<256x128xf32> to vector<256x128xbf16>
    %c0_41 = arith.constant 0 : index
    %c0_42 = arith.constant 0 : index
    %c0_43 = arith.constant 0 : index
    %32 = vector.load %arg7[%c0_41, %c0_42, %c0_43] : memref<1x256x128xbf16, #tpu.memory_space<vmem>>, vector<1x256x128xbf16>
    %33 = vector.shape_cast %32 : vector<1x256x128xbf16> to vector<256x128xbf16>
    %34 = vector.shape_cast %31 : vector<256x128xbf16> to vector<1x256x128xbf16>
    tpu.vector_store %arg7[%c0_41, %c0_42, %c0_43], %34 {strides = array<i32>} : memref<1x256x128xbf16, #tpu.memory_space<vmem>>, vector<1x256x128xbf16>,
    return
  }
  func.func @transform_0(%arg0: i32, %arg1: i32, %arg2: i32) -> (i32, i32, i32, i32) {
    %c0_i32 = arith.constant 0 : i32
    %c0_i32_0 = arith.constant 0 : i32
    %c0_i32_1 = arith.constant 0 : i32
    %c0_i32_2 = arith.constant 0 : i32
    return %arg1, %c0_i32, %c0_i32_0, %c0_i32_1 : i32, i32, i32, i32
  }
  func.func @transform_1(%arg0: i32, %arg1: i32, %arg2: i32) -> (i32, i32) {
    %c0_i32 = arith.constant 0 : i32
    %c0_i32_0 = arith.constant 0 : i32
    return %c0_i32, %arg0 : i32, i32
  }
  func.func @transform_2(%arg0: i32, %arg1: i32, %arg2: i32) -> (i32, i32) {
    %c0_i32 = arith.constant 0 : i32
    %c0_i32_0 = arith.constant 0 : i32
    return %c0_i32, %arg0 : i32, i32
  }
  func.func @transform_3(%arg0: i32, %arg1: i32, %arg2: i32) -> (i32, i32, i32) {
    %c0_i32 = arith.constant 0 : i32
    return %arg1, %arg2, %arg0 : i32, i32, i32
  }
  func.func @transform_4(%arg0: i32, %arg1: i32, %arg2: i32) -> (i32, i32, i32) {
    %c0_i32 = arith.constant 0 : i32
    return %arg1, %arg2, %arg0 : i32, i32, i32
  }
}

module attributes {stable_mosaic.version = 11 : i64} {
  func.func @_conv_bn_kernel(%arg0: i32, %arg1: i32, %arg2: i32, %arg3: memref<1x8x8x128xbf16, #tpu.memory_space<vmem>>, %arg4: memref<128x128xbf16, #tpu.memory_space<vmem>>, %arg5: memref<1x128xf32, #tpu.memory_space<vmem>>, %arg6: memref<1x64x128xbf16, #tpu.memory_space<vmem>>) attributes {dimension_semantics = [#tpu.dimension_semantics<parallel>, #tpu.dimension_semantics<parallel>, #tpu.dimension_semantics<arbitrary>], iteration_bounds = array<i64: 1, 2, 1>, scalar_prefetch = 0 : i64, scratch_operands = 0 : i64, tpu.core_type = #tpu.core_type<tc>, window_params = [{transform_indices = @transform_0, window_bounds = array<i64: 1, 8, 8, 128>}, {transform_indices = @transform_1, window_bounds = array<i64: 128, 128>}, {transform_indices = @transform_2, window_bounds = array<i64: 1, 128>}, {transform_indices = @transform_3, window_bounds = array<i64: 1, 64, 128>}]} {
    %c0 = arith.constant 0 : index
    %c0_0 = arith.constant 0 : index
    %c0_1 = arith.constant 0 : index
    %c0_2 = arith.constant 0 : index
    %0 = vector.load %arg3[%c0, %c0_0, %c0_1, %c0_2] : memref<1x8x8x128xbf16, #tpu.memory_space<vmem>>, vector<1x8x8x128xbf16>
    %1 = vector.shape_cast %0 : vector<1x8x8x128xbf16> to vector<8x8x128xbf16>
    %2 = vector.shape_cast %1 : vector<8x8x128xbf16> to vector<64x128xbf16>
    %c0_3 = arith.constant 0 : index
    %c0_4 = arith.constant 0 : index
    %3 = vector.load %arg4[%c0_3, %c0_4] : memref<128x128xbf16, #tpu.memory_space<vmem>>, vector<128x128xbf16>
    %cst = arith.constant dense<0.000000e+00> : vector<64x128xf32>
    %4 = tpu.matmul %2, %3, %cst {dimension_numbers = #tpu.dot_dimension_numbers<[1], [0], [0], [1], [0, 0, 1, 1], [], []>} : vector<64x128xbf16>, vector<128x128xbf16>, vector<64x128xf32> -> vector<64x128xf32>
    %c0_5 = arith.constant 0 : index
    %c0_6 = arith.constant 0 : index
    %5 = vector.load %arg5[%c0_5, %c0_6] : memref<1x128xf32, #tpu.memory_space<vmem>>, vector<1x128xf32>
    %6 = vector.broadcast %5 : vector<1x128xf32> to vector<64x128xf32>
    %7 = arith.addf %4, %6 : vector<64x128xf32>
    %8 = arith.truncf %7 : vector<64x128xf32> to vector<64x128xbf16>
    %c0_7 = arith.constant 0 : index
    %c0_8 = arith.constant 0 : index
    %c0_9 = arith.constant 0 : index
    %9 = vector.load %arg6[%c0_7, %c0_8, %c0_9] : memref<1x64x128xbf16, #tpu.memory_space<vmem>>, vector<1x64x128xbf16>
    %10 = vector.shape_cast %9 : vector<1x64x128xbf16> to vector<64x128xbf16>
    %11 = vector.shape_cast %8 : vector<64x128xbf16> to vector<1x64x128xbf16>
    tpu.vector_store %arg6[%c0_7, %c0_8, %c0_9], %11 {strides = array<i32>} : memref<1x64x128xbf16, #tpu.memory_space<vmem>>, vector<1x64x128xbf16>,
    return
  }
  func.func @transform_0(%arg0: i32, %arg1: i32, %arg2: i32) -> (i32, i32, i32, i32) {
    %c0_i32 = arith.constant 0 : i32
    %c0_i32_0 = arith.constant 0 : i32
    %c0_i32_1 = arith.constant 0 : i32
    %c0_i32_2 = arith.constant 0 : i32
    return %arg1, %c0_i32, %c0_i32_0, %c0_i32_1 : i32, i32, i32, i32
  }
  func.func @transform_1(%arg0: i32, %arg1: i32, %arg2: i32) -> (i32, i32) {
    %c0_i32 = arith.constant 0 : i32
    %c0_i32_0 = arith.constant 0 : i32
    return %c0_i32, %arg0 : i32, i32
  }
  func.func @transform_2(%arg0: i32, %arg1: i32, %arg2: i32) -> (i32, i32) {
    %c0_i32 = arith.constant 0 : i32
    %c0_i32_0 = arith.constant 0 : i32
    return %c0_i32, %arg0 : i32, i32
  }
  func.func @transform_3(%arg0: i32, %arg1: i32, %arg2: i32) -> (i32, i32, i32) {
    %c0_i32 = arith.constant 0 : i32
    return %arg1, %arg2, %arg0 : i32, i32, i32
  }
}

module attributes {stable_mosaic.version = 11 : i64} {
  func.func @_conv_bn_kernel(%arg0: i32, %arg1: i32, %arg2: i32, %arg3: memref<1x36x9x128xbf16, #tpu.memory_space<vmem>>, %arg4: memref<1152x128xbf16, #tpu.memory_space<vmem>>, %arg5: memref<1x128xf32, #tpu.memory_space<vmem>>, %arg6: memref<1x64x128xbf16, #tpu.memory_space<vmem>>) attributes {dimension_semantics = [#tpu.dimension_semantics<parallel>, #tpu.dimension_semantics<parallel>, #tpu.dimension_semantics<arbitrary>], iteration_bounds = array<i64: 1, 2, 1>, scalar_prefetch = 0 : i64, scratch_operands = 0 : i64, tpu.core_type = #tpu.core_type<tc>, window_params = [{transform_indices = @transform_0, window_bounds = array<i64: 1, 36, 9, 128>}, {transform_indices = @transform_1, window_bounds = array<i64: 1152, 128>}, {transform_indices = @transform_2, window_bounds = array<i64: 1, 128>}, {transform_indices = @transform_3, window_bounds = array<i64: 1, 64, 128>}]} {
    %c0 = arith.constant 0 : index
    %c0_0 = arith.constant 0 : index
    %c0_1 = arith.constant 0 : index
    %c0_2 = arith.constant 0 : index
    %0 = vector.load %arg3[%c0, %c0_0, %c0_1, %c0_2] : memref<1x36x9x128xbf16, #tpu.memory_space<vmem>>, vector<1x8x8x128xbf16>
    %1 = vector.shape_cast %0 : vector<1x8x8x128xbf16> to vector<8x8x128xbf16>
    %c0_3 = arith.constant 0 : index
    %c9 = arith.constant 9 : index
    %c0_4 = arith.constant 0 : index
    %c0_5 = arith.constant 0 : index
    %2 = vector.load %arg3[%c0_3, %c9, %c0_4, %c0_5] : memref<1x36x9x128xbf16, #tpu.memory_space<vmem>>, vector<1x8x8x128xbf16>
    %3 = vector.shape_cast %2 : vector<1x8x8x128xbf16> to vector<8x8x128xbf16>
    %c0_6 = arith.constant 0 : index
    %c0_7 = arith.constant 0 : index
    %c1 = arith.constant 1 : index
    %c0_8 = arith.constant 0 : index
    %4 = vector.load %arg3[%c0_6, %c0_7, %c1, %c0_8] : memref<1x36x9x128xbf16, #tpu.memory_space<vmem>>, vector<1x8x8x128xbf16>
    %5 = vector.shape_cast %4 : vector<1x8x8x128xbf16> to vector<8x8x128xbf16>
    %c0_9 = arith.constant 0 : index
    %c18 = arith.constant 18 : index
    %c0_10 = arith.constant 0 : index
    %c0_11 = arith.constant 0 : index
    %6 = vector.load %arg3[%c0_9, %c18, %c0_10, %c0_11] : memref<1x36x9x128xbf16, #tpu.memory_space<vmem>>, vector<1x8x8x128xbf16>
    %7 = vector.shape_cast %6 : vector<1x8x8x128xbf16> to vector<8x8x128xbf16>
    %c0_12 = arith.constant 0 : index
    %c27 = arith.constant 27 : index
    %c0_13 = arith.constant 0 : index
    %c0_14 = arith.constant 0 : index
    %8 = vector.load %arg3[%c0_12, %c27, %c0_13, %c0_14] : memref<1x36x9x128xbf16, #tpu.memory_space<vmem>>, vector<1x8x8x128xbf16>
    %9 = vector.shape_cast %8 : vector<1x8x8x128xbf16> to vector<8x8x128xbf16>
    %c0_15 = arith.constant 0 : index
    %c18_16 = arith.constant 18 : index
    %c1_17 = arith.constant 1 : index
    %c0_18 = arith.constant 0 : index
    %10 = vector.load %arg3[%c0_15, %c18_16, %c1_17, %c0_18] : memref<1x36x9x128xbf16, #tpu.memory_space<vmem>>, vector<1x8x8x128xbf16>
    %11 = vector.shape_cast %10 : vector<1x8x8x128xbf16> to vector<8x8x128xbf16>
    %c0_19 = arith.constant 0 : index
    %c1_20 = arith.constant 1 : index
    %c0_21 = arith.constant 0 : index
    %c0_22 = arith.constant 0 : index
    %12 = vector.load %arg3[%c0_19, %c1_20, %c0_21, %c0_22] : memref<1x36x9x128xbf16, #tpu.memory_space<vmem>>, vector<1x8x8x128xbf16>
    %13 = vector.shape_cast %12 : vector<1x8x8x128xbf16> to vector<8x8x128xbf16>
    %c0_23 = arith.constant 0 : index
    %c10 = arith.constant 10 : index
    %c0_24 = arith.constant 0 : index
    %c0_25 = arith.constant 0 : index
    %14 = vector.load %arg3[%c0_23, %c10, %c0_24, %c0_25] : memref<1x36x9x128xbf16, #tpu.memory_space<vmem>>, vector<1x8x8x128xbf16>
    %15 = vector.shape_cast %14 : vector<1x8x8x128xbf16> to vector<8x8x128xbf16>
    %c0_26 = arith.constant 0 : index
    %c1_27 = arith.constant 1 : index
    %c1_28 = arith.constant 1 : index
    %c0_29 = arith.constant 0 : index
    %16 = vector.load %arg3[%c0_26, %c1_27, %c1_28, %c0_29] : memref<1x36x9x128xbf16, #tpu.memory_space<vmem>>, vector<1x8x8x128xbf16>
    %17 = vector.shape_cast %16 : vector<1x8x8x128xbf16> to vector<8x8x128xbf16>
    %18 = tpu.concatenate %1, %3, %5, %7, %9, %11, %13, %15, %17 in 2 : vector<8x8x128xbf16>, vector<8x8x128xbf16>, vector<8x8x128xbf16>, vector<8x8x128xbf16>, vector<8x8x128xbf16>, vector<8x8x128xbf16>, vector<8x8x128xbf16>, vector<8x8x128xbf16>, vector<8x8x128xbf16> -> vector<8x8x1152xbf16>
    %19 = vector.shape_cast %18 : vector<8x8x1152xbf16> to vector<64x1152xbf16>
    %c0_30 = arith.constant 0 : index
    %c0_31 = arith.constant 0 : index
    %20 = vector.load %arg4[%c0_30, %c0_31] : memref<1152x128xbf16, #tpu.memory_space<vmem>>, vector<1152x128xbf16>
    %cst = arith.constant dense<0.000000e+00> : vector<64x128xf32>
    %21 = tpu.matmul %19, %20, %cst {dimension_numbers = #tpu.dot_dimension_numbers<[1], [0], [0], [1], [0, 0, 1, 1], [], []>} : vector<64x1152xbf16>, vector<1152x128xbf16>, vector<64x128xf32> -> vector<64x128xf32>
    %c0_32 = arith.constant 0 : index
    %c0_33 = arith.constant 0 : index
    %22 = vector.load %arg5[%c0_32, %c0_33] : memref<1x128xf32, #tpu.memory_space<vmem>>, vector<1x128xf32>
    %23 = vector.broadcast %22 : vector<1x128xf32> to vector<64x128xf32>
    %24 = arith.addf %21, %23 : vector<64x128xf32>
    %cst_34 = arith.constant 0.000000e+00 : f32
    %25 = vector.broadcast %cst_34 : f32 to vector<64x128xf32>
    %26 = arith.maximumf %24, %25 : vector<64x128xf32>
    %27 = arith.truncf %26 : vector<64x128xf32> to vector<64x128xbf16>
    %c0_35 = arith.constant 0 : index
    %c0_36 = arith.constant 0 : index
    %c0_37 = arith.constant 0 : index
    %28 = vector.load %arg6[%c0_35, %c0_36, %c0_37] : memref<1x64x128xbf16, #tpu.memory_space<vmem>>, vector<1x64x128xbf16>
    %29 = vector.shape_cast %28 : vector<1x64x128xbf16> to vector<64x128xbf16>
    %30 = vector.shape_cast %27 : vector<64x128xbf16> to vector<1x64x128xbf16>
    tpu.vector_store %arg6[%c0_35, %c0_36, %c0_37], %30 {strides = array<i32>} : memref<1x64x128xbf16, #tpu.memory_space<vmem>>, vector<1x64x128xbf16>,
    return
  }
  func.func @transform_0(%arg0: i32, %arg1: i32, %arg2: i32) -> (i32, i32, i32, i32) {
    %c0_i32 = arith.constant 0 : i32
    %c0_i32_0 = arith.constant 0 : i32
    %c0_i32_1 = arith.constant 0 : i32
    %c0_i32_2 = arith.constant 0 : i32
    return %arg1, %c0_i32, %c0_i32_0, %c0_i32_1 : i32, i32, i32, i32
  }
  func.func @transform_1(%arg0: i32, %arg1: i32, %arg2: i32) -> (i32, i32) {
    %c0_i32 = arith.constant 0 : i32
    %c0_i32_0 = arith.constant 0 : i32
    return %c0_i32, %arg0 : i32, i32
  }
  func.func @transform_2(%arg0: i32, %arg1: i32, %arg2: i32) -> (i32, i32) {
    %c0_i32 = arith.constant 0 : i32
    %c0_i32_0 = arith.constant 0 : i32
    return %c0_i32, %arg0 : i32, i32
  }
  func.func @transform_3(%arg0: i32, %arg1: i32, %arg2: i32) -> (i32, i32, i32) {
    %c0_i32 = arith.constant 0 : i32
    return %arg1, %arg2, %arg0 : i32, i32, i32
  }
}

module attributes {stable_mosaic.version = 11 : i64} {
  func.func @_conv_bn_kernel(%arg0: i32, %arg1: i32, %arg2: i32, %arg3: memref<1x10x10x128xbf16, #tpu.memory_space<vmem>>, %arg4: memref<1152x128xbf16, #tpu.memory_space<vmem>>, %arg5: memref<1x128xf32, #tpu.memory_space<vmem>>, %arg6: memref<1x64x128xbf16, #tpu.memory_space<vmem>>, %arg7: memref<1x1x128xf32, #tpu.memory_space<vmem>>) attributes {dimension_semantics = [#tpu.dimension_semantics<parallel>, #tpu.dimension_semantics<parallel>, #tpu.dimension_semantics<arbitrary>], iteration_bounds = array<i64: 1, 2, 1>, scalar_prefetch = 0 : i64, scratch_operands = 0 : i64, tpu.core_type = #tpu.core_type<tc>, window_params = [{transform_indices = @transform_0, window_bounds = array<i64: 1, 10, 10, 128>}, {transform_indices = @transform_1, window_bounds = array<i64: 1152, 128>}, {transform_indices = @transform_2, window_bounds = array<i64: 1, 128>}, {transform_indices = @transform_3, window_bounds = array<i64: 1, 64, 128>}, {transform_indices = @transform_4, window_bounds = array<i64: 1, 1, 128>}]} {
    %c0 = arith.constant 0 : index
    %c0_0 = arith.constant 0 : index
    %c0_1 = arith.constant 0 : index
    %c0_2 = arith.constant 0 : index
    %0 = vector.load %arg3[%c0, %c0_0, %c0_1, %c0_2] : memref<1x10x10x128xbf16, #tpu.memory_space<vmem>>, vector<1x8x8x128xbf16>
    %1 = vector.shape_cast %0 : vector<1x8x8x128xbf16> to vector<8x8x128xbf16>
    %c0_3 = arith.constant 0 : index
    %c0_4 = arith.constant 0 : index
    %c1 = arith.constant 1 : index
    %c0_5 = arith.constant 0 : index
    %2 = vector.load %arg3[%c0_3, %c0_4, %c1, %c0_5] : memref<1x10x10x128xbf16, #tpu.memory_space<vmem>>, vector<1x8x8x128xbf16>
    %3 = vector.shape_cast %2 : vector<1x8x8x128xbf16> to vector<8x8x128xbf16>
    %c0_6 = arith.constant 0 : index
    %c0_7 = arith.constant 0 : index
    %c2 = arith.constant 2 : index
    %c0_8 = arith.constant 0 : index
    %4 = vector.load %arg3[%c0_6, %c0_7, %c2, %c0_8] : memref<1x10x10x128xbf16, #tpu.memory_space<vmem>>, vector<1x8x8x128xbf16>
    %5 = vector.shape_cast %4 : vector<1x8x8x128xbf16> to vector<8x8x128xbf16>
    %c0_9 = arith.constant 0 : index
    %c1_10 = arith.constant 1 : index
    %c0_11 = arith.constant 0 : index
    %c0_12 = arith.constant 0 : index
    %6 = vector.load %arg3[%c0_9, %c1_10, %c0_11, %c0_12] : memref<1x10x10x128xbf16, #tpu.memory_space<vmem>>, vector<1x8x8x128xbf16>
    %7 = vector.shape_cast %6 : vector<1x8x8x128xbf16> to vector<8x8x128xbf16>
    %c0_13 = arith.constant 0 : index
    %c1_14 = arith.constant 1 : index
    %c1_15 = arith.constant 1 : index
    %c0_16 = arith.constant 0 : index
    %8 = vector.load %arg3[%c0_13, %c1_14, %c1_15, %c0_16] : memref<1x10x10x128xbf16, #tpu.memory_space<vmem>>, vector<1x8x8x128xbf16>
    %9 = vector.shape_cast %8 : vector<1x8x8x128xbf16> to vector<8x8x128xbf16>
    %c0_17 = arith.constant 0 : index
    %c1_18 = arith.constant 1 : index
    %c2_19 = arith.constant 2 : index
    %c0_20 = arith.constant 0 : index
    %10 = vector.load %arg3[%c0_17, %c1_18, %c2_19, %c0_20] : memref<1x10x10x128xbf16, #tpu.memory_space<vmem>>, vector<1x8x8x128xbf16>
    %11 = vector.shape_cast %10 : vector<1x8x8x128xbf16> to vector<8x8x128xbf16>
    %c0_21 = arith.constant 0 : index
    %c2_22 = arith.constant 2 : index
    %c0_23 = arith.constant 0 : index
    %c0_24 = arith.constant 0 : index
    %12 = vector.load %arg3[%c0_21, %c2_22, %c0_23, %c0_24] : memref<1x10x10x128xbf16, #tpu.memory_space<vmem>>, vector<1x8x8x128xbf16>
    %13 = vector.shape_cast %12 : vector<1x8x8x128xbf16> to vector<8x8x128xbf16>
    %c0_25 = arith.constant 0 : index
    %c2_26 = arith.constant 2 : index
    %c1_27 = arith.constant 1 : index
    %c0_28 = arith.constant 0 : index
    %14 = vector.load %arg3[%c0_25, %c2_26, %c1_27, %c0_28] : memref<1x10x10x128xbf16, #tpu.memory_space<vmem>>, vector<1x8x8x128xbf16>
    %15 = vector.shape_cast %14 : vector<1x8x8x128xbf16> to vector<8x8x128xbf16>
    %c0_29 = arith.constant 0 : index
    %c2_30 = arith.constant 2 : index
    %c2_31 = arith.constant 2 : index
    %c0_32 = arith.constant 0 : index
    %16 = vector.load %arg3[%c0_29, %c2_30, %c2_31, %c0_32] : memref<1x10x10x128xbf16, #tpu.memory_space<vmem>>, vector<1x8x8x128xbf16>
    %17 = vector.shape_cast %16 : vector<1x8x8x128xbf16> to vector<8x8x128xbf16>
    %18 = tpu.concatenate %1, %3, %5, %7, %9, %11, %13, %15, %17 in 2 : vector<8x8x128xbf16>, vector<8x8x128xbf16>, vector<8x8x128xbf16>, vector<8x8x128xbf16>, vector<8x8x128xbf16>, vector<8x8x128xbf16>, vector<8x8x128xbf16>, vector<8x8x128xbf16>, vector<8x8x128xbf16> -> vector<8x8x1152xbf16>
    %19 = vector.shape_cast %18 : vector<8x8x1152xbf16> to vector<64x1152xbf16>
    %c0_33 = arith.constant 0 : index
    %c0_34 = arith.constant 0 : index
    %20 = vector.load %arg4[%c0_33, %c0_34] : memref<1152x128xbf16, #tpu.memory_space<vmem>>, vector<1152x128xbf16>
    %cst = arith.constant dense<0.000000e+00> : vector<64x128xf32>
    %21 = tpu.matmul %19, %20, %cst {dimension_numbers = #tpu.dot_dimension_numbers<[1], [0], [0], [1], [0, 0, 1, 1], [], []>} : vector<64x1152xbf16>, vector<1152x128xbf16>, vector<64x128xf32> -> vector<64x128xf32>
    %c0_35 = arith.constant 0 : index
    %c0_36 = arith.constant 0 : index
    %22 = vector.load %arg5[%c0_35, %c0_36] : memref<1x128xf32, #tpu.memory_space<vmem>>, vector<1x128xf32>
    %23 = vector.broadcast %22 : vector<1x128xf32> to vector<64x128xf32>
    %24 = arith.addf %21, %23 : vector<64x128xf32>
    %c0_37 = arith.constant 0 : index
    %c0_38 = arith.constant 0 : index
    %c0_39 = arith.constant 0 : index
    %25 = vector.load %arg6[%c0_37, %c0_38, %c0_39] : memref<1x64x128xbf16, #tpu.memory_space<vmem>>, vector<1x64x128xbf16>
    %26 = vector.shape_cast %25 : vector<1x64x128xbf16> to vector<64x128xbf16>
    %27 = arith.extf %26 : vector<64x128xbf16> to vector<64x128xf32>
    %28 = arith.addf %24, %27 : vector<64x128xf32>
    %cst_40 = arith.constant 0.000000e+00 : f32
    %29 = vector.broadcast %cst_40 : f32 to vector<64x128xf32>
    %30 = arith.maximumf %28, %29 : vector<64x128xf32>
    %cst_41 = arith.constant dense<0.000000e+00> : vector<128xf32>
    %31 = vector.multi_reduction <add>, %30, %cst_41 [0] : vector<64x128xf32> to vector<128xf32>
    %32 = vector.shape_cast %31 : vector<128xf32> to vector<1x128xf32>
    %cst_42 = arith.constant 6.400000e+01 : f32
    %33 = vector.broadcast %cst_42 : f32 to vector<1x128xf32>
    %34 = arith.divf %32, %33 : vector<1x128xf32>
    %c0_43 = arith.constant 0 : index
    %c0_44 = arith.constant 0 : index
    %c0_45 = arith.constant 0 : index
    %35 = vector.load %arg7[%c0_43, %c0_44, %c0_45] : memref<1x1x128xf32, #tpu.memory_space<vmem>>, vector<1x1x128xf32>
    %36 = vector.shape_cast %35 : vector<1x1x128xf32> to vector<1x128xf32>
    %37 = vector.shape_cast %34 : vector<1x128xf32> to vector<1x1x128xf32>
    tpu.vector_store %arg7[%c0_43, %c0_44, %c0_45], %37 {strides = array<i32>} : memref<1x1x128xf32, #tpu.memory_space<vmem>>, vector<1x1x128xf32>,
    return
  }
  func.func @transform_0(%arg0: i32, %arg1: i32, %arg2: i32) -> (i32, i32, i32, i32) {
    %c0_i32 = arith.constant 0 : i32
    %c0_i32_0 = arith.constant 0 : i32
    %c0_i32_1 = arith.constant 0 : i32
    %c0_i32_2 = arith.constant 0 : i32
    return %arg1, %c0_i32, %c0_i32_0, %c0_i32_1 : i32, i32, i32, i32
  }
  func.func @transform_1(%arg0: i32, %arg1: i32, %arg2: i32) -> (i32, i32) {
    %c0_i32 = arith.constant 0 : i32
    %c0_i32_0 = arith.constant 0 : i32
    return %c0_i32, %arg0 : i32, i32
  }
  func.func @transform_2(%arg0: i32, %arg1: i32, %arg2: i32) -> (i32, i32) {
    %c0_i32 = arith.constant 0 : i32
    %c0_i32_0 = arith.constant 0 : i32
    return %c0_i32, %arg0 : i32, i32
  }
  func.func @transform_3(%arg0: i32, %arg1: i32, %arg2: i32) -> (i32, i32, i32) {
    %c0_i32 = arith.constant 0 : i32
    return %arg1, %arg2, %arg0 : i32, i32, i32
  }
  func.func @transform_4(%arg0: i32, %arg1: i32, %arg2: i32) -> (i32, i32, i32) {
    %c0_i32 = arith.constant 0 : i32
    %c0_i32_0 = arith.constant 0 : i32
    return %arg1, %c0_i32, %arg0 : i32, i32, i32
  }
}

module attributes {stable_mosaic.version = 11 : i64} {
  func.func @_linear_kernel(%arg0: i32, %arg1: memref<2x128xf32, #tpu.memory_space<vmem>>, %arg2: memref<128x128xf32, #tpu.memory_space<vmem>>, %arg3: memref<1x128xf32, #tpu.memory_space<vmem>>, %arg4: memref<2x128xf32, #tpu.memory_space<vmem>>) attributes {dimension_semantics = [#tpu.dimension_semantics<arbitrary>], iteration_bounds = array<i64: 1>, scalar_prefetch = 0 : i64, scratch_operands = 0 : i64, tpu.core_type = #tpu.core_type<tc>, window_params = [{pipeline_mode = #tpu.pipeline_mode<synchronous>, transform_indices = @transform_0, window_bounds = array<i64: 2, 128>}, {pipeline_mode = #tpu.pipeline_mode<synchronous>, transform_indices = @transform_1, window_bounds = array<i64: 128, 128>}, {pipeline_mode = #tpu.pipeline_mode<synchronous>, transform_indices = @transform_2, window_bounds = array<i64: 1, 128>}, {pipeline_mode = #tpu.pipeline_mode<synchronous>, transform_indices = @transform_3, window_bounds = array<i64: 2, 128>}]} {
    %c0 = arith.constant 0 : index
    %c0_0 = arith.constant 0 : index
    %0 = vector.load %arg1[%c0, %c0_0] : memref<2x128xf32, #tpu.memory_space<vmem>>, vector<2x128xf32>
    %c0_1 = arith.constant 0 : index
    %c0_2 = arith.constant 0 : index
    %1 = vector.load %arg2[%c0_1, %c0_2] : memref<128x128xf32, #tpu.memory_space<vmem>>, vector<128x128xf32>
    %cst = arith.constant dense<0.000000e+00> : vector<2x128xf32>
    %2 = tpu.matmul %0, %1, %cst {dimension_numbers = #tpu.dot_dimension_numbers<[1], [0], [0], [1], [0, 0, 1, 1], [], []>} : vector<2x128xf32>, vector<128x128xf32>, vector<2x128xf32> -> vector<2x128xf32>
    %c0_3 = arith.constant 0 : index
    %c0_4 = arith.constant 0 : index
    %3 = vector.load %arg3[%c0_3, %c0_4] : memref<1x128xf32, #tpu.memory_space<vmem>>, vector<1x128xf32>
    %4 = vector.broadcast %3 : vector<1x128xf32> to vector<2x128xf32>
    %5 = arith.addf %2, %4 : vector<2x128xf32>
    %c0_5 = arith.constant 0 : index
    %c0_6 = arith.constant 0 : index
    %6 = vector.load %arg4[%c0_5, %c0_6] : memref<2x128xf32, #tpu.memory_space<vmem>>, vector<2x128xf32>
    tpu.vector_store %arg4[%c0_5, %c0_6], %5 {strides = array<i32>} : memref<2x128xf32, #tpu.memory_space<vmem>>, vector<2x128xf32>,
    return
  }
  func.func @transform_0(%arg0: i32) -> (i32, i32) {
    %c0_i32 = arith.constant 0 : i32
    %c0_i32_0 = arith.constant 0 : i32
    %c0_i32_1 = arith.constant 0 : i32
    return %c0_i32, %c0_i32_0 : i32, i32
  }
  func.func @transform_1(%arg0: i32) -> (i32, i32) {
    %c0_i32 = arith.constant 0 : i32
    %c0_i32_0 = arith.constant 0 : i32
    %c0_i32_1 = arith.constant 0 : i32
    return %c0_i32, %c0_i32_0 : i32, i32
  }
  func.func @transform_2(%arg0: i32) -> (i32, i32) {
    %c0_i32 = arith.constant 0 : i32
    %c0_i32_0 = arith.constant 0 : i32
    %c0_i32_1 = arith.constant 0 : i32
    return %c0_i32, %c0_i32_0 : i32, i32
  }
  func.func @transform_3(%arg0: i32) -> (i32, i32) {
    %c0_i32 = arith.constant 0 : i32
    %c0_i32_0 = arith.constant 0 : i32
    %c0_i32_1 = arith.constant 0 : i32
    return %c0_i32, %c0_i32_0 : i32, i32
  }
}

</mosaic_0001>

<bundles_post_ra>
// kernel: _lambda_.11
= control target key start
LH: loop header
LB: loop body
LE: loop exit
PB: predicated region body
PF: predicated region fallthrough
CT: control target
= control target key end

     0   :  { %s769_s12 = smov 0   ;;  %s771_s13 = smov 0   ;;  %s842_s0 = inlined_call_operand.vmem [shape: bf16[2,8,8,128], index: 0, kind: input, shape index: {}]   ;;  %s843_s1 = inlined_call_operand.vmem [shape: bf16[128,128], index: 1, kind: input, shape index: {}]   ;;  %s844_s2 = inlined_call_operand.vmem [shape: f32[1,128], index: 2, kind: input, shape index: {}]   ;;  %s845_s3 = inlined_call_operand.vmem [shape: bf16[2,64,128], index: 3, kind: output, shape index: {}]  }
   0x1   :  { %s773_s14 = smov 0  }
   0x2 LB: > { %s28_s15 = sadd.s32 1, %s743_s13  ;;  %p576_p0 = scmp.ge.s32.totalorder %s747_s14, 1  ;;  %s747_s14 = sphi %s773_s14, %s13_s14   ;;  %s743_s13 = sphi %s771_s13, %s847_s13   ;;  %s739_s12 = sphi %s769_s12, %s846_s12  }
   0x3   : > { %p30_p1 = scmp.ge.s32.totalorder %s28_s15, 2  ;;  %p177_p2 = scmp.lt.s32.totalorder %s747_s14, 3 }
   0x5   : > { %s849_s15 = smov (%p30_p1, %s28_s15), 0  ;;  %p178_p3 = pnand %p576_p0, %p177_p2 }
   0x6   : > { %p215_p4 = scmp.lt.s32.totalorder (!%p178_p3), %s739_s12, 1 }
   0x7   : > { %181 = sbr.rel (%p178_p3) target bundleno = 249 (0xf9), region = 32 }
   0xc   : > { %v713_v0 = vld [vmem:[%s843_s1 + $0x38] sm:$0xff]   ;;  %v714_v1 = vld [vmem:[%s843_s1 + $0x30] sm:$0xff]   ;;  %s851_s12 = smov (!%p215_p4, %s739_s12), 1  ;;  %v715_v2 = vld [vmem:[%s843_s1 + $0x28] sm:$0xff]  }
   0xd   : > { %649 = vmatprep.subr.bf16.mxu0 %v713_v0  ;;  %673 = vmatprep.subr.bf16.mxu1 %v713_v0  ;;  %s604_s22 = sshll.u32 %s851_s12, 5  ;;  %v716_v3 = vld [vmem:[%s843_s1 + $0x20] sm:$0xff]   ;;  %v717_v6 = vld [vmem:[%s843_s1 + $0x18] sm:$0xff]   ;;  %v718_v7 = vld [vmem:[%s843_s1 + $0x10] sm:$0xff]  }
   0xe   : > { %650 = vmatpush3.bf16.msra.mxu0 %v713_v0  ;;  %681 = vmatpush3.bf16.msra.mxu1 %v713_v0  ;;  %s804_s25 = scalar_lea.vmem %s842_s0, %s604_s22  ;;  %v719_v8 = vld [vmem:[%s843_s1 + $0x8] sm:$0xff]   ;;  %v720_v9 = vld [vmem:[%s843_s1] sm:$0xff]   ;;  %s238_s17 = scalar_lea.vmem %s845_s3, %s604_s22 }
   0xf   : > { %651 = vmatprep.subr.bf16.mxu0 %v714_v1  ;;  %674 = vmatprep.subr.bf16.mxu1 %v714_v1  ;;  %v721_v4 = vld [vmem:[%s804_s25] sm:$0xff]   ;;  %v722_v5 = vld [vmem:[%s804_s25 + $0x10] sm:$0xff]   ;;  %v723_v10 = vld [vmem:[%s804_s25 + $0x8] sm:$0xff]  }
  0x10   : > { %665 = vmatprep.mubr.bf16.mxu0 %v721_v4  ;;  %669 = vmatprep.mubr.bf16.mxu1 %v722_v5  ;;  %v724_v11 = vld [vmem:[%s804_s25 + $0x18] sm:$0xff]   ;;  %v581_v14 = vld [vmem:[%s844_s2] ss:$0 sm:$0xff] }
  0x12   : > { %652 = vmatpush3.bf16.msra.mxu0 %v714_v1  ;;  %682 = vmatpush3.bf16.msra.mxu1 %v714_v1 }
  0x13   : > { %653 = vmatprep.subr.bf16.mxu0 %v715_v2  ;;  %675 = vmatprep.subr.bf16.mxu1 %v715_v2 }
  0x16   : > { %654 = vmatpush3.bf16.msra.mxu0 %v715_v2  ;;  %683 = vmatpush3.bf16.msra.mxu1 %v715_v2 }
  0x17   : > { %655 = vmatprep.subr.bf16.mxu0 %v716_v3  ;;  %676 = vmatprep.subr.bf16.mxu1 %v716_v3 }
  0x1a   : > { %656 = vmatpush3.bf16.msra.mxu0 %v716_v3  ;;  %684 = vmatpush3.bf16.msra.mxu1 %v716_v3 }
  0x1b   : > { %657 = vmatprep.subr.bf16.mxu0 %v717_v6  ;;  %677 = vmatprep.subr.bf16.mxu1 %v717_v6 }
  0x1e   : > { %658 = vmatpush3.bf16.msra.mxu0 %v717_v6  ;;  %685 = vmatpush3.bf16.msra.mxu1 %v717_v6 }
  0x1f   : > { %659 = vmatprep.subr.bf16.mxu0 %v718_v7  ;;  %678 = vmatprep.subr.bf16.mxu1 %v718_v7 }
  0x22   : > { %660 = vmatpush3.bf16.msra.mxu0 %v718_v7  ;;  %686 = vmatpush3.bf16.msra.mxu1 %v718_v7 }
  0x23   : > { %661 = vmatprep.subr.bf16.mxu0 %v719_v8  ;;  %679 = vmatprep.subr.bf16.mxu1 %v719_v8 }
  0x26   : > { %662 = vmatpush3.bf16.msra.mxu0 %v719_v8  ;;  %687 = vmatpush3.bf16.msra.mxu1 %v719_v8 }
  0x27   : > { %663 = vmatprep.subr.bf16.mxu0 %v720_v9  ;;  %680 = vmatprep.subr.bf16.mxu1 %v720_v9 }
  0x2a   : > { %664 = vmatpush3.bf16.msra.mxu0 %v720_v9  ;;  %688 = vmatpush3.bf16.msra.mxu1 %v720_v9 }
  0x2d   : > { %666 = vmatmul.mubr.bf16.vlgmr.msra.gmra.mxu0 %v723_v10  ;;  %670 = vmatmul.mubr.bf16.vlgmr.msra.gmra.mxu1 %v724_v11 }
  0xed   : > { %v667_v12 = vpop.f32.mrf.mxu0  ;;  %v671_v13 = vpop.f32.mrf.mxu1 }
  0xee   : > { %v387_v19 = vadd.f32 %v667_v12, %v581_v14  ;;  %v403_v20 = vadd.f32 %v671_v13, %v581_v14 }
  0xef   : > { %v378_v15 = vpop.f32.mrf.mxu0  ;;  %v394_v16 = vpop.f32.mrf.mxu1 }
  0xf0   : > { %v379_v23 = vadd.f32 %v581_v14, %v378_v15  ;;  %v395_v24 = vadd.f32 %v581_v14, %v394_v16 }
  0xf1   : > { %v668_v17 = vpop.f32.mrf.mxu0  ;;  %v672_v18 = vpop.f32.mrf.mxu1 }
  0xf2   : > { %v390_v21 = vadd.f32 %v668_v17, %v581_v14  ;;  %v406_v22 = vadd.f32 %v672_v18, %v581_v14 }
  0xf3   : > { %v381_v25 = vpop.f32.mrf.mxu0  ;;  %v397_v26 = vpop.f32.mrf.mxu1 }
  0xf4   : > { %v622_v27 = vpack.c.bf16 %v390_v21, %v387_v19  ;;  %v632_v28 = vpack.c.bf16 %v406_v22, %v403_v20  ;;  %v382_v29 = vadd.f32 %v581_v14, %v381_v25  ;;  %v398_v30 = vadd.f32 %v581_v14, %v397_v26 }
  0xf6   : > { %634 = vst [vmem:[%s238_s17 + $0x8] sm:$0xff] %v622_v27   ;;  %636 = vst [vmem:[%s238_s17 + $0x18] sm:$0xff] %v632_v28   ;;  %v617_v31 = vpack.c.bf16 %v382_v29, %v379_v23  ;;  %v627_v32 = vpack.c.bf16 %v398_v30, %v395_v24 }
  0xf8   : > { %618 = vst [vmem:[%s238_s17] sm:$0xff] %v617_v31   ;;  %635 = vst [vmem:[%s238_s17 + $0x10] sm:$0xff] %v627_v32  }
  0xf9 PF: > { %s13_s14 = sadd.s32 1, %s747_s14   ;;  %s846_s12 = smov %s743_s13 }
  0xfa   : > { %p10_p5 = scmp.ge.s32.totalorder %s13_s14, 4   ;;  %s847_s13 = smov %s849_s15 }
  0xfc   :  { %12 = sbr.rel (!%p10_p5) target bundleno = 2 (0x2), region = 68 }

// kernel: _lambda_.7
= control target key start
LH: loop header
LB: loop body
LE: loop exit
PB: predicated region body
PF: predicated region fallthrough
CT: control target
= control target key end

     0   :  { %s4876_s12 = smov 0   ;;  %s4878_s13 = smov 0   ;;  %s6373_s0 = inlined_call_operand.vmem [shape: bf16[2,18,18,128], index: 0, kind: input, shape index: {}]   ;;  %s6374_s1 = inlined_call_operand.vmem [shape: bf16[1152,128], index: 1, kind: input, shape index: {}]   ;;  %s6375_s2 = inlined_call_operand.vmem [shape: f32[1,128], index: 2, kind: input, shape index: {}]   ;;  %s6376_s3 = inlined_call_operand.vmem [shape: bf16[2,256,128], index: 3, kind: output, shape index: {}]  }
   0x1   :  { %s4880_s14 = smov 0  }
   0x2 LB: > { %s28_s15 = sadd.s32 1, %s4850_s13  ;;  %p3536_p0 = scmp.ge.s32.totalorder %s4854_s14, 1  ;;  %s4854_s14 = sphi %s4880_s14, %s13_s14   ;;  %s4850_s13 = sphi %s4878_s13, %s6400_s13   ;;  %s4846_s12 = sphi %s4876_s12, %s6399_s12  }
   0x3   : > { %p30_p1 = scmp.ge.s32.totalorder %s28_s15, 2  ;;  %p177_p2 = scmp.lt.s32.totalorder %s4854_s14, 3 }
   0x5   : > { %s6402_s15 = smov (%p30_p1, %s28_s15), 0  ;;  %p178_p3 = pnand %p3536_p0, %p177_p2 }
   0x7   : > { %181 = sbr.rel (%p178_p3) target bundleno = 535 (0x217), region = 32 }
   0xc   : > { %v4608_v0 = vld [vmem:[%s6374_s1 + $0x78] sm:$0xff]   ;;  %p215_p4 = scmp.lt.s32.totalorder %s4846_s12, 1  ;;  %v4610_v2 = vld [vmem:[%s6374_s1 + $0x70] sm:$0xff]   ;;  %v4612_v4 = vld [vmem:[%s6374_s1 + $0x68] sm:$0xff]   ;;  %vm579_vm0 = vsmask.f32 7424 }
   0xd   : > { %v4609_v1 = vld [vmem:[%s6374_s1 + $0x38] sm:$0xff]   ;;  %4047 = vmatprep.subr.bf16.mxu0 %v4608_v0  ;;  %4567 = vmatprep.subr.bf16.mxu1 %v4608_v0  ;;  %v4611_v3 = vld [vmem:[%s6374_s1 + $0x30] sm:$0xff]   ;;  %v4613_v5 = vld [vmem:[%s6374_s1 + $0x28] sm:$0xff]   ;;  %vm836_vm1 = vcmask 1046528  }
   0xe   : > { %4048 = vmatpush3.bf16.msra.mxu0 %v4609_v1  ;;  %4575 = vmatpush3.bf16.msra.mxu1 %v4609_v1  ;;  %s6404_s12 = smov (!%p215_p4, %s4846_s12), 1  ;;  %v4614_v6 = vld [vmem:[%s6374_s1 + $0x60] sm:$0xff]   ;;  %v4616_v8 = vld [vmem:[%s6374_s1 + $0x58] sm:$0xff]   ;;  %v4618_v10 = vld [vmem:[%s6374_s1 + $0x50] sm:$0xff]  }
   0xf   : > { %4049 = vmatprep.subr.bf16.mxu0 %v4610_v2  ;;  %4568 = vmatprep.subr.bf16.mxu1 %v4610_v2  ;;  %s4583_s30 = smul.u32 216, %s6404_s12  ;;  %v4615_v7 = vld [vmem:[%s6374_s1 + $0x20] sm:$0xff]   ;;  %v4617_v9 = vld [vmem:[%s6374_s1 + $0x18] sm:$0xff]   ;;  %v4619_v17 = vld [vmem:[%s6374_s1 + $0x10] sm:$0xff]  }
  0x10   : > { %v4620_v21 = vld [vmem:[%s6374_s1 + $0x48] sm:$0xff]   ;;  %v4622_v31 = vld [vmem:[%s6374_s1 + $0x40] sm:$0xff]   ;;  %v4628_v37 = vld [vmem:[%s6374_s1 + $0xf8] sm:$0xff]  }
  0x11   : > { %s4927_s10 = scalar_lea.vmem %s6373_s0, %s4583_s30  ;;  %v4621_v26 = vld [vmem:[%s6374_s1 + $0x8] sm:$0xff]   ;;  %v4623_v34 = vld [vmem:[%s6374_s1] sm:$0xff]   ;;  %v4631_v40 = vld [vmem:[%s6374_s1 + $0x178] sm:$0xff]  }
  0x12   : > { %4050 = vmatpush3.bf16.msra.mxu0 %v4611_v3  ;;  %4576 = vmatpush3.bf16.msra.mxu1 %v4611_v3  ;;  %v241_v11 = vld [vmem:[%s4927_s10] sm:$0xf]  ;;  %v4937_v12 = vld [vmem:[%s4927_s10 + $0x4] sm:$0xf]  ;;  %v265_v15 = vld [vmem:[%s4927_s10 + $0x90] sm:$0xf] }
  0x13   : > { %4051 = vmatprep.subr.bf16.mxu0 %v4612_v4  ;;  %4569 = vmatprep.subr.bf16.mxu1 %v4612_v4  ;;  %v4940_v13 = vcombine.low %v241_v11, %v4937_v12  ;;  %v4943_v14 = vld [vmem:[%s4927_s10 + $0x8] ss:$0 sps:$4 sm:$0x11]   ;;  %v266_v16 = vld [vmem:[%s4927_s10 + $0x94] sm:$0xf]  ;;  %v4629_v46 = vld [vmem:[%s6374_s1 + $0xb8] sm:$0xff]  }
  0x14   : > { %v588_v20 = vshll.u32 %v4943_v14, 16  ;;  %v3680_v22 = vcombine.low %v265_v15, %v266_v16  ;;  %v4627_v23 = vld [vmem:[%s4927_s10 + $0x98] ss:$0 sps:$4 sm:$0x11]   ;;  %v243_v38 = vld [vmem:[%s4927_s10 + $0xc] sm:$0xf] }
  0x15   : > { %v581_v18 = vshrl.u32 %v4940_v13, 16  ;;  %v583_v19 = vshll.u32 %v4940_v13, 16  ;;  %v732_v29 = vshll.u32 %v4627_v23, 16  ;;  %v4972_v39 = vld [vmem:[%s4927_s10 + $0x10] sm:$0xf]  ;;  %v4633_v47 = vld [vmem:[%s6374_s1 + $0x138] sm:$0xff]  }
  0x16   : > { %4052 = vmatpush3.bf16.msra.mxu0 %v4613_v5  ;;  %4577 = vmatpush3.bf16.msra.mxu1 %v4613_v5  ;;  %v590_v25 = vrot.slane %v588_v20, 1  ;;  %v725_v27 = vshrl.u32 %v3680_v22, 16  ;;  %v727_v28 = vshll.u32 %v3680_v22, 16  ;;  %v4978_v41 = vcombine.low %v243_v38, %v4972_v39  ;;  %v4981_v42 = vld [vmem:[%s4927_s10 + $0x14] ss:$0 sps:$4 sm:$0x11]  }
  0x17   : > { %4053 = vmatprep.subr.bf16.mxu0 %v4614_v6  ;;  %4570 = vmatprep.subr.bf16.mxu1 %v4614_v6  ;;  %v585_v24 = vrot.slane %v583_v19, 1  ;;  %v734_v33 = vrot.slane %v732_v29, 1  ;;  %v267_v44 = vld [vmem:[%s4927_s10 + $0x9c] sm:$0xf]  ;;  %v268_v45 = vld [vmem:[%s4927_s10 + $0xa0] sm:$0xf] }
  0x18   : > { %v729_v32 = vrot.slane %v727_v28, 1  ;;  %v593_v48 = vshrl.u32 %v4978_v41, 16  ;;  %v595_v49 = vshll.u32 %v4978_v41, 16  ;;  %v600_v50 = vshll.u32 %v4981_v42, 16  ;;  %v4630_v57 = vld [vmem:[%s6374_s1 + $0xf0] sm:$0xff]   ;;  %v4638_v3 = vld [vmem:[%s6374_s1 + $0xe8] sm:$0xff]  }
  0x19   : > { %v586_v30 = vor.u32 %v585_v24, %v581_v18  ;;  %v3681_v51 = vcombine.low %v267_v44, %v268_v45  ;;  %v4637_v52 = vld [vmem:[%s4927_s10 + $0xa4] ss:$0 sps:$4 sm:$0x11]   ;;  %v4632_v61 = vld [vmem:[%s6374_s1 + $0xb0] sm:$0xff]   ;;  %v245_v63 = vld [vmem:[%s4927_s10 + $0x18] sm:$0xf] }
  0x1a   : > { %4054 = vmatpush3.bf16.msra.mxu0 %v4615_v7  ;;  %4578 = vmatpush3.bf16.msra.mxu1 %v4615_v7  ;;  %v730_v36 = vor.u32 %v729_v32, %v725_v27  ;;  %v597_v53 = vrot.slane %v595_v49, 1  ;;  %v602_v54 = vrot.slane %v600_v50, 1  ;;  %v744_v58 = vshll.u32 %v4637_v52, 16  ;;  %v5005_v0 = vld [vmem:[%s4927_s10 + $0x1c] sm:$0xf]  ;;  %v4640_v16 = vld [vmem:[%s6374_s1 + $0xe0] sm:$0xff]  }
  0x1b   : > { %4055 = vmatprep.subr.bf16.mxu0 %v4616_v8  ;;  %4571 = vmatprep.subr.bf16.mxu1 %v4616_v8  ;;  %v591_v35 = vsel %vm579_vm0, %v586_v30, %v590_v25  ;;  %v737_v55 = vshrl.u32 %v3681_v51, 16  ;;  %v739_v56 = vshll.u32 %v3681_v51, 16  ;;  %v3670_v4 = vcombine.low %v245_v63, %v5005_v0  ;;  %v5013_v5 = vld [vmem:[%s4927_s10 + $0x20] ss:$0 sps:$4 sm:$0x11]   ;;  %v4649_v27 = vld [vmem:[%s6374_s1 + $0x130] sm:$0xff]  }
  0x1c   : > { %2444 = vmatprep.mubr.bf16.mxu0 %v591_v35  ;;  %v735_v43 = vsel %vm579_vm0, %v730_v36, %v734_v33  ;;  %v598_v59 = vor.u32 %v597_v53, %v593_v48  ;;  %v746_v62 = vrot.slane %v744_v58, 1  ;;  %v269_v6 = vld [vmem:[%s4927_s10 + $0xa8] sm:$0xf]  ;;  %v270_v7 = vld [vmem:[%s4927_s10 + $0xac] sm:$0xf]  ;;  %v4641_v28 = vld [vmem:[%s6374_s1 + $0xa0] sm:$0xff]  }
  0x1d   : > { %2540 = vmatprep.mubr.bf16.mxu1 %v735_v43  ;;  %v741_v60 = vrot.slane %v739_v56, 1  ;;  %v607_v11 = vshll.u32 %v3670_v4, 16  ;;  %v4645_v15 = vld [vmem:[%s4927_s10 + $0xb0] ss:$0 sps:$4 sm:$0x11]   ;;  %v4656_v56 = vld [vmem:[%s6374_s1 + $0xc8] sm:$0xff]  }
  0x1e   : > { %4056 = vmatpush3.bf16.msra.mxu0 %v4617_v9  ;;  %4579 = vmatpush3.bf16.msra.mxu1 %v4617_v9  ;;  %v603_v1 = vsel %vm579_vm0, %v598_v59, %v602_v54  ;;  %v4639_v9 = vld [vmem:[%s6374_s1 + $0xa8] sm:$0xff]   ;;  %v756_v20 = vshll.u32 %v4645_v15, 16  ;;  %v247_v32 = vld [vmem:[%s4927_s10 + $0x24] sm:$0xf]  ;;  %v4650_v38 = vld [vmem:[%s6374_s1 + $0xd0] sm:$0xff]  }
  0x1f   : > { %4057 = vmatprep.subr.bf16.mxu0 %v4618_v10  ;;  %4572 = vmatprep.subr.bf16.mxu1 %v4618_v10  ;;  %v742_v2 = vor.u32 %v741_v60, %v737_v55  ;;  %v605_v10 = vshrl.u32 %v3670_v4, 16  ;;  %v609_v18 = vrot.slane %v607_v11, 1  ;;  %v5042_v33 = vld [vmem:[%s4927_s10 + $0x28] sm:$0xf]  ;;  %v4651_v52 = vld [vmem:[%s6374_s1 + $0x90] sm:$0xff]  }
  0x20   : > { %v758_v25 = vrot.slane %v756_v20, 1  ;;  %v3671_v35 = vcombine.low %v247_v32, %v5042_v33  ;;  %v5049_v36 = vld [vmem:[%s4927_s10 + $0x2c] ss:$0 sps:$4 sm:$0x11]   ;;  %v5074_v63 = vld [vmem:[%s4927_s10 + $0x34] sm:$0xf] }
  0x21   : > { %v747_v8 = vsel %vm579_vm0, %v742_v2, %v746_v62  ;;  %v610_v24 = vor.u32 %v609_v18, %v605_v10  ;;  %v624_v45 = vshll.u32 %v5049_v36, 16  ;;  %v4659_v58 = vld [vmem:[%s6374_s1 + $0x168] sm:$0xff]   ;;  %v249_v62 = vld [vmem:[%s4927_s10 + $0x30] sm:$0xf]  ;;  %v4667_v20 = vld [vmem:[%s6374_s1 + $0x1f8] sm:$0xff]  }
  0x22   : > { %4058 = vmatpush3.bf16.msra.mxu0 %v4619_v17  ;;  %4580 = vmatpush3.bf16.msra.mxu1 %v4619_v17  ;;  %v3682_v17 = vcombine.low %v269_v6, %v270_v7  ;;  %v617_v43 = vshrl.u32 %v3671_v35, 16  ;;  %v619_v44 = vshll.u32 %v3671_v35, 16  ;;  %v4657_v2 = vld [vmem:[%s6374_s1 + $0x88] sm:$0xff]   ;;  %v838_v6 = vrot.slane %v4943_v14, 1  ;;  %v4658_v7 = vld [vmem:[%s6374_s1 + $0xc0] sm:$0xff]  }
  0x23   : > { %4059 = vmatprep.subr.bf16.mxu0 %v4620_v21  ;;  %4573 = vmatprep.subr.bf16.mxu1 %v4620_v21  ;;  %v4647_v21 = vld [vmem:[%s6374_s1 + $0x170] sm:$0xff]   ;;  %v626_v49 = vrot.slane %v624_v45, 1  ;;  %v289_v14 = vld [vmem:[%s4927_s10] sm:$0xe]  ;;  %v253_v45 = vld [vmem:[%s4927_s10 + $0x48] sm:$0xf] }
  0x24   : > { %v751_v23 = vshll.u32 %v3682_v17, 16  ;;  %v621_v48 = vrot.slane %v619_v44, 1 }
  0x26   : > { %4060 = vmatpush3.bf16.msra.mxu0 %v4621_v26  ;;  %4581 = vmatpush3.bf16.msra.mxu1 %v4621_v26  ;;  %v753_v26 = vrot.slane %v751_v23, 1  ;;  %v622_v54 = vor.u32 %v621_v48, %v617_v43  ;;  %v4674_v23 = vld [vmem:[%s6374_s1 + $0x160] sm:$0xff]   ;;  %v5137_v48 = vld [vmem:[%s4927_s10 + $0x4c] sm:$0xf] }
  0x27   : > { %4061 = vmatprep.subr.bf16.mxu0 %v4622_v31  ;;  %4574 = vmatprep.subr.bf16.mxu1 %v4622_v31  ;;  %v4646_v31 = vld [vmem:[%s6374_s1 + $0xd8] sm:$0xff]  }
  0x28   : > { %v627_v59 = vsel %vm579_vm0, %v622_v54, %v626_v49  ;;  %v291_v54 = vld [vmem:[%s4927_s10 + $0x18] sm:$0xe] }
  0x2a   : > { %4062 = vmatpush3.bf16.msra.mxu0 %v4623_v34  ;;  %4582 = vmatpush3.bf16.msra.mxu1 %v4623_v34  ;;  %v4648_v34 = vld [vmem:[%s6374_s1 + $0x98] sm:$0xff]  }
  0x2b   : > { %4159 = vmatprep.subr.bf16.mxu1 %v4628_v37  ;;  %4271 = vmatprep.subr.bf16.mxu0 %v4631_v40  ;;  %v271_v40 = vld [vmem:[%s4927_s10 + $0xb4] sm:$0xf] }
  0x2d   : > { %2445 = vmatmul.mubr.bf16.vlgmr.msra.gmra.mxu0 %v4940_v13  ;;  %2541 = vmatmul.mubr.bf16.vlgmr.msra.gmra.mxu1 %v3680_v22  ;;  %v612_v13 = vshll.u32 %v5013_v5, 16  ;;  %v749_v22 = vshrl.u32 %v3682_v17, 16 }
  0x2e   : > { %4160 = vmatpush3.bf16.msra.mxu1 %v4629_v46  ;;  %4272 = vmatpush3.bf16.msra.mxu0 %v4633_v47  ;;  %v4655_v47 = vld [vmem:[%s4927_s10 + $0xbc] ss:$0 sps:$4 sm:$0x11]  }
  0x2f   : > { %4161 = vmatprep.subr.bf16.mxu1 %v4630_v57  ;;  %2452 = vmatprep.mubr.bf16.mxu0 %v603_v1  ;;  %v614_v19 = vrot.slane %v612_v13, 1  ;;  %v754_v30 = vor.u32 %v753_v26, %v749_v22  ;;  %v768_v53 = vshll.u32 %v4655_v47, 16  ;;  %v251_v22 = vld [vmem:[%s4927_s10 + $0x3c] sm:$0xf]  ;;  %v841_v47 = vrot.slane %v4981_v42, 1 }
  0x30   : > { %2548 = vmatprep.mubr.bf16.mxu1 %v747_v8  ;;  %4273 = vmatprep.subr.bf16.mxu0 %v4647_v21  ;;  %v3540_v8 = vld [vmem:[%s4927_s10 + $0xc] sm:$0xf]  ;;  %v5114_v26 = vld [vmem:[%s4927_s10 + $0x44] ss:$0 sps:$4 sm:$0x11]  }
  0x31   : > { %v615_v29 = vsel %vm579_vm0, %v610_v24, %v614_v19  ;;  %v759_v37 = vsel %vm579_vm0, %v754_v30, %v758_v25  ;;  %v770_v57 = vrot.slane %v768_v53, 1  ;;  %v5122_v30 = vld [vmem:[%s4927_s10 + $0x1c] sm:$0xf]  ;;  %v5149_v53 = vld [vmem:[%s4927_s10 + $0x28] sm:$0xf] }
  0x32   : > { %4162 = vmatpush3.bf16.msra.mxu1 %v4632_v61  ;;  %4274 = vmatpush3.bf16.msra.mxu0 %v4649_v27  ;;  %v4661_v61 = vld [vmem:[%s6374_s1 + $0x128] sm:$0xff]  }
  0x33   : > { %4163 = vmatprep.subr.bf16.mxu1 %v4638_v3  ;;  %4275 = vmatprep.subr.bf16.mxu0 %v4659_v58  ;;  %v3672_v3 = vcombine.low %v249_v62, %v5074_v63  ;;  %v4682_v58 = vld [vmem:[%s6374_s1 + $0x1b0] sm:$0xff]  }
  0x35   : > { %2453 = vmatmul.mubr.bf16.gmra.mxu0 %v4978_v41  ;;  %2549 = vmatmul.mubr.bf16.gmra.mxu1 %v3681_v51  ;;  %v272_v41 = vld [vmem:[%s4927_s10 + $0xb8] sm:$0xf]  ;;  %v629_v10 = vshrl.u32 %v3672_v3, 16  ;;  %v631_v11 = vshll.u32 %v3672_v3, 16 }
  0x36   : > { %4164 = vmatpush3.bf16.msra.mxu1 %v4639_v9  ;;  %2460 = vmatprep.mubr.bf16.mxu0 %v615_v29  ;;  %v3683_v46 = vcombine.low %v271_v40, %v272_v41  ;;  %v5090_v9 = vld [vmem:[%s4927_s10 + $0x10] sm:$0xf]  ;;  %v3542_v29 = vld [vmem:[%s4927_s10 + $0x18] sm:$0xf] }
  0x37   : > { %4165 = vmatprep.subr.bf16.mxu1 %v4640_v16  ;;  %2556 = vmatprep.mubr.bf16.mxu1 %v759_v37  ;;  %v5094_v15 = vcombine.low %v3540_v8, %v5090_v9  ;;  %v3700_v16 = vcombine.low %v289_v14, %v4937_v12  ;;  %v633_v18 = vrot.slane %v631_v11, 1  ;;  %v5107_v12 = vld [vmem:[%s4927_s10 + $0x40] sm:$0xf]  ;;  %v290_v37 = vld [vmem:[%s4927_s10 + $0xc] sm:$0xe]  ;;  %v5131_v40 = vcombine.low %v3542_v29, %v5122_v30 }
  0x38   : > { %v761_v50 = vshrl.u32 %v3683_v46, 16  ;;  %v763_v51 = vshll.u32 %v3683_v46, 16  ;;  %4276 = vmatpush3.bf16.msra.mxu0 %v4661_v61  ;;  %v3673_v25 = vcombine.low %v251_v22, %v5107_v12  ;;  %v3701_v41 = vcombine.low %v290_v37, %v4972_v39  ;;  %v5170_v8 = vld [vmem:[%s4927_s10 + $0x58] sm:$0xf]  ;;  %v4695_v22 = vld [vmem:[%s6374_s1 + $0x150] sm:$0xff]  }
  0x39   : > { %v837_v21 = vrot.slane %v3700_v16, 1  ;;  %v634_v24 = vor.u32 %v633_v18, %v629_v10  ;;  %4277 = vmatprep.subr.bf16.mxu0 %v4674_v23  ;;  %v3674_v39 = vcombine.low %v253_v45, %v5137_v48  ;;  %v5174_v10 = vld [vmem:[%s4927_s10 + $0x5c] ss:$0 sps:$4 sm:$0x11]   ;;  %v844_v14 = vrot.slane %v5013_v5, 1 }
  0x3a   : > { %4166 = vmatpush3.bf16.msra.mxu1 %v4641_v28  ;;  %v765_v55 = vrot.slane %v763_v51, 1  ;;  %v4668_v28 = vld [vmem:[%s6374_s1 + $0x1b8] sm:$0xff]   ;;  %v641_v32 = vshrl.u32 %v3673_v25, 16  ;;  %v4681_v51 = vld [vmem:[%s6374_s1 + $0x1f0] sm:$0xff]   ;;  %v257_v23 = vld [vmem:[%s4927_s10 + $0x60] sm:$0xf] }
  0x3b   : > { %4167 = vmatprep.subr.bf16.mxu1 %v4646_v31  ;;  %v839_v27 = vsel %vm836_vm1, %v837_v21, %v838_v6  ;;  %v3546_v16 = vld [vmem:[%s4927_s10 + $0x30] sm:$0xf]  ;;  %v292_v21 = vld [vmem:[%s4927_s10 + $0x24] sm:$0xe] }
  0x3c   : > { %v766_v60 = vor.u32 %v765_v55, %v761_v50  ;;  %v5142_v50 = vld [vmem:[%s4927_s10 + $0x50] ss:$0 sps:$4 sm:$0x11]   ;;  %v653_v55 = vshrl.u32 %v3674_v39, 16 }
  0x3d   : > { %2461 = vmatmul.mubr.bf16.gmra.mxu0 %v3670_v4  ;;  %2557 = vmatmul.mubr.bf16.gmra.mxu1 %v3682_v17  ;;  %v5082_v4 = vld [vmem:[%s4927_s10 + $0x38] ss:$0 sps:$4 sm:$0x11]   ;;  %v4660_v17 = vld [vmem:[%s6374_s1 + $0x80] sm:$0xff]  }
  0x3e   : > { %4168 = vmatpush3.bf16.msra.mxu1 %v4648_v34  ;;  %2468 = vmatprep.mubr.bf16.mxu0 %v627_v59  ;;  %v771_v1 = vsel %vm579_vm0, %v766_v60, %v770_v57  ;;  %v636_v13 = vshll.u32 %v5082_v4, 16  ;;  %v643_v34 = vshll.u32 %v3673_v25, 16  ;;  %v660_v57 = vshll.u32 %v5142_v50, 16 }
  0x3f   : > { %4169 = vmatprep.subr.bf16.mxu1 %v4650_v38  ;;  %2564 = vmatprep.mubr.bf16.mxu1 %v771_v1  ;;  %v4675_v38 = vld [vmem:[%s6374_s1 + $0x120] sm:$0xff]   ;;  %v3702_v1 = vcombine.low %v291_v54, %v5005_v0 }
  0x40   : > { %v638_v19 = vrot.slane %v636_v13, 1  ;;  %v645_v43 = vrot.slane %v643_v34, 1  ;;  %4278 = vmatpush3.bf16.msra.mxu0 %v4675_v38  ;;  %v662_v61 = vrot.slane %v660_v57, 1  ;;  %v4696_v34 = vld [vmem:[%s6374_s1 + $0x1e8] sm:$0xff]  }
  0x41   : > { %v843_v13 = vrot.slane %v3702_v1, 1  ;;  %v4704_v57 = vld [vmem:[%s6374_s1 + $0x148] sm:$0xff]  }
  0x42   : > { %4170 = vmatpush3.bf16.msra.mxu1 %v4651_v52  ;;  %v639_v31 = vsel %vm579_vm0, %v634_v24, %v638_v19  ;;  %v646_v49 = vor.u32 %v645_v43, %v641_v32  ;;  %v3544_v52 = vld [vmem:[%s4927_s10 + $0x24] sm:$0xf]  ;;  %v3703_v32 = vcombine.low %v292_v21, %v5042_v33  ;;  %v4697_v43 = vld [vmem:[%s6374_s1 + $0x110] sm:$0xff]  }
  0x43   : > { %4171 = vmatprep.subr.bf16.mxu1 %v4656_v56  ;;  %v655_v56 = vshll.u32 %v3674_v39, 16  ;;  %v5159_v62 = vcombine.low %v3544_v52, %v5149_v53  ;;  %v5190_v24 = vld [vmem:[%s4927_s10 + $0x64] sm:$0xf]  ;;  %v845_v29 = vsel %vm836_vm1, %v843_v13, %v844_v14  ;;  %v5251_v13 = vld [vmem:[%s4927_s10 + $0x4c] sm:$0xf] }
  0x44   : > { %v294_v14 = vld [vmem:[%s4927_s10 + $0x3c] sm:$0xe] }
  0x45   : > { %2469 = vmatmul.mubr.bf16.gmra.mxu0 %v3671_v35  ;;  %2565 = vmatmul.mubr.bf16.gmra.mxu1 %v3683_v46  ;;  %v648_v35 = vshll.u32 %v5114_v26, 16  ;;  %v840_v46 = vrot.slane %v3701_v41, 1  ;;  %v657_v60 = vrot.slane %v655_v56, 1  ;;  %v5231_v56 = vld [vmem:[%s4927_s10 + $0x74] ss:$0 sps:$4 sm:$0x11]  }
  0x46   : > { %4172 = vmatpush3.bf16.msra.mxu1 %v4657_v2  ;;  %2605 = vmatprep.mubr.bf16.mxu1 %v5094_v15  ;;  %v4683_v2 = vld [vmem:[%s6374_s1 + $0x158] sm:$0xff]  }
  0x47   : > { %4173 = vmatprep.subr.bf16.mxu1 %v4658_v7  ;;  %2476 = vmatprep.mubr.bf16.mxu0 %v639_v31  ;;  %v650_v44 = vrot.slane %v648_v35, 1  ;;  %v842_v59 = vsel %vm836_vm1, %v840_v46, %v841_v47  ;;  %v658_v6 = vor.u32 %v657_v60, %v653_v55  ;;  %v255_v7 = vld [vmem:[%s4927_s10 + $0x54] sm:$0xf]  ;;  %v3548_v46 = vld [vmem:[%s4927_s10 + $0x3c] sm:$0xf] }
  0x48   : > { %v3675_v0 = vcombine.low %v255_v7, %v5170_v8  ;;  %4279 = vmatprep.subr.bf16.mxu0 %v4683_v2  ;;  %v5216_v47 = vld [vmem:[%s4927_s10 + $0x40] sm:$0xf]  ;;  %v850_v7 = vrot.slane %v5082_v4, 1 }
  0x49   : > { %v651_v42 = vsel %vm579_vm0, %v646_v49, %v650_v44  ;;  %v663_v11 = vsel %vm579_vm0, %v658_v6, %v662_v61  ;;  %v847_v44 = vrot.slane %v5049_v36, 1  ;;  %v293_v49 = vld [vmem:[%s4927_s10 + $0x30] sm:$0xe]  ;;  %v4705_v6 = vld [vmem:[%s6374_s1 + $0x108] sm:$0xff]  }
  0x4a   : > { %4174 = vmatpush3.bf16.msra.mxu1 %v4660_v17  ;;  %v5181_v17 = vld [vmem:[%s4927_s10 + $0x34] sm:$0xf]  ;;  %v665_v18 = vshrl.u32 %v3675_v0, 16  ;;  %v667_v19 = vshll.u32 %v3675_v0, 16  ;;  %v5225_v36 = vld [vmem:[%s4927_s10 + $0x70] sm:$0xf]  ;;  %v3704_v60 = vcombine.low %v293_v49, %v5074_v63 }
  0x4b   : > { %4383 = vmatprep.subr.bf16.mxu1 %v4667_v20  ;;  %v672_v20 = vshll.u32 %v5174_v10, 16  ;;  %v5200_v31 = vcombine.low %v3546_v16, %v5181_v17  ;;  %v261_v16 = vld [vmem:[%s4927_s10 + $0x78] sm:$0xf] }
  0x4c   : > { %v669_v5 = vrot.slane %v667_v19, 1  ;;  %v5257_v19 = vld [vmem:[%s4927_s10 + $0x7c] sm:$0xf]  ;;  %v5294_v49 = vld [vmem:[%s4927_s10 + $0x58] sm:$0xf] }
  0x4d   : > { %2477 = vmatmul.mubr.bf16.gmra.mxu0 %v3672_v3  ;;  %2606 = vmatmul.mubr.bf16.vlgmr.msra.gmra.mxu1 %v839_v27  ;;  %v4684_v3 = vld [vmem:[%s6374_s1 + $0x118] sm:$0xff]   ;;  %v5193_v27 = vcombine.low %v257_v23, %v5190_v24  ;;  %v5263_v4 = vcombine.low %v261_v16, %v5257_v19  ;;  %v4712_v23 = vld [vmem:[%s6374_s1 + $0x1a0] sm:$0xff]  }
  0x4e   : > { %4384 = vmatpush3.bf16.msra.mxu1 %v4668_v28  ;;  %2613 = vmatprep.mubr.bf16.mxu1 %v5131_v40  ;;  %v5196_v28 = vld [vmem:[%s4927_s10 + $0x68] ss:$0 sps:$4 sm:$0x11]   ;;  %v670_v35 = vor.u32 %v669_v5, %v665_v18  ;;  %v849_v18 = vrot.slane %v3704_v60, 1  ;;  %v3705_v5 = vcombine.low %v294_v14, %v5107_v12  ;;  %v5329_v16 = vld [vmem:[%s4927_s10 + $0x64] sm:$0xf] }
  0x4f   : > { %4385 = vmatprep.subr.bf16.mxu1 %v4681_v51  ;;  %2484 = vmatprep.mubr.bf16.mxu0 %v651_v42  ;;  %v677_v37 = vshrl.u32 %v5193_v27, 16  ;;  %v679_v38 = vshll.u32 %v5193_v27, 16  ;;  %v684_v41 = vshll.u32 %v5196_v28, 16  ;;  %v846_v51 = vrot.slane %v3703_v32, 1  ;;  %v259_v42 = vld [vmem:[%s4927_s10 + $0x6c] sm:$0xf] }
  0x50   : > { %4280 = vmatpush3.bf16.msra.mxu0 %v4684_v3  ;;  %v5228_v55 = vcombine.low %v259_v42, %v5225_v36  ;;  %v696_v3 = vshll.u32 %v5231_v56, 16  ;;  %v4718_v32 = vld [vmem:[%s6374_s1 + $0x140] sm:$0xff]   ;;  %v701_v12 = vshrl.u32 %v5263_v4, 16 }
  0x51   : > { %4281 = vmatprep.subr.bf16.mxu0 %v4695_v22  ;;  %v681_v45 = vrot.slane %v679_v38, 1  ;;  %v686_v54 = vrot.slane %v684_v41, 1  ;;  %v5266_v22 = vld [vmem:[%s4927_s10 + $0x80] ss:$0 sps:$4 sm:$0x11]  }
  0x52   : > { %4386 = vmatpush3.bf16.msra.mxu1 %v4682_v58  ;;  %v848_v58 = vsel %vm836_vm1, %v846_v51, %v847_v44  ;;  %v689_v1 = vshrl.u32 %v5228_v55, 16  ;;  %v691_v2 = vshll.u32 %v5228_v55, 16  ;;  %v698_v21 = vrot.slane %v696_v3, 1  ;;  %v263_v41 = vld [vmem:[%s4927_s10 + $0x84] sm:$0xf]  ;;  %v4724_v3 = vld [vmem:[%s6374_s1 + $0x1d8] sm:$0xff]  }
  0x53   : > { %4387 = vmatprep.subr.bf16.mxu1 %v4696_v34  ;;  %v682_v52 = vor.u32 %v681_v45, %v677_v37  ;;  %v851_v34 = vsel %vm836_vm1, %v849_v18, %v850_v7  ;;  %v852_v44 = vrot.slane %v3705_v5, 1  ;;  %v853_v45 = vrot.slane %v5114_v26, 1  ;;  %v3554_v7 = vld [vmem:[%s4927_s10 + $0x60] sm:$0xf]  ;;  %v296_v18 = vld [vmem:[%s4927_s10 + $0x54] sm:$0xe] }
  0x54   : > { %4282 = vmatpush3.bf16.msra.mxu0 %v4697_v43  ;;  %v693_v63 = vrot.slane %v691_v2, 1  ;;  %v5285_v43 = vld [vmem:[%s4927_s10 + $0x88] sm:$0xf] }
  0x55   : > { %2485 = vmatmul.mubr.bf16.gmra.mxu0 %v3673_v25  ;;  %2614 = vmatmul.mubr.bf16.gmra.mxu1 %v842_v59  ;;  %v674_v25 = vrot.slane %v672_v20, 1  ;;  %v5238_v59 = vcombine.low %v3548_v46, %v5216_v47  ;;  %v687_v61 = vsel %vm579_vm0, %v682_v52, %v686_v54  ;;  %v3552_v46 = vld [vmem:[%s4927_s10 + $0x54] sm:$0xf]  ;;  %v5299_v52 = vld [vmem:[%s4927_s10 + $0x8c] ss:$0 sps:$4 sm:$0x11]   ;;  %v854_v26 = vsel %vm836_vm1, %v852_v44, %v853_v45 }
  0x56   : > { %2621 = vmatprep.mubr.bf16.mxu1 %v5159_v62  ;;  %2492 = vmatprep.mubr.bf16.mxu0 %v663_v11  ;;  %v3550_v11 = vld [vmem:[%s4927_s10 + $0x48] sm:$0xf]  ;;  %v694_v20 = vor.u32 %v693_v63, %v689_v1  ;;  %v720_v2 = vshll.u32 %v5299_v52, 16  ;;  %v3589_v45 = vld [vmem:[%s4927_s10 + $0x18] sm:$0xe] }
  0x57   : > { %v675_v33 = vsel %vm579_vm0, %v670_v35, %v674_v25  ;;  %4283 = vmatprep.subr.bf16.mxu0 %v4704_v57  ;;  %v703_v25 = vshll.u32 %v5263_v4, 16  ;;  %v5279_v35 = vcombine.low %v3550_v11, %v5251_v13  ;;  %v5307_v57 = vcombine.low %v3552_v46, %v5294_v49  ;;  %v5326_v11 = vld [vmem:[%s6374_s1 + $0x238] sm:$0xff]  }
  0x58   : > { %4284 = vmatpush3.bf16.msra.mxu0 %v4705_v6  ;;  %v699_v37 = vsel %vm579_vm0, %v694_v20, %v698_v21  ;;  %v856_v6 = vrot.slane %v5142_v50, 1  ;;  %v722_v50 = vrot.slane %v720_v2, 1  ;;  %v5336_v20 = vcombine.low %v3554_v7, %v5329_v16  ;;  %v3590_v2 = vld [vmem:[%s4927_s10 + $0x24] sm:$0xe] }
  0x59   : > { %v705_v38 = vrot.slane %v703_v25, 1  ;;  %4285 = vmatprep.subr.bf16.mxu0 %v4718_v32  ;;  %v3707_v21 = vcombine.low %v296_v18, %v5170_v8  ;;  %v4722_v25 = vld [vmem:[%s4927_s10 + $0x14] ss:$0 sps:$4 sm:$0x11]   ;;  %v1048_v32 = vshll.u32 %v5094_v15, 16  ;;  %v1058_v18 = vshrl.u32 %v5131_v40, 16 }
  0x5a   : > { %v297_v8 = vld [vmem:[%s4927_s10 + $0x60] sm:$0xe]  ;;  %v1302_v44 = vrot.slane %v4722_v25, 1  ;;  %v1053_v46 = vshll.u32 %v4722_v25, 16 }
  0x5b   : > { %v706_v54 = vor.u32 %v705_v38, %v701_v12  ;;  %v5350_v12 = vld [vmem:[%s4927_s10 + $0x70] sm:$0xf] }
  0x5c   : > { %v4736_v38 = vld [vmem:[%s6374_s1 + $0x190] sm:$0xff]  }
  0x5d   : > { %2493 = vmatmul.mubr.bf16.gmra.mxu0 %v3674_v39  ;;  %2622 = vmatmul.mubr.bf16.gmra.mxu1 %v845_v29  ;;  %v4698_v39 = vld [vmem:[%s6374_s1 + $0x1a8] sm:$0xff]   ;;  %v708_v29 = vshll.u32 %v5266_v22, 16 }
  0x5e   : > { %2500 = vmatprep.mubr.bf16.mxu0 %v675_v33  ;;  %2629 = vmatprep.mubr.bf16.mxu1 %v5200_v31  ;;  %v5288_v33 = vcombine.low %v263_v41, %v5285_v43 }
  0x5f   : > { %4388 = vmatpush3.bf16.msra.mxu1 %v4698_v39  ;;  %v710_v51 = vrot.slane %v708_v29, 1  ;;  %v295_v39 = vld [vmem:[%s4927_s10 + $0x48] sm:$0xe]  ;;  %v4735_v29 = vld [vmem:[%s6374_s1 + $0x1d0] sm:$0xff]  }
  0x60   : > { %v715_v42 = vshll.u32 %v5288_v33, 16 }
  0x61   : > { %v711_v60 = vsel %vm579_vm0, %v706_v54, %v710_v51  ;;  %v3708_v51 = vcombine.low %v297_v8, %v5190_v24  ;;  %v862_v24 = vrot.slane %v5196_v28, 1  ;;  %v4747_v28 = vld [vmem:[%s6374_s1 + $0x188] sm:$0xff]   ;;  %v4757_v8 = vld [vmem:[%s6374_s1 + $0x1c0] sm:$0xff]  }
  0x62   : > { %v717_v1 = vrot.slane %v715_v42, 1 }
  0x65   : > { %2501 = vmatmul.mubr.bf16.gmra.mxu0 %v3675_v0  ;;  %2630 = vmatmul.mubr.bf16.gmra.mxu1 %v848_v58  ;;  %v4711_v0 = vld [vmem:[%s6374_s1 + $0x1e0] sm:$0xff]   ;;  %v3706_v58 = vcombine.low %v295_v39, %v5137_v48  ;;  %v4725_v48 = vld [vmem:[%s6374_s1 + $0x198] sm:$0xff]  }
  0x66   : > { %2508 = vmatprep.mubr.bf16.mxu0 %v687_v61  ;;  %2637 = vmatprep.mubr.bf16.mxu1 %v5238_v59  ;;  %v713_v61 = vshrl.u32 %v5288_v33, 16 }
  0x67   : > { %4389 = vmatprep.subr.bf16.mxu1 %v4711_v0  ;;  %v855_v63 = vrot.slane %v3706_v58, 1  ;;  %v861_v58 = vrot.slane %v3708_v51, 1 }
  0x68   : > { %4390 = vmatpush3.bf16.msra.mxu1 %v4712_v23  ;;  %v718_v14 = vor.u32 %v717_v1, %v713_v61  ;;  %v1055_v61 = vrot.slane %v1053_v46, 1  ;;  %v4746_v1 = vld [vmem:[%s6374_s1 + $0x1c8] sm:$0xff]   ;;  %v4740_v46 = vld [vmem:[%s4927_s10 + $0x38] ss:$0 sps:$4 sm:$0x11]  }
  0x69   : > { %4391 = vmatprep.subr.bf16.mxu1 %v4724_v3  ;;  %v857_v0 = vsel %vm836_vm1, %v855_v63, %v856_v6  ;;  %v3558_v3 = vld [vmem:[%s4927_s10 + $0x78] sm:$0xf]  ;;  %v298_v6 = vld [vmem:[%s4927_s10 + $0x6c] sm:$0xe]  ;;  %v863_v7 = vsel %vm836_vm1, %v861_v58, %v862_v24  ;;  %v868_v58 = vrot.slane %v5266_v22, 1  ;;  %v1084_v24 = vshll.u32 %v5200_v31, 16 }
  0x6a   : > { %v723_v5 = vsel %vm579_vm0, %v718_v14, %v722_v50  ;;  %v3709_v50 = vcombine.low %v298_v6, %v5225_v36  ;;  %v3560_v36 = vld [vmem:[%s4927_s10 + $0x84] sm:$0xf]  ;;  %v1311_v6 = vrot.slane %v4740_v46, 1 }
  0x6c   : > { %4392 = vmatpush3.bf16.msra.mxu1 %v4725_v48 }
  0x6d   : > { %2509 = vmatmul.mubr.bf16.gmra.mxu0 %v5193_v27  ;;  %2638 = vmatmul.mubr.bf16.gmra.mxu1 %v851_v34  ;;  %v4719_v27 = vld [vmem:[%s6374_s1 + $0x100] sm:$0xff]   ;;  %v859_v34 = vrot.slane %v5174_v10, 1  ;;  %v1046_v10 = vshrl.u32 %v5094_v15, 16  ;;  %v3749_v15 = vcombine.low %v3589_v45, %v5122_v30  ;;  %v5377_v30 = vld [vmem:[%s4927_s10 + $0x7c] sm:$0xf]  ;;  %v1070_v45 = vshrl.u32 %v5159_v62, 16 }
  0x6e   : > { %2516 = vmatprep.mubr.bf16.mxu0 %v699_v37  ;;  %2645 = vmatprep.mubr.bf16.mxu1 %v5279_v35  ;;  %v3556_v37 = vld [vmem:[%s4927_s10 + $0x6c] sm:$0xf]  ;;  %v5386_v14 = vcombine.low %v3558_v3, %v5377_v30 }
  0x6f   : > { %4286 = vmatpush3.bf16.msra.mxu0 %v4719_v27  ;;  %4393 = vmatprep.subr.bf16.mxu1 %v4735_v29  ;;  %v5362_v54 = vcombine.low %v3556_v37, %v5350_v12  ;;  %v1060_v27 = vshll.u32 %v5131_v40, 16  ;;  %v1072_v29 = vshll.u32 %v5159_v62, 16  ;;  %v5399_v40 = vld [vmem:[%s4927_s10 + $0x88] sm:$0xf]  ;;  %v4759_v62 = vld [vmem:[%s6374_s1 + $0x220] sm:$0xff]  }
  0x70   : > { %4519 = vmatprep.subr.bf16.mxu0 %v5326_v11  ;;  %4394 = vmatpush3.bf16.msra.mxu1 %v4736_v38 }
  0x71   : > { %4395 = vmatprep.subr.bf16.mxu1 %v4746_v1  ;;  %v300_v1 = vld [vmem:[%s4927_s10 + $0x84] sm:$0xe] }
  0x72   : > { %v3711_v22 = vcombine.low %v300_v1, %v5285_v43 }
  0x74   : > { %4396 = vmatpush3.bf16.msra.mxu1 %v4747_v28  ;;  %v1082_v28 = vshrl.u32 %v5200_v31, 16  ;;  %v870_v31 = vrot.slane %v3711_v22, 1 }
  0x75   : > { %2517 = vmatmul.mubr.bf16.gmra.mxu0 %v5228_v55  ;;  %2646 = vmatmul.mubr.bf16.gmra.mxu1 %v854_v26  ;;  %v3588_v55 = vld [vmem:[%s4927_s10 + $0xc] sm:$0xe]  ;;  %v4729_v26 = vld [vmem:[%s4927_s10 + $0x20] ss:$0 sps:$4 sm:$0x11]  }
  0x76   : > { %2524 = vmatprep.mubr.bf16.mxu0 %v711_v60  ;;  %2653 = vmatprep.mubr.bf16.mxu1 %v5307_v57  ;;  %v3748_v23 = vcombine.low %v3588_v55, %v5090_v9  ;;  %v858_v9 = vrot.slane %v3707_v21, 1  ;;  %v1305_v48 = vrot.slane %v4729_v26, 1  ;;  %v1062_v55 = vrot.slane %v1060_v27, 1 }
  0x77   : > { %v3750_v21 = vcombine.low %v3590_v2, %v5149_v53  ;;  %v864_v53 = vrot.slane %v3709_v50, 1  ;;  %4397 = vmatprep.subr.bf16.mxu1 %v4757_v8  ;;  %v5434_v2 = vld [vmem:[%s4927_s10 + $0x94] sm:$0xf]  ;;  %v1086_v50 = vrot.slane %v1084_v24, 1 }
  0x78   : > { %v1301_v41 = vrot.slane %v3748_v23, 1  ;;  %v860_v39 = vsel %vm836_vm1, %v858_v9, %v859_v34  ;;  %v4733_v23 = vld [vmem:[%s4927_s10 + $0x2c] ss:$0 sps:$4 sm:$0x11]   ;;  %v1063_v34 = vor.u32 %v1062_v55, %v1058_v18  ;;  %v299_v9 = vld [vmem:[%s4927_s10 + $0x78] sm:$0xe] }
  0x79   : > { %v1307_v38 = vrot.slane %v3750_v21, 1  ;;  %v1077_v27 = vshll.u32 %v4733_v23, 16  ;;  %v1089_v18 = vshll.u32 %v4740_v46, 16  ;;  %v4744_v55 = vld [vmem:[%s4927_s10 + $0x44] ss:$0 sps:$4 sm:$0x11]  }
  0x7a   : > { %v1303_v42 = vsel %vm836_vm1, %v1301_v41, %v1302_v44  ;;  %v1308_v41 = vrot.slane %v4733_v23, 1  ;;  %v3591_v44 = vld [vmem:[%s4927_s10 + $0x30] sm:$0xe]  ;;  %v871_v23 = vrot.slane %v5299_v52, 1 }
  0x7b   : > { %v4774_v52 = vld [vmem:[%s6374_s1 + $0x210] sm:$0xff]  }
  0x7d   : > { %2525 = vmatmul.mubr.bf16.gmra.mxu0 %v5263_v4  ;;  %2654 = vmatmul.mubr.bf16.gmra.mxu1 %v857_v0  ;;  %v1050_v4 = vrot.slane %v1048_v32, 1  ;;  %v1065_v0 = vshll.u32 %v4729_v26, 16  ;;  %v865_v32 = vrot.slane %v5231_v56, 1  ;;  %v4758_v56 = vld [vmem:[%s6374_s1 + $0x180] sm:$0xff]   ;;  %v1309_v26 = vsel %vm836_vm1, %v1307_v38, %v1308_v41 }
  0x7e   : > { %2532 = vmatprep.mubr.bf16.mxu0 %v723_v5  ;;  %2661 = vmatprep.mubr.bf16.mxu1 %v5336_v20  ;;  %v4737_v5 = vld [vmem:[%s6374_s1 + $0x230] sm:$0xff]   ;;  %v872_v38 = vsel %vm836_vm1, %v870_v31, %v871_v23  ;;  %v303_v31 = vld [vmem:[%s4927_s10 + $0xa8] sm:$0xe] }
  0x7f   : > { %v1051_v60 = vor.u32 %v1050_v4, %v1046_v10  ;;  %v1067_v37 = vrot.slane %v1065_v0, 1  ;;  %v5416_v10 = vcombine.low %v3560_v36, %v5399_v40  ;;  %v3710_v4 = vcombine.low %v299_v9, %v5257_v19  ;;  %4398 = vmatpush3.bf16.msra.mxu1 %v4758_v56  ;;  %v4767_v0 = vld [vmem:[%s6374_s1 + $0x218] sm:$0xff]   ;;  %v4824_v9 = vld [vmem:[%s4927_s10 + $0x94] sm:$0xf] }
  0x80   : > { %v866_v51 = vsel %vm836_vm1, %v864_v53, %v865_v32  ;;  %v1087_v36 = vor.u32 %v1086_v50, %v1082_v28  ;;  %v5456_v53 = vld [vmem:[%s4927_s10 + $0xa0] sm:$0xf]  ;;  %v1094_v56 = vshrl.u32 %v5238_v59, 16 }
  0x81   : > { %v1056_v63 = vsel %vm579_vm0, %v1051_v60, %v1055_v61  ;;  %v867_v19 = vrot.slane %v3710_v4, 1  ;;  %v3562_v61 = vld [vmem:[%s4927_s10 + $0x90] sm:$0xf] }
  0x85   : > { %2533 = vmatmul.mubr.bf16.gmra.mxu0 %v5288_v33  ;;  %2662 = vmatmul.mubr.bf16.gmra.mxu1 %v860_v39  ;;  %v1304_v33 = vrot.slane %v3749_v15, 1  ;;  %v1068_v39 = vsel %vm579_vm0, %v1063_v34, %v1067_v37  ;;  %v3751_v15 = vcombine.low %v3591_v44, %v5181_v17  ;;  %v1079_v17 = vrot.slane %v1077_v27, 1  ;;  %v3593_v37 = vld [vmem:[%s4927_s10 + $0x48] sm:$0xe] }
  0x86   : > { %2669 = vmatprep.mubr.bf16.mxu1 %v5362_v54  ;;  %2766 = vmatprep.mubr.bf16.mxu0 %v1303_v42  ;;  %v1074_v42 = vrot.slane %v1072_v29, 1  ;;  %v1096_v29 = vshll.u32 %v5238_v59, 16  ;;  %v1314_v34 = vrot.slane %v4744_v55, 1  ;;  %v3753_v46 = vcombine.low %v3593_v37, %v5251_v13  ;;  %v4825_v27 = vld [vmem:[%s4927_s10 + $0x98] ss:$0 sps:$4 sm:$0x11]  }
  0x87   : > { %v1306_v25 = vsel %vm836_vm1, %v1304_v33, %v1305_v48  ;;  %v1310_v3 = vrot.slane %v3751_v15, 1  ;;  %v3592_v33 = vld [vmem:[%s4927_s10 + $0x3c] sm:$0xe]  ;;  %v869_v48 = vsel %vm836_vm1, %v867_v19, %v868_v58  ;;  %v874_v15 = vrot.slane %v4825_v27, 1  ;;  %v4788_v59 = vld [vmem:[%s6374_s1 + $0x200] sm:$0xff]  }
  0x88   : > { %v1075_v60 = vor.u32 %v1074_v42, %v1070_v45  ;;  %v3752_v21 = vcombine.low %v3592_v33, %v5216_v47  ;;  %v1091_v47 = vrot.slane %v1089_v18, 1  ;;  %v1098_v4 = vrot.slane %v1096_v29, 1  ;;  %v5483_v58 = vld [vmem:[%s4927_s10 + $0xac] sm:$0xf]  ;;  %v5504_v29 = vld [vmem:[%s4927_s10 + $0xb8] sm:$0xf] }
  0x89   : > { %v1312_v43 = vsel %vm836_vm1, %v1310_v3, %v1311_v6  ;;  %v1101_v45 = vshll.u32 %v4744_v55, 16  ;;  %v1108_v13 = vshll.u32 %v5279_v35, 16  ;;  %v1316_v24 = vrot.slane %v3753_v46, 1  ;;  %v4755_v55 = vld [vmem:[%s4927_s10 + $0x5c] ss:$0 sps:$4 sm:$0x11]  }
  0x8a   : > { %v1313_v32 = vrot.slane %v3752_v21, 1  ;;  %v1092_v44 = vsel %vm579_vm0, %v1087_v36, %v1091_v47  ;;  %v1106_v6 = vshrl.u32 %v5279_v35, 16  ;;  %v1120_v21 = vshll.u32 %v5307_v57, 16  ;;  %v4827_v35 = vld [vmem:[%s4927_s10 + $0xa4] ss:$0 sps:$4 sm:$0x11]  }
  0x8b   : > { %v1103_v19 = vrot.slane %v1101_v45, 1  ;;  %v1110_v28 = vrot.slane %v1108_v13, 1  ;;  %v1320_v47 = vrot.slane %v4755_v55, 1  ;;  %v4762_v45 = vld [vmem:[%s4927_s10 + $0x68] ss:$0 sps:$4 sm:$0x11]  }
  0x8c   : > { %v1132_v46 = vshll.u32 %v5336_v20, 16  ;;  %v304_v13 = vld [vmem:[%s4927_s10 + $0xb4] sm:$0xe] }
  0x8d   : > { %2670 = vmatmul.mubr.bf16.gmra.mxu1 %v863_v7  ;;  %2767 = vmatmul.mubr.bf16.vlgmr.msra.gmra.mxu0 %v1056_v63  ;;  %v1080_v7 = vsel %vm579_vm0, %v1075_v60, %v1079_v17  ;;  %v5442_v63 = vcombine.low %v3562_v61, %v5434_v2  ;;  %v302_v17 = vld [vmem:[%s4927_s10 + $0x9c] sm:$0xe]  ;;  %v3594_v61 = vld [vmem:[%s4927_s10 + $0x54] sm:$0xe]  ;;  %v1111_v23 = vor.u32 %v1110_v28, %v1106_v6  ;;  %v3606_v28 = vld [vmem:[%s4927_s10 + $0x24] sm:$0xf] }
  0x8e   : > { %4520 = vmatpush3.bf16.msra.mxu0 %v5326_v11  ;;  %2677 = vmatprep.mubr.bf16.mxu1 %v5386_v14  ;;  %v4748_v11 = vld [vmem:[%s6374_s1 + $0x228] sm:$0xff]   ;;  %v3754_v50 = vcombine.low %v3594_v61, %v5294_v49  ;;  %v1137_v61 = vshll.u32 %v4762_v45, 16  ;;  %v4766_v6 = vld [vmem:[%s4927_s10 + $0x20] ss:$0 sps:$4 sm:$0x11]  }
  0x8f   : > { %2774 = vmatprep.mubr.bf16.mxu0 %v1306_v25  ;;  %4521 = vmatprep.subr.bf16.mxu0 %v4737_v5  ;;  %v301_v25 = vld [vmem:[%s4927_s10 + $0x90] sm:$0xe] }
  0x90   : > { %v3712_v8 = vcombine.low %v301_v25, %v4824_v9  ;;  %v3568_v25 = vld [vmem:[%s4927_s10 + $0xb4] sm:$0xf]  ;;  %v1319_v36 = vrot.slane %v3754_v50, 1  ;;  %v5509_v9 = vld [vmem:[%s4927_s10 + $0x1c] sm:$0xf]  ;;  %v1144_v50 = vshll.u32 %v5362_v54, 16 }
  0x92   : > { %4522 = vmatpush3.bf16.msra.mxu0 %v4737_v5  ;;  %v3564_v5 = vld [vmem:[%s4927_s10 + $0x9c] sm:$0xf]  ;;  %v873_v42 = vrot.slane %v3712_v8, 1 }
  0x93   : > { %4523 = vmatprep.subr.bf16.mxu0 %v4748_v11  ;;  %v5465_v41 = vcombine.low %v3564_v5, %v5456_v53 }
  0x94   : > { %v875_v1 = vsel %vm836_vm1, %v873_v42, %v874_v15  ;;  %v4829_v42 = vld [vmem:[%s4927_s10 + $0xb0] ss:$0 sps:$4 sm:$0x11]  }
  0x95   : > { %2678 = vmatmul.mubr.bf16.gmra.mxu1 %v866_v51  ;;  %2775 = vmatmul.mubr.bf16.gmra.mxu0 %v1068_v39  ;;  %v1315_v51 = vsel %vm836_vm1, %v1313_v32, %v1314_v34  ;;  %v4751_v39 = vld [vmem:[%s4927_s10 + $0x50] ss:$0 sps:$4 sm:$0x11]   ;;  %v3604_v32 = vld [vmem:[%s4927_s10 + $0x18] sm:$0xf]  ;;  %v880_v27 = vrot.slane %v4829_v42, 1 }
  0x96   : > { %2685 = vmatprep.mubr.bf16.mxu1 %v5416_v10  ;;  %2782 = vmatprep.mubr.bf16.mxu0 %v1309_v26  ;;  %v3566_v26 = vld [vmem:[%s4927_s10 + $0xa8] sm:$0xf]  ;;  %v1317_v60 = vrot.slane %v4751_v39, 1  ;;  %v4828_v34 = vld [vmem:[%s4927_s10 + $0xac] sm:$0xf] }
  0x97   : > { %4524 = vmatpush3.bf16.msra.mxu0 %v4748_v11  ;;  %v4781_v11 = vld [vmem:[%s6374_s1 + $0x208] sm:$0xff]   ;;  %v5489_v3 = vcombine.low %v3566_v26, %v5483_v58  ;;  %v3714_v37 = vcombine.low %v303_v31, %v4828_v34  ;;  %v5528_v26 = vld [vmem:[%s4927_s10 + $0xc4] sm:$0xf]  ;;  %v1517_v31 = vshll.u32 %v4766_v6, 16 }
  0x98   : > { %4525 = vmatprep.subr.bf16.mxu0 %v4759_v62  ;;  %v1318_v18 = vsel %vm836_vm1, %v1316_v24, %v1317_v60  ;;  %v1323_v24 = vrot.slane %v4762_v45, 1  ;;  %v1130_v60 = vshrl.u32 %v5336_v20, 16  ;;  %v3653_v42 = vld [vmem:[%s4927_s10 + $0x24] sm:$0xe] }
  0x9b   : > { %4526 = vmatpush3.bf16.msra.mxu0 %v4759_v62  ;;  %v1099_v62 = vor.u32 %v1098_v4, %v1094_v56  ;;  %v5516_v56 = vcombine.low %v3568_v25, %v5504_v29  ;;  %v1125_v4 = vshll.u32 %v4755_v55, 16 }
  0x9c   : > { %4527 = vmatprep.subr.bf16.mxu0 %v4767_v0 }
  0x9d   : > { %2686 = vmatmul.mubr.bf16.gmra.mxu1 %v869_v48  ;;  %2783 = vmatmul.mubr.bf16.gmra.mxu0 %v1080_v7  ;;  %v1104_v33 = vsel %vm579_vm0, %v1099_v62, %v1103_v19  ;;  %v4826_v48 = vld [vmem:[%s4927_s10 + $0xa0] sm:$0xf]  ;;  %v1113_v7 = vshll.u32 %v4751_v39, 16  ;;  %v879_v39 = vrot.slane %v3714_v37, 1  ;;  %v1127_v62 = vrot.slane %v1125_v4, 1 }
  0x9e   : > { %2693 = vmatprep.mubr.bf16.mxu1 %v5442_v63  ;;  %2790 = vmatprep.mubr.bf16.mxu0 %v1312_v43  ;;  %v3713_v22 = vcombine.low %v302_v17, %v4826_v48  ;;  %v877_v43 = vrot.slane %v4827_v35, 1  ;;  %v1134_v17 = vrot.slane %v1132_v46, 1  ;;  %v4830_v48 = vld [vmem:[%s4927_s10 + $0xb8] sm:$0xf]  ;;  %v1142_v37 = vshrl.u32 %v5362_v54, 16 }
  0x9f   : > { %4528 = vmatpush3.bf16.msra.mxu0 %v4767_v0  ;;  %v3595_v0 = vld [vmem:[%s4927_s10 + $0x60] sm:$0xe]  ;;  %v1115_v5 = vrot.slane %v1113_v7, 1  ;;  %v3607_v7 = vld [vmem:[%s4927_s10 + $0x28] sm:$0xf]  ;;  %v881_v55 = vsel %vm836_vm1, %v879_v39, %v880_v27 }
  0xa0   : > { %4529 = vmatprep.subr.bf16.mxu0 %v4774_v52  ;;  %v876_v49 = vrot.slane %v3713_v22, 1  ;;  %v3755_v8 = vcombine.low %v3595_v0, %v5329_v16  ;;  %v5522_v16 = vcombine.low %v3604_v32, %v5509_v9  ;;  %v3715_v22 = vcombine.low %v304_v13, %v4830_v48  ;;  %v3608_v4 = vld [vmem:[%s4927_s10 + $0x30] sm:$0xf]  ;;  %v3652_v39 = vld [vmem:[%s4927_s10 + $0x18] sm:$0xe] }
  0xa1   : > { %v1766_v13 = vrot.slane %v4766_v6, 1 }
  0xa2   : > { %v1322_v19 = vrot.slane %v3755_v8, 1  ;;  %v1510_v35 = vshrl.u32 %v5522_v16, 16  ;;  %v4770_v8 = vld [vmem:[%s4927_s10 + $0x2c] ss:$0 sps:$4 sm:$0x11]  }
  0xa3   : > { %4530 = vmatpush3.bf16.msra.mxu0 %v4774_v52  ;;  %v1118_v52 = vshrl.u32 %v5307_v57, 16  ;;  %v3596_v57 = vld [vmem:[%s4927_s10 + $0x6c] sm:$0xe] }
  0xa4   : > { %4531 = vmatprep.subr.bf16.mxu0 %v4781_v11 }
  0xa5   : > { %2694 = vmatmul.mubr.bf16.gmra.mxu1 %v872_v38  ;;  %2791 = vmatmul.mubr.bf16.gmra.mxu0 %v1092_v44  ;;  %v1122_v38 = vrot.slane %v1120_v21, 1  ;;  %v1116_v44 = vsel %vm579_vm0, %v1111_v23, %v1115_v5  ;;  %v1324_v21 = vsel %vm836_vm1, %v1322_v19, %v1323_v24  ;;  %v882_v23 = vrot.slane %v3715_v22, 1  ;;  %v4831_v5 = vld [vmem:[%s4927_s10 + $0xbc] ss:$0 sps:$4 sm:$0x11]  }
  0xa6   : > { %2701 = vmatprep.mubr.bf16.mxu1 %v5465_v41  ;;  %2798 = vmatprep.mubr.bf16.mxu0 %v1315_v51  ;;  %v1321_v51 = vsel %vm836_vm1, %v1319_v36, %v1320_v47  ;;  %v883_v25 = vrot.slane %v4831_v5, 1  ;;  %v1139_v36 = vrot.slane %v1137_v61, 1  ;;  %v3597_v47 = vld [vmem:[%s4927_s10 + $0x78] sm:$0xe]  ;;  %v1769_v19 = vrot.slane %v4770_v8, 1 }
  0xa7   : > { %4532 = vmatpush3.bf16.msra.mxu0 %v4781_v11  ;;  %v878_v11 = vsel %vm836_vm1, %v876_v49, %v877_v43  ;;  %v1123_v15 = vor.u32 %v1122_v38, %v1118_v52  ;;  %v5550_v49 = vcombine.low %v3606_v28, %v3607_v7  ;;  %v1519_v38 = vrot.slane %v1517_v31, 1  ;;  %v3598_v22 = vld [vmem:[%s4927_s10 + $0x84] sm:$0xe]  ;;  %v5591_v31 = vld [vmem:[%s4927_s10 + $0x40] sm:$0xf] }
  0xa8   : > { %4533 = vmatprep.subr.bf16.mxu0 %v4788_v59  ;;  %v3757_v45 = vcombine.low %v3597_v47, %v5377_v30  ;;  %v884_v46 = vsel %vm836_vm1, %v882_v23, %v883_v25  ;;  %v1529_v30 = vshll.u32 %v4770_v8, 16  ;;  %v3797_v24 = vcombine.low %v3653_v42, %v3607_v7 }
  0xa9   : > { %v1128_v20 = vsel %vm579_vm0, %v1123_v15, %v1127_v62  ;;  %v4768_v15 = vld [vmem:[%s4927_s10 + $0x80] ss:$0 sps:$4 sm:$0x11]   ;;  %v1522_v62 = vshrl.u32 %v5550_v49, 16  ;;  %v3758_v23 = vcombine.low %v3598_v22, %v5399_v40  ;;  %v1154_v5 = vshrl.u32 %v5386_v14, 16 }
  0xaa   : > { %v1768_v48 = vrot.slane %v3797_v24, 1  ;;  %v1328_v7 = vrot.slane %v3757_v45, 1 }
  0xab   : > { %4534 = vmatpush3.bf16.msra.mxu0 %v4788_v59  ;;  %v3570_v59 = vld [vmem:[%s4927_s10 + $0xc0] sm:$0xf] }
  0xac   : > { %v5546_v0 = vcombine.low %v3570_v59, %v5528_v26  ;;  %v3796_v59 = vcombine.low %v3652_v39, %v5509_v9 }
  0xad   : > { %2702 = vmatmul.mubr.bf16.gmra.mxu1 %v875_v1  ;;  %2799 = vmatmul.mubr.bf16.gmra.mxu0 %v1104_v33  ;;  %v5534_v1 = vld [vmem:[%s4927_s10 + $0x74] ss:$0 sps:$4 sm:$0x11]   ;;  %v1512_v33 = vshll.u32 %v5522_v16, 16 }
  0xae   : > { %2709 = vmatprep.mubr.bf16.mxu1 %v5489_v3  ;;  %2806 = vmatprep.mubr.bf16.mxu0 %v1318_v18  ;;  %v3756_v18 = vcombine.low %v3596_v57, %v5350_v12  ;;  %v1135_v12 = vor.u32 %v1134_v17, %v1130_v60  ;;  %v1326_v34 = vrot.slane %v5534_v1, 1  ;;  %v5564_v57 = vld [vmem:[%s4927_s10 + $0x34] sm:$0xf]  ;;  %v1149_v27 = vshll.u32 %v5534_v1, 16 }
  0xaf   : > { %v1514_v43 = vrot.slane %v1512_v33, 1  ;;  %v5575_v61 = vcombine.low %v3608_v4, %v5564_v57  ;;  %v1765_v33 = vrot.slane %v3796_v59, 1  ;;  %v1156_v1 = vshll.u32 %v5386_v14, 16 }
  0xb0   : > { %v1325_v32 = vrot.slane %v3756_v18, 1  ;;  %v1151_v28 = vrot.slane %v1149_v27, 1  ;;  %v5583_v18 = vsel %vm836_vm1, %v1768_v48, %v1769_v19  ;;  %v1168_v14 = vshll.u32 %v5416_v10, 16  ;;  %v5613_v27 = vld [vmem:[%s4927_s10 + $0x4c] sm:$0xf] }
  0xb1   : > { %v1515_v52 = vor.u32 %v1514_v43, %v1510_v35  ;;  %v5580_v6 = vsel %vm836_vm1, %v1765_v33, %v1766_v13  ;;  %v1536_v35 = vshll.u32 %v5575_v61, 16  ;;  %v3610_v43 = vld [vmem:[%s4927_s10 + $0x3c] sm:$0xf]  ;;  %v1158_v25 = vrot.slane %v1156_v1, 1 }
  0xb2   : > { %v1327_v54 = vsel %vm836_vm1, %v1325_v32, %v1326_v34  ;;  %v4771_v32 = vld [vmem:[%s4927_s10 + $0x8c] ss:$0 sps:$4 sm:$0x11]   ;;  %v1534_v34 = vshrl.u32 %v5575_v61, 16  ;;  %v5602_v40 = vcombine.low %v3610_v43, %v5591_v31  ;;  %v3600_v48 = vld [vmem:[%s4927_s10 + $0x9c] sm:$0xe] }
  0xb3   : > { %v1520_v60 = vsel %vm579_vm0, %v1515_v52, %v1519_v38  ;;  %v1538_v8 = vrot.slane %v1536_v35, 1  ;;  %v3599_v38 = vld [vmem:[%s4927_s10 + $0x90] sm:$0xe]  ;;  %v1159_v4 = vor.u32 %v1158_v25, %v1154_v5  ;;  %v1332_v45 = vrot.slane %v4771_v32, 1  ;;  %v3614_v35 = vld [vmem:[%s4927_s10 + $0x54] sm:$0xf] }
  0xb4   : > { %v1548_v42 = vshll.u32 %v5602_v40, 16  ;;  %v1173_v59 = vshll.u32 %v4771_v32, 16  ;;  %v3759_v13 = vcombine.low %v3599_v38, %v5434_v2  ;;  %v1180_v2 = vshll.u32 %v5442_v63, 16  ;;  %v5635_v43 = vld [vmem:[%s4927_s10 + $0x58] sm:$0xf] }
  0xb5   : > { %2710 = vmatmul.mubr.bf16.gmra.mxu1 %v878_v11  ;;  %2807 = vmatmul.mubr.bf16.gmra.mxu0 %v1116_v44  ;;  %v1146_v11 = vrot.slane %v1144_v50, 1  ;;  %v1524_v44 = vshll.u32 %v5550_v49, 16  ;;  %v1329_v50 = vrot.slane %v4768_v15, 1  ;;  %v1178_v5 = vshrl.u32 %v5442_v63, 16 }
  0xb6   : > { %2717 = vmatprep.mubr.bf16.mxu1 %v5516_v56  ;;  %2814 = vmatprep.mubr.bf16.mxu0 %v1321_v51  ;;  %v1140_v51 = vsel %vm579_vm0, %v1135_v12, %v1139_v36  ;;  %v1161_v12 = vshll.u32 %v4768_v15, 16  ;;  %v1166_v15 = vshrl.u32 %v5416_v10, 16  ;;  %v1550_v33 = vrot.slane %v1548_v42, 1  ;;  %v3616_v42 = vld [vmem:[%s4927_s10 + $0x60] sm:$0xf] }
  0xb7   : > { %v1526_v17 = vrot.slane %v1524_v44, 1  ;;  %v1147_v9 = vor.u32 %v1146_v11, %v1142_v37  ;;  %v1330_v47 = vsel %vm836_vm1, %v1328_v7, %v1329_v50  ;;  %v1331_v44 = vrot.slane %v3758_v23, 1 }
  0xb8   : > { %v1163_v11 = vrot.slane %v1161_v12, 1  ;;  %v1175_v22 = vrot.slane %v1173_v59, 1  ;;  %v1334_v7 = vrot.slane %v3759_v13, 1  ;;  %v3760_v23 = vcombine.low %v3600_v48, %v5456_v53  ;;  %v4778_v12 = vld [vmem:[%s4927_s10 + $0xa4] ss:$0 sps:$4 sm:$0x11]  }
  0xb9   : > { %v1152_v36 = vsel %vm579_vm0, %v1147_v9, %v1151_v28  ;;  %v5630_v9 = vld [vmem:[%s4927_s10 + $0x50] ss:$0 sps:$4 sm:$0x11]   ;;  %v1182_v25 = vrot.slane %v1180_v2, 1  ;;  %v5646_v53 = vcombine.low %v3614_v35, %v5635_v43  ;;  %v1192_v63 = vshll.u32 %v5465_v41, 16 }
  0xba   : > { %v1204_v2 = vshll.u32 %v5489_v3, 16  ;;  %v3602_v48 = vld [vmem:[%s4927_s10 + $0xb4] sm:$0xe]  ;;  %v5679_v35 = vld [vmem:[%s4927_s10 + $0x70] sm:$0xf] }
  0xbd   : > { %2718 = vmatmul.mubr.bf16.gmra.mxu1 %v881_v55  ;;  %2815 = vmatmul.mubr.bf16.gmra.mxu0 %v1128_v20  ;;  %v1527_v55 = vor.u32 %v1526_v17, %v1522_v62  ;;  %v1531_v20 = vrot.slane %v1529_v30, 1  ;;  %v1164_v62 = vsel %vm579_vm0, %v1159_v4, %v1163_v11  ;;  %v1333_v30 = vsel %vm836_vm1, %v1331_v44, %v1332_v45  ;;  %v3601_v45 = vld [vmem:[%s4927_s10 + $0xa8] sm:$0xe] }
  0xbe   : > { %2725 = vmatprep.mubr.bf16.mxu1 %v5546_v0  ;;  %2822 = vmatprep.mubr.bf16.mxu0 %v1324_v21  ;;  %v5586_v21 = vld [vmem:[%s4927_s10 + $0x38] ss:$0 sps:$4 sm:$0x11]   ;;  %v1546_v17 = vshrl.u32 %v5602_v40, 16  ;;  %v1338_v11 = vrot.slane %v4778_v12, 1  ;;  %v3761_v59 = vcombine.low %v3601_v45, %v5483_v58 }
  0xbf   : > { %v1532_v37 = vsel %vm579_vm0, %v1527_v55, %v1531_v20  ;;  %v1541_v52 = vshll.u32 %v5586_v21, 16 }
  0xc0   : > { %v1551_v55 = vor.u32 %v1550_v33, %v1546_v17 }
  0xc1   : > { %v1543_v39 = vrot.slane %v1541_v52, 1  ;;  %v1183_v52 = vor.u32 %v1182_v25, %v1178_v5  ;;  %v1206_v25 = vrot.slane %v1204_v2, 1  ;;  %v4789_v2 = vld [vmem:[%s4927_s10 + $0xc8] ss:$0 sps:$4 sm:$0x11]  }
  0xc5   : > { %2726 = vmatmul.mubr.bf16.gmra.mxu1 %v884_v46  ;;  %2823 = vmatmul.mubr.bf16.gmra.mxu0 %v1140_v51  ;;  %v5608_v46 = vld [vmem:[%s4927_s10 + $0x44] ss:$0 sps:$4 sm:$0x11]   ;;  %v1539_v51 = vor.u32 %v1538_v8, %v1534_v34  ;;  %v1565_v34 = vshll.u32 %v5630_v9, 16 }
  0xc6   : > { %2830 = vmatprep.mubr.bf16.mxu0 %v1327_v54  ;;  %2927 = vmatprep.mubr.bf16.mxu1 %v1520_v60  ;;  %v3612_v54 = vld [vmem:[%s4927_s10 + $0x48] sm:$0xf]  ;;  %v4775_v60 = vld [vmem:[%s4927_s10 + $0x98] ss:$0 sps:$4 sm:$0x11]   ;;  %v1553_v10 = vshll.u32 %v5608_v46, 16 }
  0xc7   : > { %v5620_v19 = vcombine.low %v3612_v54, %v5613_v27  ;;  %v1544_v24 = vsel %vm579_vm0, %v1539_v51, %v1543_v39  ;;  %v1335_v50 = vrot.slane %v4775_v60, 1  ;;  %v1567_v4 = vrot.slane %v1565_v34, 1  ;;  %v5652_v51 = vld [vmem:[%s4927_s10 + $0x5c] ss:$0 sps:$4 sm:$0x11]  }
  0xc8   : > { %v1555_v20 = vrot.slane %v1553_v10, 1  ;;  %v1572_v39 = vshll.u32 %v5646_v53, 16  ;;  %v5657_v54 = vld [vmem:[%s4927_s10 + $0x64] sm:$0xf]  ;;  %v1577_v33 = vshll.u32 %v5652_v51, 16 }
  0xc9   : > { %v1560_v28 = vshll.u32 %v5620_v19, 16 }
  0xca   : > { %v1556_v8 = vsel %vm579_vm0, %v1551_v55, %v1555_v20  ;;  %v1574_v17 = vrot.slane %v1572_v39, 1  ;;  %v3618_v20 = vld [vmem:[%s4927_s10 + $0x6c] sm:$0xf] }
  0xcb   : > { %v1562_v32 = vrot.slane %v1560_v28, 1 }
  0xcd   : > { %2831 = vmatmul.mubr.bf16.gmra.mxu0 %v1152_v36  ;;  %2928 = vmatmul.mubr.bf16.vlgmr.msra.gmra.mxu1 %v5522_v16  ;;  %v1170_v16 = vrot.slane %v1168_v14, 1  ;;  %v1185_v36 = vshll.u32 %v4775_v60, 16  ;;  %v1337_v14 = vrot.slane %v3760_v23, 1  ;;  %v1570_v60 = vshrl.u32 %v5646_v53, 16 }
  0xce   : > { %2838 = vmatprep.mubr.bf16.mxu0 %v1330_v47  ;;  %2935 = vmatprep.mubr.bf16.mxu1 %v1532_v37  ;;  %v1558_v47 = vshrl.u32 %v5620_v19, 16  ;;  %v1336_v37 = vsel %vm836_vm1, %v1334_v7, %v1335_v50  ;;  %v1579_v7 = vrot.slane %v1577_v33, 1  ;;  %v5674_v50 = vld [vmem:[%s4927_s10 + $0x68] ss:$0 sps:$4 sm:$0x11]  }
  0xcf   : > { %v1171_v1 = vor.u32 %v1170_v16, %v1166_v15  ;;  %v1187_v38 = vrot.slane %v1185_v36, 1  ;;  %v1190_v15 = vshrl.u32 %v5465_v41, 16  ;;  %v1197_v16 = vshll.u32 %v4778_v12, 16  ;;  %v4785_v36 = vld [vmem:[%s4927_s10 + $0xbc] ss:$0 sps:$4 sm:$0x11]  }
  0xd0   : > { %v1563_v44 = vor.u32 %v1562_v32, %v1558_v47  ;;  %v5668_v41 = vcombine.low %v3616_v42, %v5657_v54  ;;  %v1575_v28 = vor.u32 %v1574_v17, %v1570_v60  ;;  %v1221_v17 = vshll.u32 %v4785_v36, 16 }
  0xd1   : > { %v1188_v13 = vsel %vm579_vm0, %v1183_v52, %v1187_v38  ;;  %v1199_v10 = vrot.slane %v1197_v16, 1  ;;  %v3603_v52 = vld [vmem:[%s4927_s10 + $0xc0] sm:$0xe] }
  0xd2   : > { %v1584_v55 = vshll.u32 %v5668_v41, 16  ;;  %v1582_v47 = vshrl.u32 %v5668_v41, 16  ;;  %v1580_v32 = vsel %vm579_vm0, %v1575_v28, %v1579_v7  ;;  %v3763_v33 = vcombine.low %v3603_v52, %v5528_v26  ;;  %v3622_v52 = vld [vmem:[%s4927_s10 + $0x84] sm:$0xf] }
  0xd4   : > { %v1586_v34 = vrot.slane %v1584_v55, 1 }
  0xd5   : > { %2839 = vmatmul.mubr.bf16.gmra.mxu0 %v1164_v62  ;;  %2936 = vmatmul.mubr.bf16.gmra.mxu1 %v5550_v49  ;;  %v1176_v49 = vsel %vm579_vm0, %v1171_v1, %v1175_v22  ;;  %v1339_v62 = vsel %vm836_vm1, %v1337_v14, %v1338_v11  ;;  %v1340_v1 = vrot.slane %v3761_v59, 1  ;;  %v3620_v59 = vld [vmem:[%s4927_s10 + $0x78] sm:$0xf] }
  0xd6   : > { %2846 = vmatprep.mubr.bf16.mxu0 %v1333_v30  ;;  %2943 = vmatprep.mubr.bf16.mxu1 %v1544_v24  ;;  %v1568_v30 = vsel %vm579_vm0, %v1563_v44, %v1567_v4  ;;  %v4782_v24 = vld [vmem:[%s4927_s10 + $0xb0] ss:$0 sps:$4 sm:$0x11]   ;;  %v1344_v44 = vrot.slane %v4785_v36, 1  ;;  %v1587_v39 = vor.u32 %v1586_v34, %v1582_v47  ;;  %v1347_v36 = vrot.slane %v4789_v2, 1 }
  0xd7   : > { %v1341_v22 = vrot.slane %v4782_v24, 1  ;;  %v1209_v12 = vshll.u32 %v4782_v24, 16  ;;  %v1214_v24 = vshrl.u32 %v5516_v56, 16  ;;  %v5725_v47 = vld [vmem:[%s4927_s10 + $0x80] ss:$0 sps:$4 sm:$0x11]  }
  0xd9   : > { %v1342_v5 = vsel %vm836_vm1, %v1340_v1, %v1341_v22  ;;  %v1211_v38 = vrot.slane %v1209_v12, 1  ;;  %v1346_v12 = vrot.slane %v3763_v33, 1 }
  0xdd   : > { %2847 = vmatmul.mubr.bf16.gmra.mxu0 %v1176_v49  ;;  %2944 = vmatmul.mubr.bf16.gmra.mxu1 %v5575_v61  ;;  %v1194_v61 = vrot.slane %v1192_v63, 1  ;;  %v1202_v49 = vshrl.u32 %v5489_v3, 16 }
  0xde   : > { %2854 = vmatprep.mubr.bf16.mxu0 %v1336_v37  ;;  %2951 = vmatprep.mubr.bf16.mxu1 %v1556_v8  ;;  %v1589_v37 = vshll.u32 %v5674_v50, 16  ;;  %v5690_v8 = vcombine.low %v3618_v20, %v5679_v35 }
  0xdf   : > { %v1195_v58 = vor.u32 %v1194_v61, %v1190_v15  ;;  %v1207_v14 = vor.u32 %v1206_v25, %v1202_v49  ;;  %v5696_v15 = vld [vmem:[%s4927_s10 + $0x74] ss:$0 sps:$4 sm:$0x11]   ;;  %v1228_v25 = vshll.u32 %v5546_v0, 16 }
  0xe0   : > { %v1591_v42 = vrot.slane %v1589_v37, 1  ;;  %v1596_v61 = vshll.u32 %v5690_v8, 16  ;;  %v1601_v55 = vshll.u32 %v5696_v15, 16 }
  0xe1   : > { %v1200_v23 = vsel %vm579_vm0, %v1195_v58, %v1199_v10  ;;  %v1212_v58 = vsel %vm579_vm0, %v1207_v14, %v1211_v38  ;;  %v5734_v14 = vld [vmem:[%s4927_s10 + $0x88] sm:$0xf] }
  0xe2   : > { %v1592_v28 = vsel %vm579_vm0, %v1587_v39, %v1591_v42  ;;  %v1598_v7 = vrot.slane %v1596_v61, 1  ;;  %v1230_v39 = vrot.slane %v1228_v25, 1  ;;  %v1233_v42 = vshll.u32 %v4789_v2, 16  ;;  %v3624_v25 = vld [vmem:[%s4927_s10 + $0x90] sm:$0xf] }
  0xe3   : > { %v1613_v61 = vshll.u32 %v5725_v47, 16 }
  0xe5   : > { %2855 = vmatmul.mubr.bf16.gmra.mxu0 %v1188_v13  ;;  %2952 = vmatmul.mubr.bf16.gmra.mxu1 %v5602_v40  ;;  %v3762_v40 = vcombine.low %v3602_v48, %v5504_v29  ;;  %v1216_v29 = vshll.u32 %v5516_v56, 16  ;;  %v5705_v13 = vld [vmem:[%s4927_s10 + $0x7c] sm:$0xf]  ;;  %v1594_v48 = vshrl.u32 %v5690_v8, 16 }
  0xe6   : > { %2862 = vmatprep.mubr.bf16.mxu0 %v1339_v62  ;;  %2959 = vmatprep.mubr.bf16.mxu1 %v1568_v30  ;;  %v5716_v56 = vcombine.low %v3620_v59, %v5705_v13 }
  0xe7   : > { %v1343_v11 = vrot.slane %v3762_v40, 1  ;;  %v1218_v60 = vrot.slane %v1216_v29, 1  ;;  %v1599_v37 = vor.u32 %v1598_v7, %v1594_v48  ;;  %v1603_v29 = vrot.slane %v1601_v55, 1 }
  0xe8   : > { %v1235_v48 = vrot.slane %v1233_v42, 1  ;;  %v1615_v55 = vrot.slane %v1613_v61, 1 }
  0xe9   : > { %v1345_v10 = vsel %vm836_vm1, %v1343_v11, %v1344_v44  ;;  %v1219_v49 = vor.u32 %v1218_v60, %v1214_v24  ;;  %v1606_v24 = vshrl.u32 %v5716_v56, 16 }
  0xed   : > { %v4063_v63 = vpop.f32.mrf.mxu0  ;;  %v4135_v3 = vpop.f32.mrf.mxu1  ;;  %2863 = vmatmul.mubr.bf16.gmra.mxu0 %v1200_v23  ;;  %2960 = vmatmul.mubr.bf16.gmra.mxu1 %v5620_v19 }
  0xee   : > { %2870 = vmatprep.mubr.bf16.mxu0 %v1342_v5  ;;  %2967 = vmatprep.mubr.bf16.mxu1 %v1580_v32  ;;  %v1223_v5 = vrot.slane %v1221_v17, 1  ;;  %v5743_v17 = vcombine.low %v3622_v52, %v5734_v14 }
  0xef   : > { %v4064_v4 = vpop.f32.mrf.mxu0  ;;  %v4136_v45 = vpop.f32.mrf.mxu1 }
  0xf0   : > { %v5699_v16 = vadd.f32 %v4064_v4, %v4063_v63  ;;  %v5701_v19 = vadd.f32 %v4136_v45, %v4135_v3  ;;  %v1608_v63 = vshll.u32 %v5716_v56, 16  ;;  %v1224_v44 = vsel %vm579_vm0, %v1219_v49, %v1223_v5 }
  0xf1   : > { %v4066_v62 = vpop.f32.mrf.mxu0  ;;  %v4138_v30 = vpop.f32.mrf.mxu1  ;;  %v1226_v4 = vshrl.u32 %v5546_v0, 16  ;;  %v1348_v45 = vsel %vm836_vm1, %v1346_v12, %v1347_v36  ;;  %v5761_v12 = vld [vmem:[%s4927_s10 + $0x94] sm:$0xf] }
  0xf2   : > { %v1610_v60 = vrot.slane %v1608_v63, 1 }
  0xf3   : > { %v4067_v1 = vpop.f32.mrf.mxu0  ;;  %v4139_v22 = vpop.f32.mrf.mxu1  ;;  %v1231_v2 = vor.u32 %v1230_v39, %v1226_v4 }
  0xf4   : > { %v5718_v20 = vadd.f32 %v4067_v1, %v4066_v62  ;;  %v5720_v26 = vadd.f32 %v4139_v22, %v4138_v30  ;;  %v1604_v30 = vsel %vm579_vm0, %v1599_v37, %v1603_v29  ;;  %v3654_v1 = vld [vmem:[%s4927_s10 + $0x30] sm:$0xe]  ;;  %v1611_v7 = vor.u32 %v1610_v60, %v1606_v24 }
  0xf5   : > { %v4069_v40 = vpop.f32.mrf.mxu0  ;;  %v4141_v23 = vpop.f32.mrf.mxu1  ;;  %2871 = vmatmul.mubr.bf16.gmra.mxu0 %v1212_v58  ;;  %2968 = vmatmul.mubr.bf16.gmra.mxu1 %v5646_v53  ;;  %v3798_v37 = vcombine.low %v3654_v1, %v5564_v57  ;;  %v1772_v57 = vrot.slane %v5586_v21, 1  ;;  %v3626_v1 = vld [vmem:[%s4927_s10 + $0x9c] sm:$0xf]  ;;  %v5790_v21 = vld [vmem:[%s4927_s10 + $0xa0] sm:$0xf] }
  0xf6   : > { %2878 = vmatprep.mubr.bf16.mxu0 %v1345_v10  ;;  %2975 = vmatprep.mubr.bf16.mxu1 %v1592_v28  ;;  %v1616_v52 = vsel %vm579_vm0, %v1611_v7, %v1615_v55 }
  0xf7   : > { %v4070_v32 = vpop.f32.mrf.mxu0  ;;  %v4142_v34 = vpop.f32.mrf.mxu1  ;;  %v1771_v61 = vrot.slane %v3798_v37, 1  ;;  %v5799_v37 = vcombine.low %v3626_v1, %v5790_v21  ;;  %v5826_v1 = vld [vmem:[%s4927_s10 + $0xac] sm:$0xf] }
  0xf8   : > { %v5728_v3 = vadd.f32 %v4070_v32, %v4069_v40  ;;  %v5730_v53 = vadd.f32 %v4142_v34, %v4141_v23  ;;  %v5752_v40 = vld [vmem:[%s4927_s10 + $0x8c] ss:$0 sps:$4 sm:$0x11]   ;;  %v1620_v23 = vshll.u32 %v5743_v17, 16  ;;  %v1236_v32 = vsel %vm579_vm0, %v1231_v2, %v1235_v48 }
  0xf9   : > { %v4072_v38 = vpop.f32.mrf.mxu0  ;;  %v4144_v11 = vpop.f32.mrf.mxu1  ;;  %v1618_v34 = vshrl.u32 %v5743_v17, 16  ;;  %v1773_v7 = vsel %vm836_vm1, %v1771_v61, %v1772_v57  ;;  %v5816_v57 = vld [vmem:[%s4927_s10 + $0xa4] ss:$0 sps:$4 sm:$0x11]  }
  0xfb   : > { %v4073_v59 = vpop.f32.mrf.mxu0  ;;  %v4145_v62 = vpop.f32.mrf.mxu1 }
  0xfc   : > { %v5745_v33 = vadd.f32 %v4073_v59, %v4072_v38  ;;  %v5747_v0 = vadd.f32 %v4145_v62, %v4144_v11  ;;  %v1622_v38 = vrot.slane %v1620_v23, 1  ;;  %v1625_v11 = vshll.u32 %v5752_v40, 16  ;;  %v3655_v59 = vld [vmem:[%s4927_s10 + $0x3c] sm:$0xe] }
  0xfd   : > { %v4075_v58 = vpop.f32.mrf.mxu0  ;;  %v4147_v10 = vpop.f32.mrf.mxu1  ;;  %2879 = vmatmul.mubr.bf16.gmra.mxu0 %v1224_v44  ;;  %2976 = vmatmul.mubr.bf16.gmra.mxu1 %v5668_v41  ;;  %v5769_v44 = vcombine.low %v3624_v25, %v5761_v12  ;;  %v5780_v62 = vld [vmem:[%s4927_s10 + $0x98] ss:$0 sps:$4 sm:$0x11]  }
  0xfe   : > { %2886 = vmatprep.mubr.bf16.mxu0 %v1348_v45  ;;  %2983 = vmatprep.mubr.bf16.mxu1 %v1604_v30  ;;  %v1623_v60 = vor.u32 %v1622_v38, %v1618_v34  ;;  %v1637_v23 = vshll.u32 %v5780_v62, 16 }
  0xff   : > { %v4076_v22 = vpop.f32.mrf.mxu0  ;;  %v4148_v28 = vpop.f32.mrf.mxu1  ;;  %v1630_v55 = vshrl.u32 %v5769_v44, 16 }
 0x100   : > { %v5755_v49 = vadd.f32 %v4076_v22, %v4075_v58  ;;  %v5757_v5 = vadd.f32 %v4148_v28, %v4147_v10  ;;  %v1627_v58 = vrot.slane %v1625_v11, 1  ;;  %v1632_v10 = vshll.u32 %v5769_v44, 16 }
 0x101   : > { %v4078_v41 = vpop.f32.mrf.mxu0  ;;  %v4150_v36 = vpop.f32.mrf.mxu1  ;;  %v3799_v28 = vcombine.low %v3655_v59, %v5591_v31  ;;  %v1775_v11 = vrot.slane %v5608_v46, 1 }
 0x103   : > { %v4079_v29 = vpop.f32.mrf.mxu0  ;;  %v4151_v63 = vpop.f32.mrf.mxu1 }
 0x104   : > { %v5771_v4 = vadd.f32 %v4079_v29, %v4078_v41  ;;  %v5773_v45 = vadd.f32 %v4151_v63, %v4150_v36  ;;  %v1628_v36 = vsel %vm579_vm0, %v1623_v60, %v1627_v58  ;;  %v5808_v63 = vld [vmem:[%s6375_s2] ss:$0 sm:$0xff] }
 0x105   : > { %v4081_v39 = vpop.f32.mrf.mxu0  ;;  %v4153_v42 = vpop.f32.mrf.mxu1  ;;  %2887 = vmatmul.mubr.bf16.gmra.mxu0 %v1236_v32  ;;  %2984 = vmatmul.mubr.bf16.gmra.mxu1 %v5690_v8  ;;  %v3656_v8 = vld [vmem:[%s4927_s10 + $0x48] sm:$0xe]  ;;  %v1634_v32 = vrot.slane %v1632_v10, 1  ;;  %v2447_v46 = vadd.f32 %v5699_v16, %v5808_v63 }
 0x106   : > { %2991 = vmatprep.mubr.bf16.mxu1 %v1616_v52  ;;  %4535 = vmatprep.mubr.bf16.mxu0 %v5580_v6  ;;  %v3800_v34 = vcombine.low %v3656_v8, %v5613_v27  ;;  %v1774_v27 = vrot.slane %v3799_v28, 1  ;;  %v3628_v8 = vld [vmem:[%s4927_s10 + $0xa8] sm:$0xf] }
 0x107   : > { %v4082_v30 = vpop.f32.mrf.mxu0  ;;  %v4154_v24 = vpop.f32.mrf.mxu1 }
 0x108   : > { %v5783_v2 = vadd.f32 %v4082_v30, %v4081_v39  ;;  %v5785_v48 = vadd.f32 %v4154_v24, %v4153_v42  ;;  %v1778_v39 = vrot.slane %v5630_v9, 1  ;;  %v3657_v42 = vld [vmem:[%s4927_s10 + $0x54] sm:$0xe]  ;;  %v1635_v30 = vor.u32 %v1634_v32, %v1630_v55 }
 0x109   : > { %v4084_v22 = vpop.f32.mrf.mxu0  ;;  %v4156_v6 = vpop.f32.mrf.mxu1  ;;  %v1639_v24 = vrot.slane %v1637_v23, 1  ;;  %v1777_v60 = vrot.slane %v3800_v34, 1  ;;  %v3801_v28 = vcombine.low %v3657_v42, %v5635_v43  ;;  %v1642_v55 = vshrl.u32 %v5799_v37, 16 }
 0x10a   : > { %v1649_v23 = vshll.u32 %v5816_v57, 16  ;;  %v2450_v43 = vadd.f32 %v5718_v20, %v5808_v63 }
 0x10b   : > { %v4085_v25 = vpop.f32.mrf.mxu0  ;;  %v4157_v41 = vpop.f32.mrf.mxu1  ;;  %v1779_v32 = vsel %vm836_vm1, %v1777_v60, %v1778_v39  ;;  %v1780_v42 = vrot.slane %v3801_v28, 1  ;;  %v1781_v39 = vrot.slane %v5652_v51, 1  ;;  %v2455_v51 = vadd.f32 %v5728_v3, %v5808_v63 }
 0x10c   : > { %v5801_v29 = vadd.f32 %v4085_v25, %v4084_v22  ;;  %v5803_v31 = vadd.f32 %v4157_v41, %v4156_v6  ;;  %v1776_v6 = vsel %vm836_vm1, %v1774_v27, %v1775_v11 }
 0x10d   : > { %v4087_v52 = vpop.f32.mrf.mxu0  ;;  %v4175_v38 = vpop.f32.mrf.mxu1  ;;  %2992 = vmatmul.mubr.bf16.gmra.mxu1 %v5716_v56  ;;  %4536 = vmatmul.mubr.bf16.vlgmr.msra.gmra.mxu0 %v5583_v18  ;;  %v1644_v56 = vshll.u32 %v5799_v37, 16  ;;  %v3658_v18 = vld [vmem:[%s4927_s10 + $0x60] sm:$0xe] }
 0x10e   : > { %2999 = vmatprep.mubr.bf16.mxu1 %v1628_v36  ;;  %4539 = vmatprep.mubr.bf16.mxu0 %v1773_v7  ;;  %v3802_v16 = vcombine.low %v3658_v18, %v5657_v54  ;;  %v1640_v36 = vsel %vm579_vm0, %v1635_v30, %v1639_v24  ;;  %v3659_v30 = vld [vmem:[%s4927_s10 + $0x6c] sm:$0xe]  ;;  %v5851_v24 = vld [vmem:[%s4927_s10 + $0xb0] ss:$0 sps:$4 sm:$0x11]   ;;  %v1651_v18 = vrot.slane %v1649_v23, 1 }
 0x10f   : > { %v4088_v61 = vpop.f32.mrf.mxu0  ;;  %v4176_v59 = vpop.f32.mrf.mxu1  ;;  %v1646_v34 = vrot.slane %v1644_v56, 1 }
 0x110   : > { %v5822_v58 = vadd.f32 %v4088_v61, %v4087_v52  ;;  %v4177_v10 = vadd.f32 %v4176_v59, %v4175_v38  ;;  %v5838_v52 = vcombine.low %v3628_v8, %v5826_v1  ;;  %v1784_v61 = vrot.slane %v5674_v50, 1 }
 0x111   : > { %v4090_v9 = vpop.f32.mrf.mxu0  ;;  %v4178_v22 = vpop.f32.mrf.mxu1  ;;  %v1783_v20 = vrot.slane %v3802_v16, 1  ;;  %v1782_v16 = vsel %vm836_vm1, %v1780_v42, %v1781_v39 }
 0x112   : > { %v5830_v7 = vadd.f32 %v4177_v10, %v2447_v46  ;;  %v1656_v46 = vshll.u32 %v5838_v52, 16  ;;  %v3660_v10 = vld [vmem:[%s4927_s10 + $0x78] sm:$0xe] }
 0x113   : > { %v4091_v25 = vpop.f32.mrf.mxu0  ;;  %v4179_v41 = vpop.f32.mrf.mxu1  ;;  %v1785_v23 = vsel %vm836_vm1, %v1783_v20, %v1784_v61  ;;  %v3804_v3 = vcombine.low %v3660_v10, %v5705_v13  ;;  %v1787_v20 = vrot.slane %v5696_v15, 1  ;;  %v2463_v15 = vadd.f32 %v5755_v49, %v5808_v63 }
 0x114   : > { %v5842_v38 = vadd.f32 %v4091_v25, %v4090_v9  ;;  %v4180_v27 = vadd.f32 %v4179_v41, %v4178_v22  ;;  %v3630_v9 = vld [vmem:[%s4927_s10 + $0xb4] sm:$0xf]  ;;  %v5861_v22 = vld [vmem:[%s4927_s10 + $0xb8] sm:$0xf]  ;;  %v3803_v25 = vcombine.low %v3659_v30, %v5679_v35  ;;  %v1661_v41 = vshll.u32 %v5851_v24, 16 }
 0x115   : > { %v4093_v11 = vpop.f32.mrf.mxu0  ;;  %v4181_v54 = vpop.f32.mrf.mxu1  ;;  %3000 = vmatmul.mubr.bf16.gmra.mxu1 %v5743_v17  ;;  %4540 = vmatmul.mubr.bf16.gmra.mxu0 %v1776_v6  ;;  %v1647_v17 = vor.u32 %v1646_v34, %v1642_v55  ;;  %v2458_v35 = vadd.f32 %v5745_v33, %v5808_v63  ;;  %v1790_v30 = vrot.slane %v5725_v47, 1  ;;  %v1789_v33 = vrot.slane %v3804_v3, 1 }
 0x116   : > { %v5847_v59 = vadd.f32 %v4180_v27, %v2450_v43  ;;  %3007 = vmatprep.mubr.bf16.mxu1 %v1640_v36  ;;  %4543 = vmatprep.mubr.bf16.mxu0 %v1779_v32  ;;  %v1654_v43 = vshrl.u32 %v5838_v52, 16  ;;  %v1658_v27 = vrot.slane %v1656_v46, 1  ;;  %v1786_v61 = vrot.slane %v3803_v25, 1 }
 0x117   : > { %v4094_v60 = vpop.f32.mrf.mxu0  ;;  %v4182_v56 = vpop.f32.mrf.mxu1  ;;  %v1652_v34 = vsel %vm579_vm0, %v1647_v17, %v1651_v18  ;;  %v5886_v17 = vld [vmem:[%s4927_s10 + $0xbc] ss:$0 sps:$4 sm:$0x11]   ;;  %v1663_v10 = vrot.slane %v1661_v41, 1  ;;  %v1791_v41 = vsel %vm836_vm1, %v1789_v33, %v1790_v30  ;;  %v1793_v33 = vrot.slane %v5752_v40, 1 }
 0x118   : > { %v5857_v50 = vadd.f32 %v4094_v60, %v4093_v11  ;;  %v4183_v8 = vadd.f32 %v4182_v56, %v4181_v54  ;;  %v5873_v11 = vcombine.low %v3630_v9, %v5861_v22  ;;  %v3661_v56 = vld [vmem:[%s4927_s10 + $0x84] sm:$0xe]  ;;  %v2471_v40 = vadd.f32 %v5783_v2, %v5808_v63 }
 0x119   : > { %v4096_v6 = vpop.f32.mrf.mxu0  ;;  %v4184_v28 = vpop.f32.mrf.mxu1  ;;  %v3805_v3 = vcombine.low %v3661_v56, %v5734_v14  ;;  %v2466_v14 = vadd.f32 %v5771_v4, %v5808_v63  ;;  %v1796_v4 = vrot.slane %v5780_v62, 1 }
 0x11a   : > { %v5865_v55 = vadd.f32 %v4183_v8, %v2455_v51  ;;  %v1668_v51 = vshll.u32 %v5873_v11, 16  ;;  %v3662_v8 = vld [vmem:[%s4927_s10 + $0x90] sm:$0xe] }
 0x11b   : > { %v4097_v36 = vpop.f32.mrf.mxu0  ;;  %v4185_v32 = vpop.f32.mrf.mxu1  ;;  %v3806_v49 = vcombine.low %v3662_v8, %v5761_v12  ;;  %v1792_v30 = vrot.slane %v3805_v3, 1 }
 0x11c   : > { %v5877_v54 = vadd.f32 %v4097_v36, %v4096_v6  ;;  %v4186_v42 = vadd.f32 %v4185_v32, %v4184_v28  ;;  %v3632_v6 = vld [vmem:[%s4927_s10 + $0xc0] sm:$0xf]  ;;  %v5896_v28 = vld [vmem:[%s4927_s10 + $0xc4] sm:$0xf]  ;;  %v1673_v32 = vshll.u32 %v5886_v17, 16 }
 0x11d   : > { %v4099_v39 = vpop.f32.mrf.mxu0  ;;  %v4187_v13 = vpop.f32.mrf.mxu1  ;;  %3008 = vmatmul.mubr.bf16.gmra.mxu1 %v5769_v44  ;;  %4544 = vmatmul.mubr.bf16.gmra.mxu0 %v1782_v16  ;;  %v1659_v44 = vor.u32 %v1658_v27, %v1654_v43 }
 0x11e   : > { %v5882_v60 = vadd.f32 %v4186_v42, %v2458_v35  ;;  %3015 = vmatprep.mubr.bf16.mxu1 %v1652_v34  ;;  %4547 = vmatprep.mubr.bf16.mxu0 %v1785_v23  ;;  %v1788_v23 = vsel %vm836_vm1, %v1786_v61, %v1787_v20  ;;  %v1666_v35 = vshrl.u32 %v5873_v11, 16  ;;  %v1670_v42 = vrot.slane %v1668_v51, 1 }
 0x11f   : > { %v4100_v18 = vpop.f32.mrf.mxu0  ;;  %v4188_v46 = vpop.f32.mrf.mxu1  ;;  %v1664_v27 = vsel %vm579_vm0, %v1659_v44, %v1663_v10  ;;  %v3664_v44 = vld [vmem:[%s4927_s10 + $0xa8] sm:$0xe] }
 0x120   : > { %v5892_v47 = vadd.f32 %v4100_v18, %v4099_v39  ;;  %v4189_v9 = vadd.f32 %v4188_v46, %v4187_v13  ;;  %v5908_v39 = vcombine.low %v3632_v6, %v5896_v28  ;;  %v1795_v18 = vrot.slane %v3806_v49, 1  ;;  %v3663_v46 = vld [vmem:[%s4927_s10 + $0x9c] sm:$0xe] }
 0x121   : > { %v4102_v16 = vpop.f32.mrf.mxu0  ;;  %v4190_v25 = vpop.f32.mrf.mxu1  ;;  %v1671_v8 = vor.u32 %v1670_v42, %v1666_v35  ;;  %v3807_v49 = vcombine.low %v3663_v46, %v5790_v21  ;;  %v3808_v2 = vcombine.low %v3664_v44, %v5826_v1  ;;  %v2474_v21 = vadd.f32 %v5801_v29, %v5808_v63  ;;  %v3665_v29 = vld [vmem:[%s4927_s10 + $0xb4] sm:$0xe] }
 0x122   : > { %v5900_v36 = vadd.f32 %v4189_v9, %v2463_v15  ;;  %v1675_v15 = vrot.slane %v1673_v32, 1  ;;  %v1680_v9 = vshll.u32 %v5908_v39, 16 }
 0x123   : > { %v4103_v34 = vpop.f32.mrf.mxu0  ;;  %v4191_v43 = vpop.f32.mrf.mxu1  ;;  %v1801_v44 = vrot.slane %v3808_v2, 1 }
 0x124   : > { %v5912_v13 = vadd.f32 %v4103_v34, %v4102_v16  ;;  %v4192_v61 = vadd.f32 %v4191_v43, %v4190_v25  ;;  %v3634_v25 = vld [vmem:[%s4927_s10 + $0xcc] sm:$0xf]  ;;  %v1797_v34 = vsel %vm836_vm1, %v1795_v18, %v1796_v4  ;;  %v1678_v43 = vshrl.u32 %v5908_v39, 16 }
 0x125   : > { %v4105_v20 = vpop.f32.mrf.mxu0  ;;  %v4193_v12 = vpop.f32.mrf.mxu1  ;;  %3016 = vmatmul.mubr.bf16.gmra.mxu1 %v5799_v37  ;;  %4548 = vmatmul.mubr.bf16.gmra.mxu0 %v1788_v23  ;;  %v5922_v37 = vld [vmem:[%s4927_s10 + $0xc8] ss:$0 sps:$4 sm:$0x11]   ;;  %v5931_v23 = vld [vmem:[%s4927_s10 + $0xd0] sm:$0xf]  ;;  %v1676_v42 = vsel %vm579_vm0, %v1671_v8, %v1675_v15  ;;  %v1798_v18 = vrot.slane %v3807_v49, 1 }
 0x126   : > { %v5916_v56 = vadd.f32 %v4192_v61, %v2466_v14  ;;  %3023 = vmatprep.mubr.bf16.mxu1 %v1664_v27  ;;  %4551 = vmatprep.mubr.bf16.mxu0 %v1791_v41  ;;  %v1794_v41 = vsel %vm836_vm1, %v1792_v30, %v1793_v33  ;;  %v1682_v14 = vrot.slane %v1680_v9, 1  ;;  %v1685_v61 = vshll.u32 %v5922_v37, 16 }
 0x127   : > { %v4106_v10 = vpop.f32.mrf.mxu0  ;;  %v4194_v51 = vpop.f32.mrf.mxu1  ;;  %v1799_v4 = vrot.slane %v5816_v57, 1  ;;  %v2479_v57 = vadd.f32 %v5822_v58, %v5808_v63 }
 0x128   : > { %v5927_v6 = vadd.f32 %v4106_v10, %v4105_v20  ;;  %v4195_v16 = vadd.f32 %v4194_v51, %v4193_v12  ;;  %v5943_v20 = vcombine.low %v3634_v25, %v5931_v23  ;;  %v1802_v10 = vrot.slane %v5851_v24, 1  ;;  %v3666_v51 = vld [vmem:[%s4927_s10 + $0xc0] sm:$0xe] }
 0x129   : > { %v4108_v62 = vpop.f32.mrf.mxu0  ;;  %v4196_v3 = vpop.f32.mrf.mxu1  ;;  %v1683_v9 = vor.u32 %v1682_v14, %v1678_v43  ;;  %v1800_v24 = vsel %vm836_vm1, %v1798_v18, %v1799_v4  ;;  %v3809_v43 = vcombine.low %v3665_v29, %v5861_v22  ;;  %v3810_v2 = vcombine.low %v3666_v51, %v5896_v28 }
 0x12a   : > { %v5935_v32 = vadd.f32 %v4195_v16, %v2471_v40  ;;  %v1687_v40 = vrot.slane %v1685_v61, 1  ;;  %v5957_v16 = vld [vmem:[%s4927_s10 + $0xd4] ss:$0 sps:$4 sm:$0x11]   ;;  %v1690_v58 = vshrl.u32 %v5943_v20, 16  ;;  %v1805_v4 = vrot.slane %v5886_v17, 1 }
 0x12b   : > { %v4109_v27 = vpop.f32.mrf.mxu0  ;;  %v4197_v35 = vpop.f32.mrf.mxu1  ;;  %v1697_v61 = vshll.u32 %v5957_v16, 16  ;;  %v1804_v18 = vrot.slane %v3809_v43, 1  ;;  %v1807_v51 = vrot.slane %v3810_v2, 1 }
 0x12c   : > { %v5947_v12 = vadd.f32 %v4109_v27, %v4108_v62  ;;  %v4198_v30 = vadd.f32 %v4197_v35, %v4196_v3 }
 0x12d   : > { %v4111_v33 = vpop.f32.mrf.mxu0  ;;  %v4199_v1 = vpop.f32.mrf.mxu1  ;;  %3024 = vmatmul.mubr.bf16.gmra.mxu1 %v5838_v52  ;;  %4552 = vmatmul.mubr.bf16.gmra.mxu0 %v1794_v41  ;;  %v1692_v52 = vshll.u32 %v5943_v20, 16  ;;  %v1806_v17 = vsel %vm836_vm1, %v1804_v18, %v1805_v4 }
 0x12e   : > { %v5951_v46 = vadd.f32 %v4198_v30, %v2474_v21  ;;  %3031 = vmatprep.mubr.bf16.mxu1 %v1676_v42  ;;  %4555 = vmatprep.mubr.bf16.mxu0 %v1797_v34  ;;  %v1803_v34 = vsel %vm836_vm1, %v1801_v44, %v1802_v10  ;;  %v1688_v42 = vsel %vm579_vm0, %v1683_v9, %v1687_v40 }
 0x12f   : > { %v4112_v8 = vpop.f32.mrf.mxu0  ;;  %v4200_v15 = vpop.f32.mrf.mxu1  ;;  %v1694_v14 = vrot.slane %v1692_v52, 1  ;;  %v2482_v21 = vadd.f32 %v5842_v38, %v5808_v63  ;;  %v1699_v38 = vrot.slane %v1697_v61, 1  ;;  %v2487_v9 = vadd.f32 %v5857_v50, %v5808_v63 }
 0x130   : > { %v5962_v25 = vadd.f32 %v4112_v8, %v4111_v33  ;;  %v4201_v62 = vadd.f32 %v4200_v15, %v4199_v1  ;;  %v1808_v8 = vrot.slane %v5922_v37, 1  ;;  %v3667_v15 = vld [vmem:[%s4927_s10 + $0xcc] sm:$0xe]  ;;  %v2490_v50 = vadd.f32 %v5877_v54, %v5808_v63  ;;  %s3919_s10 = sshll.u32 %s6404_s12, 7 }
 0x131   : > { %v4114_v3 = vpop.f32.mrf.mxu0  ;;  %v4202_v41 = vpop.f32.mrf.mxu1  ;;  %v1695_v29 = vor.u32 %v1694_v14, %v1690_v58  ;;  %v1811_v58 = vrot.slane %v5957_v16, 1  ;;  %v2495_v54 = vadd.f32 %v5892_v47, %v5808_v63  ;;  %s6280_s7 = scalar_lea.vmem %s6376_s3, %s3919_s10 }
 0x132   : > { %v5965_v49 = vadd.f32 %v4201_v62, %v2479_v57  ;;  %v1809_v37 = vsel %vm836_vm1, %v1807_v51, %v1808_v8 }
 0x133   : > { %v4115_v27 = vpop.f32.mrf.mxu0  ;;  %v4203_v35 = vpop.f32.mrf.mxu1 }
 0x134   : > { %v5975_v30 = vadd.f32 %v4115_v27, %v4114_v3  ;;  %v4204_v33 = vadd.f32 %v4203_v35, %v4202_v41  ;;  %v3811_v3 = vcombine.low %v3667_v15, %v5931_v23 }
 0x135   : > { %v4117_v1 = vpop.f32.mrf.mxu0  ;;  %v4205_v22 = vpop.f32.mrf.mxu1  ;;  %3032 = vmatmul.mubr.bf16.gmra.mxu1 %v5873_v11  ;;  %4556 = vmatmul.mubr.bf16.gmra.mxu0 %v1800_v24 }
 0x136   : > { %v5978_v28 = vadd.f32 %v4204_v33, %v2482_v21  ;;  %3039 = vmatprep.mubr.bf16.mxu1 %v1688_v42  ;;  %4559 = vmatprep.mubr.bf16.mxu0 %v1803_v34  ;;  %v1700_v34 = vsel %vm579_vm0, %v1695_v29, %v1699_v38  ;;  %v1810_v23 = vrot.slane %v3811_v3, 1 }
 0x137   : > { %v4118_v44 = vpop.f32.mrf.mxu0  ;;  %v4206_v10 = vpop.f32.mrf.mxu1 }
 0x138   : > { %v5985_v11 = vadd.f32 %v4118_v44, %v4117_v1  ;;  %v4207_v40 = vadd.f32 %v4206_v10, %v4205_v22  ;;  %v2498_v10 = vadd.f32 %v5912_v13, %v5808_v63 }
 0x139   : > { %v4120_v52 = vpop.f32.mrf.mxu0  ;;  %v4208_v57 = vpop.f32.mrf.mxu1 }
 0x13a   : > { %v5987_v62 = vadd.f32 %v4207_v40, %v2487_v9  ;;  %v2503_v9 = vadd.f32 %v5927_v6, %v5808_v63 }
 0x13b   : > { %v4121_v41 = vpop.f32.mrf.mxu0  ;;  %v4209_v24 = vpop.f32.mrf.mxu1 }
 0x13c   : > { %v5995_v43 = vadd.f32 %v4121_v41, %v4120_v52  ;;  %v4210_v2 = vadd.f32 %v4209_v24, %v4208_v57 }
 0x13d   : > { %v4123_v27 = vpop.f32.mrf.mxu0  ;;  %v4211_v35 = vpop.f32.mrf.mxu1  ;;  %3040 = vmatmul.mubr.bf16.gmra.mxu1 %v5908_v39  ;;  %4560 = vmatmul.mubr.bf16.gmra.mxu0 %v1806_v17  ;;  %v1812_v39 = vsel %vm836_vm1, %v1810_v23, %v1811_v58 }
 0x13e   : > { %v5998_v42 = vadd.f32 %v4210_v2, %v2490_v50  ;;  %3047 = vmatprep.mubr.bf16.mxu1 %v1700_v34  ;;  %4563 = vmatprep.mubr.bf16.mxu0 %v1809_v37 }
 0x13f   : > { %v4124_v14 = vpop.f32.mrf.mxu0  ;;  %v4212_v61 = vpop.f32.mrf.mxu1 }
 0x140   : > { %v6003_v21 = vadd.f32 %v4124_v14, %v4123_v27  ;;  %v4213_v33 = vadd.f32 %v4212_v61, %v4211_v35  ;;  %v2511_v35 = vadd.f32 %v5962_v25, %v5808_v63 }
 0x141   : > { %v4126_v1 = vpop.f32.mrf.mxu0  ;;  %v4214_v22 = vpop.f32.mrf.mxu1 }
 0x142   : > { %v6005_v18 = vadd.f32 %v4213_v33, %v2495_v54 }
 0x143   : > { %v4127_v4 = vpop.f32.mrf.mxu0  ;;  %v4215_v44 = vpop.f32.mrf.mxu1 }
 0x144   : > { %v6010_v16 = vadd.f32 %v4127_v4, %v4126_v1  ;;  %v4216_v29 = vadd.f32 %v4215_v44, %v4214_v22  ;;  %v2514_v22 = vadd.f32 %v5975_v30, %v5808_v63 }
 0x145   : > { %v4129_v38 = vpop.f32.mrf.mxu0  ;;  %v4217_v51 = vpop.f32.mrf.mxu1  ;;  %3048 = vmatmul.mubr.bf16.gmra.mxu1 %v5943_v20  ;;  %4564 = vmatmul.mubr.bf16.gmra.mxu0 %v1812_v39  ;;  %v2506_v20 = vadd.f32 %v5947_v12, %v5808_v63 }
 0x146   : > { %v6013_v47 = vadd.f32 %v4216_v29, %v2498_v10 }
 0x147   : > { %v4130_v8 = vpop.f32.mrf.mxu0  ;;  %v4218_v15 = vpop.f32.mrf.mxu1 }
 0x148   : > { %v6017_v40 = vadd.f32 %v4130_v8, %v4129_v38  ;;  %v4219_v52 = vadd.f32 %v4218_v15, %v4217_v51 }
 0x149   : > { %v4132_v57 = vpop.f32.mrf.mxu0  ;;  %v4220_v13 = vpop.f32.mrf.mxu1 }
 0x14a   : > { %v6019_v17 = vadd.f32 %v4219_v52, %v2503_v9 }
 0x14b   : > { %v4133_v3 = vpop.f32.mrf.mxu0  ;;  %v4221_v41 = vpop.f32.mrf.mxu1 }
 0x14c   : > { %v6023_v24 = vadd.f32 %v4133_v3, %v4132_v57  ;;  %v4222_v34 = vadd.f32 %v4221_v41, %v4220_v13 }
 0x14d   : > { %v4223_v37 = vpop.f32.mrf.mxu1  ;;  %v4287_v50 = vpop.f32.mrf.mxu0 }
 0x14e   : > { %v6025_v2 = vadd.f32 %v4222_v34, %v2506_v20 }
 0x14f   : > { %v4224_v6 = vpop.f32.mrf.mxu1  ;;  %v4288_v27 = vpop.f32.mrf.mxu0 }
 0x150   : > { %v4225_v23 = vadd.f32 %v4224_v6, %v4223_v37  ;;  %v4289_v58 = vadd.f32 %v4288_v27, %v4287_v50 }
 0x151   : > { %v4226_v14 = vpop.f32.mrf.mxu1  ;;  %v4290_v61 = vpop.f32.mrf.mxu0 }
 0x152   : > { %v6029_v54 = vadd.f32 %v4225_v23, %v2511_v35  ;;  %v6032_v12 = vadd.f32 %v4289_v58, %v5830_v7  ;;  %v2519_v7 = vadd.f32 %v5985_v11, %v5808_v63 }
 0x153   : > { %v4227_v33 = vpop.f32.mrf.mxu1  ;;  %v4291_v1 = vpop.f32.mrf.mxu0 }
 0x154   : > { %v4228_v39 = vadd.f32 %v4227_v33, %v4226_v14  ;;  %v4292_v4 = vadd.f32 %v4291_v1, %v4290_v61 }
 0x155   : > { %v4229_v44 = vpop.f32.mrf.mxu1  ;;  %v4293_v10 = vpop.f32.mrf.mxu0 }
 0x156   : > { %v6036_v29 = vadd.f32 %v4228_v39, %v2514_v22  ;;  %v6039_v25 = vadd.f32 %v4292_v4, %v5847_v59  ;;  %v2522_v59 = vadd.f32 %v5995_v43, %v5808_v63 }
 0x157   : > { %v4230_v38 = vpop.f32.mrf.mxu1  ;;  %v4294_v51 = vpop.f32.mrf.mxu0 }
 0x158   : > { %v4231_v8 = vadd.f32 %v4230_v38, %v4229_v44  ;;  %v4295_v15 = vadd.f32 %v4294_v51, %v4293_v10 }
 0x159   : > { %v4232_v9 = vpop.f32.mrf.mxu1  ;;  %v4296_v52 = vpop.f32.mrf.mxu0 }
 0x15a   : > { %v6043_v57 = vadd.f32 %v4231_v8, %v2519_v7  ;;  %v6046_v30 = vadd.f32 %v4295_v15, %v5865_v55  ;;  %v2527_v55 = vadd.f32 %v6003_v21, %v5808_v63 }
 0x15b   : > { %v4233_v13 = vpop.f32.mrf.mxu1  ;;  %v4297_v3 = vpop.f32.mrf.mxu0 }
 0x15c   : > { %v4234_v41 = vadd.f32 %v4233_v13, %v4232_v9  ;;  %v4298_v20 = vadd.f32 %v4297_v3, %v4296_v52 }
 0x15d   : > { %v4235_v34 = vpop.f32.mrf.mxu1  ;;  %v4299_v37 = vpop.f32.mrf.mxu0 }
 0x15e   : > { %v6050_v50 = vadd.f32 %v4234_v41, %v2522_v59  ;;  %v6053_v11 = vadd.f32 %v4298_v20, %v5882_v60  ;;  %v2530_v60 = vadd.f32 %v6010_v16, %v5808_v63 }
 0x15f   : > { %v4236_v6 = vpop.f32.mrf.mxu1  ;;  %v4300_v27 = vpop.f32.mrf.mxu0 }
 0x160   : > { %v4237_v35 = vadd.f32 %v4236_v6, %v4235_v34  ;;  %v4301_v23 = vadd.f32 %v4300_v27, %v4299_v37 }
 0x161   : > { %v4238_v58 = vpop.f32.mrf.mxu1  ;;  %v4302_v14 = vpop.f32.mrf.mxu0 }
 0x162   : > { %v6057_v61 = vadd.f32 %v4237_v35, %v2527_v55  ;;  %v6060_v43 = vadd.f32 %v4301_v23, %v5900_v36  ;;  %v2535_v36 = vadd.f32 %v6017_v40, %v5808_v63 }
 0x163   : > { %v4239_v33 = vpop.f32.mrf.mxu1  ;;  %v4303_v1 = vpop.f32.mrf.mxu0 }
 0x164   : > { %v4240_v22 = vadd.f32 %v4239_v33, %v4238_v58  ;;  %v4304_v39 = vadd.f32 %v4303_v1, %v4302_v14 }
 0x165   : > { %v4241_v4 = vpop.f32.mrf.mxu1  ;;  %v4305_v44 = vpop.f32.mrf.mxu0 }
 0x166   : > { %v6064_v10 = vadd.f32 %v4240_v22, %v2530_v60  ;;  %v6067_v21 = vadd.f32 %v4304_v39, %v5916_v56  ;;  %v2538_v56 = vadd.f32 %v6023_v24, %v5808_v63 }
 0x167   : > { %v4242_v38 = vpop.f32.mrf.mxu1  ;;  %v4306_v51 = vpop.f32.mrf.mxu0 }
 0x168   : > { %v4243_v7 = vadd.f32 %v4242_v38, %v4241_v4  ;;  %v4307_v8 = vadd.f32 %v4306_v51, %v4305_v44 }
 0x169   : > { %v4244_v15 = vpop.f32.mrf.mxu1  ;;  %v4308_v9 = vpop.f32.mrf.mxu0 }
 0x16a   : > { %v6071_v52 = vadd.f32 %v4243_v7, %v2535_v36  ;;  %v6074_v16 = vadd.f32 %v4307_v8, %v5935_v32  ;;  %v2543_v32 = vadd.f32 %v5701_v19, %v5808_v63 }
 0x16b   : > { %v4245_v13 = vpop.f32.mrf.mxu1  ;;  %v4309_v3 = vpop.f32.mrf.mxu0 }
 0x16c   : > { %v4246_v59 = vadd.f32 %v4245_v13, %v4244_v15  ;;  %v4310_v41 = vadd.f32 %v4309_v3, %v4308_v9 }
 0x16d   : > { %v4247_v20 = vpop.f32.mrf.mxu1  ;;  %v4311_v34 = vpop.f32.mrf.mxu0 }
 0x16e   : > { %v6078_v37 = vadd.f32 %v4246_v59, %v2538_v56  ;;  %v6081_v40 = vadd.f32 %v4310_v41, %v5951_v46  ;;  %v2546_v46 = vadd.f32 %v5720_v26, %v5808_v63 }
 0x16f   : > { %v4248_v6 = vpop.f32.mrf.mxu1  ;;  %v4312_v27 = vpop.f32.mrf.mxu0 }
 0x170   : > { %v4249_v55 = vadd.f32 %v4248_v6, %v4247_v20  ;;  %v4313_v35 = vadd.f32 %v4312_v27, %v4311_v34 }
 0x171   : > { %v4250_v23 = vpop.f32.mrf.mxu1  ;;  %v4314_v58 = vpop.f32.mrf.mxu0 }
 0x172   : > { %v6085_v14 = vadd.f32 %v4249_v55, %v2543_v32  ;;  %v6088_v24 = vadd.f32 %v4313_v35, %v5965_v49  ;;  %v2551_v49 = vadd.f32 %v5730_v53, %v5808_v63 }
 0x173   : > { %v4251_v33 = vpop.f32.mrf.mxu1  ;;  %v4315_v1 = vpop.f32.mrf.mxu0 }
 0x174   : > { %v4252_v60 = vadd.f32 %v4251_v33, %v4250_v23  ;;  %v4316_v22 = vadd.f32 %v4315_v1, %v4314_v58 }
 0x175   : > { %v4253_v39 = vpop.f32.mrf.mxu1  ;;  %v4317_v4 = vpop.f32.mrf.mxu0 }
 0x176   : > { %v6092_v44 = vadd.f32 %v4252_v60, %v2546_v46  ;;  %v6095_v19 = vadd.f32 %v4316_v22, %v5978_v28  ;;  %v2554_v28 = vadd.f32 %v5747_v0, %v5808_v63 }
 0x177   : > { %v4254_v38 = vpop.f32.mrf.mxu1  ;;  %v4318_v51 = vpop.f32.mrf.mxu0 }
 0x178   : > { %v4255_v36 = vadd.f32 %v4254_v38, %v4253_v39  ;;  %v4319_v7 = vadd.f32 %v4318_v51, %v4317_v4 }
 0x179   : > { %v4256_v8 = vpop.f32.mrf.mxu1  ;;  %v4320_v15 = vpop.f32.mrf.mxu0 }
 0x17a   : > { %v6099_v9 = vadd.f32 %v4255_v36, %v2551_v49  ;;  %v6102_v26 = vadd.f32 %v4319_v7, %v5987_v62  ;;  %v2559_v62 = vadd.f32 %v5757_v5, %v5808_v63 }
 0x17b   : > { %v4257_v13 = vpop.f32.mrf.mxu1  ;;  %v4321_v3 = vpop.f32.mrf.mxu0 }
 0x17c   : > { %v4258_v56 = vadd.f32 %v4257_v13, %v4256_v8  ;;  %v4322_v59 = vadd.f32 %v4321_v3, %v4320_v15 }
 0x17d   : > { %v4259_v41 = vpop.f32.mrf.mxu1  ;;  %v4323_v20 = vpop.f32.mrf.mxu0 }
 0x17e   : > { %v6106_v34 = vadd.f32 %v4258_v56, %v2554_v28  ;;  %v6109_v53 = vadd.f32 %v4322_v59, %v5998_v42  ;;  %v2562_v42 = vadd.f32 %v5773_v45, %v5808_v63 }
 0x17f   : > { %v4260_v6 = vpop.f32.mrf.mxu1  ;;  %v4324_v27 = vpop.f32.mrf.mxu0 }
 0x180   : > { %v4261_v32 = vadd.f32 %v4260_v6, %v4259_v41  ;;  %v4325_v55 = vadd.f32 %v4324_v27, %v4323_v20 }
 0x181   : > { %v4262_v35 = vpop.f32.mrf.mxu1  ;;  %v4326_v23 = vpop.f32.mrf.mxu0 }
 0x182   : > { %v6113_v58 = vadd.f32 %v4261_v32, %v2559_v62  ;;  %v6116_v0 = vadd.f32 %v4325_v55, %v6005_v18  ;;  %v2567_v18 = vadd.f32 %v5785_v48, %v5808_v63 }
 0x183   : > { %v4263_v33 = vpop.f32.mrf.mxu1  ;;  %v4327_v1 = vpop.f32.mrf.mxu0 }
 0x184   : > { %v4264_v46 = vadd.f32 %v4263_v33, %v4262_v35  ;;  %v4328_v60 = vadd.f32 %v4327_v1, %v4326_v23 }
 0x185   : > { %v4265_v22 = vpop.f32.mrf.mxu1  ;;  %v4329_v39 = vpop.f32.mrf.mxu0 }
 0x186   : > { %v6120_v4 = vadd.f32 %v4264_v46, %v2562_v42  ;;  %v6123_v5 = vadd.f32 %v4328_v60, %v6013_v47  ;;  %v2570_v47 = vadd.f32 %v5803_v31, %v5808_v63 }
 0x187   : > { %v4266_v38 = vpop.f32.mrf.mxu1  ;;  %v4330_v51 = vpop.f32.mrf.mxu0 }
 0x188   : > { %v4267_v49 = vadd.f32 %v4266_v38, %v4265_v22  ;;  %v4331_v36 = vadd.f32 %v4330_v51, %v4329_v39 }
 0x189   : > { %v4268_v7 = vpop.f32.mrf.mxu1  ;;  %v4332_v8 = vpop.f32.mrf.mxu0 }
 0x18a   : > { %v6127_v15 = vadd.f32 %v4267_v49, %v2567_v18  ;;  %v6130_v45 = vadd.f32 %v4331_v36, %v6019_v17 }
 0x18b   : > { %v4269_v13 = vpop.f32.mrf.mxu1  ;;  %v4333_v3 = vpop.f32.mrf.mxu0 }
 0x18c   : > { %v4270_v28 = vadd.f32 %v4269_v13, %v4268_v7  ;;  %v4334_v56 = vadd.f32 %v4333_v3, %v4332_v8 }
 0x18d   : > { %v4335_v59 = vpop.f32.mrf.mxu0  ;;  %v4399_v41 = vpop.f32.mrf.mxu1 }
 0x18e   : > { %v6134_v20 = vadd.f32 %v4270_v28, %v2570_v47  ;;  %v6137_v48 = vadd.f32 %v4334_v56, %v6025_v2 }
 0x18f   : > { %v4336_v6 = vpop.f32.mrf.mxu0  ;;  %v4400_v27 = vpop.f32.mrf.mxu1 }
 0x190   : > { %v4337_v62 = vadd.f32 %v4336_v6, %v4335_v59  ;;  %v4401_v32 = vadd.f32 %v4400_v27, %v4399_v41 }
 0x191   : > { %v4338_v17 = vpop.f32.mrf.mxu0  ;;  %v6139_v55 = vpop.f32.mrf.mxu1 }
 0x192   : > { %v6142_v35 = vadd.f32 %v4337_v62, %v6029_v54  ;;  %v6145_v31 = vadd.f32 %v4401_v32, %v6032_v12 }
 0x193   : > { %v4339_v63 = vpop.f32.mrf.mxu0  ;;  %v6147_v23 = vpop.f32.mrf.mxu1 }
 0x194   : > { %v4340_v33 = vadd.f32 %v4339_v63, %v4338_v17 }
 0x195   : > { %v4341_v1 = vpop.f32.mrf.mxu0  ;;  %v6149_v2 = vpop.f32.mrf.mxu1 }
 0x196   : > { %v6152_v42 = vadd.f32 %v4340_v33, %v6036_v29 }
 0x197   : > { %v4342_v46 = vpop.f32.mrf.mxu0  ;;  %v6154_v60 = vpop.f32.mrf.mxu1 }
 0x198   : > { %v4343_v22 = vadd.f32 %v4342_v46, %v4341_v1 }
 0x199   : > { %v4344_v39 = vpop.f32.mrf.mxu0  ;;  %v6156_v54 = vpop.f32.mrf.mxu1 }
 0x19a   : > { %v6159_v12 = vadd.f32 %v4343_v22, %v6043_v57 }
 0x19b   : > { %v4345_v38 = vpop.f32.mrf.mxu0  ;;  %v6161_v51 = vpop.f32.mrf.mxu1 }
 0x19c   : > { %v4346_v18 = vadd.f32 %v4345_v38, %v4344_v39 }
 0x19d   : > { %v4347_v49 = vpop.f32.mrf.mxu0  ;;  %v6163_v36 = vpop.f32.mrf.mxu1 }
 0x19e   : > { %v6166_v29 = vadd.f32 %v4346_v18, %v6050_v50 }
 0x19f   : > { %v4348_v7 = vpop.f32.mrf.mxu0  ;;  %v6168_v8 = vpop.f32.mrf.mxu1 }
 0x1a0   : > { %v4349_v13 = vadd.f32 %v4348_v7, %v4347_v49 }
 0x1a1   : > { %v4350_v3 = vpop.f32.mrf.mxu0  ;;  %v6170_v47 = vpop.f32.mrf.mxu1 }
 0x1a2   : > { %v6173_v57 = vadd.f32 %v4349_v13, %v6057_v61 }
 0x1a3   : > { %v4351_v28 = vpop.f32.mrf.mxu0  ;;  %v6175_v56 = vpop.f32.mrf.mxu1 }
 0x1a4   : > { %6377 = vst [vmem:[#allocation2_spill] sm:$0xff] %v6173_v57  ;;  %v4352_v59 = vadd.f32 %v4351_v28, %v4350_v3 }
 0x1a5   : > { %v4353_v41 = vpop.f32.mrf.mxu0  ;;  %v6177_v6 = vpop.f32.mrf.mxu1 }
 0x1a6   : > { %v6180_v50 = vadd.f32 %v4352_v59, %v6064_v10 }
 0x1a7   : > { %v4354_v27 = vpop.f32.mrf.mxu0  ;;  %v6182_v62 = vpop.f32.mrf.mxu1 }
 0x1a8   : > { %6378 = vst [vmem:[#allocation3_spill] sm:$0xff] %v6180_v50  ;;  %v4355_v32 = vadd.f32 %v4354_v27, %v4353_v41 }
 0x1a9   : > { %v4356_v17 = vpop.f32.mrf.mxu0  ;;  %v6184_v63 = vpop.f32.mrf.mxu1 }
 0x1aa   : > { %v6187_v61 = vadd.f32 %v4355_v32, %v6071_v52 }
 0x1ab   : > { %v4357_v33 = vpop.f32.mrf.mxu0  ;;  %v6189_v1 = vpop.f32.mrf.mxu1 }
 0x1ac   : > { %6379 = vst [vmem:[#allocation4_spill] sm:$0xff] %v6187_v61  ;;  %v4358_v46 = vadd.f32 %v4357_v33, %v4356_v17 }
 0x1ad   : > { %v4359_v22 = vpop.f32.mrf.mxu0  ;;  %v6191_v39 = vpop.f32.mrf.mxu1 }
 0x1ae   : > { %v6194_v10 = vadd.f32 %v4358_v46, %v6078_v37 }
 0x1af   : > { %v4360_v38 = vpop.f32.mrf.mxu0  ;;  %v6196_v18 = vpop.f32.mrf.mxu1 }
 0x1b0   : > { %6380 = vst [vmem:[#allocation5_spill] sm:$0xff] %v6194_v10  ;;  %v4361_v49 = vadd.f32 %v4360_v38, %v4359_v22 }
 0x1b1   : > { %v4362_v7 = vpop.f32.mrf.mxu0  ;;  %v6198_v13 = vpop.f32.mrf.mxu1 }
 0x1b2   : > { %v6201_v52 = vadd.f32 %v4361_v49, %v6085_v14 }
 0x1b3   : > { %v4363_v3 = vpop.f32.mrf.mxu0  ;;  %v6203_v28 = vpop.f32.mrf.mxu1 }
 0x1b4   : > { %6381 = vst [vmem:[#allocation6_spill] sm:$0xff] %v6201_v52  ;;  %v4364_v59 = vadd.f32 %v4363_v3, %v4362_v7 }
 0x1b5   : > { %v4365_v41 = vpop.f32.mrf.mxu0  ;;  %v6205_v27 = vpop.f32.mrf.mxu1 }
 0x1b6   : > { %v6208_v37 = vadd.f32 %v4364_v59, %v6092_v44 }
 0x1b7   : > { %v4366_v32 = vpop.f32.mrf.mxu0  ;;  %v6210_v17 = vpop.f32.mrf.mxu1 }
 0x1b8   : > { %6382 = vst [vmem:[#allocation7_spill] sm:$0xff] %v6208_v37  ;;  %v4367_v33 = vadd.f32 %v4366_v32, %v4365_v41 }
 0x1b9   : > { %v4368_v46 = vpop.f32.mrf.mxu0  ;;  %v6212_v22 = vpop.f32.mrf.mxu1 }
 0x1ba   : > { %v6215_v14 = vadd.f32 %v4367_v33, %v6099_v9 }
 0x1bb   : > { %v4369_v38 = vpop.f32.mrf.mxu0  ;;  %v6217_v49 = vpop.f32.mrf.mxu1 }
 0x1bc   : > { %6383 = vst [vmem:[#allocation8_spill] sm:$0xff] %v6215_v14  ;;  %v4370_v7 = vadd.f32 %v4369_v38, %v4368_v46 }
 0x1bd   : > { %v4371_v3 = vpop.f32.mrf.mxu0  ;;  %v6219_v52 = vpop.f32.mrf.mxu1 }
 0x1be   : > { %v6222_v44 = vadd.f32 %v4370_v7, %v6106_v34 }
 0x1bf   : > { %v4372_v59 = vpop.f32.mrf.mxu0  ;;  %v6224_v37 = vpop.f32.mrf.mxu1 }
 0x1c0   : > { %6384 = vst [vmem:[#allocation9_spill] sm:$0xff] %v6222_v44  ;;  %v4373_v41 = vadd.f32 %v4372_v59, %v4371_v3 }
 0x1c1   : > { %v4374_v32 = vpop.f32.mrf.mxu0  ;;  %v6226_v50 = vpop.f32.mrf.mxu1 }
 0x1c2   : > { %v6229_v9 = vadd.f32 %v4373_v41, %v6113_v58  ;;  %v4407_v58 = vadd.f32 %v6154_v60, %v6149_v2 }
 0x1c3   : > { %v4375_v33 = vpop.f32.mrf.mxu0  ;;  %v6231_v14 = vpop.f32.mrf.mxu1 }
 0x1c4   : > { %6385 = vst [vmem:[#allocation10_spill] sm:$0xff] %v6229_v9  ;;  %v4376_v46 = vadd.f32 %v4375_v33, %v4374_v32 }
 0x1c5   : > { %v4377_v38 = vpop.f32.mrf.mxu0  ;;  %v6233_v10 = vpop.f32.mrf.mxu1 }
 0x1c6   : > { %v6236_v34 = vadd.f32 %v4376_v46, %v6120_v4  ;;  %v4410_v4 = vadd.f32 %v6161_v51, %v6156_v54  ;;  %v4419_v51 = vadd.f32 %v6182_v62, %v6177_v6  ;;  %v4416_v6 = vadd.f32 %v6175_v56, %v6170_v47 }
 0x1c7   : > { %v4378_v7 = vpop.f32.mrf.mxu0  ;;  %v6238_v44 = vpop.f32.mrf.mxu1 }
 0x1c8   : > { %6386 = vst [vmem:[#allocation11_spill] sm:$0xff] %v6236_v34  ;;  %v4379_v3 = vadd.f32 %v4378_v7, %v4377_v38  ;;  %v4404_v7 = vadd.f32 %v6147_v23, %v6139_v55 }
 0x1c9   : > { %v4380_v59 = vpop.f32.mrf.mxu0  ;;  %v6240_v57 = vpop.f32.mrf.mxu1 }
 0x1ca   : > { %v6245_v41 = vadd.f32 %v4379_v3, %v6127_v15  ;;  %v2938_v15 = vadd.f32 %v4407_v58, %v6046_v30  ;;  %v4413_v30 = vadd.f32 %v6168_v8, %v6163_v36 }
 0x1cb   : > { %v4381_v32 = vpop.f32.mrf.mxu0  ;;  %v6247_v33 = vpop.f32.mrf.mxu1 }
 0x1cc   : > { %6387 = vst [vmem:[#allocation12_spill] sm:$0xff] %v6245_v41  ;;  %v4382_v46 = vadd.f32 %v4381_v32, %v4380_v59  ;;  %v2941_v41 = vadd.f32 %v4410_v4, %v6053_v11  ;;  %v4422_v11 = vadd.f32 %v6189_v1, %v6184_v63  ;;  %v2954_v63 = vadd.f32 %v4419_v51, %v6074_v16 }
 0x1cd   : > { %v6251_v34 = vpop.f32.mrf.mxu1  ;;  %v4537_v38 = vpop.f32.mrf.mxu0  ;;  %v2949_v16 = vadd.f32 %v4416_v6, %v6067_v21  ;;  %v4425_v51 = vadd.f32 %v6196_v18, %v6191_v39 }
 0x1ce   : > { %v6256_v9 = vadd.f32 %v4382_v46, %v6134_v20  ;;  %v3099_v3 = vadd.f32 %v4537_v38, %v2938_v15  ;;  %v2933_v20 = vadd.f32 %v4404_v7, %v6039_v25  ;;  %v2946_v38 = vadd.f32 %v4413_v30, %v6060_v43 }
 0x1cf   : > { %v6259_v2 = vpop.f32.mrf.mxu1  ;;  %v3090_v60 = vpop.f32.mrf.mxu0  ;;  %v2957_v7 = vadd.f32 %v4422_v11, %v6081_v40  ;;  %v4434_v43 = vadd.f32 %v6217_v49, %v6212_v22  ;;  %v2962_v6 = vadd.f32 %v4425_v51, %v6088_v24  ;;  %v4446_v24 = vadd.f32 %v6247_v33, %v6240_v57 }
 0x1d0   : > { %v3091_v59 = vadd.f32 %v3090_v60, %v6145_v31  ;;  %v3219_v32 = vmax.f32 %v3099_v3, 0.0  ;;  %v4431_v3 = vadd.f32 %v6210_v17, %v6205_v27  ;;  %v4428_v27 = vadd.f32 %v6203_v28, %v6198_v13 }
 0x1d1   : > { %v6262_v61 = vpop.f32.mrf.mxu1  ;;  %v4538_v54 = vpop.f32.mrf.mxu0  ;;  %v2989_v33 = vadd.f32 %v4446_v24, %v6137_v48 }
 0x1d2   : > { %v3102_v55 = vadd.f32 %v4538_v54, %v2941_v41  ;;  %v3217_v36 = vmax.f32 %v3091_v59, 0.0  ;;  %v2970_v39 = vadd.f32 %v4431_v3, %v6102_v26  ;;  %v2965_v26 = vadd.f32 %v4428_v27, %v6095_v19 }
 0x1d3   : > { %v6271_v23 = vpop.f32.mrf.mxu1  ;;  %v3093_v58 = vpop.f32.mrf.mxu0 }
 0x1d4   : > { %v3220_v4 = vmax.f32 %v3102_v55, 0.0  ;;  %v3094_v46 = vadd.f32 %v3093_v58, %v2933_v20 }
 0x1d5   : > { %v6282_v25 = vpop.f32.mrf.mxu1  ;;  %v4541_v31 = vpop.f32.mrf.mxu0 }
 0x1d6   : > { %v3960_v8 = vpack.c.bf16 %v3220_v4, %v3219_v32  ;;  %v3218_v62 = vmax.f32 %v3094_v46, 0.0  ;;  %v3115_v56 = vadd.f32 %v4541_v31, %v2954_v63  ;;  %v2973_v31 = vadd.f32 %v4434_v43, %v6109_v53 }
 0x1d7   : > { %v6285_v1 = vpop.f32.mrf.mxu1  ;;  %v3106_v41 = vpop.f32.mrf.mxu0  ;;  %v4437_v63 = vadd.f32 %v6224_v37, %v6219_v52 }
 0x1d8   : > { %4032 = vst [vmem:[%s6280_s7 + $0x8] sm:$0xff] %v3960_v8   ;;  %v3955_v47 = vpack.c.bf16 %v3218_v62, %v3217_v36  ;;  %v3107_v54 = vadd.f32 %v3106_v41, %v2946_v38  ;;  %v3223_v40 = vmax.f32 %v3115_v56, 0.0  ;;  %v4443_v36 = vadd.f32 %v6238_v44, %v6233_v10 }
 0x1d9   : > { %v6290_v15 = vpop.f32.mrf.mxu1  ;;  %v4542_v60 = vpop.f32.mrf.mxu0  ;;  %v4440_v10 = vadd.f32 %v6231_v14, %v6226_v50  ;;  %v2978_v57 = vadd.f32 %v4437_v63, %v6116_v0  ;;  %v4455_v50 = vadd.f32 %v6285_v1, %v6282_v25 }
 0x1da   : > { %3956 = vst [vmem:[%s6280_s7] sm:$0xff] %v3955_v47   ;;  %v3118_v59 = vadd.f32 %v4542_v60, %v2957_v7  ;;  %v3221_v21 = vmax.f32 %v3107_v54, 0.0  ;;  %v2986_v52 = vadd.f32 %v4443_v36, %v6130_v45  ;;  %v4449_v45 = vadd.f32 %v6259_v2, %v6251_v34 }
 0x1db   : > { %v4457_v55 = vpop.f32.mrf.mxu1  ;;  %v3109_v20 = vpop.f32.mrf.mxu0 }
 0x1dc   : > { %v3224_v30 = vmax.f32 %v3118_v59, 0.0  ;;  %v3110_v58 = vadd.f32 %v3109_v20, %v2949_v16  ;;  %v4458_v0 = vadd.f32 %v4457_v55, %v6290_v15  ;;  %v2994_v15 = vadd.f32 %v4449_v45, %v6142_v35 }
 0x1dd   : > { %v6302_v17 = vpop.f32.mrf.mxu1  ;;  %v4545_v11 = vpop.f32.mrf.mxu0 }
 0x1de   : > { %v3970_v32 = vpack.c.bf16 %v3224_v30, %v3223_v40  ;;  %v3222_v4 = vmax.f32 %v3110_v58, 0.0  ;;  %v3131_v49 = vadd.f32 %v4545_v11, %v2970_v39  ;;  %v2981_v40 = vadd.f32 %v4440_v10, %v6123_v5  ;;  %v6388_v10 = vld [vmem:[#allocation4_spill] sm:$0xff] }
 0x1df   : > { %v6305_v18 = vpop.f32.mrf.mxu1  ;;  %v3122_v46 = vpop.f32.mrf.mxu0  ;;  %v3002_v39 = vadd.f32 %v4455_v50, %v6159_v12  ;;  %v3005_v55 = vadd.f32 %v4458_v0, %v6166_v29 }
 0x1e0   : > { %4034 = vst [vmem:[%s6280_s7 + $0x18] sm:$0xff] %v3970_v32   ;;  %v3965_v22 = vpack.c.bf16 %v3222_v4, %v3221_v21  ;;  %v3123_v8 = vadd.f32 %v3122_v46, %v2962_v6  ;;  %v3227_v53 = vmax.f32 %v3131_v49, 0.0  ;;  %v4452_v21 = vadd.f32 %v6271_v23, %v6262_v61 }
 0x1e1   : > { %v6310_v13 = vpop.f32.mrf.mxu1  ;;  %v4546_v28 = vpop.f32.mrf.mxu0  ;;  %v4461_v12 = vadd.f32 %v6305_v18, %v6302_v17 }
 0x1e2   : > { %4033 = vst [vmem:[%s6280_s7 + $0x10] sm:$0xff] %v3965_v22   ;;  %v3134_v62 = vadd.f32 %v4546_v28, %v2973_v31  ;;  %v3225_v60 = vmax.f32 %v3123_v8, 0.0  ;;  %v2997_v28 = vadd.f32 %v4452_v21, %v6152_v42 }
 0x1e3   : > { %v4463_v41 = vpop.f32.mrf.mxu1  ;;  %v3125_v47 = vpop.f32.mrf.mxu0 }
 0x1e4   : > { %v3228_v56 = vmax.f32 %v3134_v62, 0.0  ;;  %v3126_v38 = vadd.f32 %v3125_v47, %v2965_v26  ;;  %v4464_v29 = vadd.f32 %v4463_v41, %v6310_v13 }
 0x1e5   : > { %v4465_v44 = vpop.f32.mrf.mxu1  ;;  %v4549_v7 = vpop.f32.mrf.mxu0 }
 0x1e6   : > { %v3980_v19 = vpack.c.bf16 %v3228_v56, %v3227_v53  ;;  %v3226_v3 = vmax.f32 %v3126_v38, 0.0  ;;  %v3147_v16 = vadd.f32 %v4549_v7, %v2986_v52 }
 0x1e7   : > { %v4466_v37 = vpop.f32.mrf.mxu1  ;;  %v3138_v54 = vpop.f32.mrf.mxu0 }
 0x1e8   : > { %4036 = vst [vmem:[%s6280_s7 + $0x28] sm:$0xff] %v3980_v19   ;;  %v3975_v59 = vpack.c.bf16 %v3226_v3, %v3225_v60  ;;  %v3139_v14 = vadd.f32 %v3138_v54, %v2978_v57  ;;  %v3231_v27 = vmax.f32 %v3147_v16, 0.0  ;;  %v4467_v61 = vadd.f32 %v4466_v37, %v4465_v44  ;;  %v6389_v60 = vld [vmem:[#allocation2_spill] sm:$0xff]  ;;  %v6390_v3 = vld [vmem:[#allocation5_spill] sm:$0xff]  ;;  %v6391_v16 = vld [vmem:[#allocation3_spill] sm:$0xff] }
 0x1e9   : > { %v4468_v51 = vpop.f32.mrf.mxu1  ;;  %v4550_v20 = vpop.f32.mrf.mxu0  ;;  %v3010_v19 = vadd.f32 %v4461_v12, %v6389_v60  ;;  %v3013_v57 = vadd.f32 %v4464_v29, %v6391_v16  ;;  %v6398_v60 = vld [vmem:[#allocation11_spill] sm:$0xff] }
 0x1ea   : > { %4035 = vst [vmem:[%s6280_s7 + $0x20] sm:$0xff] %v3975_v59   ;;  %v3150_v43 = vadd.f32 %v4550_v20, %v2989_v33  ;;  %v3229_v32 = vmax.f32 %v3139_v14, 0.0  ;;  %v3018_v42 = vadd.f32 %v4467_v61, %v6388_v10 }
 0x1eb   : > { %v4469_v30 = vpop.f32.mrf.mxu1  ;;  %v3141_v58 = vpop.f32.mrf.mxu0 }
 0x1ec   : > { %v3232_v48 = vmax.f32 %v3150_v43, 0.0  ;;  %v3142_v11 = vadd.f32 %v3141_v58, %v2981_v40  ;;  %v4470_v62 = vadd.f32 %v4469_v30, %v4468_v51 }
 0x1ed   : > { %v4471_v25 = vpop.f32.mrf.mxu1  ;;  %v4553_v1 = vpop.f32.mrf.mxu0 }
 0x1ee   : > { %v3990_v4 = vpack.c.bf16 %v3232_v48, %v3231_v27  ;;  %v3230_v5 = vmax.f32 %v3142_v11, 0.0  ;;  %v3163_v22 = vadd.f32 %v4553_v1, %v3002_v39  ;;  %v3021_v52 = vadd.f32 %v4470_v62, %v6390_v3  ;;  %v6392_v11 = vld [vmem:[#allocation8_spill] sm:$0xff] }
 0x1ef   : > { %v4472_v34 = vpop.f32.mrf.mxu1  ;;  %v3154_v2 = vpop.f32.mrf.mxu0 }
 0x1f0   : > { %4038 = vst [vmem:[%s6280_s7 + $0x38] sm:$0xff] %v3990_v4   ;;  %v3985_v46 = vpack.c.bf16 %v3230_v5, %v3229_v32  ;;  %v3155_v23 = vadd.f32 %v3154_v2, %v2994_v15  ;;  %v3235_v26 = vmax.f32 %v3163_v22, 0.0  ;;  %v4473_v33 = vadd.f32 %v4472_v34, %v4471_v25  ;;  %v6393_v5 = vld [vmem:[#allocation6_spill] sm:$0xff]  ;;  %v6394_v34 = vld [vmem:[#allocation9_spill] sm:$0xff] }
 0x1f1   : > { %v4474_v49 = vpop.f32.mrf.mxu1  ;;  %v4554_v6 = vpop.f32.mrf.mxu0 }
 0x1f2   : > { %4037 = vst [vmem:[%s6280_s7 + $0x30] sm:$0xff] %v3985_v46   ;;  %v3166_v31 = vadd.f32 %v4554_v6, %v3005_v55  ;;  %v3233_v53 = vmax.f32 %v3155_v23, 0.0  ;;  %v3026_v39 = vadd.f32 %v4473_v33, %v6393_v5 }
 0x1f3   : > { %v4475_v36 = vpop.f32.mrf.mxu1  ;;  %v3157_v8 = vpop.f32.mrf.mxu0 }
 0x1f4   : > { %v3236_v63 = vmax.f32 %v3166_v31, 0.0  ;;  %v3158_v35 = vadd.f32 %v3157_v8, %v2997_v28  ;;  %v4476_v45 = vadd.f32 %v4475_v36, %v4474_v49  ;;  %v6395_v49 = vld [vmem:[#allocation7_spill] sm:$0xff] }
 0x1f5   : > { %v4477_v47 = vpop.f32.mrf.mxu1  ;;  %v4557_v24 = vpop.f32.mrf.mxu0 }
 0x1f6   : > { %v4000_v56 = vpack.c.bf16 %v3236_v63, %v3235_v26  ;;  %v3234_v38 = vmax.f32 %v3158_v35, 0.0  ;;  %v3179_v18 = vadd.f32 %v4557_v24, %v3018_v42  ;;  %v3029_v6 = vadd.f32 %v4476_v45, %v6395_v49 }
 0x1f7   : > { %v4478_v44 = vpop.f32.mrf.mxu1  ;;  %v3170_v7 = vpop.f32.mrf.mxu0 }
 0x1f8   : > { %4040 = vst [vmem:[%s6280_s7 + $0x48] sm:$0xff] %v4000_v56   ;;  %v3995_v17 = vpack.c.bf16 %v3234_v38, %v3233_v53  ;;  %v4479_v13 = vadd.f32 %v4478_v44, %v4477_v47  ;;  %v3171_v41 = vadd.f32 %v3170_v7, %v3010_v19  ;;  %v3239_v50 = vmax.f32 %v3179_v18, 0.0  ;;  %v6396_v38 = vld [vmem:[#allocation10_spill] sm:$0xff]  ;;  %v6397_v7 = vld [vmem:[#allocation12_spill] sm:$0xff] }
 0x1f9   : > { %v4480_v37 = vpop.f32.mrf.mxu1  ;;  %v4558_v54 = vpop.f32.mrf.mxu0 }
 0x1fa   : > { %4039 = vst [vmem:[%s6280_s7 + $0x40] sm:$0xff] %v3995_v17   ;;  %v3182_v59 = vadd.f32 %v4558_v54, %v3021_v52  ;;  %v3237_v0 = vmax.f32 %v3171_v41, 0.0  ;;  %v3034_v21 = vadd.f32 %v4479_v13, %v6392_v11 }
 0x1fb   : > { %v4481_v51 = vpop.f32.mrf.mxu1  ;;  %v3173_v20 = vpop.f32.mrf.mxu0 }
 0x1fc   : > { %v3240_v14 = vmax.f32 %v3182_v59, 0.0  ;;  %v4482_v43 = vadd.f32 %v4481_v51, %v4480_v37  ;;  %v3174_v40 = vadd.f32 %v3173_v20, %v3013_v57 }
 0x1fd   : > { %v4483_v30 = vpop.f32.mrf.mxu1  ;;  %v4561_v58 = vpop.f32.mrf.mxu0 }
 0x1fe   : > { %v4010_v27 = vpack.c.bf16 %v3240_v14, %v3239_v50  ;;  %v3238_v48 = vmax.f32 %v3174_v40, 0.0  ;;  %v3195_v4 = vadd.f32 %v4561_v58, %v3034_v21  ;;  %v3037_v2 = vadd.f32 %v4482_v43, %v6394_v34 }
 0x1ff   : > { %v4484_v1 = vpop.f32.mrf.mxu1  ;;  %v3186_v32 = vpop.f32.mrf.mxu0 }
 0x200   : > { %4042 = vst [vmem:[%s6280_s7 + $0x58] sm:$0xff] %v4010_v27   ;;  %v4005_v25 = vpack.c.bf16 %v3238_v48, %v3237_v0  ;;  %v3187_v15 = vadd.f32 %v3186_v32, %v3026_v39  ;;  %v3243_v31 = vmax.f32 %v3195_v4, 0.0  ;;  %v4485_v28 = vadd.f32 %v4484_v1, %v4483_v30 }
 0x201   : > { %v4486_v46 = vpop.f32.mrf.mxu1  ;;  %v4562_v22 = vpop.f32.mrf.mxu0 }
 0x202   : > { %4041 = vst [vmem:[%s6280_s7 + $0x50] sm:$0xff] %v4005_v25   ;;  %v3198_v55 = vadd.f32 %v4562_v22, %v3037_v2  ;;  %v3241_v26 = vmax.f32 %v3187_v15, 0.0  ;;  %v3042_v10 = vadd.f32 %v4485_v28, %v6396_v38 }
 0x203   : > { %v4487_v61 = vpop.f32.mrf.mxu1  ;;  %v3189_v23 = vpop.f32.mrf.mxu0 }
 0x204   : > { %v3244_v12 = vmax.f32 %v3198_v55, 0.0  ;;  %v3190_v36 = vadd.f32 %v3189_v23, %v3029_v6  ;;  %v4488_v35 = vadd.f32 %v4487_v61, %v4486_v46 }
 0x205   : > { %v4489_v8 = vpop.f32.mrf.mxu1  ;;  %v4565_v62 = vpop.f32.mrf.mxu0 }
 0x206   : > { %v4020_v63 = vpack.c.bf16 %v3244_v12, %v3243_v31  ;;  %v3242_v29 = vmax.f32 %v3190_v36, 0.0  ;;  %v3045_v19 = vadd.f32 %v4488_v35, %v6398_v60 }
 0x207   : > { %v4490_v47 = vpop.f32.mrf.mxu1  ;;  %v3202_v24 = vpop.f32.mrf.mxu0 }
 0x208   : > { %4044 = vst [vmem:[%s6280_s7 + $0x68] sm:$0xff] %v4020_v63   ;;  %v4015_v53 = vpack.c.bf16 %v3242_v29, %v3241_v26  ;;  %v4491_v56 = vadd.f32 %v4490_v47, %v4489_v8  ;;  %v3203_v18 = vadd.f32 %v3202_v24, %v3042_v10 }
 0x209   : > { %v4492_v42 = vpop.f32.mrf.mxu1  ;;  %v4566_v44 = vpop.f32.mrf.mxu0 }
 0x20a   : > { %4043 = vst [vmem:[%s6280_s7 + $0x60] sm:$0xff] %v4015_v53   ;;  %v3050_v17 = vadd.f32 %v4491_v56, %v6397_v7  ;;  %v3245_v41 = vmax.f32 %v3203_v18, 0.0 }
 0x20b   : > { %v4493_v3 = vpop.f32.mrf.mxu1  ;;  %v3205_v52 = vpop.f32.mrf.mxu0 }
 0x20c   : > { %v4494_v37 = vadd.f32 %v4493_v3, %v4492_v42  ;;  %v3206_v54 = vadd.f32 %v3205_v52, %v3045_v19  ;;  %v3211_v13 = vadd.f32 %v4565_v62, %v3050_v17 }
 0x20e   : > { %v3053_v59 = vadd.f32 %v4494_v37, %v6256_v9  ;;  %v3246_v16 = vmax.f32 %v3206_v54, 0.0  ;;  %v3247_v51 = vmax.f32 %v3211_v13, 0.0 }
 0x210   : > { %v3214_v57 = vadd.f32 %v4566_v44, %v3053_v59  ;;  %v4025_v33 = vpack.c.bf16 %v3246_v16, %v3245_v41 }
 0x212   : > { %v3248_v20 = vmax.f32 %v3214_v57, 0.0  ;;  %4045 = vst [vmem:[%s6280_s7 + $0x70] sm:$0xff] %v4025_v33  }
 0x214   : > { %v4030_v50 = vpack.c.bf16 %v3248_v20, %v3247_v51 }
 0x216   : > { %4046 = vst [vmem:[%s6280_s7 + $0x78] sm:$0xff] %v4030_v50  }
 0x217 PF: > { %s13_s14 = sadd.s32 1, %s4854_s14   ;;  %s6399_s12 = smov %s4850_s13 }
 0x218   : > { %p10_p5 = scmp.ge.s32.totalorder %s13_s14, 4   ;;  %s6400_s13 = smov %s6402_s15 }
 0x21a   :  { %12 = sbr.rel (!%p10_p5) target bundleno = 2 (0x2), region = 70 }

// kernel: _lambda_.9
= control target key start
LH: loop header
LB: loop body
LE: loop exit
PB: predicated region body
PF: predicated region fallthrough
CT: control target
= control target key end

     0   :  { %s5154_s15 = smov 0   ;;  %s5156_s16 = smov 0   ;;  %s6685_s0 = inlined_call_operand.vmem [shape: bf16[2,18,18,128], index: 0, kind: input, shape index: {}]   ;;  %s6686_s1 = inlined_call_operand.vmem [shape: bf16[1152,128], index: 1, kind: input, shape index: {}]   ;;  %s6687_s2 = inlined_call_operand.vmem [shape: f32[1,128], index: 2, kind: input, shape index: {}]   ;;  %s6688_s3 = inlined_call_operand.vmem [shape: bf16[2,256,128], index: 3, kind: input, shape index: {}]   ;;  %s6689_s4 = inlined_call_operand.vmem [shape: bf16[2,256,128], index: 4, kind: output, shape index: {}]  }
   0x1   :  { %s5158_s17 = smov 0  }
   0x2 LB: > { %s29_s18 = sadd.s32 1, %s5123_s16  ;;  %p3727_p0 = scmp.ge.s32.totalorder %s5127_s17, 1  ;;  %s5127_s17 = sphi %s5158_s17, %s14_s17   ;;  %s5123_s16 = sphi %s5156_s16, %s6717_s16   ;;  %s5119_s15 = sphi %s5154_s15, %s6716_s15  }
   0x3   : > { %p31_p1 = scmp.ge.s32.totalorder %s29_s18, 2  ;;  %p224_p2 = scmp.lt.s32.totalorder %s5127_s17, 3 }
   0x5   : > { %s6719_s18 = smov (%p31_p1, %s29_s18), 0  ;;  %p225_p3 = pnand %p3727_p0, %p224_p2 }
   0x7   : > { %228 = sbr.rel (%p225_p3) target bundleno = 537 (0x219), region = 36 }
   0xc   : > { %v4881_v0 = vld [vmem:[%s6686_s1 + $0x78] sm:$0xff]   ;;  %p276_p4 = scmp.lt.s32.totalorder %s5119_s15, 1  ;;  %v4883_v2 = vld [vmem:[%s6686_s1 + $0x70] sm:$0xff]   ;;  %v4885_v4 = vld [vmem:[%s6686_s1 + $0x68] sm:$0xff]   ;;  %vm653_vm0 = vsmask.f32 7424 }
   0xd   : > { %v4882_v1 = vld [vmem:[%s6686_s1 + $0x38] sm:$0xff]   ;;  %4320 = vmatprep.subr.bf16.mxu0 %v4881_v0  ;;  %4840 = vmatprep.subr.bf16.mxu1 %v4881_v0  ;;  %v4884_v3 = vld [vmem:[%s6686_s1 + $0x30] sm:$0xff]   ;;  %v4886_v5 = vld [vmem:[%s6686_s1 + $0x28] sm:$0xff]   ;;  %vm910_vm1 = vcmask 1046528  }
   0xe   : > { %4321 = vmatpush3.bf16.msra.mxu0 %v4882_v1  ;;  %4848 = vmatpush3.bf16.msra.mxu1 %v4882_v1  ;;  %s6721_s15 = smov (!%p276_p4, %s5119_s15), 1  ;;  %v4887_v6 = vld [vmem:[%s6686_s1 + $0x60] sm:$0xff]   ;;  %v4889_v8 = vld [vmem:[%s6686_s1 + $0x58] sm:$0xff]   ;;  %v4891_v10 = vld [vmem:[%s6686_s1 + $0x50] sm:$0xff]  }
   0xf   : > { %4322 = vmatprep.subr.bf16.mxu0 %v4883_v2  ;;  %4841 = vmatprep.subr.bf16.mxu1 %v4883_v2  ;;  %s4856_s7 = smul.u32 216, %s6721_s15  ;;  %v4888_v7 = vld [vmem:[%s6686_s1 + $0x20] sm:$0xff]   ;;  %v4890_v9 = vld [vmem:[%s6686_s1 + $0x18] sm:$0xff]   ;;  %v4892_v17 = vld [vmem:[%s6686_s1 + $0x10] sm:$0xff]  }
  0x10   : > { %v4893_v21 = vld [vmem:[%s6686_s1 + $0x48] sm:$0xff]   ;;  %v4895_v31 = vld [vmem:[%s6686_s1 + $0x40] sm:$0xff]   ;;  %v4901_v37 = vld [vmem:[%s6686_s1 + $0xf8] sm:$0xff]  }
  0x11   : > { %s5205_s14 = scalar_lea.vmem %s6685_s0, %s4856_s7  ;;  %v4894_v26 = vld [vmem:[%s6686_s1 + $0x8] sm:$0xff]   ;;  %v4896_v34 = vld [vmem:[%s6686_s1] sm:$0xff]   ;;  %v4904_v40 = vld [vmem:[%s6686_s1 + $0x178] sm:$0xff]  }
  0x12   : > { %4323 = vmatpush3.bf16.msra.mxu0 %v4884_v3  ;;  %4849 = vmatpush3.bf16.msra.mxu1 %v4884_v3  ;;  %v315_v11 = vld [vmem:[%s5205_s14] sm:$0xf]  ;;  %v5215_v12 = vld [vmem:[%s5205_s14 + $0x4] sm:$0xf]  ;;  %v339_v15 = vld [vmem:[%s5205_s14 + $0x90] sm:$0xf] }
  0x13   : > { %4324 = vmatprep.subr.bf16.mxu0 %v4885_v4  ;;  %4842 = vmatprep.subr.bf16.mxu1 %v4885_v4  ;;  %v5218_v13 = vcombine.low %v315_v11, %v5215_v12  ;;  %v5221_v14 = vld [vmem:[%s5205_s14 + $0x8] ss:$0 sps:$4 sm:$0x11]   ;;  %v340_v16 = vld [vmem:[%s5205_s14 + $0x94] sm:$0xf]  ;;  %v4902_v46 = vld [vmem:[%s6686_s1 + $0xb8] sm:$0xff]  }
  0x14   : > { %v662_v20 = vshll.u32 %v5221_v14, 16  ;;  %v3873_v22 = vcombine.low %v339_v15, %v340_v16  ;;  %v4900_v23 = vld [vmem:[%s5205_s14 + $0x98] ss:$0 sps:$4 sm:$0x11]   ;;  %v317_v38 = vld [vmem:[%s5205_s14 + $0xc] sm:$0xf] }
  0x15   : > { %v655_v18 = vshrl.u32 %v5218_v13, 16  ;;  %v657_v19 = vshll.u32 %v5218_v13, 16  ;;  %v806_v29 = vshll.u32 %v4900_v23, 16  ;;  %v5250_v39 = vld [vmem:[%s5205_s14 + $0x10] sm:$0xf]  ;;  %v4906_v47 = vld [vmem:[%s6686_s1 + $0x138] sm:$0xff]  }
  0x16   : > { %4325 = vmatpush3.bf16.msra.mxu0 %v4886_v5  ;;  %4850 = vmatpush3.bf16.msra.mxu1 %v4886_v5  ;;  %v664_v25 = vrot.slane %v662_v20, 1  ;;  %v799_v27 = vshrl.u32 %v3873_v22, 16  ;;  %v801_v28 = vshll.u32 %v3873_v22, 16  ;;  %v5256_v41 = vcombine.low %v317_v38, %v5250_v39  ;;  %v5259_v42 = vld [vmem:[%s5205_s14 + $0x14] ss:$0 sps:$4 sm:$0x11]  }
  0x17   : > { %4326 = vmatprep.subr.bf16.mxu0 %v4887_v6  ;;  %4843 = vmatprep.subr.bf16.mxu1 %v4887_v6  ;;  %v659_v24 = vrot.slane %v657_v19, 1  ;;  %v808_v33 = vrot.slane %v806_v29, 1  ;;  %v341_v44 = vld [vmem:[%s5205_s14 + $0x9c] sm:$0xf]  ;;  %v342_v45 = vld [vmem:[%s5205_s14 + $0xa0] sm:$0xf] }
  0x18   : > { %v803_v32 = vrot.slane %v801_v28, 1  ;;  %v667_v48 = vshrl.u32 %v5256_v41, 16  ;;  %v669_v49 = vshll.u32 %v5256_v41, 16  ;;  %v674_v50 = vshll.u32 %v5259_v42, 16  ;;  %v4903_v57 = vld [vmem:[%s6686_s1 + $0xf0] sm:$0xff]   ;;  %v4911_v3 = vld [vmem:[%s6686_s1 + $0xe8] sm:$0xff]  }
  0x19   : > { %v660_v30 = vor.u32 %v659_v24, %v655_v18  ;;  %v3874_v51 = vcombine.low %v341_v44, %v342_v45  ;;  %v4910_v52 = vld [vmem:[%s5205_s14 + $0xa4] ss:$0 sps:$4 sm:$0x11]   ;;  %v4905_v61 = vld [vmem:[%s6686_s1 + $0xb0] sm:$0xff]   ;;  %v319_v63 = vld [vmem:[%s5205_s14 + $0x18] sm:$0xf] }
  0x1a   : > { %4327 = vmatpush3.bf16.msra.mxu0 %v4888_v7  ;;  %4851 = vmatpush3.bf16.msra.mxu1 %v4888_v7  ;;  %v804_v36 = vor.u32 %v803_v32, %v799_v27  ;;  %v671_v53 = vrot.slane %v669_v49, 1  ;;  %v676_v54 = vrot.slane %v674_v50, 1  ;;  %v818_v58 = vshll.u32 %v4910_v52, 16  ;;  %v5283_v0 = vld [vmem:[%s5205_s14 + $0x1c] sm:$0xf]  ;;  %v4913_v16 = vld [vmem:[%s6686_s1 + $0xe0] sm:$0xff]  }
  0x1b   : > { %4328 = vmatprep.subr.bf16.mxu0 %v4889_v8  ;;  %4844 = vmatprep.subr.bf16.mxu1 %v4889_v8  ;;  %v665_v35 = vsel %vm653_vm0, %v660_v30, %v664_v25  ;;  %v811_v55 = vshrl.u32 %v3874_v51, 16  ;;  %v813_v56 = vshll.u32 %v3874_v51, 16  ;;  %v3863_v4 = vcombine.low %v319_v63, %v5283_v0  ;;  %v5291_v5 = vld [vmem:[%s5205_s14 + $0x20] ss:$0 sps:$4 sm:$0x11]   ;;  %v4922_v27 = vld [vmem:[%s6686_s1 + $0x130] sm:$0xff]  }
  0x1c   : > { %2518 = vmatprep.mubr.bf16.mxu0 %v665_v35  ;;  %v809_v43 = vsel %vm653_vm0, %v804_v36, %v808_v33  ;;  %v672_v59 = vor.u32 %v671_v53, %v667_v48  ;;  %v820_v62 = vrot.slane %v818_v58, 1  ;;  %v343_v6 = vld [vmem:[%s5205_s14 + $0xa8] sm:$0xf]  ;;  %v344_v7 = vld [vmem:[%s5205_s14 + $0xac] sm:$0xf]  ;;  %v4914_v28 = vld [vmem:[%s6686_s1 + $0xa0] sm:$0xff]  }
  0x1d   : > { %2614 = vmatprep.mubr.bf16.mxu1 %v809_v43  ;;  %v815_v60 = vrot.slane %v813_v56, 1  ;;  %v681_v11 = vshll.u32 %v3863_v4, 16  ;;  %v4918_v15 = vld [vmem:[%s5205_s14 + $0xb0] ss:$0 sps:$4 sm:$0x11]   ;;  %v4929_v56 = vld [vmem:[%s6686_s1 + $0xc8] sm:$0xff]  }
  0x1e   : > { %4329 = vmatpush3.bf16.msra.mxu0 %v4890_v9  ;;  %4852 = vmatpush3.bf16.msra.mxu1 %v4890_v9  ;;  %v677_v1 = vsel %vm653_vm0, %v672_v59, %v676_v54  ;;  %v4912_v9 = vld [vmem:[%s6686_s1 + $0xa8] sm:$0xff]   ;;  %v830_v20 = vshll.u32 %v4918_v15, 16  ;;  %v321_v32 = vld [vmem:[%s5205_s14 + $0x24] sm:$0xf]  ;;  %v4923_v38 = vld [vmem:[%s6686_s1 + $0xd0] sm:$0xff]  }
  0x1f   : > { %4330 = vmatprep.subr.bf16.mxu0 %v4891_v10  ;;  %4845 = vmatprep.subr.bf16.mxu1 %v4891_v10  ;;  %v816_v2 = vor.u32 %v815_v60, %v811_v55  ;;  %v679_v10 = vshrl.u32 %v3863_v4, 16  ;;  %v683_v18 = vrot.slane %v681_v11, 1  ;;  %v5320_v33 = vld [vmem:[%s5205_s14 + $0x28] sm:$0xf]  ;;  %v4924_v52 = vld [vmem:[%s6686_s1 + $0x90] sm:$0xff]  }
  0x20   : > { %v832_v25 = vrot.slane %v830_v20, 1  ;;  %v3864_v35 = vcombine.low %v321_v32, %v5320_v33  ;;  %v5327_v36 = vld [vmem:[%s5205_s14 + $0x2c] ss:$0 sps:$4 sm:$0x11]   ;;  %v5352_v63 = vld [vmem:[%s5205_s14 + $0x34] sm:$0xf] }
  0x21   : > { %v821_v8 = vsel %vm653_vm0, %v816_v2, %v820_v62  ;;  %v684_v24 = vor.u32 %v683_v18, %v679_v10  ;;  %v698_v45 = vshll.u32 %v5327_v36, 16  ;;  %v4932_v58 = vld [vmem:[%s6686_s1 + $0x168] sm:$0xff]   ;;  %v323_v62 = vld [vmem:[%s5205_s14 + $0x30] sm:$0xf]  ;;  %v4940_v20 = vld [vmem:[%s6686_s1 + $0x1f8] sm:$0xff]  }
  0x22   : > { %4331 = vmatpush3.bf16.msra.mxu0 %v4892_v17  ;;  %4853 = vmatpush3.bf16.msra.mxu1 %v4892_v17  ;;  %v3875_v17 = vcombine.low %v343_v6, %v344_v7  ;;  %v691_v43 = vshrl.u32 %v3864_v35, 16  ;;  %v693_v44 = vshll.u32 %v3864_v35, 16  ;;  %v4930_v2 = vld [vmem:[%s6686_s1 + $0x88] sm:$0xff]   ;;  %v912_v6 = vrot.slane %v5221_v14, 1  ;;  %v4931_v7 = vld [vmem:[%s6686_s1 + $0xc0] sm:$0xff]  }
  0x23   : > { %4332 = vmatprep.subr.bf16.mxu0 %v4893_v21  ;;  %4846 = vmatprep.subr.bf16.mxu1 %v4893_v21  ;;  %v4920_v21 = vld [vmem:[%s6686_s1 + $0x170] sm:$0xff]   ;;  %v700_v49 = vrot.slane %v698_v45, 1  ;;  %v363_v14 = vld [vmem:[%s5205_s14] sm:$0xe]  ;;  %v327_v45 = vld [vmem:[%s5205_s14 + $0x48] sm:$0xf] }
  0x24   : > { %v825_v23 = vshll.u32 %v3875_v17, 16  ;;  %v695_v48 = vrot.slane %v693_v44, 1 }
  0x26   : > { %4333 = vmatpush3.bf16.msra.mxu0 %v4894_v26  ;;  %4854 = vmatpush3.bf16.msra.mxu1 %v4894_v26  ;;  %v827_v26 = vrot.slane %v825_v23, 1  ;;  %v696_v54 = vor.u32 %v695_v48, %v691_v43  ;;  %v4947_v23 = vld [vmem:[%s6686_s1 + $0x160] sm:$0xff]   ;;  %v5415_v48 = vld [vmem:[%s5205_s14 + $0x4c] sm:$0xf] }
  0x27   : > { %4334 = vmatprep.subr.bf16.mxu0 %v4895_v31  ;;  %4847 = vmatprep.subr.bf16.mxu1 %v4895_v31  ;;  %v4919_v31 = vld [vmem:[%s6686_s1 + $0xd8] sm:$0xff]  }
  0x28   : > { %v701_v59 = vsel %vm653_vm0, %v696_v54, %v700_v49  ;;  %v365_v54 = vld [vmem:[%s5205_s14 + $0x18] sm:$0xe] }
  0x2a   : > { %4335 = vmatpush3.bf16.msra.mxu0 %v4896_v34  ;;  %4855 = vmatpush3.bf16.msra.mxu1 %v4896_v34  ;;  %v4921_v34 = vld [vmem:[%s6686_s1 + $0x98] sm:$0xff]  }
  0x2b   : > { %4432 = vmatprep.subr.bf16.mxu1 %v4901_v37  ;;  %4544 = vmatprep.subr.bf16.mxu0 %v4904_v40  ;;  %v345_v40 = vld [vmem:[%s5205_s14 + $0xb4] sm:$0xf] }
  0x2d   : > { %2519 = vmatmul.mubr.bf16.vlgmr.msra.gmra.mxu0 %v5218_v13  ;;  %2615 = vmatmul.mubr.bf16.vlgmr.msra.gmra.mxu1 %v3873_v22  ;;  %v686_v13 = vshll.u32 %v5291_v5, 16  ;;  %v823_v22 = vshrl.u32 %v3875_v17, 16 }
  0x2e   : > { %4433 = vmatpush3.bf16.msra.mxu1 %v4902_v46  ;;  %4545 = vmatpush3.bf16.msra.mxu0 %v4906_v47  ;;  %v4928_v47 = vld [vmem:[%s5205_s14 + $0xbc] ss:$0 sps:$4 sm:$0x11]  }
  0x2f   : > { %4434 = vmatprep.subr.bf16.mxu1 %v4903_v57  ;;  %2526 = vmatprep.mubr.bf16.mxu0 %v677_v1  ;;  %v688_v19 = vrot.slane %v686_v13, 1  ;;  %v828_v30 = vor.u32 %v827_v26, %v823_v22  ;;  %v842_v53 = vshll.u32 %v4928_v47, 16  ;;  %v325_v22 = vld [vmem:[%s5205_s14 + $0x3c] sm:$0xf]  ;;  %v915_v47 = vrot.slane %v5259_v42, 1 }
  0x30   : > { %2622 = vmatprep.mubr.bf16.mxu1 %v821_v8  ;;  %4546 = vmatprep.subr.bf16.mxu0 %v4920_v21  ;;  %v3733_v8 = vld [vmem:[%s5205_s14 + $0xc] sm:$0xf]  ;;  %v5392_v26 = vld [vmem:[%s5205_s14 + $0x44] ss:$0 sps:$4 sm:$0x11]  }
  0x31   : > { %v689_v29 = vsel %vm653_vm0, %v684_v24, %v688_v19  ;;  %v833_v37 = vsel %vm653_vm0, %v828_v30, %v832_v25  ;;  %v844_v57 = vrot.slane %v842_v53, 1  ;;  %v5400_v30 = vld [vmem:[%s5205_s14 + $0x1c] sm:$0xf]  ;;  %v5427_v53 = vld [vmem:[%s5205_s14 + $0x28] sm:$0xf] }
  0x32   : > { %4435 = vmatpush3.bf16.msra.mxu1 %v4905_v61  ;;  %4547 = vmatpush3.bf16.msra.mxu0 %v4922_v27  ;;  %v4934_v61 = vld [vmem:[%s6686_s1 + $0x128] sm:$0xff]  }
  0x33   : > { %4436 = vmatprep.subr.bf16.mxu1 %v4911_v3  ;;  %4548 = vmatprep.subr.bf16.mxu0 %v4932_v58  ;;  %v3865_v3 = vcombine.low %v323_v62, %v5352_v63  ;;  %v4955_v58 = vld [vmem:[%s6686_s1 + $0x1b0] sm:$0xff]  }
  0x35   : > { %2527 = vmatmul.mubr.bf16.gmra.mxu0 %v5256_v41  ;;  %2623 = vmatmul.mubr.bf16.gmra.mxu1 %v3874_v51  ;;  %v346_v41 = vld [vmem:[%s5205_s14 + $0xb8] sm:$0xf]  ;;  %v703_v10 = vshrl.u32 %v3865_v3, 16  ;;  %v705_v11 = vshll.u32 %v3865_v3, 16 }
  0x36   : > { %4437 = vmatpush3.bf16.msra.mxu1 %v4912_v9  ;;  %2534 = vmatprep.mubr.bf16.mxu0 %v689_v29  ;;  %v3876_v46 = vcombine.low %v345_v40, %v346_v41  ;;  %v5368_v9 = vld [vmem:[%s5205_s14 + $0x10] sm:$0xf]  ;;  %v3735_v29 = vld [vmem:[%s5205_s14 + $0x18] sm:$0xf] }
  0x37   : > { %4438 = vmatprep.subr.bf16.mxu1 %v4913_v16  ;;  %2630 = vmatprep.mubr.bf16.mxu1 %v833_v37  ;;  %v5372_v15 = vcombine.low %v3733_v8, %v5368_v9  ;;  %v3893_v16 = vcombine.low %v363_v14, %v5215_v12  ;;  %v707_v18 = vrot.slane %v705_v11, 1  ;;  %v5385_v12 = vld [vmem:[%s5205_s14 + $0x40] sm:$0xf]  ;;  %v364_v37 = vld [vmem:[%s5205_s14 + $0xc] sm:$0xe]  ;;  %v5409_v40 = vcombine.low %v3735_v29, %v5400_v30 }
  0x38   : > { %v835_v50 = vshrl.u32 %v3876_v46, 16  ;;  %v837_v51 = vshll.u32 %v3876_v46, 16  ;;  %4549 = vmatpush3.bf16.msra.mxu0 %v4934_v61  ;;  %v3866_v25 = vcombine.low %v325_v22, %v5385_v12  ;;  %v3894_v41 = vcombine.low %v364_v37, %v5250_v39  ;;  %v5448_v8 = vld [vmem:[%s5205_s14 + $0x58] sm:$0xf]  ;;  %v4968_v22 = vld [vmem:[%s6686_s1 + $0x150] sm:$0xff]  }
  0x39   : > { %v911_v21 = vrot.slane %v3893_v16, 1  ;;  %v708_v24 = vor.u32 %v707_v18, %v703_v10  ;;  %4550 = vmatprep.subr.bf16.mxu0 %v4947_v23  ;;  %v3867_v39 = vcombine.low %v327_v45, %v5415_v48  ;;  %v5452_v10 = vld [vmem:[%s5205_s14 + $0x5c] ss:$0 sps:$4 sm:$0x11]   ;;  %v918_v14 = vrot.slane %v5291_v5, 1 }
  0x3a   : > { %4439 = vmatpush3.bf16.msra.mxu1 %v4914_v28  ;;  %v839_v55 = vrot.slane %v837_v51, 1  ;;  %v4941_v28 = vld [vmem:[%s6686_s1 + $0x1b8] sm:$0xff]   ;;  %v715_v32 = vshrl.u32 %v3866_v25, 16  ;;  %v4954_v51 = vld [vmem:[%s6686_s1 + $0x1f0] sm:$0xff]   ;;  %v331_v23 = vld [vmem:[%s5205_s14 + $0x60] sm:$0xf] }
  0x3b   : > { %4440 = vmatprep.subr.bf16.mxu1 %v4919_v31  ;;  %v913_v27 = vsel %vm910_vm1, %v911_v21, %v912_v6  ;;  %v3739_v16 = vld [vmem:[%s5205_s14 + $0x30] sm:$0xf]  ;;  %v366_v21 = vld [vmem:[%s5205_s14 + $0x24] sm:$0xe] }
  0x3c   : > { %v840_v60 = vor.u32 %v839_v55, %v835_v50  ;;  %v5420_v50 = vld [vmem:[%s5205_s14 + $0x50] ss:$0 sps:$4 sm:$0x11]   ;;  %v727_v55 = vshrl.u32 %v3867_v39, 16 }
  0x3d   : > { %2535 = vmatmul.mubr.bf16.gmra.mxu0 %v3863_v4  ;;  %2631 = vmatmul.mubr.bf16.gmra.mxu1 %v3875_v17  ;;  %v5360_v4 = vld [vmem:[%s5205_s14 + $0x38] ss:$0 sps:$4 sm:$0x11]   ;;  %v4933_v17 = vld [vmem:[%s6686_s1 + $0x80] sm:$0xff]  }
  0x3e   : > { %4441 = vmatpush3.bf16.msra.mxu1 %v4921_v34  ;;  %2542 = vmatprep.mubr.bf16.mxu0 %v701_v59  ;;  %v845_v1 = vsel %vm653_vm0, %v840_v60, %v844_v57  ;;  %v710_v13 = vshll.u32 %v5360_v4, 16  ;;  %v717_v34 = vshll.u32 %v3866_v25, 16  ;;  %v734_v57 = vshll.u32 %v5420_v50, 16 }
  0x3f   : > { %4442 = vmatprep.subr.bf16.mxu1 %v4923_v38  ;;  %2638 = vmatprep.mubr.bf16.mxu1 %v845_v1  ;;  %v4948_v38 = vld [vmem:[%s6686_s1 + $0x120] sm:$0xff]   ;;  %v3895_v1 = vcombine.low %v365_v54, %v5283_v0 }
  0x40   : > { %v712_v19 = vrot.slane %v710_v13, 1  ;;  %v719_v43 = vrot.slane %v717_v34, 1  ;;  %4551 = vmatpush3.bf16.msra.mxu0 %v4948_v38  ;;  %v736_v61 = vrot.slane %v734_v57, 1  ;;  %v4969_v34 = vld [vmem:[%s6686_s1 + $0x1e8] sm:$0xff]  }
  0x41   : > { %v917_v13 = vrot.slane %v3895_v1, 1  ;;  %v4977_v57 = vld [vmem:[%s6686_s1 + $0x148] sm:$0xff]  }
  0x42   : > { %4443 = vmatpush3.bf16.msra.mxu1 %v4924_v52  ;;  %v713_v31 = vsel %vm653_vm0, %v708_v24, %v712_v19  ;;  %v720_v49 = vor.u32 %v719_v43, %v715_v32  ;;  %v3737_v52 = vld [vmem:[%s5205_s14 + $0x24] sm:$0xf]  ;;  %v3896_v32 = vcombine.low %v366_v21, %v5320_v33  ;;  %v4970_v43 = vld [vmem:[%s6686_s1 + $0x110] sm:$0xff]  }
  0x43   : > { %4444 = vmatprep.subr.bf16.mxu1 %v4929_v56  ;;  %v729_v56 = vshll.u32 %v3867_v39, 16  ;;  %v5437_v62 = vcombine.low %v3737_v52, %v5427_v53  ;;  %v5468_v24 = vld [vmem:[%s5205_s14 + $0x64] sm:$0xf]  ;;  %v919_v29 = vsel %vm910_vm1, %v917_v13, %v918_v14  ;;  %v5529_v13 = vld [vmem:[%s5205_s14 + $0x4c] sm:$0xf] }
  0x44   : > { %v368_v14 = vld [vmem:[%s5205_s14 + $0x3c] sm:$0xe] }
  0x45   : > { %2543 = vmatmul.mubr.bf16.gmra.mxu0 %v3864_v35  ;;  %2639 = vmatmul.mubr.bf16.gmra.mxu1 %v3876_v46  ;;  %v722_v35 = vshll.u32 %v5392_v26, 16  ;;  %v914_v46 = vrot.slane %v3894_v41, 1  ;;  %v731_v60 = vrot.slane %v729_v56, 1  ;;  %v5509_v56 = vld [vmem:[%s5205_s14 + $0x74] ss:$0 sps:$4 sm:$0x11]  }
  0x46   : > { %4445 = vmatpush3.bf16.msra.mxu1 %v4930_v2  ;;  %2679 = vmatprep.mubr.bf16.mxu1 %v5372_v15  ;;  %v4956_v2 = vld [vmem:[%s6686_s1 + $0x158] sm:$0xff]  }
  0x47   : > { %4446 = vmatprep.subr.bf16.mxu1 %v4931_v7  ;;  %2550 = vmatprep.mubr.bf16.mxu0 %v713_v31  ;;  %v724_v44 = vrot.slane %v722_v35, 1  ;;  %v916_v59 = vsel %vm910_vm1, %v914_v46, %v915_v47  ;;  %v732_v6 = vor.u32 %v731_v60, %v727_v55  ;;  %v329_v7 = vld [vmem:[%s5205_s14 + $0x54] sm:$0xf]  ;;  %v3741_v46 = vld [vmem:[%s5205_s14 + $0x3c] sm:$0xf] }
  0x48   : > { %v3868_v0 = vcombine.low %v329_v7, %v5448_v8  ;;  %4552 = vmatprep.subr.bf16.mxu0 %v4956_v2  ;;  %v5494_v47 = vld [vmem:[%s5205_s14 + $0x40] sm:$0xf]  ;;  %v924_v7 = vrot.slane %v5360_v4, 1 }
  0x49   : > { %v725_v42 = vsel %vm653_vm0, %v720_v49, %v724_v44  ;;  %v737_v11 = vsel %vm653_vm0, %v732_v6, %v736_v61  ;;  %v921_v44 = vrot.slane %v5327_v36, 1  ;;  %v367_v49 = vld [vmem:[%s5205_s14 + $0x30] sm:$0xe]  ;;  %v4978_v6 = vld [vmem:[%s6686_s1 + $0x108] sm:$0xff]  }
  0x4a   : > { %4447 = vmatpush3.bf16.msra.mxu1 %v4933_v17  ;;  %v5459_v17 = vld [vmem:[%s5205_s14 + $0x34] sm:$0xf]  ;;  %v739_v18 = vshrl.u32 %v3868_v0, 16  ;;  %v741_v19 = vshll.u32 %v3868_v0, 16  ;;  %v5503_v36 = vld [vmem:[%s5205_s14 + $0x70] sm:$0xf]  ;;  %v3897_v60 = vcombine.low %v367_v49, %v5352_v63 }
  0x4b   : > { %4656 = vmatprep.subr.bf16.mxu1 %v4940_v20  ;;  %v746_v20 = vshll.u32 %v5452_v10, 16  ;;  %v5478_v31 = vcombine.low %v3739_v16, %v5459_v17  ;;  %v335_v16 = vld [vmem:[%s5205_s14 + $0x78] sm:$0xf] }
  0x4c   : > { %v743_v5 = vrot.slane %v741_v19, 1  ;;  %v5535_v19 = vld [vmem:[%s5205_s14 + $0x7c] sm:$0xf]  ;;  %v5572_v49 = vld [vmem:[%s5205_s14 + $0x58] sm:$0xf] }
  0x4d   : > { %2551 = vmatmul.mubr.bf16.gmra.mxu0 %v3865_v3  ;;  %2680 = vmatmul.mubr.bf16.vlgmr.msra.gmra.mxu1 %v913_v27  ;;  %v4957_v3 = vld [vmem:[%s6686_s1 + $0x118] sm:$0xff]   ;;  %v5471_v27 = vcombine.low %v331_v23, %v5468_v24  ;;  %v5541_v4 = vcombine.low %v335_v16, %v5535_v19  ;;  %v4985_v23 = vld [vmem:[%s6686_s1 + $0x1a0] sm:$0xff]  }
  0x4e   : > { %4657 = vmatpush3.bf16.msra.mxu1 %v4941_v28  ;;  %2687 = vmatprep.mubr.bf16.mxu1 %v5409_v40  ;;  %v5474_v28 = vld [vmem:[%s5205_s14 + $0x68] ss:$0 sps:$4 sm:$0x11]   ;;  %v744_v35 = vor.u32 %v743_v5, %v739_v18  ;;  %v923_v18 = vrot.slane %v3897_v60, 1  ;;  %v3898_v5 = vcombine.low %v368_v14, %v5385_v12  ;;  %v5607_v16 = vld [vmem:[%s5205_s14 + $0x64] sm:$0xf] }
  0x4f   : > { %4658 = vmatprep.subr.bf16.mxu1 %v4954_v51  ;;  %2558 = vmatprep.mubr.bf16.mxu0 %v725_v42  ;;  %v751_v37 = vshrl.u32 %v5471_v27, 16  ;;  %v753_v38 = vshll.u32 %v5471_v27, 16  ;;  %v758_v41 = vshll.u32 %v5474_v28, 16  ;;  %v920_v51 = vrot.slane %v3896_v32, 1  ;;  %v333_v42 = vld [vmem:[%s5205_s14 + $0x6c] sm:$0xf] }
  0x50   : > { %4553 = vmatpush3.bf16.msra.mxu0 %v4957_v3  ;;  %v5506_v55 = vcombine.low %v333_v42, %v5503_v36  ;;  %v770_v3 = vshll.u32 %v5509_v56, 16  ;;  %v4991_v32 = vld [vmem:[%s6686_s1 + $0x140] sm:$0xff]   ;;  %v775_v12 = vshrl.u32 %v5541_v4, 16 }
  0x51   : > { %4554 = vmatprep.subr.bf16.mxu0 %v4968_v22  ;;  %v755_v45 = vrot.slane %v753_v38, 1  ;;  %v760_v54 = vrot.slane %v758_v41, 1  ;;  %v5544_v22 = vld [vmem:[%s5205_s14 + $0x80] ss:$0 sps:$4 sm:$0x11]  }
  0x52   : > { %4659 = vmatpush3.bf16.msra.mxu1 %v4955_v58  ;;  %v922_v58 = vsel %vm910_vm1, %v920_v51, %v921_v44  ;;  %v763_v1 = vshrl.u32 %v5506_v55, 16  ;;  %v765_v2 = vshll.u32 %v5506_v55, 16  ;;  %v772_v21 = vrot.slane %v770_v3, 1  ;;  %v337_v41 = vld [vmem:[%s5205_s14 + $0x84] sm:$0xf]  ;;  %v4997_v3 = vld [vmem:[%s6686_s1 + $0x1d8] sm:$0xff]  }
  0x53   : > { %4660 = vmatprep.subr.bf16.mxu1 %v4969_v34  ;;  %v756_v52 = vor.u32 %v755_v45, %v751_v37  ;;  %v925_v34 = vsel %vm910_vm1, %v923_v18, %v924_v7  ;;  %v926_v44 = vrot.slane %v3898_v5, 1  ;;  %v927_v45 = vrot.slane %v5392_v26, 1  ;;  %v3747_v7 = vld [vmem:[%s5205_s14 + $0x60] sm:$0xf]  ;;  %v370_v18 = vld [vmem:[%s5205_s14 + $0x54] sm:$0xe] }
  0x54   : > { %4555 = vmatpush3.bf16.msra.mxu0 %v4970_v43  ;;  %v767_v63 = vrot.slane %v765_v2, 1  ;;  %v5563_v43 = vld [vmem:[%s5205_s14 + $0x88] sm:$0xf] }
  0x55   : > { %2559 = vmatmul.mubr.bf16.gmra.mxu0 %v3866_v25  ;;  %2688 = vmatmul.mubr.bf16.gmra.mxu1 %v916_v59  ;;  %v748_v25 = vrot.slane %v746_v20, 1  ;;  %v5516_v59 = vcombine.low %v3741_v46, %v5494_v47  ;;  %v761_v61 = vsel %vm653_vm0, %v756_v52, %v760_v54  ;;  %v3745_v46 = vld [vmem:[%s5205_s14 + $0x54] sm:$0xf]  ;;  %v5577_v52 = vld [vmem:[%s5205_s14 + $0x8c] ss:$0 sps:$4 sm:$0x11]   ;;  %v928_v26 = vsel %vm910_vm1, %v926_v44, %v927_v45 }
  0x56   : > { %2695 = vmatprep.mubr.bf16.mxu1 %v5437_v62  ;;  %2566 = vmatprep.mubr.bf16.mxu0 %v737_v11  ;;  %v3743_v11 = vld [vmem:[%s5205_s14 + $0x48] sm:$0xf]  ;;  %v768_v20 = vor.u32 %v767_v63, %v763_v1  ;;  %v794_v2 = vshll.u32 %v5577_v52, 16  ;;  %v3782_v45 = vld [vmem:[%s5205_s14 + $0x18] sm:$0xe] }
  0x57   : > { %v749_v33 = vsel %vm653_vm0, %v744_v35, %v748_v25  ;;  %4556 = vmatprep.subr.bf16.mxu0 %v4977_v57  ;;  %v777_v25 = vshll.u32 %v5541_v4, 16  ;;  %v5557_v35 = vcombine.low %v3743_v11, %v5529_v13  ;;  %v5585_v57 = vcombine.low %v3745_v46, %v5572_v49  ;;  %v5604_v11 = vld [vmem:[%s6686_s1 + $0x238] sm:$0xff]  }
  0x58   : > { %4557 = vmatpush3.bf16.msra.mxu0 %v4978_v6  ;;  %v773_v37 = vsel %vm653_vm0, %v768_v20, %v772_v21  ;;  %v930_v6 = vrot.slane %v5420_v50, 1  ;;  %v796_v50 = vrot.slane %v794_v2, 1  ;;  %v5614_v20 = vcombine.low %v3747_v7, %v5607_v16  ;;  %v3783_v2 = vld [vmem:[%s5205_s14 + $0x24] sm:$0xe] }
  0x59   : > { %v779_v38 = vrot.slane %v777_v25, 1  ;;  %4558 = vmatprep.subr.bf16.mxu0 %v4991_v32  ;;  %v3900_v21 = vcombine.low %v370_v18, %v5448_v8  ;;  %v4995_v25 = vld [vmem:[%s5205_s14 + $0x14] ss:$0 sps:$4 sm:$0x11]   ;;  %v1122_v32 = vshll.u32 %v5372_v15, 16  ;;  %v1132_v18 = vshrl.u32 %v5409_v40, 16 }
  0x5a   : > { %v371_v8 = vld [vmem:[%s5205_s14 + $0x60] sm:$0xe]  ;;  %v1376_v44 = vrot.slane %v4995_v25, 1  ;;  %v1127_v46 = vshll.u32 %v4995_v25, 16 }
  0x5b   : > { %v780_v54 = vor.u32 %v779_v38, %v775_v12  ;;  %v5628_v12 = vld [vmem:[%s5205_s14 + $0x70] sm:$0xf] }
  0x5c   : > { %v5009_v38 = vld [vmem:[%s6686_s1 + $0x190] sm:$0xff]  }
  0x5d   : > { %2567 = vmatmul.mubr.bf16.gmra.mxu0 %v3867_v39  ;;  %2696 = vmatmul.mubr.bf16.gmra.mxu1 %v919_v29  ;;  %v4971_v39 = vld [vmem:[%s6686_s1 + $0x1a8] sm:$0xff]   ;;  %v782_v29 = vshll.u32 %v5544_v22, 16 }
  0x5e   : > { %2574 = vmatprep.mubr.bf16.mxu0 %v749_v33  ;;  %2703 = vmatprep.mubr.bf16.mxu1 %v5478_v31  ;;  %v5566_v33 = vcombine.low %v337_v41, %v5563_v43 }
  0x5f   : > { %4661 = vmatpush3.bf16.msra.mxu1 %v4971_v39  ;;  %v784_v51 = vrot.slane %v782_v29, 1  ;;  %v369_v39 = vld [vmem:[%s5205_s14 + $0x48] sm:$0xe]  ;;  %v5008_v29 = vld [vmem:[%s6686_s1 + $0x1d0] sm:$0xff]  }
  0x60   : > { %v789_v42 = vshll.u32 %v5566_v33, 16 }
  0x61   : > { %v785_v60 = vsel %vm653_vm0, %v780_v54, %v784_v51  ;;  %v3901_v51 = vcombine.low %v371_v8, %v5468_v24  ;;  %v936_v24 = vrot.slane %v5474_v28, 1  ;;  %v5020_v28 = vld [vmem:[%s6686_s1 + $0x188] sm:$0xff]   ;;  %v5030_v8 = vld [vmem:[%s6686_s1 + $0x1c0] sm:$0xff]  }
  0x62   : > { %v791_v1 = vrot.slane %v789_v42, 1 }
  0x65   : > { %2575 = vmatmul.mubr.bf16.gmra.mxu0 %v3868_v0  ;;  %2704 = vmatmul.mubr.bf16.gmra.mxu1 %v922_v58  ;;  %v4984_v0 = vld [vmem:[%s6686_s1 + $0x1e0] sm:$0xff]   ;;  %v3899_v58 = vcombine.low %v369_v39, %v5415_v48  ;;  %v4998_v48 = vld [vmem:[%s6686_s1 + $0x198] sm:$0xff]  }
  0x66   : > { %2582 = vmatprep.mubr.bf16.mxu0 %v761_v61  ;;  %2711 = vmatprep.mubr.bf16.mxu1 %v5516_v59  ;;  %v787_v61 = vshrl.u32 %v5566_v33, 16 }
  0x67   : > { %4662 = vmatprep.subr.bf16.mxu1 %v4984_v0  ;;  %v929_v63 = vrot.slane %v3899_v58, 1  ;;  %v935_v58 = vrot.slane %v3901_v51, 1 }
  0x68   : > { %4663 = vmatpush3.bf16.msra.mxu1 %v4985_v23  ;;  %v792_v14 = vor.u32 %v791_v1, %v787_v61  ;;  %v1129_v61 = vrot.slane %v1127_v46, 1  ;;  %v5019_v1 = vld [vmem:[%s6686_s1 + $0x1c8] sm:$0xff]   ;;  %v5013_v46 = vld [vmem:[%s5205_s14 + $0x38] ss:$0 sps:$4 sm:$0x11]  }
  0x69   : > { %4664 = vmatprep.subr.bf16.mxu1 %v4997_v3  ;;  %v931_v0 = vsel %vm910_vm1, %v929_v63, %v930_v6  ;;  %v3751_v3 = vld [vmem:[%s5205_s14 + $0x78] sm:$0xf]  ;;  %v372_v6 = vld [vmem:[%s5205_s14 + $0x6c] sm:$0xe]  ;;  %v937_v7 = vsel %vm910_vm1, %v935_v58, %v936_v24  ;;  %v942_v58 = vrot.slane %v5544_v22, 1  ;;  %v1158_v24 = vshll.u32 %v5478_v31, 16 }
  0x6a   : > { %v797_v5 = vsel %vm653_vm0, %v792_v14, %v796_v50  ;;  %v3902_v50 = vcombine.low %v372_v6, %v5503_v36  ;;  %v3753_v36 = vld [vmem:[%s5205_s14 + $0x84] sm:$0xf]  ;;  %v1385_v6 = vrot.slane %v5013_v46, 1 }
  0x6c   : > { %4665 = vmatpush3.bf16.msra.mxu1 %v4998_v48 }
  0x6d   : > { %2583 = vmatmul.mubr.bf16.gmra.mxu0 %v5471_v27  ;;  %2712 = vmatmul.mubr.bf16.gmra.mxu1 %v925_v34  ;;  %v4992_v27 = vld [vmem:[%s6686_s1 + $0x100] sm:$0xff]   ;;  %v933_v34 = vrot.slane %v5452_v10, 1  ;;  %v1120_v10 = vshrl.u32 %v5372_v15, 16  ;;  %v3942_v15 = vcombine.low %v3782_v45, %v5400_v30  ;;  %v5655_v30 = vld [vmem:[%s5205_s14 + $0x7c] sm:$0xf]  ;;  %v1144_v45 = vshrl.u32 %v5437_v62, 16 }
  0x6e   : > { %2590 = vmatprep.mubr.bf16.mxu0 %v773_v37  ;;  %2719 = vmatprep.mubr.bf16.mxu1 %v5557_v35  ;;  %v3749_v37 = vld [vmem:[%s5205_s14 + $0x6c] sm:$0xf]  ;;  %v5664_v14 = vcombine.low %v3751_v3, %v5655_v30 }
  0x6f   : > { %4559 = vmatpush3.bf16.msra.mxu0 %v4992_v27  ;;  %4666 = vmatprep.subr.bf16.mxu1 %v5008_v29  ;;  %v5640_v54 = vcombine.low %v3749_v37, %v5628_v12  ;;  %v1134_v27 = vshll.u32 %v5409_v40, 16  ;;  %v1146_v29 = vshll.u32 %v5437_v62, 16  ;;  %v5677_v40 = vld [vmem:[%s5205_s14 + $0x88] sm:$0xf]  ;;  %v5032_v62 = vld [vmem:[%s6686_s1 + $0x220] sm:$0xff]  }
  0x70   : > { %4792 = vmatprep.subr.bf16.mxu0 %v5604_v11  ;;  %4667 = vmatpush3.bf16.msra.mxu1 %v5009_v38 }
  0x71   : > { %4668 = vmatprep.subr.bf16.mxu1 %v5019_v1  ;;  %v374_v1 = vld [vmem:[%s5205_s14 + $0x84] sm:$0xe] }
  0x72   : > { %v3904_v22 = vcombine.low %v374_v1, %v5563_v43 }
  0x74   : > { %4669 = vmatpush3.bf16.msra.mxu1 %v5020_v28  ;;  %v1156_v28 = vshrl.u32 %v5478_v31, 16  ;;  %v944_v31 = vrot.slane %v3904_v22, 1 }
  0x75   : > { %2591 = vmatmul.mubr.bf16.gmra.mxu0 %v5506_v55  ;;  %2720 = vmatmul.mubr.bf16.gmra.mxu1 %v928_v26  ;;  %v3781_v55 = vld [vmem:[%s5205_s14 + $0xc] sm:$0xe]  ;;  %v5002_v26 = vld [vmem:[%s5205_s14 + $0x20] ss:$0 sps:$4 sm:$0x11]  }
  0x76   : > { %2598 = vmatprep.mubr.bf16.mxu0 %v785_v60  ;;  %2727 = vmatprep.mubr.bf16.mxu1 %v5585_v57  ;;  %v3941_v23 = vcombine.low %v3781_v55, %v5368_v9  ;;  %v932_v9 = vrot.slane %v3900_v21, 1  ;;  %v1379_v48 = vrot.slane %v5002_v26, 1  ;;  %v1136_v55 = vrot.slane %v1134_v27, 1 }
  0x77   : > { %v3943_v21 = vcombine.low %v3783_v2, %v5427_v53  ;;  %v938_v53 = vrot.slane %v3902_v50, 1  ;;  %4670 = vmatprep.subr.bf16.mxu1 %v5030_v8  ;;  %v5712_v2 = vld [vmem:[%s5205_s14 + $0x94] sm:$0xf]  ;;  %v1160_v50 = vrot.slane %v1158_v24, 1 }
  0x78   : > { %v1375_v41 = vrot.slane %v3941_v23, 1  ;;  %v934_v39 = vsel %vm910_vm1, %v932_v9, %v933_v34  ;;  %v5006_v23 = vld [vmem:[%s5205_s14 + $0x2c] ss:$0 sps:$4 sm:$0x11]   ;;  %v1137_v34 = vor.u32 %v1136_v55, %v1132_v18  ;;  %v373_v9 = vld [vmem:[%s5205_s14 + $0x78] sm:$0xe] }
  0x79   : > { %v1381_v38 = vrot.slane %v3943_v21, 1  ;;  %v1151_v27 = vshll.u32 %v5006_v23, 16  ;;  %v1163_v18 = vshll.u32 %v5013_v46, 16  ;;  %v5017_v55 = vld [vmem:[%s5205_s14 + $0x44] ss:$0 sps:$4 sm:$0x11]  }
  0x7a   : > { %v1377_v42 = vsel %vm910_vm1, %v1375_v41, %v1376_v44  ;;  %v1382_v41 = vrot.slane %v5006_v23, 1  ;;  %v3784_v44 = vld [vmem:[%s5205_s14 + $0x30] sm:$0xe]  ;;  %v945_v23 = vrot.slane %v5577_v52, 1 }
  0x7b   : > { %v5047_v52 = vld [vmem:[%s6686_s1 + $0x210] sm:$0xff]  }
  0x7d   : > { %2599 = vmatmul.mubr.bf16.gmra.mxu0 %v5541_v4  ;;  %2728 = vmatmul.mubr.bf16.gmra.mxu1 %v931_v0  ;;  %v1124_v4 = vrot.slane %v1122_v32, 1  ;;  %v1139_v0 = vshll.u32 %v5002_v26, 16  ;;  %v939_v32 = vrot.slane %v5509_v56, 1  ;;  %v5031_v56 = vld [vmem:[%s6686_s1 + $0x180] sm:$0xff]   ;;  %v1383_v26 = vsel %vm910_vm1, %v1381_v38, %v1382_v41 }
  0x7e   : > { %2606 = vmatprep.mubr.bf16.mxu0 %v797_v5  ;;  %2735 = vmatprep.mubr.bf16.mxu1 %v5614_v20  ;;  %v5010_v5 = vld [vmem:[%s6686_s1 + $0x230] sm:$0xff]   ;;  %v946_v38 = vsel %vm910_vm1, %v944_v31, %v945_v23  ;;  %v377_v31 = vld [vmem:[%s5205_s14 + $0xa8] sm:$0xe] }
  0x7f   : > { %v1125_v60 = vor.u32 %v1124_v4, %v1120_v10  ;;  %v1141_v37 = vrot.slane %v1139_v0, 1  ;;  %v5694_v10 = vcombine.low %v3753_v36, %v5677_v40  ;;  %v3903_v4 = vcombine.low %v373_v9, %v5535_v19  ;;  %4671 = vmatpush3.bf16.msra.mxu1 %v5031_v56  ;;  %v5040_v0 = vld [vmem:[%s6686_s1 + $0x218] sm:$0xff]   ;;  %v5097_v9 = vld [vmem:[%s5205_s14 + $0x94] sm:$0xf] }
  0x80   : > { %v940_v51 = vsel %vm910_vm1, %v938_v53, %v939_v32  ;;  %v1161_v36 = vor.u32 %v1160_v50, %v1156_v28  ;;  %v5734_v53 = vld [vmem:[%s5205_s14 + $0xa0] sm:$0xf]  ;;  %v1168_v56 = vshrl.u32 %v5516_v59, 16 }
  0x81   : > { %v1130_v63 = vsel %vm653_vm0, %v1125_v60, %v1129_v61  ;;  %v941_v19 = vrot.slane %v3903_v4, 1  ;;  %v3755_v61 = vld [vmem:[%s5205_s14 + $0x90] sm:$0xf] }
  0x85   : > { %2607 = vmatmul.mubr.bf16.gmra.mxu0 %v5566_v33  ;;  %2736 = vmatmul.mubr.bf16.gmra.mxu1 %v934_v39  ;;  %v1378_v33 = vrot.slane %v3942_v15, 1  ;;  %v1142_v39 = vsel %vm653_vm0, %v1137_v34, %v1141_v37  ;;  %v3944_v15 = vcombine.low %v3784_v44, %v5459_v17  ;;  %v1153_v17 = vrot.slane %v1151_v27, 1  ;;  %v3786_v37 = vld [vmem:[%s5205_s14 + $0x48] sm:$0xe] }
  0x86   : > { %2743 = vmatprep.mubr.bf16.mxu1 %v5640_v54  ;;  %2840 = vmatprep.mubr.bf16.mxu0 %v1377_v42  ;;  %v1148_v42 = vrot.slane %v1146_v29, 1  ;;  %v1170_v29 = vshll.u32 %v5516_v59, 16  ;;  %v1388_v34 = vrot.slane %v5017_v55, 1  ;;  %v3946_v46 = vcombine.low %v3786_v37, %v5529_v13  ;;  %v5098_v27 = vld [vmem:[%s5205_s14 + $0x98] ss:$0 sps:$4 sm:$0x11]  }
  0x87   : > { %v1380_v25 = vsel %vm910_vm1, %v1378_v33, %v1379_v48  ;;  %v1384_v3 = vrot.slane %v3944_v15, 1  ;;  %v3785_v33 = vld [vmem:[%s5205_s14 + $0x3c] sm:$0xe]  ;;  %v943_v48 = vsel %vm910_vm1, %v941_v19, %v942_v58  ;;  %v948_v15 = vrot.slane %v5098_v27, 1  ;;  %v5061_v59 = vld [vmem:[%s6686_s1 + $0x200] sm:$0xff]  }
  0x88   : > { %v1149_v60 = vor.u32 %v1148_v42, %v1144_v45  ;;  %v3945_v21 = vcombine.low %v3785_v33, %v5494_v47  ;;  %v1165_v47 = vrot.slane %v1163_v18, 1  ;;  %v1172_v4 = vrot.slane %v1170_v29, 1  ;;  %v5761_v58 = vld [vmem:[%s5205_s14 + $0xac] sm:$0xf]  ;;  %v5782_v29 = vld [vmem:[%s5205_s14 + $0xb8] sm:$0xf] }
  0x89   : > { %v1386_v43 = vsel %vm910_vm1, %v1384_v3, %v1385_v6  ;;  %v1175_v45 = vshll.u32 %v5017_v55, 16  ;;  %v1182_v13 = vshll.u32 %v5557_v35, 16  ;;  %v1390_v24 = vrot.slane %v3946_v46, 1  ;;  %v5028_v55 = vld [vmem:[%s5205_s14 + $0x5c] ss:$0 sps:$4 sm:$0x11]  }
  0x8a   : > { %v1387_v32 = vrot.slane %v3945_v21, 1  ;;  %v1166_v44 = vsel %vm653_vm0, %v1161_v36, %v1165_v47  ;;  %v1180_v6 = vshrl.u32 %v5557_v35, 16  ;;  %v1194_v21 = vshll.u32 %v5585_v57, 16  ;;  %v5100_v35 = vld [vmem:[%s5205_s14 + $0xa4] ss:$0 sps:$4 sm:$0x11]  }
  0x8b   : > { %v1177_v19 = vrot.slane %v1175_v45, 1  ;;  %v1184_v28 = vrot.slane %v1182_v13, 1  ;;  %v1394_v47 = vrot.slane %v5028_v55, 1  ;;  %v5035_v45 = vld [vmem:[%s5205_s14 + $0x68] ss:$0 sps:$4 sm:$0x11]  }
  0x8c   : > { %v1206_v46 = vshll.u32 %v5614_v20, 16  ;;  %v378_v13 = vld [vmem:[%s5205_s14 + $0xb4] sm:$0xe] }
  0x8d   : > { %2744 = vmatmul.mubr.bf16.gmra.mxu1 %v937_v7  ;;  %2841 = vmatmul.mubr.bf16.vlgmr.msra.gmra.mxu0 %v1130_v63  ;;  %v1154_v7 = vsel %vm653_vm0, %v1149_v60, %v1153_v17  ;;  %v5720_v63 = vcombine.low %v3755_v61, %v5712_v2  ;;  %v376_v17 = vld [vmem:[%s5205_s14 + $0x9c] sm:$0xe]  ;;  %v3787_v61 = vld [vmem:[%s5205_s14 + $0x54] sm:$0xe]  ;;  %v1185_v23 = vor.u32 %v1184_v28, %v1180_v6  ;;  %v3799_v28 = vld [vmem:[%s5205_s14 + $0x24] sm:$0xf] }
  0x8e   : > { %4793 = vmatpush3.bf16.msra.mxu0 %v5604_v11  ;;  %2751 = vmatprep.mubr.bf16.mxu1 %v5664_v14  ;;  %v5021_v11 = vld [vmem:[%s6686_s1 + $0x228] sm:$0xff]   ;;  %v3947_v50 = vcombine.low %v3787_v61, %v5572_v49  ;;  %v1211_v61 = vshll.u32 %v5035_v45, 16  ;;  %v5039_v6 = vld [vmem:[%s5205_s14 + $0x20] ss:$0 sps:$4 sm:$0x11]  }
  0x8f   : > { %2848 = vmatprep.mubr.bf16.mxu0 %v1380_v25  ;;  %4794 = vmatprep.subr.bf16.mxu0 %v5010_v5  ;;  %v375_v25 = vld [vmem:[%s5205_s14 + $0x90] sm:$0xe] }
  0x90   : > { %v3905_v8 = vcombine.low %v375_v25, %v5097_v9  ;;  %v3761_v25 = vld [vmem:[%s5205_s14 + $0xb4] sm:$0xf]  ;;  %v1393_v36 = vrot.slane %v3947_v50, 1  ;;  %v5787_v9 = vld [vmem:[%s5205_s14 + $0x1c] sm:$0xf]  ;;  %v1218_v50 = vshll.u32 %v5640_v54, 16 }
  0x92   : > { %4795 = vmatpush3.bf16.msra.mxu0 %v5010_v5  ;;  %v3757_v5 = vld [vmem:[%s5205_s14 + $0x9c] sm:$0xf]  ;;  %v947_v42 = vrot.slane %v3905_v8, 1 }
  0x93   : > { %4796 = vmatprep.subr.bf16.mxu0 %v5021_v11  ;;  %v5743_v41 = vcombine.low %v3757_v5, %v5734_v53 }
  0x94   : > { %v949_v1 = vsel %vm910_vm1, %v947_v42, %v948_v15  ;;  %v5102_v42 = vld [vmem:[%s5205_s14 + $0xb0] ss:$0 sps:$4 sm:$0x11]  }
  0x95   : > { %2752 = vmatmul.mubr.bf16.gmra.mxu1 %v940_v51  ;;  %2849 = vmatmul.mubr.bf16.gmra.mxu0 %v1142_v39  ;;  %v1389_v51 = vsel %vm910_vm1, %v1387_v32, %v1388_v34  ;;  %v5024_v39 = vld [vmem:[%s5205_s14 + $0x50] ss:$0 sps:$4 sm:$0x11]   ;;  %v3797_v32 = vld [vmem:[%s5205_s14 + $0x18] sm:$0xf]  ;;  %v954_v27 = vrot.slane %v5102_v42, 1 }
  0x96   : > { %2759 = vmatprep.mubr.bf16.mxu1 %v5694_v10  ;;  %2856 = vmatprep.mubr.bf16.mxu0 %v1383_v26  ;;  %v3759_v26 = vld [vmem:[%s5205_s14 + $0xa8] sm:$0xf]  ;;  %v1391_v60 = vrot.slane %v5024_v39, 1  ;;  %v5101_v34 = vld [vmem:[%s5205_s14 + $0xac] sm:$0xf] }
  0x97   : > { %4797 = vmatpush3.bf16.msra.mxu0 %v5021_v11  ;;  %v5054_v11 = vld [vmem:[%s6686_s1 + $0x208] sm:$0xff]   ;;  %v5767_v3 = vcombine.low %v3759_v26, %v5761_v58  ;;  %v3907_v37 = vcombine.low %v377_v31, %v5101_v34  ;;  %v5806_v26 = vld [vmem:[%s5205_s14 + $0xc4] sm:$0xf]  ;;  %v1591_v31 = vshll.u32 %v5039_v6, 16 }
  0x98   : > { %4798 = vmatprep.subr.bf16.mxu0 %v5032_v62  ;;  %v1392_v18 = vsel %vm910_vm1, %v1390_v24, %v1391_v60  ;;  %v1397_v24 = vrot.slane %v5035_v45, 1  ;;  %v1204_v60 = vshrl.u32 %v5614_v20, 16  ;;  %v3846_v42 = vld [vmem:[%s5205_s14 + $0x24] sm:$0xe] }
  0x9b   : > { %4799 = vmatpush3.bf16.msra.mxu0 %v5032_v62  ;;  %v1173_v62 = vor.u32 %v1172_v4, %v1168_v56  ;;  %v5794_v56 = vcombine.low %v3761_v25, %v5782_v29  ;;  %v1199_v4 = vshll.u32 %v5028_v55, 16 }
  0x9c   : > { %4800 = vmatprep.subr.bf16.mxu0 %v5040_v0 }
  0x9d   : > { %2760 = vmatmul.mubr.bf16.gmra.mxu1 %v943_v48  ;;  %2857 = vmatmul.mubr.bf16.gmra.mxu0 %v1154_v7  ;;  %v1178_v33 = vsel %vm653_vm0, %v1173_v62, %v1177_v19  ;;  %v5099_v48 = vld [vmem:[%s5205_s14 + $0xa0] sm:$0xf]  ;;  %v1187_v7 = vshll.u32 %v5024_v39, 16  ;;  %v953_v39 = vrot.slane %v3907_v37, 1  ;;  %v1201_v62 = vrot.slane %v1199_v4, 1 }
  0x9e   : > { %2767 = vmatprep.mubr.bf16.mxu1 %v5720_v63  ;;  %2864 = vmatprep.mubr.bf16.mxu0 %v1386_v43  ;;  %v3906_v22 = vcombine.low %v376_v17, %v5099_v48  ;;  %v951_v43 = vrot.slane %v5100_v35, 1  ;;  %v1208_v17 = vrot.slane %v1206_v46, 1  ;;  %v5103_v48 = vld [vmem:[%s5205_s14 + $0xb8] sm:$0xf]  ;;  %v1216_v37 = vshrl.u32 %v5640_v54, 16 }
  0x9f   : > { %4801 = vmatpush3.bf16.msra.mxu0 %v5040_v0  ;;  %v3788_v0 = vld [vmem:[%s5205_s14 + $0x60] sm:$0xe]  ;;  %v1189_v5 = vrot.slane %v1187_v7, 1  ;;  %v3800_v7 = vld [vmem:[%s5205_s14 + $0x28] sm:$0xf]  ;;  %v955_v55 = vsel %vm910_vm1, %v953_v39, %v954_v27 }
  0xa0   : > { %4802 = vmatprep.subr.bf16.mxu0 %v5047_v52  ;;  %v950_v49 = vrot.slane %v3906_v22, 1  ;;  %v3948_v8 = vcombine.low %v3788_v0, %v5607_v16  ;;  %v5800_v16 = vcombine.low %v3797_v32, %v5787_v9  ;;  %v3908_v22 = vcombine.low %v378_v13, %v5103_v48  ;;  %v3801_v4 = vld [vmem:[%s5205_s14 + $0x30] sm:$0xf]  ;;  %v3845_v39 = vld [vmem:[%s5205_s14 + $0x18] sm:$0xe] }
  0xa1   : > { %v1840_v13 = vrot.slane %v5039_v6, 1 }
  0xa2   : > { %v1396_v19 = vrot.slane %v3948_v8, 1  ;;  %v1584_v35 = vshrl.u32 %v5800_v16, 16  ;;  %v5043_v8 = vld [vmem:[%s5205_s14 + $0x2c] ss:$0 sps:$4 sm:$0x11]  }
  0xa3   : > { %4803 = vmatpush3.bf16.msra.mxu0 %v5047_v52  ;;  %v1192_v52 = vshrl.u32 %v5585_v57, 16  ;;  %v3789_v57 = vld [vmem:[%s5205_s14 + $0x6c] sm:$0xe] }
  0xa4   : > { %4804 = vmatprep.subr.bf16.mxu0 %v5054_v11 }
  0xa5   : > { %2768 = vmatmul.mubr.bf16.gmra.mxu1 %v946_v38  ;;  %2865 = vmatmul.mubr.bf16.gmra.mxu0 %v1166_v44  ;;  %v1196_v38 = vrot.slane %v1194_v21, 1  ;;  %v1190_v44 = vsel %vm653_vm0, %v1185_v23, %v1189_v5  ;;  %v1398_v21 = vsel %vm910_vm1, %v1396_v19, %v1397_v24  ;;  %v956_v23 = vrot.slane %v3908_v22, 1  ;;  %v5104_v5 = vld [vmem:[%s5205_s14 + $0xbc] ss:$0 sps:$4 sm:$0x11]  }
  0xa6   : > { %2775 = vmatprep.mubr.bf16.mxu1 %v5743_v41  ;;  %2872 = vmatprep.mubr.bf16.mxu0 %v1389_v51  ;;  %v1395_v51 = vsel %vm910_vm1, %v1393_v36, %v1394_v47  ;;  %v957_v25 = vrot.slane %v5104_v5, 1  ;;  %v1213_v36 = vrot.slane %v1211_v61, 1  ;;  %v3790_v47 = vld [vmem:[%s5205_s14 + $0x78] sm:$0xe]  ;;  %v1843_v19 = vrot.slane %v5043_v8, 1 }
  0xa7   : > { %4805 = vmatpush3.bf16.msra.mxu0 %v5054_v11  ;;  %v952_v11 = vsel %vm910_vm1, %v950_v49, %v951_v43  ;;  %v1197_v15 = vor.u32 %v1196_v38, %v1192_v52  ;;  %v5828_v49 = vcombine.low %v3799_v28, %v3800_v7  ;;  %v1593_v38 = vrot.slane %v1591_v31, 1  ;;  %v3791_v22 = vld [vmem:[%s5205_s14 + $0x84] sm:$0xe]  ;;  %v5869_v31 = vld [vmem:[%s5205_s14 + $0x40] sm:$0xf] }
  0xa8   : > { %4806 = vmatprep.subr.bf16.mxu0 %v5061_v59  ;;  %v3950_v45 = vcombine.low %v3790_v47, %v5655_v30  ;;  %v958_v46 = vsel %vm910_vm1, %v956_v23, %v957_v25  ;;  %v1603_v30 = vshll.u32 %v5043_v8, 16  ;;  %v3990_v24 = vcombine.low %v3846_v42, %v3800_v7 }
  0xa9   : > { %v1202_v20 = vsel %vm653_vm0, %v1197_v15, %v1201_v62  ;;  %v5041_v15 = vld [vmem:[%s5205_s14 + $0x80] ss:$0 sps:$4 sm:$0x11]   ;;  %v1596_v62 = vshrl.u32 %v5828_v49, 16  ;;  %v3951_v23 = vcombine.low %v3791_v22, %v5677_v40  ;;  %v1228_v5 = vshrl.u32 %v5664_v14, 16 }
  0xaa   : > { %v1842_v48 = vrot.slane %v3990_v24, 1  ;;  %v1402_v7 = vrot.slane %v3950_v45, 1 }
  0xab   : > { %4807 = vmatpush3.bf16.msra.mxu0 %v5061_v59  ;;  %v3763_v59 = vld [vmem:[%s5205_s14 + $0xc0] sm:$0xf] }
  0xac   : > { %v5824_v0 = vcombine.low %v3763_v59, %v5806_v26  ;;  %v3989_v59 = vcombine.low %v3845_v39, %v5787_v9 }
  0xad   : > { %2776 = vmatmul.mubr.bf16.gmra.mxu1 %v949_v1  ;;  %2873 = vmatmul.mubr.bf16.gmra.mxu0 %v1178_v33  ;;  %v5812_v1 = vld [vmem:[%s5205_s14 + $0x74] ss:$0 sps:$4 sm:$0x11]   ;;  %v1586_v33 = vshll.u32 %v5800_v16, 16 }
  0xae   : > { %2783 = vmatprep.mubr.bf16.mxu1 %v5767_v3  ;;  %2880 = vmatprep.mubr.bf16.mxu0 %v1392_v18  ;;  %v3949_v18 = vcombine.low %v3789_v57, %v5628_v12  ;;  %v1209_v12 = vor.u32 %v1208_v17, %v1204_v60  ;;  %v1400_v34 = vrot.slane %v5812_v1, 1  ;;  %v5842_v57 = vld [vmem:[%s5205_s14 + $0x34] sm:$0xf]  ;;  %v1223_v27 = vshll.u32 %v5812_v1, 16 }
  0xaf   : > { %v1588_v43 = vrot.slane %v1586_v33, 1  ;;  %v5853_v61 = vcombine.low %v3801_v4, %v5842_v57  ;;  %v1839_v33 = vrot.slane %v3989_v59, 1  ;;  %v1230_v1 = vshll.u32 %v5664_v14, 16 }
  0xb0   : > { %v1399_v32 = vrot.slane %v3949_v18, 1  ;;  %v1225_v28 = vrot.slane %v1223_v27, 1  ;;  %v5861_v18 = vsel %vm910_vm1, %v1842_v48, %v1843_v19  ;;  %v1242_v14 = vshll.u32 %v5694_v10, 16  ;;  %v5891_v27 = vld [vmem:[%s5205_s14 + $0x4c] sm:$0xf] }
  0xb1   : > { %v1589_v52 = vor.u32 %v1588_v43, %v1584_v35  ;;  %v5858_v6 = vsel %vm910_vm1, %v1839_v33, %v1840_v13  ;;  %v1610_v35 = vshll.u32 %v5853_v61, 16  ;;  %v3803_v43 = vld [vmem:[%s5205_s14 + $0x3c] sm:$0xf]  ;;  %v1232_v25 = vrot.slane %v1230_v1, 1 }
  0xb2   : > { %v1401_v54 = vsel %vm910_vm1, %v1399_v32, %v1400_v34  ;;  %v5044_v32 = vld [vmem:[%s5205_s14 + $0x8c] ss:$0 sps:$4 sm:$0x11]   ;;  %v1608_v34 = vshrl.u32 %v5853_v61, 16  ;;  %v5880_v40 = vcombine.low %v3803_v43, %v5869_v31  ;;  %v3793_v48 = vld [vmem:[%s5205_s14 + $0x9c] sm:$0xe] }
  0xb3   : > { %v1594_v60 = vsel %vm653_vm0, %v1589_v52, %v1593_v38  ;;  %v1612_v8 = vrot.slane %v1610_v35, 1  ;;  %v3792_v38 = vld [vmem:[%s5205_s14 + $0x90] sm:$0xe]  ;;  %v1233_v4 = vor.u32 %v1232_v25, %v1228_v5  ;;  %v1406_v45 = vrot.slane %v5044_v32, 1  ;;  %v3807_v35 = vld [vmem:[%s5205_s14 + $0x54] sm:$0xf] }
  0xb4   : > { %v1622_v42 = vshll.u32 %v5880_v40, 16  ;;  %v1247_v59 = vshll.u32 %v5044_v32, 16  ;;  %v3952_v13 = vcombine.low %v3792_v38, %v5712_v2  ;;  %v1254_v2 = vshll.u32 %v5720_v63, 16  ;;  %v5913_v43 = vld [vmem:[%s5205_s14 + $0x58] sm:$0xf] }
  0xb5   : > { %2784 = vmatmul.mubr.bf16.gmra.mxu1 %v952_v11  ;;  %2881 = vmatmul.mubr.bf16.gmra.mxu0 %v1190_v44  ;;  %v1220_v11 = vrot.slane %v1218_v50, 1  ;;  %v1598_v44 = vshll.u32 %v5828_v49, 16  ;;  %v1403_v50 = vrot.slane %v5041_v15, 1  ;;  %v1252_v5 = vshrl.u32 %v5720_v63, 16 }
  0xb6   : > { %2791 = vmatprep.mubr.bf16.mxu1 %v5794_v56  ;;  %2888 = vmatprep.mubr.bf16.mxu0 %v1395_v51  ;;  %v1214_v51 = vsel %vm653_vm0, %v1209_v12, %v1213_v36  ;;  %v1235_v12 = vshll.u32 %v5041_v15, 16  ;;  %v1240_v15 = vshrl.u32 %v5694_v10, 16  ;;  %v1624_v33 = vrot.slane %v1622_v42, 1  ;;  %v3809_v42 = vld [vmem:[%s5205_s14 + $0x60] sm:$0xf] }
  0xb7   : > { %v1600_v17 = vrot.slane %v1598_v44, 1  ;;  %v1221_v9 = vor.u32 %v1220_v11, %v1216_v37  ;;  %v1404_v47 = vsel %vm910_vm1, %v1402_v7, %v1403_v50  ;;  %v1405_v44 = vrot.slane %v3951_v23, 1 }
  0xb8   : > { %v1237_v11 = vrot.slane %v1235_v12, 1  ;;  %v1249_v22 = vrot.slane %v1247_v59, 1  ;;  %v1408_v7 = vrot.slane %v3952_v13, 1  ;;  %v3953_v23 = vcombine.low %v3793_v48, %v5734_v53  ;;  %v5051_v12 = vld [vmem:[%s5205_s14 + $0xa4] ss:$0 sps:$4 sm:$0x11]  }
  0xb9   : > { %v1226_v36 = vsel %vm653_vm0, %v1221_v9, %v1225_v28  ;;  %v5908_v9 = vld [vmem:[%s5205_s14 + $0x50] ss:$0 sps:$4 sm:$0x11]   ;;  %v1256_v25 = vrot.slane %v1254_v2, 1  ;;  %v5924_v53 = vcombine.low %v3807_v35, %v5913_v43  ;;  %v1266_v63 = vshll.u32 %v5743_v41, 16 }
  0xba   : > { %v1278_v2 = vshll.u32 %v5767_v3, 16  ;;  %v3795_v48 = vld [vmem:[%s5205_s14 + $0xb4] sm:$0xe]  ;;  %v5957_v35 = vld [vmem:[%s5205_s14 + $0x70] sm:$0xf] }
  0xbd   : > { %2792 = vmatmul.mubr.bf16.gmra.mxu1 %v955_v55  ;;  %2889 = vmatmul.mubr.bf16.gmra.mxu0 %v1202_v20  ;;  %v1601_v55 = vor.u32 %v1600_v17, %v1596_v62  ;;  %v1605_v20 = vrot.slane %v1603_v30, 1  ;;  %v1238_v62 = vsel %vm653_vm0, %v1233_v4, %v1237_v11  ;;  %v1407_v30 = vsel %vm910_vm1, %v1405_v44, %v1406_v45  ;;  %v3794_v45 = vld [vmem:[%s5205_s14 + $0xa8] sm:$0xe] }
  0xbe   : > { %2799 = vmatprep.mubr.bf16.mxu1 %v5824_v0  ;;  %2896 = vmatprep.mubr.bf16.mxu0 %v1398_v21  ;;  %v5864_v21 = vld [vmem:[%s5205_s14 + $0x38] ss:$0 sps:$4 sm:$0x11]   ;;  %v1620_v17 = vshrl.u32 %v5880_v40, 16  ;;  %v1412_v11 = vrot.slane %v5051_v12, 1  ;;  %v3954_v59 = vcombine.low %v3794_v45, %v5761_v58 }
  0xbf   : > { %v1606_v37 = vsel %vm653_vm0, %v1601_v55, %v1605_v20  ;;  %v1615_v52 = vshll.u32 %v5864_v21, 16 }
  0xc0   : > { %v1625_v55 = vor.u32 %v1624_v33, %v1620_v17 }
  0xc1   : > { %v1617_v39 = vrot.slane %v1615_v52, 1  ;;  %v1257_v52 = vor.u32 %v1256_v25, %v1252_v5  ;;  %v1280_v25 = vrot.slane %v1278_v2, 1  ;;  %v5062_v2 = vld [vmem:[%s5205_s14 + $0xc8] ss:$0 sps:$4 sm:$0x11]  }
  0xc5   : > { %2800 = vmatmul.mubr.bf16.gmra.mxu1 %v958_v46  ;;  %2897 = vmatmul.mubr.bf16.gmra.mxu0 %v1214_v51  ;;  %v5886_v46 = vld [vmem:[%s5205_s14 + $0x44] ss:$0 sps:$4 sm:$0x11]   ;;  %v1613_v51 = vor.u32 %v1612_v8, %v1608_v34  ;;  %v1639_v34 = vshll.u32 %v5908_v9, 16 }
  0xc6   : > { %2904 = vmatprep.mubr.bf16.mxu0 %v1401_v54  ;;  %3001 = vmatprep.mubr.bf16.mxu1 %v1594_v60  ;;  %v3805_v54 = vld [vmem:[%s5205_s14 + $0x48] sm:$0xf]  ;;  %v5048_v60 = vld [vmem:[%s5205_s14 + $0x98] ss:$0 sps:$4 sm:$0x11]   ;;  %v1627_v10 = vshll.u32 %v5886_v46, 16 }
  0xc7   : > { %v5898_v19 = vcombine.low %v3805_v54, %v5891_v27  ;;  %v1618_v24 = vsel %vm653_vm0, %v1613_v51, %v1617_v39  ;;  %v1409_v50 = vrot.slane %v5048_v60, 1  ;;  %v1641_v4 = vrot.slane %v1639_v34, 1  ;;  %v5930_v51 = vld [vmem:[%s5205_s14 + $0x5c] ss:$0 sps:$4 sm:$0x11]  }
  0xc8   : > { %v1629_v20 = vrot.slane %v1627_v10, 1  ;;  %v1646_v39 = vshll.u32 %v5924_v53, 16  ;;  %v5935_v54 = vld [vmem:[%s5205_s14 + $0x64] sm:$0xf]  ;;  %v1651_v33 = vshll.u32 %v5930_v51, 16 }
  0xc9   : > { %v1634_v28 = vshll.u32 %v5898_v19, 16 }
  0xca   : > { %v1630_v8 = vsel %vm653_vm0, %v1625_v55, %v1629_v20  ;;  %v1648_v17 = vrot.slane %v1646_v39, 1  ;;  %v3811_v20 = vld [vmem:[%s5205_s14 + $0x6c] sm:$0xf] }
  0xcb   : > { %v1636_v32 = vrot.slane %v1634_v28, 1 }
  0xcd   : > { %2905 = vmatmul.mubr.bf16.gmra.mxu0 %v1226_v36  ;;  %3002 = vmatmul.mubr.bf16.vlgmr.msra.gmra.mxu1 %v5800_v16  ;;  %v1244_v16 = vrot.slane %v1242_v14, 1  ;;  %v1259_v36 = vshll.u32 %v5048_v60, 16  ;;  %v1411_v14 = vrot.slane %v3953_v23, 1  ;;  %v1644_v60 = vshrl.u32 %v5924_v53, 16 }
  0xce   : > { %2912 = vmatprep.mubr.bf16.mxu0 %v1404_v47  ;;  %3009 = vmatprep.mubr.bf16.mxu1 %v1606_v37  ;;  %v1632_v47 = vshrl.u32 %v5898_v19, 16  ;;  %v1410_v37 = vsel %vm910_vm1, %v1408_v7, %v1409_v50  ;;  %v1653_v7 = vrot.slane %v1651_v33, 1  ;;  %v5952_v50 = vld [vmem:[%s5205_s14 + $0x68] ss:$0 sps:$4 sm:$0x11]  }
  0xcf   : > { %v1245_v1 = vor.u32 %v1244_v16, %v1240_v15  ;;  %v1261_v38 = vrot.slane %v1259_v36, 1  ;;  %v1264_v15 = vshrl.u32 %v5743_v41, 16  ;;  %v1271_v16 = vshll.u32 %v5051_v12, 16  ;;  %v5058_v36 = vld [vmem:[%s5205_s14 + $0xbc] ss:$0 sps:$4 sm:$0x11]  }
  0xd0   : > { %v1637_v44 = vor.u32 %v1636_v32, %v1632_v47  ;;  %v5946_v41 = vcombine.low %v3809_v42, %v5935_v54  ;;  %v1649_v28 = vor.u32 %v1648_v17, %v1644_v60  ;;  %v1295_v17 = vshll.u32 %v5058_v36, 16 }
  0xd1   : > { %v1262_v13 = vsel %vm653_vm0, %v1257_v52, %v1261_v38  ;;  %v1273_v10 = vrot.slane %v1271_v16, 1  ;;  %v3796_v52 = vld [vmem:[%s5205_s14 + $0xc0] sm:$0xe] }
  0xd2   : > { %v1658_v55 = vshll.u32 %v5946_v41, 16  ;;  %v1656_v47 = vshrl.u32 %v5946_v41, 16  ;;  %v1654_v32 = vsel %vm653_vm0, %v1649_v28, %v1653_v7  ;;  %v3956_v33 = vcombine.low %v3796_v52, %v5806_v26  ;;  %v3815_v52 = vld [vmem:[%s5205_s14 + $0x84] sm:$0xf] }
  0xd4   : > { %v1660_v34 = vrot.slane %v1658_v55, 1 }
  0xd5   : > { %2913 = vmatmul.mubr.bf16.gmra.mxu0 %v1238_v62  ;;  %3010 = vmatmul.mubr.bf16.gmra.mxu1 %v5828_v49  ;;  %v1250_v49 = vsel %vm653_vm0, %v1245_v1, %v1249_v22  ;;  %v1413_v62 = vsel %vm910_vm1, %v1411_v14, %v1412_v11  ;;  %v1414_v1 = vrot.slane %v3954_v59, 1  ;;  %v3813_v59 = vld [vmem:[%s5205_s14 + $0x78] sm:$0xf] }
  0xd6   : > { %2920 = vmatprep.mubr.bf16.mxu0 %v1407_v30  ;;  %3017 = vmatprep.mubr.bf16.mxu1 %v1618_v24  ;;  %v1642_v30 = vsel %vm653_vm0, %v1637_v44, %v1641_v4  ;;  %v5055_v24 = vld [vmem:[%s5205_s14 + $0xb0] ss:$0 sps:$4 sm:$0x11]   ;;  %v1418_v44 = vrot.slane %v5058_v36, 1  ;;  %v1661_v39 = vor.u32 %v1660_v34, %v1656_v47  ;;  %v1421_v36 = vrot.slane %v5062_v2, 1 }
  0xd7   : > { %v1415_v22 = vrot.slane %v5055_v24, 1  ;;  %v1283_v12 = vshll.u32 %v5055_v24, 16  ;;  %v1288_v24 = vshrl.u32 %v5794_v56, 16  ;;  %v6003_v47 = vld [vmem:[%s5205_s14 + $0x80] ss:$0 sps:$4 sm:$0x11]  }
  0xd9   : > { %v1416_v5 = vsel %vm910_vm1, %v1414_v1, %v1415_v22  ;;  %v1285_v38 = vrot.slane %v1283_v12, 1  ;;  %v1420_v12 = vrot.slane %v3956_v33, 1 }
  0xdd   : > { %2921 = vmatmul.mubr.bf16.gmra.mxu0 %v1250_v49  ;;  %3018 = vmatmul.mubr.bf16.gmra.mxu1 %v5853_v61  ;;  %v1268_v61 = vrot.slane %v1266_v63, 1  ;;  %v1276_v49 = vshrl.u32 %v5767_v3, 16 }
  0xde   : > { %2928 = vmatprep.mubr.bf16.mxu0 %v1410_v37  ;;  %3025 = vmatprep.mubr.bf16.mxu1 %v1630_v8  ;;  %v1663_v37 = vshll.u32 %v5952_v50, 16  ;;  %v5968_v8 = vcombine.low %v3811_v20, %v5957_v35 }
  0xdf   : > { %v1269_v58 = vor.u32 %v1268_v61, %v1264_v15  ;;  %v1281_v14 = vor.u32 %v1280_v25, %v1276_v49  ;;  %v5974_v15 = vld [vmem:[%s5205_s14 + $0x74] ss:$0 sps:$4 sm:$0x11]   ;;  %v1302_v25 = vshll.u32 %v5824_v0, 16 }
  0xe0   : > { %v1665_v42 = vrot.slane %v1663_v37, 1  ;;  %v1670_v61 = vshll.u32 %v5968_v8, 16  ;;  %v1675_v55 = vshll.u32 %v5974_v15, 16 }
  0xe1   : > { %v1274_v23 = vsel %vm653_vm0, %v1269_v58, %v1273_v10  ;;  %v1286_v58 = vsel %vm653_vm0, %v1281_v14, %v1285_v38  ;;  %v6012_v14 = vld [vmem:[%s5205_s14 + $0x88] sm:$0xf] }
  0xe2   : > { %v1666_v28 = vsel %vm653_vm0, %v1661_v39, %v1665_v42  ;;  %v1672_v7 = vrot.slane %v1670_v61, 1  ;;  %v1304_v39 = vrot.slane %v1302_v25, 1  ;;  %v1307_v42 = vshll.u32 %v5062_v2, 16  ;;  %v3817_v25 = vld [vmem:[%s5205_s14 + $0x90] sm:$0xf] }
  0xe3   : > { %v1687_v61 = vshll.u32 %v6003_v47, 16 }
  0xe5   : > { %2929 = vmatmul.mubr.bf16.gmra.mxu0 %v1262_v13  ;;  %3026 = vmatmul.mubr.bf16.gmra.mxu1 %v5880_v40  ;;  %v3955_v40 = vcombine.low %v3795_v48, %v5782_v29  ;;  %v1290_v29 = vshll.u32 %v5794_v56, 16  ;;  %v5983_v13 = vld [vmem:[%s5205_s14 + $0x7c] sm:$0xf]  ;;  %v1668_v48 = vshrl.u32 %v5968_v8, 16 }
  0xe6   : > { %2936 = vmatprep.mubr.bf16.mxu0 %v1413_v62  ;;  %3033 = vmatprep.mubr.bf16.mxu1 %v1642_v30  ;;  %v5994_v56 = vcombine.low %v3813_v59, %v5983_v13 }
  0xe7   : > { %v1417_v11 = vrot.slane %v3955_v40, 1  ;;  %v1292_v60 = vrot.slane %v1290_v29, 1  ;;  %v1673_v37 = vor.u32 %v1672_v7, %v1668_v48  ;;  %v1677_v29 = vrot.slane %v1675_v55, 1 }
  0xe8   : > { %v1309_v48 = vrot.slane %v1307_v42, 1  ;;  %v1689_v55 = vrot.slane %v1687_v61, 1 }
  0xe9   : > { %v1419_v10 = vsel %vm910_vm1, %v1417_v11, %v1418_v44  ;;  %v1293_v49 = vor.u32 %v1292_v60, %v1288_v24  ;;  %v1680_v24 = vshrl.u32 %v5994_v56, 16 }
  0xed   : > { %v4336_v63 = vpop.f32.mrf.mxu0  ;;  %v4408_v3 = vpop.f32.mrf.mxu1  ;;  %2937 = vmatmul.mubr.bf16.gmra.mxu0 %v1274_v23  ;;  %3034 = vmatmul.mubr.bf16.gmra.mxu1 %v5898_v19 }
  0xee   : > { %2944 = vmatprep.mubr.bf16.mxu0 %v1416_v5  ;;  %3041 = vmatprep.mubr.bf16.mxu1 %v1654_v32  ;;  %v1297_v5 = vrot.slane %v1295_v17, 1  ;;  %v6021_v17 = vcombine.low %v3815_v52, %v6012_v14 }
  0xef   : > { %v4337_v4 = vpop.f32.mrf.mxu0  ;;  %v4409_v45 = vpop.f32.mrf.mxu1 }
  0xf0   : > { %v5977_v16 = vadd.f32 %v4337_v4, %v4336_v63  ;;  %v5979_v19 = vadd.f32 %v4409_v45, %v4408_v3  ;;  %v1682_v63 = vshll.u32 %v5994_v56, 16  ;;  %v1298_v44 = vsel %vm653_vm0, %v1293_v49, %v1297_v5 }
  0xf1   : > { %v4339_v62 = vpop.f32.mrf.mxu0  ;;  %v4411_v30 = vpop.f32.mrf.mxu1  ;;  %v1300_v4 = vshrl.u32 %v5824_v0, 16  ;;  %v1422_v45 = vsel %vm910_vm1, %v1420_v12, %v1421_v36  ;;  %v6039_v12 = vld [vmem:[%s5205_s14 + $0x94] sm:$0xf] }
  0xf2   : > { %v1684_v60 = vrot.slane %v1682_v63, 1 }
  0xf3   : > { %v4340_v1 = vpop.f32.mrf.mxu0  ;;  %v4412_v22 = vpop.f32.mrf.mxu1  ;;  %v1305_v2 = vor.u32 %v1304_v39, %v1300_v4 }
  0xf4   : > { %v5996_v20 = vadd.f32 %v4340_v1, %v4339_v62  ;;  %v5998_v26 = vadd.f32 %v4412_v22, %v4411_v30  ;;  %v1678_v30 = vsel %vm653_vm0, %v1673_v37, %v1677_v29  ;;  %v3847_v1 = vld [vmem:[%s5205_s14 + $0x30] sm:$0xe]  ;;  %v1685_v7 = vor.u32 %v1684_v60, %v1680_v24 }
  0xf5   : > { %v4342_v40 = vpop.f32.mrf.mxu0  ;;  %v4414_v23 = vpop.f32.mrf.mxu1  ;;  %2945 = vmatmul.mubr.bf16.gmra.mxu0 %v1286_v58  ;;  %3042 = vmatmul.mubr.bf16.gmra.mxu1 %v5924_v53  ;;  %v3991_v37 = vcombine.low %v3847_v1, %v5842_v57  ;;  %v1846_v57 = vrot.slane %v5864_v21, 1  ;;  %v3819_v1 = vld [vmem:[%s5205_s14 + $0x9c] sm:$0xf]  ;;  %v6068_v21 = vld [vmem:[%s5205_s14 + $0xa0] sm:$0xf] }
  0xf6   : > { %2952 = vmatprep.mubr.bf16.mxu0 %v1419_v10  ;;  %3049 = vmatprep.mubr.bf16.mxu1 %v1666_v28  ;;  %v1690_v52 = vsel %vm653_vm0, %v1685_v7, %v1689_v55 }
  0xf7   : > { %v4343_v32 = vpop.f32.mrf.mxu0  ;;  %v4415_v34 = vpop.f32.mrf.mxu1  ;;  %v1845_v61 = vrot.slane %v3991_v37, 1  ;;  %v6077_v37 = vcombine.low %v3819_v1, %v6068_v21  ;;  %v6104_v1 = vld [vmem:[%s5205_s14 + $0xac] sm:$0xf] }
  0xf8   : > { %v6006_v3 = vadd.f32 %v4343_v32, %v4342_v40  ;;  %v6008_v53 = vadd.f32 %v4415_v34, %v4414_v23  ;;  %v6030_v40 = vld [vmem:[%s5205_s14 + $0x8c] ss:$0 sps:$4 sm:$0x11]   ;;  %v1694_v23 = vshll.u32 %v6021_v17, 16  ;;  %v1310_v32 = vsel %vm653_vm0, %v1305_v2, %v1309_v48 }
  0xf9   : > { %v4345_v38 = vpop.f32.mrf.mxu0  ;;  %v4417_v11 = vpop.f32.mrf.mxu1  ;;  %v1692_v34 = vshrl.u32 %v6021_v17, 16  ;;  %v1847_v7 = vsel %vm910_vm1, %v1845_v61, %v1846_v57  ;;  %v6094_v57 = vld [vmem:[%s5205_s14 + $0xa4] ss:$0 sps:$4 sm:$0x11]  }
  0xfb   : > { %v4346_v59 = vpop.f32.mrf.mxu0  ;;  %v4418_v62 = vpop.f32.mrf.mxu1 }
  0xfc   : > { %v6023_v33 = vadd.f32 %v4346_v59, %v4345_v38  ;;  %v6025_v0 = vadd.f32 %v4418_v62, %v4417_v11  ;;  %v1696_v38 = vrot.slane %v1694_v23, 1  ;;  %v1699_v11 = vshll.u32 %v6030_v40, 16  ;;  %v3848_v59 = vld [vmem:[%s5205_s14 + $0x3c] sm:$0xe] }
  0xfd   : > { %v4348_v58 = vpop.f32.mrf.mxu0  ;;  %v4420_v10 = vpop.f32.mrf.mxu1  ;;  %2953 = vmatmul.mubr.bf16.gmra.mxu0 %v1298_v44  ;;  %3050 = vmatmul.mubr.bf16.gmra.mxu1 %v5946_v41  ;;  %v6047_v44 = vcombine.low %v3817_v25, %v6039_v12  ;;  %v6058_v62 = vld [vmem:[%s5205_s14 + $0x98] ss:$0 sps:$4 sm:$0x11]  }
  0xfe   : > { %2960 = vmatprep.mubr.bf16.mxu0 %v1422_v45  ;;  %3057 = vmatprep.mubr.bf16.mxu1 %v1678_v30  ;;  %v1697_v60 = vor.u32 %v1696_v38, %v1692_v34  ;;  %v1711_v23 = vshll.u32 %v6058_v62, 16 }
  0xff   : > { %v4349_v22 = vpop.f32.mrf.mxu0  ;;  %v4421_v28 = vpop.f32.mrf.mxu1  ;;  %v1704_v55 = vshrl.u32 %v6047_v44, 16 }
 0x100   : > { %v6033_v49 = vadd.f32 %v4349_v22, %v4348_v58  ;;  %v6035_v5 = vadd.f32 %v4421_v28, %v4420_v10  ;;  %v1701_v58 = vrot.slane %v1699_v11, 1  ;;  %v1706_v10 = vshll.u32 %v6047_v44, 16 }
 0x101   : > { %v4351_v41 = vpop.f32.mrf.mxu0  ;;  %v4423_v36 = vpop.f32.mrf.mxu1  ;;  %v3992_v28 = vcombine.low %v3848_v59, %v5869_v31  ;;  %v1849_v11 = vrot.slane %v5886_v46, 1 }
 0x103   : > { %v4352_v29 = vpop.f32.mrf.mxu0  ;;  %v4424_v63 = vpop.f32.mrf.mxu1 }
 0x104   : > { %v6049_v4 = vadd.f32 %v4352_v29, %v4351_v41  ;;  %v6051_v45 = vadd.f32 %v4424_v63, %v4423_v36  ;;  %v1702_v36 = vsel %vm653_vm0, %v1697_v60, %v1701_v58  ;;  %v6086_v63 = vld [vmem:[%s6687_s2] ss:$0 sm:$0xff] }
 0x105   : > { %v4354_v39 = vpop.f32.mrf.mxu0  ;;  %v4426_v42 = vpop.f32.mrf.mxu1  ;;  %2961 = vmatmul.mubr.bf16.gmra.mxu0 %v1310_v32  ;;  %3058 = vmatmul.mubr.bf16.gmra.mxu1 %v5968_v8  ;;  %v3849_v8 = vld [vmem:[%s5205_s14 + $0x48] sm:$0xe]  ;;  %v1708_v32 = vrot.slane %v1706_v10, 1  ;;  %v2521_v46 = vadd.f32 %v5977_v16, %v6086_v63 }
 0x106   : > { %3065 = vmatprep.mubr.bf16.mxu1 %v1690_v52  ;;  %4808 = vmatprep.mubr.bf16.mxu0 %v5858_v6  ;;  %v3993_v34 = vcombine.low %v3849_v8, %v5891_v27  ;;  %v1848_v27 = vrot.slane %v3992_v28, 1  ;;  %v3821_v8 = vld [vmem:[%s5205_s14 + $0xa8] sm:$0xf] }
 0x107   : > { %v4355_v30 = vpop.f32.mrf.mxu0  ;;  %v4427_v24 = vpop.f32.mrf.mxu1 }
 0x108   : > { %v6061_v2 = vadd.f32 %v4355_v30, %v4354_v39  ;;  %v6063_v48 = vadd.f32 %v4427_v24, %v4426_v42  ;;  %v1852_v39 = vrot.slane %v5908_v9, 1  ;;  %v3850_v42 = vld [vmem:[%s5205_s14 + $0x54] sm:$0xe]  ;;  %v1709_v30 = vor.u32 %v1708_v32, %v1704_v55 }
 0x109   : > { %v4357_v22 = vpop.f32.mrf.mxu0  ;;  %v4429_v6 = vpop.f32.mrf.mxu1  ;;  %v1713_v24 = vrot.slane %v1711_v23, 1  ;;  %v1851_v60 = vrot.slane %v3993_v34, 1  ;;  %v3994_v28 = vcombine.low %v3850_v42, %v5913_v43  ;;  %v1716_v55 = vshrl.u32 %v6077_v37, 16 }
 0x10a   : > { %v1723_v23 = vshll.u32 %v6094_v57, 16  ;;  %v2524_v43 = vadd.f32 %v5996_v20, %v6086_v63 }
 0x10b   : > { %v4358_v25 = vpop.f32.mrf.mxu0  ;;  %v4430_v41 = vpop.f32.mrf.mxu1  ;;  %v1853_v32 = vsel %vm910_vm1, %v1851_v60, %v1852_v39  ;;  %v1854_v42 = vrot.slane %v3994_v28, 1  ;;  %v1855_v39 = vrot.slane %v5930_v51, 1  ;;  %v2529_v51 = vadd.f32 %v6006_v3, %v6086_v63 }
 0x10c   : > { %v6079_v29 = vadd.f32 %v4358_v25, %v4357_v22  ;;  %v6081_v31 = vadd.f32 %v4430_v41, %v4429_v6  ;;  %v1850_v6 = vsel %vm910_vm1, %v1848_v27, %v1849_v11 }
 0x10d   : > { %v4360_v52 = vpop.f32.mrf.mxu0  ;;  %v4448_v38 = vpop.f32.mrf.mxu1  ;;  %3066 = vmatmul.mubr.bf16.gmra.mxu1 %v5994_v56  ;;  %4809 = vmatmul.mubr.bf16.vlgmr.msra.gmra.mxu0 %v5861_v18  ;;  %v1718_v56 = vshll.u32 %v6077_v37, 16  ;;  %v3851_v18 = vld [vmem:[%s5205_s14 + $0x60] sm:$0xe] }
 0x10e   : > { %3073 = vmatprep.mubr.bf16.mxu1 %v1702_v36  ;;  %4812 = vmatprep.mubr.bf16.mxu0 %v1847_v7  ;;  %v3995_v16 = vcombine.low %v3851_v18, %v5935_v54  ;;  %v1714_v36 = vsel %vm653_vm0, %v1709_v30, %v1713_v24  ;;  %v3852_v30 = vld [vmem:[%s5205_s14 + $0x6c] sm:$0xe]  ;;  %v6129_v24 = vld [vmem:[%s5205_s14 + $0xb0] ss:$0 sps:$4 sm:$0x11]   ;;  %v1725_v18 = vrot.slane %v1723_v23, 1 }
 0x10f   : > { %v4361_v61 = vpop.f32.mrf.mxu0  ;;  %v4449_v59 = vpop.f32.mrf.mxu1  ;;  %v1720_v34 = vrot.slane %v1718_v56, 1 }
 0x110   : > { %v6100_v58 = vadd.f32 %v4361_v61, %v4360_v52  ;;  %v4450_v10 = vadd.f32 %v4449_v59, %v4448_v38  ;;  %v6116_v52 = vcombine.low %v3821_v8, %v6104_v1  ;;  %v1858_v61 = vrot.slane %v5952_v50, 1 }
 0x111   : > { %v4363_v9 = vpop.f32.mrf.mxu0  ;;  %v4451_v22 = vpop.f32.mrf.mxu1  ;;  %v1857_v20 = vrot.slane %v3995_v16, 1  ;;  %v1856_v16 = vsel %vm910_vm1, %v1854_v42, %v1855_v39 }
 0x112   : > { %v6108_v7 = vadd.f32 %v4450_v10, %v2521_v46  ;;  %v1730_v46 = vshll.u32 %v6116_v52, 16  ;;  %v3853_v10 = vld [vmem:[%s5205_s14 + $0x78] sm:$0xe] }
 0x113   : > { %v4364_v25 = vpop.f32.mrf.mxu0  ;;  %v4452_v41 = vpop.f32.mrf.mxu1  ;;  %v1859_v23 = vsel %vm910_vm1, %v1857_v20, %v1858_v61  ;;  %v3997_v3 = vcombine.low %v3853_v10, %v5983_v13  ;;  %v1861_v20 = vrot.slane %v5974_v15, 1  ;;  %v2537_v15 = vadd.f32 %v6033_v49, %v6086_v63 }
 0x114   : > { %v6120_v38 = vadd.f32 %v4364_v25, %v4363_v9  ;;  %v4453_v27 = vadd.f32 %v4452_v41, %v4451_v22  ;;  %v3823_v9 = vld [vmem:[%s5205_s14 + $0xb4] sm:$0xf]  ;;  %v6139_v22 = vld [vmem:[%s5205_s14 + $0xb8] sm:$0xf]  ;;  %v3996_v25 = vcombine.low %v3852_v30, %v5957_v35  ;;  %v1735_v41 = vshll.u32 %v6129_v24, 16 }
 0x115   : > { %v4366_v11 = vpop.f32.mrf.mxu0  ;;  %v4454_v54 = vpop.f32.mrf.mxu1  ;;  %3074 = vmatmul.mubr.bf16.gmra.mxu1 %v6021_v17  ;;  %4813 = vmatmul.mubr.bf16.gmra.mxu0 %v1850_v6  ;;  %v1721_v17 = vor.u32 %v1720_v34, %v1716_v55  ;;  %v2532_v35 = vadd.f32 %v6023_v33, %v6086_v63  ;;  %v1864_v30 = vrot.slane %v6003_v47, 1  ;;  %v1863_v33 = vrot.slane %v3997_v3, 1 }
 0x116   : > { %v6125_v59 = vadd.f32 %v4453_v27, %v2524_v43  ;;  %3081 = vmatprep.mubr.bf16.mxu1 %v1714_v36  ;;  %4816 = vmatprep.mubr.bf16.mxu0 %v1853_v32  ;;  %v1728_v43 = vshrl.u32 %v6116_v52, 16  ;;  %v1732_v27 = vrot.slane %v1730_v46, 1  ;;  %v1860_v61 = vrot.slane %v3996_v25, 1 }
 0x117   : > { %v4367_v60 = vpop.f32.mrf.mxu0  ;;  %v4455_v56 = vpop.f32.mrf.mxu1  ;;  %v1726_v34 = vsel %vm653_vm0, %v1721_v17, %v1725_v18  ;;  %v6164_v17 = vld [vmem:[%s5205_s14 + $0xbc] ss:$0 sps:$4 sm:$0x11]   ;;  %v1737_v10 = vrot.slane %v1735_v41, 1  ;;  %v1865_v41 = vsel %vm910_vm1, %v1863_v33, %v1864_v30  ;;  %v1867_v33 = vrot.slane %v6030_v40, 1 }
 0x118   : > { %v6135_v50 = vadd.f32 %v4367_v60, %v4366_v11  ;;  %v4456_v8 = vadd.f32 %v4455_v56, %v4454_v54  ;;  %v6151_v11 = vcombine.low %v3823_v9, %v6139_v22  ;;  %v3854_v56 = vld [vmem:[%s5205_s14 + $0x84] sm:$0xe]  ;;  %v2545_v40 = vadd.f32 %v6061_v2, %v6086_v63 }
 0x119   : > { %v4369_v6 = vpop.f32.mrf.mxu0  ;;  %v4457_v28 = vpop.f32.mrf.mxu1  ;;  %v3998_v3 = vcombine.low %v3854_v56, %v6012_v14  ;;  %v2540_v14 = vadd.f32 %v6049_v4, %v6086_v63  ;;  %v1870_v4 = vrot.slane %v6058_v62, 1 }
 0x11a   : > { %v6143_v55 = vadd.f32 %v4456_v8, %v2529_v51  ;;  %v1742_v51 = vshll.u32 %v6151_v11, 16  ;;  %v3855_v8 = vld [vmem:[%s5205_s14 + $0x90] sm:$0xe] }
 0x11b   : > { %v4370_v36 = vpop.f32.mrf.mxu0  ;;  %v4458_v32 = vpop.f32.mrf.mxu1  ;;  %v3999_v49 = vcombine.low %v3855_v8, %v6039_v12  ;;  %v1866_v30 = vrot.slane %v3998_v3, 1 }
 0x11c   : > { %v6155_v54 = vadd.f32 %v4370_v36, %v4369_v6  ;;  %v4459_v42 = vadd.f32 %v4458_v32, %v4457_v28  ;;  %v3825_v6 = vld [vmem:[%s5205_s14 + $0xc0] sm:$0xf]  ;;  %v6174_v28 = vld [vmem:[%s5205_s14 + $0xc4] sm:$0xf]  ;;  %v1747_v32 = vshll.u32 %v6164_v17, 16 }
 0x11d   : > { %v4372_v39 = vpop.f32.mrf.mxu0  ;;  %v4460_v13 = vpop.f32.mrf.mxu1  ;;  %3082 = vmatmul.mubr.bf16.gmra.mxu1 %v6047_v44  ;;  %4817 = vmatmul.mubr.bf16.gmra.mxu0 %v1856_v16  ;;  %v1733_v44 = vor.u32 %v1732_v27, %v1728_v43 }
 0x11e   : > { %v6160_v60 = vadd.f32 %v4459_v42, %v2532_v35  ;;  %3089 = vmatprep.mubr.bf16.mxu1 %v1726_v34  ;;  %4820 = vmatprep.mubr.bf16.mxu0 %v1859_v23  ;;  %v1862_v23 = vsel %vm910_vm1, %v1860_v61, %v1861_v20  ;;  %v1740_v35 = vshrl.u32 %v6151_v11, 16  ;;  %v1744_v42 = vrot.slane %v1742_v51, 1 }
 0x11f   : > { %v4373_v18 = vpop.f32.mrf.mxu0  ;;  %v4461_v46 = vpop.f32.mrf.mxu1  ;;  %v1738_v27 = vsel %vm653_vm0, %v1733_v44, %v1737_v10  ;;  %v3857_v44 = vld [vmem:[%s5205_s14 + $0xa8] sm:$0xe] }
 0x120   : > { %v6170_v47 = vadd.f32 %v4373_v18, %v4372_v39  ;;  %v4462_v9 = vadd.f32 %v4461_v46, %v4460_v13  ;;  %v6186_v39 = vcombine.low %v3825_v6, %v6174_v28  ;;  %v1869_v18 = vrot.slane %v3999_v49, 1  ;;  %v3856_v46 = vld [vmem:[%s5205_s14 + $0x9c] sm:$0xe] }
 0x121   : > { %v4375_v16 = vpop.f32.mrf.mxu0  ;;  %v4463_v25 = vpop.f32.mrf.mxu1  ;;  %v1745_v8 = vor.u32 %v1744_v42, %v1740_v35  ;;  %v4000_v49 = vcombine.low %v3856_v46, %v6068_v21  ;;  %v4001_v2 = vcombine.low %v3857_v44, %v6104_v1  ;;  %v2548_v21 = vadd.f32 %v6079_v29, %v6086_v63  ;;  %v3858_v29 = vld [vmem:[%s5205_s14 + $0xb4] sm:$0xe] }
 0x122   : > { %v6178_v36 = vadd.f32 %v4462_v9, %v2537_v15  ;;  %v1749_v15 = vrot.slane %v1747_v32, 1  ;;  %v1754_v9 = vshll.u32 %v6186_v39, 16 }
 0x123   : > { %v4376_v34 = vpop.f32.mrf.mxu0  ;;  %v4464_v43 = vpop.f32.mrf.mxu1  ;;  %v1875_v44 = vrot.slane %v4001_v2, 1 }
 0x124   : > { %v6190_v13 = vadd.f32 %v4376_v34, %v4375_v16  ;;  %v4465_v61 = vadd.f32 %v4464_v43, %v4463_v25  ;;  %v3827_v25 = vld [vmem:[%s5205_s14 + $0xcc] sm:$0xf]  ;;  %v1871_v34 = vsel %vm910_vm1, %v1869_v18, %v1870_v4  ;;  %v1752_v43 = vshrl.u32 %v6186_v39, 16 }
 0x125   : > { %v4378_v20 = vpop.f32.mrf.mxu0  ;;  %v4466_v12 = vpop.f32.mrf.mxu1  ;;  %3090 = vmatmul.mubr.bf16.gmra.mxu1 %v6077_v37  ;;  %4821 = vmatmul.mubr.bf16.gmra.mxu0 %v1862_v23  ;;  %v6200_v37 = vld [vmem:[%s5205_s14 + $0xc8] ss:$0 sps:$4 sm:$0x11]   ;;  %v6209_v23 = vld [vmem:[%s5205_s14 + $0xd0] sm:$0xf]  ;;  %v1750_v42 = vsel %vm653_vm0, %v1745_v8, %v1749_v15  ;;  %v1872_v18 = vrot.slane %v4000_v49, 1 }
 0x126   : > { %v6194_v56 = vadd.f32 %v4465_v61, %v2540_v14  ;;  %3097 = vmatprep.mubr.bf16.mxu1 %v1738_v27  ;;  %4824 = vmatprep.mubr.bf16.mxu0 %v1865_v41  ;;  %v1868_v41 = vsel %vm910_vm1, %v1866_v30, %v1867_v33  ;;  %v1756_v14 = vrot.slane %v1754_v9, 1  ;;  %v1759_v61 = vshll.u32 %v6200_v37, 16 }
 0x127   : > { %v4379_v10 = vpop.f32.mrf.mxu0  ;;  %v4467_v51 = vpop.f32.mrf.mxu1  ;;  %v1873_v4 = vrot.slane %v6094_v57, 1  ;;  %v2553_v57 = vadd.f32 %v6100_v58, %v6086_v63 }
 0x128   : > { %v6205_v6 = vadd.f32 %v4379_v10, %v4378_v20  ;;  %v4468_v16 = vadd.f32 %v4467_v51, %v4466_v12  ;;  %v6221_v20 = vcombine.low %v3827_v25, %v6209_v23  ;;  %v1876_v10 = vrot.slane %v6129_v24, 1  ;;  %v3859_v51 = vld [vmem:[%s5205_s14 + $0xc0] sm:$0xe] }
 0x129   : > { %v4381_v62 = vpop.f32.mrf.mxu0  ;;  %v4469_v3 = vpop.f32.mrf.mxu1  ;;  %v1757_v9 = vor.u32 %v1756_v14, %v1752_v43  ;;  %v1874_v24 = vsel %vm910_vm1, %v1872_v18, %v1873_v4  ;;  %v4002_v43 = vcombine.low %v3858_v29, %v6139_v22  ;;  %v4003_v2 = vcombine.low %v3859_v51, %v6174_v28 }
 0x12a   : > { %v6213_v32 = vadd.f32 %v4468_v16, %v2545_v40  ;;  %v1761_v40 = vrot.slane %v1759_v61, 1  ;;  %v6235_v16 = vld [vmem:[%s5205_s14 + $0xd4] ss:$0 sps:$4 sm:$0x11]   ;;  %v1764_v58 = vshrl.u32 %v6221_v20, 16  ;;  %v1879_v4 = vrot.slane %v6164_v17, 1 }
 0x12b   : > { %v4382_v27 = vpop.f32.mrf.mxu0  ;;  %v4470_v35 = vpop.f32.mrf.mxu1  ;;  %v1771_v61 = vshll.u32 %v6235_v16, 16  ;;  %v1878_v18 = vrot.slane %v4002_v43, 1  ;;  %v1881_v51 = vrot.slane %v4003_v2, 1 }
 0x12c   : > { %v6225_v12 = vadd.f32 %v4382_v27, %v4381_v62  ;;  %v4471_v30 = vadd.f32 %v4470_v35, %v4469_v3 }
 0x12d   : > { %v4384_v33 = vpop.f32.mrf.mxu0  ;;  %v4472_v1 = vpop.f32.mrf.mxu1  ;;  %3098 = vmatmul.mubr.bf16.gmra.mxu1 %v6116_v52  ;;  %4825 = vmatmul.mubr.bf16.gmra.mxu0 %v1868_v41  ;;  %v1766_v52 = vshll.u32 %v6221_v20, 16  ;;  %v1880_v17 = vsel %vm910_vm1, %v1878_v18, %v1879_v4 }
 0x12e   : > { %v6229_v46 = vadd.f32 %v4471_v30, %v2548_v21  ;;  %3105 = vmatprep.mubr.bf16.mxu1 %v1750_v42  ;;  %4828 = vmatprep.mubr.bf16.mxu0 %v1871_v34  ;;  %v1877_v34 = vsel %vm910_vm1, %v1875_v44, %v1876_v10  ;;  %v1762_v42 = vsel %vm653_vm0, %v1757_v9, %v1761_v40 }
 0x12f   : > { %v4385_v8 = vpop.f32.mrf.mxu0  ;;  %v4473_v15 = vpop.f32.mrf.mxu1  ;;  %v1768_v14 = vrot.slane %v1766_v52, 1  ;;  %v2556_v21 = vadd.f32 %v6120_v38, %v6086_v63  ;;  %v1773_v38 = vrot.slane %v1771_v61, 1  ;;  %v2561_v9 = vadd.f32 %v6135_v50, %v6086_v63 }
 0x130   : > { %v6240_v25 = vadd.f32 %v4385_v8, %v4384_v33  ;;  %v4474_v62 = vadd.f32 %v4473_v15, %v4472_v1  ;;  %v1882_v8 = vrot.slane %v6200_v37, 1  ;;  %v3860_v15 = vld [vmem:[%s5205_s14 + $0xcc] sm:$0xe]  ;;  %v2564_v50 = vadd.f32 %v6155_v54, %v6086_v63  ;;  %s4112_s14 = sshll.u32 %s6721_s15, 7 }
 0x131   : > { %v4387_v3 = vpop.f32.mrf.mxu0  ;;  %v4475_v41 = vpop.f32.mrf.mxu1  ;;  %v1769_v29 = vor.u32 %v1768_v14, %v1764_v58  ;;  %v1885_v58 = vrot.slane %v6235_v16, 1  ;;  %v2569_v54 = vadd.f32 %v6170_v47, %v6086_v63  ;;  %s6526_s23 = scalar_lea.vmem %s6688_s3, %s4112_s14  ;;  %s6574_s26 = scalar_lea.vmem %s6689_s4, %s4112_s14 }
 0x132   : > { %v6243_v49 = vadd.f32 %v4474_v62, %v2553_v57  ;;  %v1883_v37 = vsel %vm910_vm1, %v1881_v51, %v1882_v8 }
 0x133   : > { %v4388_v27 = vpop.f32.mrf.mxu0  ;;  %v4476_v35 = vpop.f32.mrf.mxu1 }
 0x134   : > { %v6253_v30 = vadd.f32 %v4388_v27, %v4387_v3  ;;  %v4477_v33 = vadd.f32 %v4476_v35, %v4475_v41  ;;  %v4004_v3 = vcombine.low %v3860_v15, %v6209_v23 }
 0x135   : > { %v4390_v1 = vpop.f32.mrf.mxu0  ;;  %v4478_v22 = vpop.f32.mrf.mxu1  ;;  %3106 = vmatmul.mubr.bf16.gmra.mxu1 %v6151_v11  ;;  %4829 = vmatmul.mubr.bf16.gmra.mxu0 %v1874_v24 }
 0x136   : > { %v6256_v28 = vadd.f32 %v4477_v33, %v2556_v21  ;;  %3113 = vmatprep.mubr.bf16.mxu1 %v1762_v42  ;;  %4832 = vmatprep.mubr.bf16.mxu0 %v1877_v34  ;;  %v1774_v34 = vsel %vm653_vm0, %v1769_v29, %v1773_v38  ;;  %v1884_v23 = vrot.slane %v4004_v3, 1 }
 0x137   : > { %v4391_v44 = vpop.f32.mrf.mxu0  ;;  %v4479_v10 = vpop.f32.mrf.mxu1 }
 0x138   : > { %v6263_v11 = vadd.f32 %v4391_v44, %v4390_v1  ;;  %v4480_v40 = vadd.f32 %v4479_v10, %v4478_v22  ;;  %v2572_v10 = vadd.f32 %v6190_v13, %v6086_v63 }
 0x139   : > { %v4393_v52 = vpop.f32.mrf.mxu0  ;;  %v4481_v57 = vpop.f32.mrf.mxu1 }
 0x13a   : > { %v6265_v62 = vadd.f32 %v4480_v40, %v2561_v9  ;;  %v2577_v9 = vadd.f32 %v6205_v6, %v6086_v63 }
 0x13b   : > { %v4394_v41 = vpop.f32.mrf.mxu0  ;;  %v4482_v24 = vpop.f32.mrf.mxu1 }
 0x13c   : > { %v6273_v43 = vadd.f32 %v4394_v41, %v4393_v52  ;;  %v4483_v2 = vadd.f32 %v4482_v24, %v4481_v57 }
 0x13d   : > { %v4396_v27 = vpop.f32.mrf.mxu0  ;;  %v4484_v35 = vpop.f32.mrf.mxu1  ;;  %3114 = vmatmul.mubr.bf16.gmra.mxu1 %v6186_v39  ;;  %4833 = vmatmul.mubr.bf16.gmra.mxu0 %v1880_v17  ;;  %v1886_v39 = vsel %vm910_vm1, %v1884_v23, %v1885_v58 }
 0x13e   : > { %v6276_v42 = vadd.f32 %v4483_v2, %v2564_v50  ;;  %3121 = vmatprep.mubr.bf16.mxu1 %v1774_v34  ;;  %4836 = vmatprep.mubr.bf16.mxu0 %v1883_v37 }
 0x13f   : > { %v4397_v14 = vpop.f32.mrf.mxu0  ;;  %v4485_v61 = vpop.f32.mrf.mxu1 }
 0x140   : > { %v6281_v21 = vadd.f32 %v4397_v14, %v4396_v27  ;;  %v4486_v33 = vadd.f32 %v4485_v61, %v4484_v35  ;;  %v2585_v35 = vadd.f32 %v6240_v25, %v6086_v63 }
 0x141   : > { %v4399_v1 = vpop.f32.mrf.mxu0  ;;  %v4487_v22 = vpop.f32.mrf.mxu1 }
 0x142   : > { %v6283_v18 = vadd.f32 %v4486_v33, %v2569_v54 }
 0x143   : > { %v4400_v4 = vpop.f32.mrf.mxu0  ;;  %v4488_v44 = vpop.f32.mrf.mxu1 }
 0x144   : > { %v6288_v16 = vadd.f32 %v4400_v4, %v4399_v1  ;;  %v4489_v29 = vadd.f32 %v4488_v44, %v4487_v22  ;;  %v2588_v22 = vadd.f32 %v6253_v30, %v6086_v63 }
 0x145   : > { %v4402_v38 = vpop.f32.mrf.mxu0  ;;  %v4490_v51 = vpop.f32.mrf.mxu1  ;;  %3122 = vmatmul.mubr.bf16.gmra.mxu1 %v6221_v20  ;;  %4837 = vmatmul.mubr.bf16.gmra.mxu0 %v1886_v39  ;;  %v2580_v20 = vadd.f32 %v6225_v12, %v6086_v63 }
 0x146   : > { %v6291_v47 = vadd.f32 %v4489_v29, %v2572_v10 }
 0x147   : > { %v4403_v8 = vpop.f32.mrf.mxu0  ;;  %v4491_v15 = vpop.f32.mrf.mxu1 }
 0x148   : > { %v6295_v40 = vadd.f32 %v4403_v8, %v4402_v38  ;;  %v4492_v52 = vadd.f32 %v4491_v15, %v4490_v51 }
 0x149   : > { %v4405_v57 = vpop.f32.mrf.mxu0  ;;  %v4493_v13 = vpop.f32.mrf.mxu1 }
 0x14a   : > { %v6297_v17 = vadd.f32 %v4492_v52, %v2577_v9 }
 0x14b   : > { %v4406_v3 = vpop.f32.mrf.mxu0  ;;  %v4494_v41 = vpop.f32.mrf.mxu1 }
 0x14c   : > { %v6301_v24 = vadd.f32 %v4406_v3, %v4405_v57  ;;  %v4495_v34 = vadd.f32 %v4494_v41, %v4493_v13 }
 0x14d   : > { %v4496_v37 = vpop.f32.mrf.mxu1  ;;  %v4560_v50 = vpop.f32.mrf.mxu0 }
 0x14e   : > { %v6303_v2 = vadd.f32 %v4495_v34, %v2580_v20 }
 0x14f   : > { %v4497_v6 = vpop.f32.mrf.mxu1  ;;  %v4561_v27 = vpop.f32.mrf.mxu0 }
 0x150   : > { %v4498_v23 = vadd.f32 %v4497_v6, %v4496_v37  ;;  %v4562_v58 = vadd.f32 %v4561_v27, %v4560_v50 }
 0x151   : > { %v4499_v14 = vpop.f32.mrf.mxu1  ;;  %v4563_v61 = vpop.f32.mrf.mxu0 }
 0x152   : > { %v6307_v54 = vadd.f32 %v4498_v23, %v2585_v35  ;;  %v6310_v12 = vadd.f32 %v4562_v58, %v6108_v7  ;;  %v2593_v7 = vadd.f32 %v6263_v11, %v6086_v63 }
 0x153   : > { %v4500_v33 = vpop.f32.mrf.mxu1  ;;  %v4564_v1 = vpop.f32.mrf.mxu0 }
 0x154   : > { %v4501_v39 = vadd.f32 %v4500_v33, %v4499_v14  ;;  %v4565_v4 = vadd.f32 %v4564_v1, %v4563_v61 }
 0x155   : > { %v4502_v44 = vpop.f32.mrf.mxu1  ;;  %v4566_v10 = vpop.f32.mrf.mxu0 }
 0x156   : > { %v6314_v29 = vadd.f32 %v4501_v39, %v2588_v22  ;;  %v6317_v25 = vadd.f32 %v4565_v4, %v6125_v59  ;;  %v2596_v59 = vadd.f32 %v6273_v43, %v6086_v63 }
 0x157   : > { %v4503_v38 = vpop.f32.mrf.mxu1  ;;  %v4567_v51 = vpop.f32.mrf.mxu0 }
 0x158   : > { %v4504_v8 = vadd.f32 %v4503_v38, %v4502_v44  ;;  %v4568_v15 = vadd.f32 %v4567_v51, %v4566_v10 }
 0x159   : > { %v4505_v9 = vpop.f32.mrf.mxu1  ;;  %v4569_v52 = vpop.f32.mrf.mxu0 }
 0x15a   : > { %v6321_v57 = vadd.f32 %v4504_v8, %v2593_v7  ;;  %v6324_v30 = vadd.f32 %v4568_v15, %v6143_v55  ;;  %v2601_v55 = vadd.f32 %v6281_v21, %v6086_v63 }
 0x15b   : > { %v4506_v13 = vpop.f32.mrf.mxu1  ;;  %v4570_v3 = vpop.f32.mrf.mxu0 }
 0x15c   : > { %v4507_v41 = vadd.f32 %v4506_v13, %v4505_v9  ;;  %v4571_v20 = vadd.f32 %v4570_v3, %v4569_v52 }
 0x15d   : > { %v4508_v34 = vpop.f32.mrf.mxu1  ;;  %v4572_v37 = vpop.f32.mrf.mxu0 }
 0x15e   : > { %v6328_v50 = vadd.f32 %v4507_v41, %v2596_v59  ;;  %v6331_v11 = vadd.f32 %v4571_v20, %v6160_v60  ;;  %v2604_v60 = vadd.f32 %v6288_v16, %v6086_v63 }
 0x15f   : > { %v4509_v6 = vpop.f32.mrf.mxu1  ;;  %v4573_v27 = vpop.f32.mrf.mxu0 }
 0x160   : > { %v4510_v35 = vadd.f32 %v4509_v6, %v4508_v34  ;;  %v4574_v23 = vadd.f32 %v4573_v27, %v4572_v37 }
 0x161   : > { %v4511_v58 = vpop.f32.mrf.mxu1  ;;  %v4575_v14 = vpop.f32.mrf.mxu0 }
 0x162   : > { %v6335_v61 = vadd.f32 %v4510_v35, %v2601_v55  ;;  %v6338_v43 = vadd.f32 %v4574_v23, %v6178_v36  ;;  %v2609_v36 = vadd.f32 %v6295_v40, %v6086_v63 }
 0x163   : > { %v4512_v33 = vpop.f32.mrf.mxu1  ;;  %v4576_v1 = vpop.f32.mrf.mxu0 }
 0x164   : > { %v4513_v22 = vadd.f32 %v4512_v33, %v4511_v58  ;;  %v4577_v39 = vadd.f32 %v4576_v1, %v4575_v14 }
 0x165   : > { %v4514_v4 = vpop.f32.mrf.mxu1  ;;  %v4578_v44 = vpop.f32.mrf.mxu0 }
 0x166   : > { %v6342_v10 = vadd.f32 %v4513_v22, %v2604_v60  ;;  %v6345_v21 = vadd.f32 %v4577_v39, %v6194_v56  ;;  %v2612_v56 = vadd.f32 %v6301_v24, %v6086_v63 }
 0x167   : > { %v4515_v38 = vpop.f32.mrf.mxu1  ;;  %v4579_v51 = vpop.f32.mrf.mxu0 }
 0x168   : > { %v4516_v7 = vadd.f32 %v4515_v38, %v4514_v4  ;;  %v4580_v8 = vadd.f32 %v4579_v51, %v4578_v44 }
 0x169   : > { %v4517_v15 = vpop.f32.mrf.mxu1  ;;  %v4581_v9 = vpop.f32.mrf.mxu0 }
 0x16a   : > { %v6349_v52 = vadd.f32 %v4516_v7, %v2609_v36  ;;  %v6352_v16 = vadd.f32 %v4580_v8, %v6213_v32  ;;  %v2617_v32 = vadd.f32 %v5979_v19, %v6086_v63 }
 0x16b   : > { %v4518_v13 = vpop.f32.mrf.mxu1  ;;  %v4582_v3 = vpop.f32.mrf.mxu0 }
 0x16c   : > { %v4519_v59 = vadd.f32 %v4518_v13, %v4517_v15  ;;  %v4583_v41 = vadd.f32 %v4582_v3, %v4581_v9 }
 0x16d   : > { %v4520_v20 = vpop.f32.mrf.mxu1  ;;  %v4584_v34 = vpop.f32.mrf.mxu0 }
 0x16e   : > { %v6356_v37 = vadd.f32 %v4519_v59, %v2612_v56  ;;  %v6359_v40 = vadd.f32 %v4583_v41, %v6229_v46  ;;  %v2620_v46 = vadd.f32 %v5998_v26, %v6086_v63 }
 0x16f   : > { %v4521_v6 = vpop.f32.mrf.mxu1  ;;  %v4585_v27 = vpop.f32.mrf.mxu0 }
 0x170   : > { %v4522_v55 = vadd.f32 %v4521_v6, %v4520_v20  ;;  %v4586_v35 = vadd.f32 %v4585_v27, %v4584_v34 }
 0x171   : > { %v4523_v23 = vpop.f32.mrf.mxu1  ;;  %v4587_v58 = vpop.f32.mrf.mxu0 }
 0x172   : > { %v6363_v14 = vadd.f32 %v4522_v55, %v2617_v32  ;;  %v6366_v24 = vadd.f32 %v4586_v35, %v6243_v49  ;;  %v2625_v49 = vadd.f32 %v6008_v53, %v6086_v63 }
 0x173   : > { %v4524_v33 = vpop.f32.mrf.mxu1  ;;  %v4588_v1 = vpop.f32.mrf.mxu0 }
 0x174   : > { %v4525_v60 = vadd.f32 %v4524_v33, %v4523_v23  ;;  %v4589_v22 = vadd.f32 %v4588_v1, %v4587_v58 }
 0x175   : > { %v4526_v39 = vpop.f32.mrf.mxu1  ;;  %v4590_v4 = vpop.f32.mrf.mxu0 }
 0x176   : > { %v6370_v44 = vadd.f32 %v4525_v60, %v2620_v46  ;;  %v6373_v19 = vadd.f32 %v4589_v22, %v6256_v28  ;;  %v2628_v28 = vadd.f32 %v6025_v0, %v6086_v63 }
 0x177   : > { %v4527_v38 = vpop.f32.mrf.mxu1  ;;  %v4591_v51 = vpop.f32.mrf.mxu0 }
 0x178   : > { %v4528_v36 = vadd.f32 %v4527_v38, %v4526_v39  ;;  %v4592_v7 = vadd.f32 %v4591_v51, %v4590_v4 }
 0x179   : > { %v4529_v8 = vpop.f32.mrf.mxu1  ;;  %v4593_v15 = vpop.f32.mrf.mxu0 }
 0x17a   : > { %v6377_v9 = vadd.f32 %v4528_v36, %v2625_v49  ;;  %v6380_v26 = vadd.f32 %v4592_v7, %v6265_v62  ;;  %v2633_v62 = vadd.f32 %v6035_v5, %v6086_v63 }
 0x17b   : > { %v4530_v13 = vpop.f32.mrf.mxu1  ;;  %v4594_v3 = vpop.f32.mrf.mxu0 }
 0x17c   : > { %v4531_v56 = vadd.f32 %v4530_v13, %v4529_v8  ;;  %v4595_v59 = vadd.f32 %v4594_v3, %v4593_v15 }
 0x17d   : > { %v4532_v41 = vpop.f32.mrf.mxu1  ;;  %v4596_v20 = vpop.f32.mrf.mxu0 }
 0x17e   : > { %v6384_v34 = vadd.f32 %v4531_v56, %v2628_v28  ;;  %v6387_v53 = vadd.f32 %v4595_v59, %v6276_v42  ;;  %v2636_v42 = vadd.f32 %v6051_v45, %v6086_v63 }
 0x17f   : > { %v4533_v6 = vpop.f32.mrf.mxu1  ;;  %v4597_v27 = vpop.f32.mrf.mxu0 }
 0x180   : > { %v4534_v32 = vadd.f32 %v4533_v6, %v4532_v41  ;;  %v4598_v55 = vadd.f32 %v4597_v27, %v4596_v20 }
 0x181   : > { %v4535_v35 = vpop.f32.mrf.mxu1  ;;  %v4599_v23 = vpop.f32.mrf.mxu0 }
 0x182   : > { %v6391_v58 = vadd.f32 %v4534_v32, %v2633_v62  ;;  %v6394_v0 = vadd.f32 %v4598_v55, %v6283_v18  ;;  %v2641_v18 = vadd.f32 %v6063_v48, %v6086_v63 }
 0x183   : > { %v4536_v33 = vpop.f32.mrf.mxu1  ;;  %v4600_v1 = vpop.f32.mrf.mxu0 }
 0x184   : > { %v4537_v46 = vadd.f32 %v4536_v33, %v4535_v35  ;;  %v4601_v60 = vadd.f32 %v4600_v1, %v4599_v23 }
 0x185   : > { %v4538_v22 = vpop.f32.mrf.mxu1  ;;  %v4602_v39 = vpop.f32.mrf.mxu0 }
 0x186   : > { %v6398_v4 = vadd.f32 %v4537_v46, %v2636_v42  ;;  %v6401_v5 = vadd.f32 %v4601_v60, %v6291_v47  ;;  %v2644_v47 = vadd.f32 %v6081_v31, %v6086_v63 }
 0x187   : > { %v4539_v38 = vpop.f32.mrf.mxu1  ;;  %v4603_v51 = vpop.f32.mrf.mxu0 }
 0x188   : > { %v4540_v49 = vadd.f32 %v4539_v38, %v4538_v22  ;;  %v4604_v36 = vadd.f32 %v4603_v51, %v4602_v39 }
 0x189   : > { %v4541_v7 = vpop.f32.mrf.mxu1  ;;  %v4605_v8 = vpop.f32.mrf.mxu0 }
 0x18a   : > { %v6405_v15 = vadd.f32 %v4540_v49, %v2641_v18  ;;  %v6408_v45 = vadd.f32 %v4604_v36, %v6297_v17 }
 0x18b   : > { %v4542_v13 = vpop.f32.mrf.mxu1  ;;  %v4606_v3 = vpop.f32.mrf.mxu0 }
 0x18c   : > { %v4543_v28 = vadd.f32 %v4542_v13, %v4541_v7  ;;  %v4607_v56 = vadd.f32 %v4606_v3, %v4605_v8 }
 0x18d   : > { %v4608_v59 = vpop.f32.mrf.mxu0  ;;  %v4672_v41 = vpop.f32.mrf.mxu1 }
 0x18e   : > { %v6412_v20 = vadd.f32 %v4543_v28, %v2644_v47  ;;  %v6415_v48 = vadd.f32 %v4607_v56, %v6303_v2 }
 0x18f   : > { %v4609_v6 = vpop.f32.mrf.mxu0  ;;  %v4673_v27 = vpop.f32.mrf.mxu1 }
 0x190   : > { %v4610_v62 = vadd.f32 %v4609_v6, %v4608_v59  ;;  %v4674_v32 = vadd.f32 %v4673_v27, %v4672_v41 }
 0x191   : > { %v4611_v17 = vpop.f32.mrf.mxu0  ;;  %v6417_v55 = vpop.f32.mrf.mxu1 }
 0x192   : > { %v6420_v35 = vadd.f32 %v4610_v62, %v6307_v54  ;;  %v6423_v31 = vadd.f32 %v4674_v32, %v6310_v12 }
 0x193   : > { %v4612_v63 = vpop.f32.mrf.mxu0  ;;  %v6425_v23 = vpop.f32.mrf.mxu1 }
 0x194   : > { %v4613_v33 = vadd.f32 %v4612_v63, %v4611_v17 }
 0x195   : > { %v4614_v1 = vpop.f32.mrf.mxu0  ;;  %v6427_v2 = vpop.f32.mrf.mxu1 }
 0x196   : > { %v6430_v42 = vadd.f32 %v4613_v33, %v6314_v29 }
 0x197   : > { %v4615_v46 = vpop.f32.mrf.mxu0  ;;  %v6432_v60 = vpop.f32.mrf.mxu1 }
 0x198   : > { %6690 = vst [vmem:[#allocation2_spill] sm:$0xff] %v6430_v42  ;;  %v4616_v22 = vadd.f32 %v4615_v46, %v4614_v1 }
 0x199   : > { %v4617_v39 = vpop.f32.mrf.mxu0  ;;  %v6434_v54 = vpop.f32.mrf.mxu1 }
 0x19a   : > { %v6437_v12 = vadd.f32 %v4616_v22, %v6321_v57 }
 0x19b   : > { %v4618_v38 = vpop.f32.mrf.mxu0  ;;  %v6439_v51 = vpop.f32.mrf.mxu1 }
 0x19c   : > { %v4619_v18 = vadd.f32 %v4618_v38, %v4617_v39 }
 0x19d   : > { %v4620_v49 = vpop.f32.mrf.mxu0  ;;  %v6441_v36 = vpop.f32.mrf.mxu1 }
 0x19e   : > { %v6444_v29 = vadd.f32 %v4619_v18, %v6328_v50 }
 0x19f   : > { %v4621_v7 = vpop.f32.mrf.mxu0  ;;  %v6446_v8 = vpop.f32.mrf.mxu1 }
 0x1a0   : > { %v4622_v13 = vadd.f32 %v4621_v7, %v4620_v49 }
 0x1a1   : > { %v4623_v3 = vpop.f32.mrf.mxu0  ;;  %v6448_v47 = vpop.f32.mrf.mxu1 }
 0x1a2   : > { %v6451_v57 = vadd.f32 %v4622_v13, %v6335_v61 }
 0x1a3   : > { %v4624_v28 = vpop.f32.mrf.mxu0  ;;  %v6453_v56 = vpop.f32.mrf.mxu1 }
 0x1a4   : > { %6691 = vst [vmem:[#allocation3_spill] sm:$0xff] %v6451_v57  ;;  %v4625_v59 = vadd.f32 %v4624_v28, %v4623_v3  ;;  %v4677_v57 = vadd.f32 %v6425_v23, %v6417_v55 }
 0x1a5   : > { %v4626_v41 = vpop.f32.mrf.mxu0  ;;  %v6455_v6 = vpop.f32.mrf.mxu1 }
 0x1a6   : > { %v6458_v50 = vadd.f32 %v4625_v59, %v6342_v10 }
 0x1a7   : > { %v4627_v27 = vpop.f32.mrf.mxu0  ;;  %v6460_v62 = vpop.f32.mrf.mxu1 }
 0x1a8   : > { %6692 = vst [vmem:[#allocation4_spill] sm:$0xff] %v6458_v50  ;;  %v4628_v32 = vadd.f32 %v4627_v27, %v4626_v41 }
 0x1a9   : > { %v4629_v17 = vpop.f32.mrf.mxu0  ;;  %v6462_v63 = vpop.f32.mrf.mxu1 }
 0x1aa   : > { %v6465_v61 = vadd.f32 %v4628_v32, %v6349_v52 }
 0x1ab   : > { %v4630_v33 = vpop.f32.mrf.mxu0  ;;  %v6467_v1 = vpop.f32.mrf.mxu1 }
 0x1ac   : > { %6693 = vst [vmem:[#allocation5_spill] sm:$0xff] %v6465_v61  ;;  %v4631_v46 = vadd.f32 %v4630_v33, %v4629_v17 }
 0x1ad   : > { %v4632_v22 = vpop.f32.mrf.mxu0  ;;  %v6469_v39 = vpop.f32.mrf.mxu1 }
 0x1ae   : > { %v6472_v10 = vadd.f32 %v4631_v46, %v6356_v37 }
 0x1af   : > { %v4633_v38 = vpop.f32.mrf.mxu0  ;;  %v6474_v18 = vpop.f32.mrf.mxu1 }
 0x1b0   : > { %6694 = vst [vmem:[#allocation6_spill] sm:$0xff] %v6472_v10  ;;  %v4634_v49 = vadd.f32 %v4633_v38, %v4632_v22 }
 0x1b1   : > { %v4635_v7 = vpop.f32.mrf.mxu0  ;;  %v6476_v13 = vpop.f32.mrf.mxu1 }
 0x1b2   : > { %v6479_v52 = vadd.f32 %v4634_v49, %v6363_v14 }
 0x1b3   : > { %v4636_v3 = vpop.f32.mrf.mxu0  ;;  %v6481_v28 = vpop.f32.mrf.mxu1 }
 0x1b4   : > { %6695 = vst [vmem:[#allocation7_spill] sm:$0xff] %v6479_v52  ;;  %v4637_v59 = vadd.f32 %v4636_v3, %v4635_v7 }
 0x1b5   : > { %v4638_v41 = vpop.f32.mrf.mxu0  ;;  %v6483_v27 = vpop.f32.mrf.mxu1 }
 0x1b6   : > { %v6486_v37 = vadd.f32 %v4637_v59, %v6370_v44 }
 0x1b7   : > { %v4639_v32 = vpop.f32.mrf.mxu0  ;;  %v6488_v17 = vpop.f32.mrf.mxu1 }
 0x1b8   : > { %6696 = vst [vmem:[#allocation8_spill] sm:$0xff] %v6486_v37  ;;  %v4640_v33 = vadd.f32 %v4639_v32, %v4638_v41 }
 0x1b9   : > { %v4641_v46 = vpop.f32.mrf.mxu0  ;;  %v6490_v22 = vpop.f32.mrf.mxu1 }
 0x1ba   : > { %v6493_v14 = vadd.f32 %v4640_v33, %v6377_v9 }
 0x1bb   : > { %v4642_v38 = vpop.f32.mrf.mxu0  ;;  %v6495_v49 = vpop.f32.mrf.mxu1 }
 0x1bc   : > { %6697 = vst [vmem:[#allocation9_spill] sm:$0xff] %v6493_v14  ;;  %v4643_v7 = vadd.f32 %v4642_v38, %v4641_v46 }
 0x1bd   : > { %v4644_v3 = vpop.f32.mrf.mxu0  ;;  %v6497_v52 = vpop.f32.mrf.mxu1 }
 0x1be   : > { %v6500_v44 = vadd.f32 %v4643_v7, %v6384_v34 }
 0x1bf   : > { %v4645_v59 = vpop.f32.mrf.mxu0  ;;  %v6502_v37 = vpop.f32.mrf.mxu1 }
 0x1c0   : > { %6698 = vst [vmem:[#allocation10_spill] sm:$0xff] %v6500_v44  ;;  %v4646_v41 = vadd.f32 %v4645_v59, %v4644_v3  ;;  %v4680_v3 = vadd.f32 %v6432_v60, %v6427_v2  ;;  %v4683_v2 = vadd.f32 %v6439_v51, %v6434_v54 }
 0x1c1   : > { %v4647_v32 = vpop.f32.mrf.mxu0  ;;  %v6504_v50 = vpop.f32.mrf.mxu1 }
 0x1c2   : > { %v6507_v9 = vadd.f32 %v4646_v41, %v6391_v58 }
 0x1c3   : > { %v4648_v33 = vpop.f32.mrf.mxu0  ;;  %v6509_v14 = vpop.f32.mrf.mxu1 }
 0x1c4   : > { %6699 = vst [vmem:[#allocation11_spill] sm:$0xff] %v6507_v9  ;;  %v4649_v46 = vadd.f32 %v4648_v33, %v4647_v32 }
 0x1c5   : > { %v4650_v38 = vpop.f32.mrf.mxu0  ;;  %v6511_v10 = vpop.f32.mrf.mxu1 }
 0x1c6   : > { %v6515_v34 = vadd.f32 %v4649_v46, %v6398_v4  ;;  %v4290_v46 = vld [vmem:[%s6526_s23 + $0x8] sm:$0xff]  }
 0x1c7   : > { %v4651_v7 = vpop.f32.mrf.mxu0  ;;  %v6517_v44 = vpop.f32.mrf.mxu1 }
 0x1c8   : > { %6700 = vst [vmem:[#allocation12_spill] sm:$0xff] %v6515_v34  ;;  %v4652_v59 = vadd.f32 %v4651_v7, %v4650_v38  ;;  %v3012_v38 = vadd.f32 %v4680_v3, %v6324_v30  ;;  %v4147_v7 = vld [vmem:[%s6526_s23] sm:$0xff]   ;;  %v4692_v30 = vadd.f32 %v6460_v62, %v6455_v6  ;;  %v3015_v3 = vadd.f32 %v4683_v2, %v6331_v11  ;;  %v4291_v2 = vld [vmem:[%s6526_s23 + $0x10] sm:$0xff]  }
 0x1c9   : > { %v4653_v58 = vpop.f32.mrf.mxu0  ;;  %v6528_v41 = vpop.f32.mrf.mxu1  ;;  %v4148_v54 = vunpack.c.l.bf16 %v4147_v7  ;;  %v4695_v6 = vadd.f32 %v6467_v1, %v6462_v63 }
 0x1ca   : > { %v6531_v4 = vadd.f32 %v4652_v59, %v6405_v15 }
 0x1cb   : > { %v4654_v32 = vpop.f32.mrf.mxu0  ;;  %v6533_v33 = vpop.f32.mrf.mxu1 }
 0x1cc   : > { %6701 = vst [vmem:[#allocation13_spill] sm:$0xff] %v6531_v4  ;;  %v4655_v60 = vadd.f32 %v4654_v32, %v4653_v58  ;;  %v4152_v4 = vunpack.c.l.bf16 %v4290_v46  ;;  %v4153_v58 = vunpack.c.h.bf16 %v4290_v46 }
 0x1cd   : > { %v6540_v34 = vpop.f32.mrf.mxu1  ;;  %v4810_v9 = vpop.f32.mrf.mxu0 }
 0x1ce   : > { %v6545_v15 = vadd.f32 %v4655_v60, %v6412_v20  ;;  %v3173_v59 = vadd.f32 %v4810_v9, %v3012_v38  ;;  %v3007_v9 = vadd.f32 %v4677_v57, %v6317_v25  ;;  %v4149_v60 = vunpack.c.h.bf16 %v4147_v7  ;;  %v4292_v38 = vld [vmem:[%s6526_s23 + $0x18] sm:$0xff]  }
 0x1cf   : > { %v6547_v61 = vpop.f32.mrf.mxu1  ;;  %v3164_v42 = vpop.f32.mrf.mxu0  ;;  %v4689_v25 = vadd.f32 %v6453_v56, %v6448_v47  ;;  %v4156_v56 = vunpack.c.l.bf16 %v4291_v2 }
 0x1d0   : > { %6702 = vst [vmem:[#allocation14_spill] sm:$0xff] %v6545_v15  ;;  %v3165_v51 = vadd.f32 %v3164_v42, %v6423_v31  ;;  %v3357_v23 = vadd.f32 %v4152_v4, %v3173_v59  ;;  %v4686_v15 = vadd.f32 %v6446_v8, %v6441_v36  ;;  %v3028_v4 = vadd.f32 %v4692_v30, %v6352_v16 }
 0x1d1   : > { %v6553_v55 = vpop.f32.mrf.mxu1  ;;  %v4811_v20 = vpop.f32.mrf.mxu0  ;;  %v4160_v36 = vunpack.c.l.bf16 %v4292_v38  ;;  %v3031_v30 = vadd.f32 %v4695_v6, %v6359_v40  ;;  %v3023_v40 = vadd.f32 %v4689_v25, %v6345_v21  ;;  %v4701_v21 = vadd.f32 %v6481_v28, %v6476_v13 }
 0x1d2   : > { %v3176_v32 = vadd.f32 %v4811_v20, %v3015_v3  ;;  %v3355_v42 = vadd.f32 %v4148_v54, %v3165_v51  ;;  %v3389_v8 = vmax.f32 %v3357_v23, 0.0  ;;  %v3020_v54 = vadd.f32 %v4686_v15, %v6338_v43 }
 0x1d3   : > { %v6561_v31 = vpop.f32.mrf.mxu1  ;;  %v3167_v11 = vpop.f32.mrf.mxu0  ;;  %v4161_v51 = vunpack.c.h.bf16 %v4292_v38  ;;  %v4704_v3 = vadd.f32 %v6488_v17, %v6483_v27  ;;  %v4294_v38 = vld [vmem:[%s6526_s23 + $0x28] sm:$0xff]   ;;  %v4698_v27 = vadd.f32 %v6474_v18, %v6469_v39  ;;  %v4707_v17 = vadd.f32 %v6495_v49, %v6490_v22 }
 0x1d4   : > { %v3358_v62 = vadd.f32 %v4153_v58, %v3176_v32  ;;  %v3168_v46 = vadd.f32 %v3167_v11, %v3007_v9  ;;  %v3387_v58 = vmax.f32 %v3355_v42, 0.0  ;;  %v4157_v11 = vunpack.c.h.bf16 %v4291_v2 }
 0x1d5   : > { %v6567_v57 = vpop.f32.mrf.mxu1  ;;  %v4814_v7 = vpop.f32.mrf.mxu0  ;;  %v4168_v39 = vunpack.c.l.bf16 %v4294_v38  ;;  %v4716_v13 = vadd.f32 %v6517_v44, %v6511_v10  ;;  %v4710_v10 = vadd.f32 %v6502_v37, %v6497_v52  ;;  %v4719_v44 = vadd.f32 %v6533_v33, %v6528_v41 }
 0x1d6   : > { %v3390_v59 = vmax.f32 %v3358_v62, 0.0  ;;  %v3356_v63 = vadd.f32 %v4149_v60, %v3168_v46  ;;  %v3189_v1 = vadd.f32 %v4814_v7, %v3028_v4  ;;  %v3044_v7 = vadd.f32 %v4704_v3, %v6380_v26 }
 0x1d7   : > { %v6576_v16 = vpop.f32.mrf.mxu1  ;;  %v3180_v47 = vpop.f32.mrf.mxu0  ;;  %v3047_v26 = vadd.f32 %v4707_v17, %v6387_v53  ;;  %v3039_v53 = vadd.f32 %v4701_v21, %v6373_v19  ;;  %v4295_v17 = vld [vmem:[%s6526_s23 + $0x30] sm:$0xff]   ;;  %v4713_v19 = vadd.f32 %v6509_v14, %v6504_v50 }
 0x1d8   : > { %v4218_v20 = vpack.c.bf16 %v3390_v59, %v3389_v8  ;;  %v3388_v23 = vmax.f32 %v3356_v63, 0.0  ;;  %v3181_v32 = vadd.f32 %v3180_v47, %v3020_v54  ;;  %v3361_v15 = vadd.f32 %v4160_v36, %v3189_v1  ;;  %v4293_v36 = vld [vmem:[%s6526_s23 + $0x20] sm:$0xff]  }
 0x1d9   : > { %v6582_v9 = vpop.f32.mrf.mxu1  ;;  %v4815_v60 = vpop.f32.mrf.mxu0  ;;  %v3036_v1 = vadd.f32 %v4698_v27, %v6366_v24  ;;  %v4164_v47 = vunpack.c.l.bf16 %v4293_v36  ;;  %v3060_v27 = vadd.f32 %v4716_v13, %v6408_v45  ;;  %v4172_v21 = vunpack.c.l.bf16 %v4295_v17 }
 0x1da   : > { %4305 = vst [vmem:[%s6574_s26 + $0x8] sm:$0xff] %v4218_v20   ;;  %v4213_v43 = vpack.c.bf16 %v3388_v23, %v3387_v58  ;;  %v3192_v62 = vadd.f32 %v4815_v60, %v3031_v30  ;;  %v3359_v46 = vadd.f32 %v4156_v56, %v3181_v32  ;;  %v3393_v18 = vmax.f32 %v3361_v15, 0.0 }
 0x1db   : > { %v6591_v6 = vpop.f32.mrf.mxu1  ;;  %v3183_v42 = vpop.f32.mrf.mxu0  ;;  %v4169_v56 = vunpack.c.h.bf16 %v4294_v38  ;;  %v4165_v23 = vunpack.c.h.bf16 %v4293_v36  ;;  %v3063_v45 = vadd.f32 %v4719_v44, %v6415_v48  ;;  %v4728_v50 = vadd.f32 %v6576_v16, %v6567_v57  ;;  %v4298_v48 = vld [vmem:[%s6526_s23 + $0x48] sm:$0xff]  }
 0x1dc   : > { %4214 = vst [vmem:[%s6574_s26] sm:$0xff] %v4213_v43   ;;  %v3362_v4 = vadd.f32 %v4161_v51, %v3192_v62  ;;  %v3184_v2 = vadd.f32 %v3183_v42, %v3023_v40  ;;  %v3391_v28 = vmax.f32 %v3359_v46, 0.0  ;;  %v4731_v57 = vadd.f32 %v6591_v6, %v6582_v9 }
 0x1dd   : > { %v6598_v25 = vpop.f32.mrf.mxu1  ;;  %v4818_v8 = vpop.f32.mrf.mxu0  ;;  %v4185_v44 = vunpack.c.h.bf16 %v4298_v48 }
 0x1de   : > { %v3394_v59 = vmax.f32 %v3362_v4, 0.0  ;;  %v3360_v22 = vadd.f32 %v4157_v11, %v3184_v2  ;;  %v3205_v49 = vadd.f32 %v4818_v8, %v3044_v7  ;;  %v4296_v11 = vld [vmem:[%s6526_s23 + $0x38] sm:$0xff]   ;;  %v3052_v7 = vadd.f32 %v4710_v10, %v6394_v0 }
 0x1df   : > { %v6600_v63 = vpop.f32.mrf.mxu1  ;;  %v3196_v54 = vpop.f32.mrf.mxu0  ;;  %v4176_v4 = vunpack.c.l.bf16 %v4296_v11  ;;  %v4177_v8 = vunpack.c.h.bf16 %v4296_v11 }
 0x1e0   : > { %v4228_v30 = vpack.c.bf16 %v3394_v59, %v3393_v18  ;;  %v3392_v51 = vmax.f32 %v3360_v22, 0.0  ;;  %v3197_v3 = vadd.f32 %v3196_v54, %v3036_v1  ;;  %v3365_v32 = vadd.f32 %v4168_v39, %v3205_v49 }
 0x1e1   : > { %v6606_v58 = vpop.f32.mrf.mxu1  ;;  %v4819_v20 = vpop.f32.mrf.mxu0  ;;  %v4173_v1 = vunpack.c.h.bf16 %v4295_v17 }
 0x1e2   : > { %4307 = vst [vmem:[%s6574_s26 + $0x18] sm:$0xff] %v4228_v30   ;;  %v4223_v24 = vpack.c.bf16 %v3392_v51, %v3391_v28  ;;  %v3208_v60 = vadd.f32 %v4819_v20, %v3047_v26  ;;  %v3363_v62 = vadd.f32 %v4164_v47, %v3197_v3  ;;  %v3397_v52 = vmax.f32 %v3365_v32, 0.0  ;;  %v4297_v20 = vld [vmem:[%s6526_s23 + $0x40] sm:$0xff]  }
 0x1e3   : > { %v6615_v43 = vpop.f32.mrf.mxu1  ;;  %v3199_v15 = vpop.f32.mrf.mxu0  ;;  %v3055_v26 = vadd.f32 %v4713_v19, %v6401_v5  ;;  %v3076_v3 = vadd.f32 %v4728_v50, %v6437_v12  ;;  %v4184_v32 = vunpack.c.l.bf16 %v4298_v48  ;;  %v4180_v10 = vunpack.c.l.bf16 %v4297_v20 }
 0x1e4   : > { %4306 = vst [vmem:[%s6574_s26 + $0x10] sm:$0xff] %v4223_v24   ;;  %v3366_v40 = vadd.f32 %v4169_v56, %v3208_v60  ;;  %v3200_v38 = vadd.f32 %v3199_v15, %v3039_v53  ;;  %v3395_v14 = vmax.f32 %v3363_v62, 0.0  ;;  %v4722_v56 = vadd.f32 %v6547_v61, %v6540_v34 }
 0x1e5   : > { %v4738_v42 = vpop.f32.mrf.mxu1  ;;  %v4822_v46 = vpop.f32.mrf.mxu0  ;;  %v3079_v12 = vadd.f32 %v4731_v57, %v6444_v29  ;;  %v4181_v17 = vunpack.c.h.bf16 %v4297_v20  ;;  %v4734_v29 = vadd.f32 %v6600_v63, %v6598_v25  ;;  %v4737_v50 = vadd.f32 %v6615_v43, %v6606_v58 }
 0x1e6   : > { %v3398_v37 = vmax.f32 %v3366_v40, 0.0  ;;  %v3364_v2 = vadd.f32 %v4165_v23, %v3200_v38  ;;  %v3221_v41 = vadd.f32 %v4822_v46, %v3060_v27  ;;  %v4725_v23 = vadd.f32 %v6561_v31, %v6553_v55 }
 0x1e7   : > { %v4739_v33 = vpop.f32.mrf.mxu1  ;;  %v3212_v36 = vpop.f32.mrf.mxu0  ;;  %v3068_v53 = vadd.f32 %v4722_v56, %v6420_v35 }
 0x1e8   : > { %v4238_v39 = vpack.c.bf16 %v3398_v37, %v3397_v52  ;;  %v3396_v18 = vmax.f32 %v3364_v2, 0.0  ;;  %v3213_v59 = vadd.f32 %v3212_v36, %v3052_v7  ;;  %v3369_v54 = vadd.f32 %v4176_v4, %v3221_v41  ;;  %v6703_v4 = vld [vmem:[#allocation2_spill] sm:$0xff]  ;;  %v4300_v37 = vld [vmem:[%s6526_s23 + $0x58] sm:$0xff]  }
 0x1e9   : > { %v4741_v22 = vpop.f32.mrf.mxu1  ;;  %v4823_v49 = vpop.f32.mrf.mxu0  ;;  %v4740_v15 = vadd.f32 %v4739_v33, %v4738_v42  ;;  %v3071_v52 = vadd.f32 %v4725_v23, %v6703_v4  ;;  %v4193_v56 = vunpack.c.h.bf16 %v4300_v37 }
 0x1ea   : > { %4309 = vst [vmem:[%s6574_s26 + $0x28] sm:$0xff] %v4238_v39   ;;  %v4233_v0 = vpack.c.bf16 %v3396_v18, %v3395_v14  ;;  %v3224_v47 = vadd.f32 %v4823_v49, %v3063_v45  ;;  %v3367_v28 = vadd.f32 %v4172_v21, %v3213_v59  ;;  %v3401_v61 = vmax.f32 %v3369_v54, 0.0  ;;  %v6704_v21 = vld [vmem:[#allocation5_spill] sm:$0xff] }
 0x1eb   : > { %v4742_v16 = vpop.f32.mrf.mxu1  ;;  %v3215_v13 = vpop.f32.mrf.mxu0  ;;  %v3092_v45 = vadd.f32 %v4740_v15, %v6704_v21  ;;  %v4192_v18 = vunpack.c.l.bf16 %v4300_v37 }
 0x1ec   : > { %4308 = vst [vmem:[%s6574_s26 + $0x20] sm:$0xff] %v4233_v0   ;;  %v3370_v30 = vadd.f32 %v4177_v8, %v3224_v47  ;;  %v3216_v51 = vadd.f32 %v3215_v13, %v3055_v26  ;;  %v3399_v55 = vmax.f32 %v3367_v28, 0.0  ;;  %v4743_v42 = vadd.f32 %v4742_v16, %v4741_v22  ;;  %v4299_v8 = vld [vmem:[%s6526_s23 + $0x50] sm:$0xff]   ;;  %v6705_v22 = vld [vmem:[#allocation3_spill] sm:$0xff]  ;;  %v6706_v26 = vld [vmem:[#allocation6_spill] sm:$0xff] }
 0x1ed   : > { %v6638_v5 = vpop.f32.mrf.mxu1  ;;  %v4826_v24 = vpop.f32.mrf.mxu0  ;;  %v3084_v0 = vadd.f32 %v4734_v29, %v6705_v22  ;;  %v4188_v47 = vunpack.c.l.bf16 %v4299_v8 }
 0x1ee   : > { %v3402_v34 = vmax.f32 %v3370_v30, 0.0  ;;  %v3368_v60 = vadd.f32 %v4173_v1, %v3216_v51  ;;  %v3237_v9 = vadd.f32 %v4826_v24, %v3076_v3  ;;  %v3095_v48 = vadd.f32 %v4743_v42, %v6706_v26  ;;  %v6707_v24 = vld [vmem:[#allocation4_spill] sm:$0xff] }
 0x1ef   : > { %v4745_v6 = vpop.f32.mrf.mxu1  ;;  %v3228_v11 = vpop.f32.mrf.mxu0  ;;  %v4189_v51 = vunpack.c.h.bf16 %v4299_v8 }
 0x1f0   : > { %v4248_v31 = vpack.c.bf16 %v3402_v34, %v3401_v61  ;;  %v3400_v62 = vmax.f32 %v3368_v60, 0.0  ;;  %v3229_v40 = vadd.f32 %v3228_v11, %v3068_v53  ;;  %v3373_v46 = vadd.f32 %v4184_v32, %v3237_v9  ;;  %v4302_v61 = vld [vmem:[%s6526_s23 + $0x68] sm:$0xff]   ;;  %v6708_v53 = vld [vmem:[#allocation9_spill] sm:$0xff] }
 0x1f1   : > { %v4747_v38 = vpop.f32.mrf.mxu1  ;;  %v4827_v27 = vpop.f32.mrf.mxu0  ;;  %v3087_v32 = vadd.f32 %v4737_v50, %v6707_v24  ;;  %v4746_v34 = vadd.f32 %v4745_v6, %v6638_v5  ;;  %v6709_v6 = vld [vmem:[#allocation7_spill] sm:$0xff]  ;;  %v4201_v29 = vunpack.c.h.bf16 %v4302_v61 }
 0x1f2   : > { %4311 = vst [vmem:[%s6574_s26 + $0x38] sm:$0xff] %v4248_v31   ;;  %v4243_v19 = vpack.c.bf16 %v3400_v62, %v3399_v55  ;;  %v3240_v35 = vadd.f32 %v4827_v27, %v3079_v12  ;;  %v3371_v33 = vadd.f32 %v4180_v10, %v3229_v40  ;;  %v3405_v59 = vmax.f32 %v3373_v46, 0.0  ;;  %v4301_v55 = vld [vmem:[%s6526_s23 + $0x60] sm:$0xff]  }
 0x1f3   : > { %v4748_v2 = vpop.f32.mrf.mxu1  ;;  %v3231_v41 = vpop.f32.mrf.mxu0  ;;  %v4200_v27 = vunpack.c.l.bf16 %v4302_v61  ;;  %v3100_v4 = vadd.f32 %v4746_v34, %v6709_v6  ;;  %v4196_v37 = vunpack.c.l.bf16 %v4301_v55  ;;  %v4197_v8 = vunpack.c.h.bf16 %v4301_v55 }
 0x1f4   : > { %4310 = vst [vmem:[%s6574_s26 + $0x30] sm:$0xff] %v4243_v19   ;;  %v3374_v7 = vadd.f32 %v4185_v44, %v3240_v35  ;;  %v3232_v36 = vadd.f32 %v3231_v41, %v3071_v52  ;;  %v3403_v57 = vmax.f32 %v3371_v33, 0.0  ;;  %v4749_v31 = vadd.f32 %v4748_v2, %v4747_v38 }
 0x1f5   : > { %v4750_v14 = vpop.f32.mrf.mxu1  ;;  %v4830_v39 = vpop.f32.mrf.mxu0 }
 0x1f6   : > { %v3406_v49 = vmax.f32 %v3374_v7, 0.0  ;;  %v3372_v1 = vadd.f32 %v4181_v17, %v3232_v36  ;;  %v3253_v25 = vadd.f32 %v4830_v39, %v3092_v45  ;;  %v6710_v7 = vld [vmem:[#allocation10_spill] sm:$0xff] }
 0x1f7   : > { %v4751_v63 = vpop.f32.mrf.mxu1  ;;  %v3244_v54 = vpop.f32.mrf.mxu0 }
 0x1f8   : > { %v4258_v16 = vpack.c.bf16 %v3406_v49, %v3405_v59  ;;  %v3404_v58 = vmax.f32 %v3372_v1, 0.0  ;;  %v4752_v43 = vadd.f32 %v4751_v63, %v4750_v14  ;;  %v3245_v13 = vadd.f32 %v3244_v54, %v3084_v0  ;;  %v4303_v0 = vld [vmem:[%s6526_s23 + $0x70] sm:$0xff]  }
 0x1f9   : > { %v4753_v28 = vpop.f32.mrf.mxu1  ;;  %v4831_v30 = vpop.f32.mrf.mxu0  ;;  %v3377_v20 = vadd.f32 %v4192_v18, %v3253_v25  ;;  %v6711_v18 = vld [vmem:[#allocation8_spill] sm:$0xff] }
 0x1fa   : > { %4313 = vst [vmem:[%s6574_s26 + $0x48] sm:$0xff] %v4258_v16   ;;  %v4253_v3 = vpack.c.bf16 %v3404_v58, %v3403_v57  ;;  %v3256_v23 = vadd.f32 %v4831_v30, %v3095_v48  ;;  %v3108_v11 = vadd.f32 %v4752_v43, %v6708_v53  ;;  %v3375_v10 = vadd.f32 %v4188_v47, %v3245_v13  ;;  %v6712_v16 = vld [vmem:[#allocation11_spill] sm:$0xff]  ;;  %v6714_v53 = vld [vmem:[#allocation12_spill] sm:$0xff] }
 0x1fb   : > { %v4754_v60 = vpop.f32.mrf.mxu1  ;;  %v3247_v9 = vpop.f32.mrf.mxu0  ;;  %v3409_v17 = vmax.f32 %v3377_v20, 0.0  ;;  %v3103_v59 = vadd.f32 %v4749_v31, %v6711_v18  ;;  %v4204_v30 = vunpack.c.l.bf16 %v4303_v0 }
 0x1fc   : > { %4312 = vst [vmem:[%s6574_s26 + $0x40] sm:$0xff] %v4253_v3   ;;  %v3378_v12 = vadd.f32 %v4193_v56, %v3256_v23  ;;  %v4755_v44 = vadd.f32 %v4754_v60, %v4753_v28  ;;  %v3248_v15 = vadd.f32 %v3247_v9, %v3087_v32  ;;  %v3407_v42 = vmax.f32 %v3375_v10, 0.0  ;;  %v4304_v23 = vld [vmem:[%s6526_s23 + $0x78] sm:$0xff]  }
 0x1fd   : > { %v4756_v62 = vpop.f32.mrf.mxu1  ;;  %v4834_v40 = vpop.f32.mrf.mxu0  ;;  %v6713_v60 = vld [vmem:[#allocation13_spill] sm:$0xff]  ;;  %v4205_v10 = vunpack.c.h.bf16 %v4303_v0 }
 0x1fe   : > { %v3410_v19 = vmax.f32 %v3378_v12, 0.0  ;;  %v3376_v46 = vadd.f32 %v4189_v51, %v3248_v15  ;;  %v3269_v35 = vadd.f32 %v4834_v40, %v3108_v11  ;;  %v3111_v38 = vadd.f32 %v4755_v44, %v6710_v7 }
 0x1ff   : > { %v4757_v5 = vpop.f32.mrf.mxu1  ;;  %v3260_v52 = vpop.f32.mrf.mxu0  ;;  %v4208_v12 = vunpack.c.l.bf16 %v4304_v23 }
 0x200   : > { %v4268_v41 = vpack.c.bf16 %v3410_v19, %v3409_v17  ;;  %v3408_v33 = vmax.f32 %v3376_v46, 0.0  ;;  %v3381_v2 = vadd.f32 %v4200_v27, %v3269_v35  ;;  %v3261_v36 = vadd.f32 %v3260_v52, %v3100_v4  ;;  %v6715_v27 = vld [vmem:[#allocation14_spill] sm:$0xff] }
 0x201   : > { %v4759_v21 = vpop.f32.mrf.mxu1  ;;  %v4835_v45 = vpop.f32.mrf.mxu0  ;;  %v4758_v14 = vadd.f32 %v4757_v5, %v4756_v62  ;;  %v4209_v19 = vunpack.c.h.bf16 %v4304_v23 }
 0x202   : > { %4315 = vst [vmem:[%s6574_s26 + $0x58] sm:$0xff] %v4268_v41   ;;  %v4263_v50 = vpack.c.bf16 %v3408_v33, %v3407_v42  ;;  %v3272_v39 = vadd.f32 %v4835_v45, %v3111_v38  ;;  %v3379_v49 = vadd.f32 %v4196_v37, %v3261_v36  ;;  %v3413_v54 = vmax.f32 %v3381_v2, 0.0 }
 0x203   : > { %v4760_v1 = vpop.f32.mrf.mxu1  ;;  %v3263_v25 = vpop.f32.mrf.mxu0  ;;  %v3116_v58 = vadd.f32 %v4758_v14, %v6712_v16 }
 0x204   : > { %4314 = vst [vmem:[%s6574_s26 + $0x50] sm:$0xff] %v4263_v50   ;;  %v3382_v63 = vadd.f32 %v4201_v29, %v3272_v39  ;;  %v3264_v22 = vadd.f32 %v3263_v25, %v3103_v59  ;;  %v4761_v56 = vadd.f32 %v4760_v1, %v4759_v21  ;;  %v3411_v43 = vmax.f32 %v3379_v49, 0.0 }
 0x205   : > { %v4762_v47 = vpop.f32.mrf.mxu1  ;;  %v4838_v26 = vpop.f32.mrf.mxu0 }
 0x206   : > { %v3414_v48 = vmax.f32 %v3382_v63, 0.0  ;;  %v3380_v57 = vadd.f32 %v4197_v8, %v3264_v22  ;;  %v3119_v11 = vadd.f32 %v4761_v56, %v6714_v53 }
 0x207   : > { %v4763_v13 = vpop.f32.mrf.mxu1  ;;  %v3276_v28 = vpop.f32.mrf.mxu0 }
 0x208   : > { %v4278_v51 = vpack.c.bf16 %v3414_v48, %v3413_v54  ;;  %v3412_v3 = vmax.f32 %v3380_v57, 0.0  ;;  %v4764_v20 = vadd.f32 %v4763_v13, %v4762_v47  ;;  %v3277_v24 = vadd.f32 %v3276_v28, %v3116_v58 }
 0x209   : > { %v4765_v32 = vpop.f32.mrf.mxu1  ;;  %v4839_v61 = vpop.f32.mrf.mxu0 }
 0x20a   : > { %4317 = vst [vmem:[%s6574_s26 + $0x68] sm:$0xff] %v4278_v51   ;;  %v4273_v34 = vpack.c.bf16 %v3412_v3, %v3411_v43  ;;  %v3124_v9 = vadd.f32 %v4764_v20, %v6713_v60  ;;  %v3383_v31 = vadd.f32 %v4204_v30, %v3277_v24 }
 0x20b   : > { %v4766_v44 = vpop.f32.mrf.mxu1  ;;  %v3279_v15 = vpop.f32.mrf.mxu0 }
 0x20c   : > { %4316 = vst [vmem:[%s6574_s26 + $0x60] sm:$0xff] %v4273_v34   ;;  %v3285_v55 = vadd.f32 %v4838_v26, %v3124_v9  ;;  %v4767_v62 = vadd.f32 %v4766_v44, %v4765_v32  ;;  %v3280_v40 = vadd.f32 %v3279_v15, %v3119_v11  ;;  %v3415_v5 = vmax.f32 %v3383_v31, 0.0 }
 0x20e   : > { %v3127_v17 = vadd.f32 %v4767_v62, %v6715_v27  ;;  %v3384_v46 = vadd.f32 %v4205_v10, %v3280_v40  ;;  %v3385_v35 = vadd.f32 %v4208_v12, %v3285_v55 }
 0x210   : > { %v3288_v6 = vadd.f32 %v4839_v61, %v3127_v17  ;;  %v3416_v4 = vmax.f32 %v3384_v46, 0.0  ;;  %v3417_v29 = vmax.f32 %v3385_v35, 0.0 }
 0x212   : > { %v3386_v52 = vadd.f32 %v4209_v19, %v3288_v6  ;;  %v4283_v37 = vpack.c.bf16 %v3416_v4, %v3415_v5 }
 0x214   : > { %v3418_v42 = vmax.f32 %v3386_v52, 0.0  ;;  %4318 = vst [vmem:[%s6574_s26 + $0x70] sm:$0xff] %v4283_v37  }
 0x216   : > { %v4288_v41 = vpack.c.bf16 %v3418_v42, %v3417_v29 }
 0x218   : > { %4319 = vst [vmem:[%s6574_s26 + $0x78] sm:$0xff] %v4288_v41  }
 0x219 PF: > { %s14_s17 = sadd.s32 1, %s5127_s17   ;;  %s6716_s15 = smov %s5123_s16 }
 0x21a   : > { %p11_p5 = scmp.ge.s32.totalorder %s14_s17, 4   ;;  %s6717_s16 = smov %s6719_s18 }
 0x21c   :  { %13 = sbr.rel (!%p11_p5) target bundleno = 2 (0x2), region = 77 }

// kernel: _lambda_.10
= control target key start
LH: loop header
LB: loop body
LE: loop exit
PB: predicated region body
PF: predicated region fallthrough
CT: control target
= control target key end

     0   :  { %s2469_s12 = smov 0   ;;  %s2471_s13 = smov 0   ;;  %s2886_s0 = inlined_call_operand.vmem [shape: bf16[2,36,9,128], index: 0, kind: input, shape index: {}]   ;;  %s2887_s1 = inlined_call_operand.vmem [shape: bf16[1152,128], index: 1, kind: input, shape index: {}]   ;;  %s2888_s2 = inlined_call_operand.vmem [shape: f32[1,128], index: 2, kind: input, shape index: {}]   ;;  %s2889_s3 = inlined_call_operand.vmem [shape: bf16[2,64,128], index: 3, kind: output, shape index: {}]  }
   0x1   :  { %s2473_s14 = smov 0  }
   0x2 LB: > { %s28_s15 = sadd.s32 1, %s2443_s13  ;;  %p1833_p0 = scmp.ge.s32.totalorder %s2447_s14, 1  ;;  %s2447_s14 = sphi %s2473_s14, %s13_s14   ;;  %s2443_s13 = sphi %s2471_s13, %s2899_s13   ;;  %s2439_s12 = sphi %s2469_s12, %s2898_s12  }
   0x3   : > { %p30_p1 = scmp.ge.s32.totalorder %s28_s15, 2  ;;  %p177_p2 = scmp.lt.s32.totalorder %s2447_s14, 3 }
   0x5   : > { %s2901_s15 = smov (%p30_p1, %s28_s15), 0  ;;  %p178_p3 = pnand %p1833_p0, %p177_p2 }
   0x7   : > { %181 = sbr.rel (%p178_p3) target bundleno = 319 (0x13f), region = 32 }
   0xc   : > { %v2305_v0 = vld [vmem:[%s2887_s1 + $0x78] sm:$0xff]   ;;  %v2309_v4 = vld [vmem:[%s2887_s1 + $0x70] sm:$0xff]   ;;  %v2313_v8 = vld [vmem:[%s2887_s1 + $0x68] sm:$0xff]   ;;  %p215_p4 = scmp.lt.s32.totalorder %s2439_s12, 1 }
   0xd   : > { %v2306_v1 = vld [vmem:[%s2887_s1 + $0xf8] sm:$0xff]   ;;  %2068 = vmatprep.subr.bf16.mxu0 %v2305_v0  ;;  %v2310_v5 = vld [vmem:[%s2887_s1 + $0xf0] sm:$0xff]   ;;  %v2314_v9 = vld [vmem:[%s2887_s1 + $0xe8] sm:$0xff]  }
   0xe   : > { %v2307_v2 = vld [vmem:[%s2887_s1 + $0x38] sm:$0xff]   ;;  %2108 = vmatprep.subr.bf16.mxu1 %v2306_v1  ;;  %v2311_v6 = vld [vmem:[%s2887_s1 + $0x30] sm:$0xff]   ;;  %v2315_v10 = vld [vmem:[%s2887_s1 + $0x28] sm:$0xff]   ;;  %s2903_s12 = smov (!%p215_p4, %s2439_s12), 1 }
   0xf   : > { %v2308_v3 = vld [vmem:[%s2887_s1 + $0xb8] sm:$0xff]   ;;  %2069 = vmatpush3.bf16.msra.mxu0 %v2307_v2  ;;  %v2312_v7 = vld [vmem:[%s2887_s1 + $0xb0] sm:$0xff]   ;;  %v2316_v11 = vld [vmem:[%s2887_s1 + $0xa8] sm:$0xff]   ;;  %s2280_s26 = smul.u32 288, %s2903_s12  ;;  %s2036_s30 = sshll.u32 %s2903_s12, 5 }
  0x10   : > { %2109 = vmatpush3.bf16.msra.mxu1 %v2308_v3  ;;  %2070 = vmatprep.subr.bf16.mxu0 %v2309_v4  ;;  %v2317_v12 = vld [vmem:[%s2887_s1 + $0x60] sm:$0xff]   ;;  %v2321_v16 = vld [vmem:[%s2887_s1 + $0x58] sm:$0xff]   ;;  %v2325_v20 = vld [vmem:[%s2887_s1 + $0x50] sm:$0xff]   ;;  %s238_s12 = scalar_lea.vmem %s2889_s3, %s2036_s30 }
  0x11   : > { %2110 = vmatprep.subr.bf16.mxu1 %v2310_v5  ;;  %v2318_v13 = vld [vmem:[%s2887_s1 + $0xe0] sm:$0xff]   ;;  %v2322_v17 = vld [vmem:[%s2887_s1 + $0xd8] sm:$0xff]   ;;  %v2326_v21 = vld [vmem:[%s2887_s1 + $0xd0] sm:$0xff]   ;;  %s2593_s10 = scalar_lea.vmem %s2886_s0, %s2280_s26 }
  0x12   : > { %v2319_v14 = vld [vmem:[%s2887_s1 + $0x20] sm:$0xff]   ;;  %v2323_v18 = vld [vmem:[%s2887_s1 + $0x18] sm:$0xff]   ;;  %v2327_v22 = vld [vmem:[%s2887_s1 + $0x10] sm:$0xff]  }
  0x13   : > { %2071 = vmatpush3.bf16.msra.mxu0 %v2311_v6  ;;  %v2320_v15 = vld [vmem:[%s2887_s1 + $0xa0] sm:$0xff]   ;;  %v2324_v19 = vld [vmem:[%s2887_s1 + $0x98] sm:$0xff]   ;;  %v2328_v23 = vld [vmem:[%s2887_s1 + $0x90] sm:$0xff]  }
  0x14   : > { %2111 = vmatpush3.bf16.msra.mxu1 %v2312_v7  ;;  %2072 = vmatprep.subr.bf16.mxu0 %v2313_v8  ;;  %v2329_v24 = vld [vmem:[%s2887_s1 + $0x48] sm:$0xff]   ;;  %v2333_v28 = vld [vmem:[%s2887_s1 + $0x40] sm:$0xff]   ;;  %v1845_v33 = vld [vmem:[%s2593_s10 + $0x90] sm:$0xf] }
  0x15   : > { %2112 = vmatprep.subr.bf16.mxu1 %v2314_v9  ;;  %v2330_v25 = vld [vmem:[%s2887_s1 + $0xc8] sm:$0xff]   ;;  %v2334_v29 = vld [vmem:[%s2887_s1 + $0xc0] sm:$0xff]   ;;  %v1846_v34 = vld [vmem:[%s2593_s10 + $0x98] sm:$0xf] }
  0x16   : > { %v2331_v26 = vld [vmem:[%s2887_s1 + $0x8] sm:$0xff]   ;;  %v2335_v30 = vld [vmem:[%s2887_s1] sm:$0xff]   ;;  %v1921_v35 = vcombine.low %v1845_v33, %v1846_v34  ;;  %v2344_v43 = vld [vmem:[%s2887_s1 + $0x178] sm:$0xff]  }
  0x17   : > { %2073 = vmatpush3.bf16.msra.mxu0 %v2315_v10  ;;  %v2332_v27 = vld [vmem:[%s2887_s1 + $0x88] sm:$0xff]   ;;  %v2336_v31 = vld [vmem:[%s2887_s1 + $0x80] sm:$0xff]   ;;  %v2345_v44 = vld [vmem:[%s2887_s1 + $0x1f8] sm:$0xff]  }
  0x18   : > { %2113 = vmatpush3.bf16.msra.mxu1 %v2316_v11  ;;  %2074 = vmatprep.subr.bf16.mxu0 %v2317_v12  ;;  %v2337_v32 = vld [vmem:[%s2593_s10 + $0x48] ss:$8 sps:$4 sm:$0xff]   ;;  %v241_v36 = vld [vmem:[%s2593_s10] sm:$0xf]  ;;  %v258_v38 = vld [vmem:[%s2593_s10 + $0x4] sm:$0x1] }
  0x19   : > { %2114 = vmatprep.subr.bf16.mxu1 %v2318_v13  ;;  %1365 = vmatprep.mubr.bf16.mxu0 %v2337_v32  ;;  %v242_v37 = vld [vmem:[%s2593_s10 + $0x8] sm:$0xf]  ;;  %v259_v39 = vld [vmem:[%s2593_s10 + $0xc] sm:$0x1]  ;;  %v1893_v41 = vcombine.low %v241_v36, %v258_v38  ;;  %v2346_v49 = vld [vmem:[%s2887_s1 + $0x138] sm:$0xff]  }
  0x1a   : > { %v1918_v40 = vcombine.low %v241_v36, %v242_v37  ;;  %1430 = vmatprep.mubr.bf16.mxu1 %v1921_v35  ;;  %v1894_v42 = vcombine.low %v242_v37, %v259_v39  ;;  %v2348_v52 = vld [vmem:[%s2887_s1 + $0x170] sm:$0xff]   ;;  %v2347_v55 = vld [vmem:[%s2887_s1 + $0x1b8] sm:$0xff]   ;;  %v1847_v62 = vld [vmem:[%s2593_s10 + $0xa0] sm:$0xf] }
  0x1b   : > { %2075 = vmatpush3.bf16.msra.mxu0 %v2319_v14  ;;  %v361_v45 = vshll.u32 %v1893_v41, 16  ;;  %v359_v47 = vshrl.u32 %v1893_v41, 16  ;;  %v1861_v56 = vld [vmem:[%s2593_s10 + $0x94] sm:$0x1]  ;;  %v2352_v60 = vld [vmem:[%s2593_s10 + $0x58] ss:$8 sps:$4 sm:$0xff]  }
  0x1c   : > { %2115 = vmatpush3.bf16.msra.mxu1 %v2320_v15  ;;  %2076 = vmatprep.subr.bf16.mxu0 %v2321_v16  ;;  %v368_v46 = vshll.u32 %v1894_v42, 16  ;;  %v366_v48 = vshrl.u32 %v1894_v42, 16  ;;  %v2350_v57 = vld [vmem:[%s2887_s1 + $0x130] sm:$0xff]   ;;  %v1862_v61 = vld [vmem:[%s2593_s10 + $0x9c] sm:$0x1]  ;;  %v2636_v4 = vcombine.low %v1845_v33, %v1861_v56  ;;  %v2359_v10 = vld [vmem:[%s2887_s1 + $0x168] sm:$0xff]  }
  0x1d   : > { %2116 = vmatprep.subr.bf16.mxu1 %v2322_v17  ;;  %v363_v50 = vrot.slane %v361_v45, 1  ;;  %v2349_v59 = vld [vmem:[%s2887_s1 + $0x1f0] sm:$0xff]   ;;  %v2628_v63 = vld [vmem:[%s2593_s10 + $0xa8] sm:$0xf]  ;;  %v244_v3 = vld [vmem:[%s2593_s10 + $0x18] sm:$0xf]  ;;  %v2643_v11 = vcombine.low %v1846_v34, %v1862_v61 }
  0x1e   : > { %v370_v51 = vrot.slane %v368_v46, 1  ;;  %v2351_v0 = vld [vmem:[%s2887_s1 + $0x1b0] sm:$0xff]   ;;  %v1930_v1 = vcombine.low %v1847_v62, %v2628_v63  ;;  %v261_v6 = vld [vmem:[%s2593_s10 + $0x1c] sm:$0x1]  ;;  %v2360_v12 = vld [vmem:[%s2887_s1 + $0x1e8] sm:$0xff]   ;;  %v457_v17 = vshll.u32 %v2636_v4, 16 }
  0x1f   : > { %2077 = vmatpush3.bf16.msra.mxu0 %v2323_v18  ;;  %v364_v53 = vor.u32 %v363_v50, %v359_v47  ;;  %v243_v2 = vld [vmem:[%s2593_s10 + $0x10] sm:$0xf]  ;;  %v260_v5 = vld [vmem:[%s2593_s10 + $0x14] sm:$0x1]  ;;  %v1896_v9 = vcombine.low %v244_v3, %v261_v6  ;;  %v1863_v18 = vld [vmem:[%s2593_s10 + $0xa4] sm:$0x1] }
  0x20   : > { %2117 = vmatpush3.bf16.msra.mxu1 %v2324_v19  ;;  %2078 = vmatprep.subr.bf16.mxu0 %v2325_v20  ;;  %v371_v54 = vor.u32 %v370_v51, %v366_v48  ;;  %v1927_v7 = vcombine.low %v243_v2, %v244_v3  ;;  %v1895_v8 = vcombine.low %v243_v2, %v260_v5  ;;  %v2361_v19 = vld [vmem:[%s2887_s1 + $0x128] sm:$0xff]   ;;  %v2366_v33 = vld [vmem:[%s2887_s1 + $0x1a0] sm:$0xff]   ;;  %v1849_v35 = vld [vmem:[%s2593_s10 + $0xb0] sm:$0xf]  ;;  %v459_v37 = vrot.slane %v457_v17, 1 }
  0x21   : > { %2118 = vmatprep.subr.bf16.mxu1 %v2326_v21  ;;  %v382_v14 = vshll.u32 %v1896_v9, 16  ;;  %v380_v16 = vshrl.u32 %v1896_v9, 16  ;;  %v2367_v34 = vld [vmem:[%s2593_s10 + $0x68] ss:$8 sps:$4 sm:$0xff]   ;;  %v1850_v36 = vld [vmem:[%s2593_s10 + $0xb8] sm:$0xf] }
  0x22   : > { %v1920_v58 = vcombine.low %v364_v53, %v371_v54  ;;  %v375_v13 = vshll.u32 %v1895_v8, 16  ;;  %v373_v15 = vshrl.u32 %v1895_v8, 16  ;;  %v1864_v39 = vld [vmem:[%s2593_s10 + $0xac] sm:$0x1]  ;;  %v245_v41 = vld [vmem:[%s2593_s10 + $0x20] sm:$0xf] }
  0x23   : > { %2079 = vmatpush3.bf16.msra.mxu0 %v2327_v22  ;;  %v384_v21 = vrot.slane %v382_v14, 1  ;;  %v2362_v22 = vld [vmem:[%s2887_s1 + $0x1a8] sm:$0xff]   ;;  %v1865_v42 = vld [vmem:[%s2593_s10 + $0xb4] sm:$0x1]  ;;  %v2374_v50 = vld [vmem:[%s2887_s1 + $0x158] sm:$0xff]   ;;  %v2687_v51 = vcombine.low %v2628_v63, %v1864_v39 }
  0x24   : > { %2119 = vmatpush3.bf16.msra.mxu1 %v2328_v23  ;;  %2080 = vmatprep.subr.bf16.mxu0 %v2329_v24  ;;  %v377_v20 = vrot.slane %v375_v13, 1  ;;  %v2363_v23 = vld [vmem:[%s2887_s1 + $0x160] sm:$0xff]   ;;  %v464_v24 = vshll.u32 %v2643_v11, 16  ;;  %v263_v45 = vld [vmem:[%s2593_s10 + $0x2c] sm:$0x1]  ;;  %v2378_v63 = vld [vmem:[%s2887_s1 + $0x150] sm:$0xff]  }
  0x25   : > { %2120 = vmatprep.subr.bf16.mxu1 %v2330_v25  ;;  %v2380_v5 = vld [vmem:[%s2887_s1 + $0x110] sm:$0xff]   ;;  %v1851_v13 = vld [vmem:[%s2593_s10 + $0xc0] sm:$0xf]  ;;  %v476_v17 = vshrl.u32 %v2687_v51, 16 }
  0x26   : > { %v378_v25 = vor.u32 %v377_v20, %v373_v15  ;;  %v466_v38 = vrot.slane %v464_v24, 1  ;;  %v2381_v9 = vld [vmem:[%s2887_s1 + $0x190] sm:$0xff]   ;;  %v1852_v15 = vld [vmem:[%s2593_s10 + $0xc8] sm:$0xf] }
  0x27   : > { %2081 = vmatpush3.bf16.msra.mxu0 %v2331_v26  ;;  %v385_v26 = vor.u32 %v384_v21, %v380_v16  ;;  %v247_v20 = vld [vmem:[%s2593_s10 + $0x30] sm:$0xf]  ;;  %v248_v21 = vld [vmem:[%s2593_s10 + $0x38] sm:$0xf] }
  0x28   : > { %2121 = vmatpush3.bf16.msra.mxu1 %v2332_v27  ;;  %2082 = vmatprep.subr.bf16.mxu0 %v2333_v28  ;;  %v2364_v27 = vld [vmem:[%s2887_s1 + $0x1e0] sm:$0xff]   ;;  %v455_v28 = vshrl.u32 %v2636_v4, 16  ;;  %v2379_v4 = vld [vmem:[%s2887_s1 + $0x1d0] sm:$0xff]  }
  0x29   : > { %2122 = vmatprep.subr.bf16.mxu1 %v2334_v29  ;;  %v2365_v29 = vld [vmem:[%s2887_s1 + $0x120] sm:$0xff]   ;;  %v1929_v32 = vcombine.low %v378_v25, %v385_v26  ;;  %v1945_v25 = vcombine.low %v247_v20, %v248_v21 }
  0x2b   : > { %2083 = vmatpush3.bf16.msra.mxu0 %v2335_v30  ;;  %v462_v30 = vshrl.u32 %v2643_v11, 16 }
  0x2c   : > { %2123 = vmatpush3.bf16.msra.mxu1 %v2336_v31  ;;  %2148 = vmatprep.subr.bf16.mxu0 %v2344_v43  ;;  %v2668_v31 = vcombine.low %v1847_v62, %v1863_v18  ;;  %v246_v43 = vld [vmem:[%s2593_s10 + $0x28] sm:$0xf]  ;;  %v2377_v62 = vld [vmem:[%s2887_s1 + $0x198] sm:$0xff]  }
  0x2d   : > { %2188 = vmatprep.subr.bf16.mxu1 %v2345_v44  ;;  %v262_v44 = vld [vmem:[%s2593_s10 + $0x24] sm:$0x1]  ;;  %v1898_v48 = vcombine.low %v246_v43, %v263_v45  ;;  %v467_v11 = vor.u32 %v466_v38, %v462_v30  ;;  %v2392_v38 = vld [vmem:[%s2887_s1 + $0x188] sm:$0xff]  }
  0x2e   : > { %1366 = vmatmul.mubr.bf16.vlgmr.msra.gmra.mxu0 %v1918_v40  ;;  %v1939_v40 = vcombine.low %v1849_v35, %v1850_v36  ;;  %v471_v46 = vshll.u32 %v2668_v31, 16  ;;  %v1897_v47 = vcombine.low %v245_v41, %v262_v44  ;;  %v469_v6 = vshrl.u32 %v2668_v31, 16 }
  0x2f   : > { %2149 = vmatpush3.bf16.msra.mxu0 %v2346_v49  ;;  %1431 = vmatmul.mubr.bf16.vlgmr.msra.gmra.mxu1 %v1920_v58  ;;  %v1936_v49 = vcombine.low %v245_v41, %v246_v43  ;;  %v396_v54 = vshll.u32 %v1898_v48, 16  ;;  %v394_v56 = vshrl.u32 %v1898_v48, 16  ;;  %v2376_v58 = vld [vmem:[%s2887_s1 + $0x118] sm:$0xff]   ;;  %v1868_v41 = vld [vmem:[%s2593_s10 + $0xcc] sm:$0x1]  ;;  %v2394_v43 = vld [vmem:[%s2887_s1 + $0x1c0] sm:$0xff]  }
  0x30   : > { %2150 = vmatprep.subr.bf16.mxu0 %v2348_v52  ;;  %2189 = vmatpush3.bf16.msra.mxu1 %v2347_v55  ;;  %v1866_v52 = vld [vmem:[%s2593_s10 + $0xbc] sm:$0x1]  ;;  %v389_v53 = vshll.u32 %v1897_v47, 16  ;;  %v387_v55 = vshrl.u32 %v1897_v47, 16  ;;  %v473_v16 = vrot.slane %v471_v46, 1  ;;  %v2395_v48 = vld [vmem:[%s2887_s1 + $0x100] sm:$0xff]  }
  0x31   : > { %1373 = vmatprep.mubr.bf16.mxu0 %v2352_v60  ;;  %2190 = vmatprep.subr.bf16.mxu1 %v2349_v59  ;;  %v2696_v59 = vcombine.low %v1849_v35, %v1865_v42  ;;  %v398_v61 = vrot.slane %v396_v54, 1  ;;  %v2397_v54 = vld [vmem:[%s2593_s10 + $0x50] ss:$8 sps:$4 sm:$0xff]  }
  0x32   : > { %1438 = vmatprep.mubr.bf16.mxu1 %v1930_v1  ;;  %v391_v60 = vrot.slane %v389_v53, 1  ;;  %v2705_v1 = vcombine.low %v1850_v36, %v1866_v52  ;;  %v474_v44 = vor.u32 %v473_v16, %v469_v6 }
  0x33   : > { %2151 = vmatpush3.bf16.msra.mxu0 %v2350_v57  ;;  %v2375_v57 = vld [vmem:[%s2887_s1 + $0x1d8] sm:$0xff]   ;;  %v399_v3 = vor.u32 %v398_v61, %v394_v56  ;;  %v483_v30 = vshrl.u32 %v2696_v59, 16  ;;  %v1908_v56 = vcombine.low %v1852_v15, %v1868_v41  ;;  %v1885_v41 = vld [vmem:[%s2593_s10 + $0xc] sm:$0x1] }
  0x34   : > { %2191 = vmatpush3.bf16.msra.mxu1 %v2351_v0  ;;  %2152 = vmatprep.subr.bf16.mxu0 %v2359_v10  ;;  %v478_v0 = vshll.u32 %v2687_v51, 16  ;;  %v392_v2 = vor.u32 %v391_v60, %v387_v55  ;;  %v460_v10 = vor.u32 %v459_v37, %v455_v28  ;;  %v492_v14 = vshll.u32 %v2705_v1, 16  ;;  %v2389_v28 = vld [vmem:[%s2887_s1 + $0x148] sm:$0xff]   ;;  %v2396_v51 = vld [vmem:[%s2887_s1 + $0x180] sm:$0xff]   ;;  %v2400_v61 = vld [vmem:[%s2887_s1 + $0x238] sm:$0xff]  }
  0x35   : > { %2192 = vmatprep.subr.bf16.mxu1 %v2360_v12  ;;  %v2382_v12 = vld [vmem:[%s2593_s10 + $0x78] ss:$8 sps:$4 sm:$0xff]   ;;  %v2391_v37 = vld [vmem:[%s2887_s1 + $0x108] sm:$0xff]   ;;  %v504_v6 = vshrl.u32 %v1908_v56, 16 }
  0x36   : > { %1374 = vmatmul.mubr.bf16.gmra.mxu0 %v1927_v7  ;;  %v485_v7 = vshll.u32 %v2696_v59, 16  ;;  %v1938_v8 = vcombine.low %v392_v2, %v399_v3  ;;  %v480_v18 = vrot.slane %v478_v0, 1  ;;  %v1923_v26 = vcombine.low %v460_v10, %v467_v11  ;;  %v2761_v59 = vld [vmem:[%s2593_s10 + $0x10] sm:$0xf] }
  0x37   : > { %2153 = vmatpush3.bf16.msra.mxu0 %v2361_v19  ;;  %1439 = vmatmul.mubr.bf16.gmra.mxu1 %v1929_v32  ;;  %v1948_v19 = vcombine.low %v1851_v13, %v1852_v15  ;;  %v494_v52 = vrot.slane %v492_v14, 1  ;;  %v2408_v14 = vld [vmem:[%s2887_s1 + $0x220] sm:$0xff]  }
  0x38   : > { %2193 = vmatpush3.bf16.msra.mxu1 %v2362_v22  ;;  %2154 = vmatprep.subr.bf16.mxu0 %v2363_v23  ;;  %v264_v22 = vld [vmem:[%s2593_s10 + $0x34] sm:$0x1]  ;;  %v265_v23 = vld [vmem:[%s2593_s10 + $0x3c] sm:$0x1]  ;;  %v487_v31 = vrot.slane %v485_v7, 1  ;;  %v481_v45 = vor.u32 %v480_v18, %v476_v17 }
  0x39   : > { %2194 = vmatprep.subr.bf16.mxu1 %v2364_v27  ;;  %1381 = vmatprep.mubr.bf16.mxu0 %v2367_v34  ;;  %v1899_v24 = vcombine.low %v247_v20, %v264_v22  ;;  %v1900_v27 = vcombine.low %v248_v21, %v265_v23  ;;  %v1867_v34 = vld [vmem:[%s2593_s10 + $0xc4] sm:$0x1]  ;;  %v2403_v7 = vld [vmem:[%s2593_s10 + $0xe8] ss:$8 sps:$4 sm:$0xff]   ;;  %v1889_v18 = vld [vmem:[%s2593_s10 + $0x2c] sm:$0x1] }
  0x3a   : > { %1446 = vmatprep.mubr.bf16.mxu1 %v1939_v40  ;;  %v2393_v40 = vld [vmem:[%s2887_s1 + $0x140] sm:$0xff]   ;;  %v1932_v55 = vcombine.low %v474_v44, %v481_v45  ;;  %v488_v0 = vor.u32 %v487_v31, %v483_v30  ;;  %v1873_v17 = vld [vmem:[%s2593_s10 + $0x28] sm:$0xf]  ;;  %v2409_v23 = vld [vmem:[%s2593_s10 + $0x70] ss:$8 sps:$4 sm:$0xff]  }
  0x3b   : > { %2155 = vmatpush3.bf16.msra.mxu0 %v2365_v29  ;;  %v2390_v29 = vld [vmem:[%s2887_s1 + $0x1c8] sm:$0xff]   ;;  %v403_v32 = vshll.u32 %v1899_v24, 16  ;;  %v410_v35 = vshll.u32 %v1900_v27, 16  ;;  %v408_v36 = vshrl.u32 %v1900_v27, 16  ;;  %v1888_v15 = vld [vmem:[%s2593_s10 + $0x24] sm:$0x1] }
  0x3c   : > { %2195 = vmatpush3.bf16.msra.mxu1 %v2366_v33  ;;  %2156 = vmatprep.subr.bf16.mxu0 %v2374_v50  ;;  %v401_v33 = vshrl.u32 %v1899_v24, 16  ;;  %v1907_v50 = vcombine.low %v1851_v13, %v1867_v34  ;;  %v1887_v13 = vld [vmem:[%s2593_s10 + $0x1c] sm:$0x1]  ;;  %v2789_v24 = vcombine.low %v1873_v17, %v1889_v18  ;;  %v2410_v27 = vld [vmem:[%s2593_s10 + $0xf8] ss:$8 sps:$4 sm:$0xff]  }
  0x3d   : > { %2196 = vmatprep.subr.bf16.mxu1 %v2375_v57  ;;  %v405_v39 = vrot.slane %v403_v32, 1  ;;  %v412_v42 = vrot.slane %v410_v35, 1  ;;  %v2398_v57 = vld [vmem:[%s2593_s10 + $0xd8] ss:$8 sps:$4 sm:$0xff]   ;;  %v1886_v45 = vld [vmem:[%s2593_s10 + $0x14] sm:$0x1] }
  0x3e   : > { %1382 = vmatmul.mubr.bf16.gmra.mxu0 %v1936_v49  ;;  %v490_v49 = vshrl.u32 %v2705_v1, 16  ;;  %v499_v60 = vshll.u32 %v1907_v50, 16  ;;  %v497_v3 = vshrl.u32 %v1907_v50, 16  ;;  %v2414_v30 = vld [vmem:[%s2887_s1 + $0x218] sm:$0xff]   ;;  %v581_v32 = vshll.u32 %v2789_v24, 16 }
  0x3f   : > { %2157 = vmatpush3.bf16.msra.mxu0 %v2376_v58  ;;  %1447 = vmatmul.mubr.bf16.gmra.mxu1 %v1938_v8  ;;  %v406_v46 = vor.u32 %v405_v39, %v401_v33  ;;  %v413_v47 = vor.u32 %v412_v42, %v408_v36  ;;  %v2758_v58 = vld [vmem:[%s2593_s10 + $0x8] sm:$0xf]  ;;  %v1871_v8 = vld [vmem:[%s2593_s10 + $0x18] sm:$0xf]  ;;  %v2415_v33 = vld [vmem:[%s2887_s1 + $0x210] sm:$0xff]  }
  0x40   : > { %2197 = vmatpush3.bf16.msra.mxu1 %v2377_v62  ;;  %2158 = vmatprep.subr.bf16.mxu0 %v2378_v63  ;;  %v2401_v62 = vld [vmem:[%s2887_s1 + $0x230] sm:$0xff]   ;;  %v506_v63 = vshll.u32 %v1908_v56, 16  ;;  %v495_v1 = vor.u32 %v494_v52, %v490_v49  ;;  %v1924_v2 = vcombine.low %v2758_v58, %v2761_v59  ;;  %v2783_v16 = vcombine.low %v1871_v8, %v1887_v13  ;;  %v2804_v34 = vld [vmem:[%s2593_s10 + $0x38] sm:$0xf]  ;;  %v2807_v35 = vld [vmem:[%s2593_s10 + $0x40] sm:$0xf] }
  0x41   : > { %2198 = vmatprep.subr.bf16.mxu1 %v2379_v4  ;;  %1389 = vmatprep.mubr.bf16.mxu0 %v2382_v12  ;;  %v1947_v53 = vcombine.low %v406_v46, %v413_v47  ;;  %v2402_v4 = vld [vmem:[%s2593_s10 + $0x60] ss:$8 sps:$4 sm:$0xff]   ;;  %v1891_v36 = vld [vmem:[%s2593_s10 + $0x3c] sm:$0x1]  ;;  %v579_v46 = vshrl.u32 %v2789_v24, 16  ;;  %v1910_v49 = vcombine.low %v2761_v59, %v1886_v45  ;;  %v583_v50 = vrot.slane %v581_v32, 1 }
  0x42   : > { %1454 = vmatprep.mubr.bf16.mxu1 %v1948_v19  ;;  %v1941_v10 = vcombine.low %v488_v0, %v495_v1  ;;  %v508_v11 = vrot.slane %v506_v63, 1  ;;  %v1872_v12 = vld [vmem:[%s2593_s10 + $0x20] sm:$0xf]  ;;  %v1890_v19 = vld [vmem:[%s2593_s10 + $0x34] sm:$0x1] }
  0x43   : > { %2159 = vmatpush3.bf16.msra.mxu0 %v2380_v5  ;;  %v501_v5 = vrot.slane %v499_v60, 1  ;;  %v1933_v22 = vcombine.low %v1871_v8, %v1872_v12  ;;  %v2416_v47 = vld [vmem:[%s2593_s10 + $0x80] ss:$8 sps:$4 sm:$0xff]   ;;  %v560_v63 = vshll.u32 %v1910_v49, 16 }
  0x44   : > { %2199 = vmatpush3.bf16.msra.mxu1 %v2381_v9  ;;  %2160 = vmatprep.subr.bf16.mxu0 %v2389_v28  ;;  %v2407_v9 = vld [vmem:[%s2887_s1 + $0x228] sm:$0xff]   ;;  %v509_v21 = vor.u32 %v508_v11, %v504_v6  ;;  %v2422_v0 = vld [vmem:[%s2887_s1 + $0x200] sm:$0xff]  }
  0x45   : > { %2200 = vmatprep.subr.bf16.mxu1 %v2390_v29  ;;  %v502_v20 = vor.u32 %v501_v5, %v497_v3  ;;  %v567_v29 = vshll.u32 %v2783_v16, 16  ;;  %v584_v3 = vor.u32 %v583_v50, %v579_v46 }
  0x46   : > { %1390 = vmatmul.mubr.bf16.gmra.mxu0 %v1945_v25  ;;  %v1874_v25 = vld [vmem:[%s2593_s10 + $0x30] sm:$0xf] }
  0x47   : > { %1495 = vmatprep.mubr.bf16.mxu0 %v1923_v26  ;;  %2161 = vmatpush3.bf16.msra.mxu0 %v2391_v37  ;;  %v2792_v26 = vcombine.low %v1872_v12, %v1888_v15  ;;  %v1914_v28 = vcombine.low %v1874_v25, %v1890_v19  ;;  %v1950_v31 = vcombine.low %v502_v20, %v509_v21  ;;  %v1892_v37 = vld [vmem:[%s2593_s10 + $0x44] sm:$0x1]  ;;  %v569_v52 = vrot.slane %v567_v29, 1 }
  0x48   : > { %2201 = vmatpush3.bf16.msra.mxu1 %v2392_v38  ;;  %2162 = vmatprep.subr.bf16.mxu0 %v2393_v40  ;;  %v565_v40 = vshrl.u32 %v2783_v16, 16  ;;  %v1942_v42 = vcombine.low %v1873_v17, %v1874_v25  ;;  %v1916_v44 = vcombine.low %v2807_v35, %v1892_v37 }
  0x49   : > { %2202 = vmatprep.subr.bf16.mxu1 %v2394_v43  ;;  %1455 = vmatmul.mubr.bf16.gmra.mxu1 %v1947_v53  ;;  %v574_v38 = vshll.u32 %v2792_v26, 16  ;;  %v588_v39 = vshll.u32 %v1914_v28, 16  ;;  %v1915_v43 = vcombine.low %v2804_v34, %v1891_v36  ;;  %v572_v53 = vshrl.u32 %v2792_v26, 16 }
  0x4a   : > { %1560 = vmatprep.mubr.bf16.mxu1 %v2397_v54  ;;  %v602_v59 = vshll.u32 %v1916_v44, 16  ;;  %v570_v5 = vor.u32 %v569_v52, %v565_v40  ;;  %v600_v12 = vshrl.u32 %v1916_v44, 16 }
  0x4b   : > { %2163 = vmatpush3.bf16.msra.mxu0 %v2395_v48  ;;  %v1909_v48 = vcombine.low %v2758_v58, %v1885_v41  ;;  %v576_v54 = vrot.slane %v574_v38, 1  ;;  %v590_v56 = vrot.slane %v588_v39, 1  ;;  %v595_v58 = vshll.u32 %v1915_v43, 16 }
  0x4c   : > { %2203 = vmatpush3.bf16.msra.mxu1 %v2396_v51  ;;  %2240 = vmatprep.subr.bf16.mxu0 %v2400_v61  ;;  %v586_v51 = vshrl.u32 %v1914_v28, 16  ;;  %v604_v13 = vrot.slane %v602_v59, 1 }
  0x4d   : > { %2264 = vmatprep.subr.bf16.mxu1 %v2400_v61  ;;  %v551_v60 = vshrl.u32 %v1909_v48, 16  ;;  %v577_v6 = vor.u32 %v576_v54, %v572_v53  ;;  %v597_v11 = vrot.slane %v595_v58, 1 }
  0x4e   : > { %1496 = vmatmul.mubr.bf16.vlgmr.msra.gmra.mxu0 %v2398_v57  ;;  %v2421_v57 = vld [vmem:[%s2887_s1 + $0x208] sm:$0xff]   ;;  %v605_v18 = vor.u32 %v604_v13, %v600_v12 }
  0x4f   : > { %1503 = vmatprep.mubr.bf16.mxu0 %v1932_v55  ;;  %2241 = vmatpush3.bf16.msra.mxu0 %v2400_v61  ;;  %v2417_v55 = vld [vmem:[%s2593_s10 + $0x108] ss:$8 sps:$4 sm:$0xff]   ;;  %v1935_v16 = vcombine.low %v570_v5, %v577_v6 }
  0x50   : > { %2242 = vmatprep.subr.bf16.mxu0 %v2401_v62 }
  0x51   : > { %1561 = vmatmul.mubr.bf16.vlgmr.msra.gmra.mxu1 %v1924_v2  ;;  %v562_v2 = vrot.slane %v560_v63, 1 }
  0x52   : > { %2272 = vmatpush3.bf16.msra.mxu1 %v2400_v61  ;;  %1568 = vmatprep.mubr.bf16.mxu1 %v2402_v4  ;;  %v553_v61 = vshll.u32 %v1909_v48, 16  ;;  %v591_v4 = vor.u32 %v590_v56, %v586_v51 }
  0x53   : > { %2243 = vmatpush3.bf16.msra.mxu0 %v2401_v62  ;;  %2265 = vmatprep.subr.bf16.mxu1 %v2401_v62 }
  0x54   : > { %2244 = vmatprep.subr.bf16.mxu0 %v2407_v9  ;;  %v555_v1 = vrot.slane %v553_v61, 1  ;;  %v1944_v15 = vcombine.low %v584_v3, %v591_v4 }
  0x56   : > { %1504 = vmatmul.mubr.bf16.gmra.mxu0 %v2403_v7  ;;  %2273 = vmatpush3.bf16.msra.mxu1 %v2401_v62  ;;  %v558_v62 = vshrl.u32 %v1910_v49, 16  ;;  %v1951_v7 = vcombine.low %v2804_v34, %v2807_v35  ;;  %v556_v8 = vor.u32 %v555_v1, %v551_v60 }
  0x57   : > { %1511 = vmatprep.mubr.bf16.mxu0 %v1941_v10  ;;  %2245 = vmatpush3.bf16.msra.mxu0 %v2407_v9  ;;  %v593_v10 = vshrl.u32 %v1915_v43, 16 }
  0x58   : > { %2246 = vmatprep.subr.bf16.mxu0 %v2408_v14  ;;  %2266 = vmatprep.subr.bf16.mxu1 %v2407_v9 }
  0x59   : > { %1569 = vmatmul.mubr.bf16.gmra.mxu1 %v1933_v22  ;;  %v598_v17 = vor.u32 %v597_v11, %v593_v10 }
  0x5a   : > { %2274 = vmatpush3.bf16.msra.mxu1 %v2407_v9  ;;  %1576 = vmatprep.mubr.bf16.mxu1 %v2409_v23  ;;  %v563_v9 = vor.u32 %v562_v2, %v558_v62 }
  0x5b   : > { %2247 = vmatpush3.bf16.msra.mxu0 %v2408_v14  ;;  %2267 = vmatprep.subr.bf16.mxu1 %v2408_v14  ;;  %v1953_v19 = vcombine.low %v598_v17, %v605_v18 }
  0x5c   : > { %2248 = vmatprep.subr.bf16.mxu0 %v2414_v30 }
  0x5e   : > { %1512 = vmatmul.mubr.bf16.gmra.mxu0 %v2410_v27  ;;  %2275 = vmatpush3.bf16.msra.mxu1 %v2408_v14  ;;  %v1926_v14 = vcombine.low %v556_v8, %v563_v9 }
  0x5f   : > { %1519 = vmatprep.mubr.bf16.mxu0 %v1950_v31  ;;  %2249 = vmatpush3.bf16.msra.mxu0 %v2414_v30 }
  0x60   : > { %2250 = vmatprep.subr.bf16.mxu0 %v2415_v33  ;;  %2268 = vmatprep.subr.bf16.mxu1 %v2414_v30 }
  0x61   : > { %1577 = vmatmul.mubr.bf16.gmra.mxu1 %v1942_v42 }
  0x62   : > { %2276 = vmatpush3.bf16.msra.mxu1 %v2414_v30  ;;  %1584 = vmatprep.mubr.bf16.mxu1 %v2416_v47 }
  0x63   : > { %2251 = vmatpush3.bf16.msra.mxu0 %v2415_v33  ;;  %2269 = vmatprep.subr.bf16.mxu1 %v2415_v33 }
  0x64   : > { %2252 = vmatprep.subr.bf16.mxu0 %v2421_v57 }
  0x66   : > { %1520 = vmatmul.mubr.bf16.gmra.mxu0 %v2417_v55  ;;  %2277 = vmatpush3.bf16.msra.mxu1 %v2415_v33 }
  0x67   : > { %2253 = vmatpush3.bf16.msra.mxu0 %v2421_v57  ;;  %2270 = vmatprep.subr.bf16.mxu1 %v2421_v57 }
  0x68   : > { %2254 = vmatprep.subr.bf16.mxu0 %v2422_v0  ;;  %2256 = vmatprep.mubr.bf16.mxu0 %v1926_v14 }
  0x69   : > { %1585 = vmatmul.mubr.bf16.gmra.mxu1 %v1951_v7  ;;  %v1917_v7 = vld [vmem:[%s2888_s2] ss:$0 sm:$0xff] }
  0x6a   : > { %2278 = vmatpush3.bf16.msra.mxu1 %v2421_v57  ;;  %2260 = vmatprep.mubr.bf16.mxu1 %v1944_v15 }
  0x6b   : > { %2255 = vmatpush3.bf16.msra.mxu0 %v2422_v0  ;;  %2271 = vmatprep.subr.bf16.mxu1 %v2422_v0 }
  0x6e   : > { %2257 = vmatmul.mubr.bf16.vlgmr.msra.gmra.mxu0 %v1935_v16  ;;  %2279 = vmatpush3.bf16.msra.mxu1 %v2422_v0 }
  0x71   : > { %2261 = vmatmul.mubr.bf16.vlgmr.msra.gmra.mxu1 %v1953_v19 }
  0xee   : > { %v2084_v20 = vpop.f32.mrf.mxu0 }
  0xef   : > { %v2124_v23 = vpop.f32.mrf.mxu1 }
  0xf0   : > { %v2085_v21 = vpop.f32.mrf.mxu0 }
  0xf1   : > { %v2125_v25 = vpop.f32.mrf.mxu1  ;;  %v2086_v5 = vadd.f32 %v2085_v21, %v2084_v20 }
  0xf2   : > { %v2087_v22 = vpop.f32.mrf.mxu0  ;;  %v2126_v19 = vadd.f32 %v2125_v25, %v2124_v23 }
  0xf3   : > { %v2831_v27 = vpop.f32.mrf.mxu1  ;;  %v1368_v14 = vadd.f32 %v2086_v5, %v1917_v7 }
  0xf4   : > { %v2088_v24 = vpop.f32.mrf.mxu0 }
  0xf5   : > { %v2833_v29 = vpop.f32.mrf.mxu1  ;;  %v2089_v10 = vadd.f32 %v2088_v24, %v2087_v22  ;;  %v1433_v24 = vadd.f32 %v2126_v19, %v1368_v14 }
  0xf6   : > { %v2090_v26 = vpop.f32.mrf.mxu0 }
  0xf7   : > { %v2130_v31 = vpop.f32.mrf.mxu1 }
  0xf8   : > { %v2091_v28 = vpop.f32.mrf.mxu0 }
  0xf9   : > { %v2131_v33 = vpop.f32.mrf.mxu1  ;;  %v2092_v6 = vadd.f32 %v2091_v28, %v2090_v26  ;;  %v1371_v28 = vadd.f32 %v2089_v10, %v1917_v7 }
  0xfa   : > { %v2093_v30 = vpop.f32.mrf.mxu0  ;;  %v2132_v20 = vadd.f32 %v2131_v33, %v2130_v31 }
  0xfb   : > { %v2133_v34 = vpop.f32.mrf.mxu1  ;;  %v1376_v15 = vadd.f32 %v2092_v6, %v1917_v7 }
  0xfc   : > { %v2094_v32 = vpop.f32.mrf.mxu0 }
  0xfd   : > { %v2134_v37 = vpop.f32.mrf.mxu1  ;;  %v2095_v11 = vadd.f32 %v2094_v32, %v2093_v30  ;;  %v2129_v30 = vadd.f32 %v2833_v29, %v2831_v27  ;;  %v1441_v32 = vadd.f32 %v2132_v20, %v1376_v15 }
  0xfe   : > { %v2096_v35 = vpop.f32.mrf.mxu0 }
  0xff   : > { %v2835_v39 = vpop.f32.mrf.mxu1 }
 0x100   : > { %v2097_v36 = vpop.f32.mrf.mxu0 }
 0x101   : > { %v2837_v41 = vpop.f32.mrf.mxu1  ;;  %v2098_v21 = vadd.f32 %v2097_v36, %v2096_v35 }
 0x102   : > { %v2099_v38 = vpop.f32.mrf.mxu0  ;;  %v2138_v27 = vadd.f32 %v2837_v41, %v2835_v39 }
 0x103   : > { %v2839_v43 = vpop.f32.mrf.mxu1  ;;  %v1384_v31 = vadd.f32 %v2098_v21, %v1917_v7 }
 0x104   : > { %v2100_v40 = vpop.f32.mrf.mxu0 }
 0x105   : > { %v2841_v46 = vpop.f32.mrf.mxu1 }
 0x106   : > { %v2102_v42 = vpop.f32.mrf.mxu0  ;;  %2890 = vst [vmem:[#allocation2_spill] sm:$0xff] %v2841_v46 }
 0x108   : > { %v2103_v44 = vpop.f32.mrf.mxu0 }
 0x109   : > { %v2142_v48 = vpop.f32.mrf.mxu1  ;;  %v2104_v16 = vadd.f32 %v2103_v44, %v2102_v42  ;;  %v2135_v42 = vadd.f32 %v2134_v37, %v2133_v34  ;;  %v2101_v44 = vadd.f32 %v2100_v40, %v2099_v38 }
 0x10a   : > { %v2105_v45 = vpop.f32.mrf.mxu0 }
 0x10b   : > { %v2143_v50 = vpop.f32.mrf.mxu1  ;;  %v1392_v5 = vadd.f32 %v2104_v16, %v1917_v7  ;;  %v1387_v38 = vadd.f32 %v2101_v44, %v1917_v7 }
 0x10c   : > { %v2106_v47 = vpop.f32.mrf.mxu0  ;;  %v2144_v33 = vadd.f32 %v2143_v50, %v2142_v48  ;;  %v1449_v48 = vadd.f32 %v2138_v27, %v1384_v31 }
 0x10d   : > { %v2145_v52 = vpop.f32.mrf.mxu1  ;;  %v2107_v26 = vadd.f32 %v2106_v47, %v2105_v45  ;;  %v1436_v45 = vadd.f32 %v2129_v30, %v1371_v28  ;;  %v2894_v41 = vld [vmem:[#allocation2_spill] sm:$0xff] }
 0x10e   : > { %v2164_v49 = vpop.f32.mrf.mxu0  ;;  %v1457_v29 = vadd.f32 %v2144_v33, %v1392_v5 }
 0x10f   : > { %v2146_v54 = vpop.f32.mrf.mxu1  ;;  %v1395_v35 = vadd.f32 %v2107_v26, %v1917_v7 }
 0x110   : > { %v2165_v51 = vpop.f32.mrf.mxu0  ;;  %v2147_v34 = vadd.f32 %v2146_v54, %v2145_v52  ;;  %v2141_v52 = vadd.f32 %v2894_v41, %v2839_v43 }
 0x111   : > { %v2843_v56 = vpop.f32.mrf.mxu1  ;;  %v2166_v6 = vadd.f32 %v2165_v51, %v2164_v49 }
 0x112   : > { %v2167_v53 = vpop.f32.mrf.mxu0  ;;  %v1460_v50 = vadd.f32 %v2147_v34, %v1395_v35 }
 0x113   : > { %v2845_v57 = vpop.f32.mrf.mxu1  ;;  %v1498_v40 = vadd.f32 %v2166_v6, %v1433_v24 }
 0x114   : > { %v2168_v55 = vpop.f32.mrf.mxu0 }
 0x115   : > { %v2847_v61 = vpop.f32.mrf.mxu1 }
 0x116   : > { %v2170_v60 = vpop.f32.mrf.mxu0  ;;  %2891 = vst [vmem:[#allocation3_spill] sm:$0xff] %v2847_v61 }
 0x117   : > { %v2849_v63 = vpop.f32.mrf.mxu1 }
 0x118   : > { %v2171_v62 = vpop.f32.mrf.mxu0  ;;  %2892 = vst [vmem:[#allocation4_spill] sm:$0xff] %v2849_v63  ;;  %v1379_v63 = vadd.f32 %v2095_v11, %v1917_v7 }
 0x119   : > { %v2210_v59 = vpop.f32.mrf.mxu1  ;;  %v2172_v61 = vadd.f32 %v2171_v62, %v2170_v60  ;;  %v2169_v60 = vadd.f32 %v2168_v55, %v2167_v53  ;;  %v2206_v53 = vadd.f32 %v2845_v57, %v2843_v56  ;;  %v1452_v56 = vadd.f32 %v2141_v52, %v1387_v38 }
 0x11a   : > { %v2173_v58 = vpop.f32.mrf.mxu0  ;;  %v1444_v47 = vadd.f32 %v2135_v42, %v1379_v63 }
 0x11b   : > { %v2211_v1 = vpop.f32.mrf.mxu1  ;;  %v1506_v62 = vadd.f32 %v2172_v61, %v1441_v32  ;;  %v1501_v55 = vadd.f32 %v2169_v60, %v1436_v45  ;;  %v1563_v19 = vadd.f32 %v2206_v53, %v1498_v40 }
 0x11c   : > { %v2174_v0 = vpop.f32.mrf.mxu0  ;;  %v2212_v49 = vadd.f32 %v2211_v1, %v2210_v59 }
 0x11d   : > { %v2213_v3 = vpop.f32.mrf.mxu1  ;;  %v2895_v16 = vld [vmem:[#allocation3_spill] sm:$0xff] }
 0x11e   : > { %v2176_v2 = vpop.f32.mrf.mxu0  ;;  %v1571_v39 = vadd.f32 %v2212_v49, %v1506_v62 }
 0x11f   : > { %v2214_v8 = vpop.f32.mrf.mxu1 }
 0x120   : > { %v2177_v4 = vpop.f32.mrf.mxu0  ;;  %v2215_v61 = vadd.f32 %v2214_v8, %v2213_v3 }
 0x121   : > { %v2854_v12 = vpop.f32.mrf.mxu1 }
 0x122   : > { %v2179_v9 = vpop.f32.mrf.mxu0 }
 0x123   : > { %v2856_v17 = vpop.f32.mrf.mxu1 }
 0x124   : > { %v2180_v13 = vpop.f32.mrf.mxu0  ;;  %2893 = vst [vmem:[#allocation5_spill] sm:$0xff] %v2856_v17  ;;  %v2175_v17 = vadd.f32 %v2174_v0, %v2173_v58  ;;  %v2178_v0 = vadd.f32 %v2177_v4, %v2176_v2 }
 0x125   : > { %v2858_v46 = vpop.f32.mrf.mxu1  ;;  %v2181_v54 = vadd.f32 %v2180_v13, %v2179_v9 }
 0x126   : > { %v2182_v18 = vpop.f32.mrf.mxu0  ;;  %v1509_v51 = vadd.f32 %v2175_v17, %v1444_v47  ;;  %v2896_v17 = vld [vmem:[#allocation4_spill] sm:$0xff]  ;;  %v1514_v57 = vadd.f32 %v2178_v0, %v1449_v48 }
 0x127   : > { %v2220_v23 = vpop.f32.mrf.mxu1  ;;  %v2209_v2 = vadd.f32 %v2896_v17, %v2895_v16  ;;  %v1517_v24 = vadd.f32 %v2181_v54, %v1452_v56 }
 0x128   : > { %v2183_v22 = vpop.f32.mrf.mxu0  ;;  %v1574_v20 = vadd.f32 %v2215_v61, %v1509_v51 }
 0x129   : > { %v2184_v36 = vadd.f32 %v2183_v22, %v2182_v18  ;;  %v2222_v10 = vpop.f32.mrf.mxu1  ;;  %v1566_v9 = vadd.f32 %v2209_v2, %v1501_v55 }
 0x12a   : > { %v2185_v25 = vpop.f32.mrf.mxu0 }
 0x12b   : > { %v2223_v58 = vpop.f32.mrf.mxu1  ;;  %v1522_v14 = vadd.f32 %v2184_v36, %v1457_v29  ;;  %v2897_v13 = vld [vmem:[#allocation5_spill] sm:$0xff] }
 0x12c   : > { %v2186_v11 = vpop.f32.mrf.mxu0  ;;  %v2224_v59 = vadd.f32 %v2223_v58, %v2222_v10  ;;  %v2218_v22 = vadd.f32 %v2897_v13, %v2854_v12 }
 0x12d   : > { %v2187_v37 = vadd.f32 %v2186_v11, %v2185_v25  ;;  %v2225_v15 = vpop.f32.mrf.mxu1  ;;  %v2221_v25 = vadd.f32 %v2220_v23, %v2858_v46 }
 0x12e   : > { %v2258_v63 = vpop.f32.mrf.mxu0  ;;  %v1587_v8 = vadd.f32 %v2224_v59, %v1522_v14  ;;  %v1579_v33 = vadd.f32 %v2218_v22, %v1514_v57 }
 0x12f   : > { %v1525_v1 = vadd.f32 %v2187_v37, %v1460_v50  ;;  %v2226_v4 = vpop.f32.mrf.mxu1  ;;  %v1636_v18 = vadd.f32 %v2258_v63, %v1571_v39  ;;  %v1582_v62 = vadd.f32 %v2221_v25, %v1517_v24 }
 0x130   : > { %v1627_v7 = vpop.f32.mrf.mxu0  ;;  %v2227_v3 = vadd.f32 %v2226_v4, %v2225_v15 }
 0x131   : > { %v2262_v26 = vpop.f32.mrf.mxu1  ;;  %v1628_v28 = vadd.f32 %v1627_v7, %v1563_v19  ;;  %v1660_v5 = vmax.f32 %v1636_v18, 0.0 }
 0x132   : > { %v2259_v21 = vpop.f32.mrf.mxu0  ;;  %v1590_v30 = vadd.f32 %v2227_v3, %v1525_v1  ;;  %v1652_v31 = vadd.f32 %v2262_v26, %v1587_v8 }
 0x133   : > { %v1639_v43 = vadd.f32 %v2259_v21, %v1574_v20  ;;  %v1643_v42 = vpop.f32.mrf.mxu1  ;;  %v1658_v35 = vmax.f32 %v1628_v28, 0.0 }
 0x134   : > { %v1630_v32 = vpop.f32.mrf.mxu0  ;;  %v1644_v12 = vadd.f32 %v1643_v42, %v1579_v33  ;;  %v1664_v27 = vmax.f32 %v1652_v31, 0.0 }
 0x135   : > { %v1661_v44 = vmax.f32 %v1639_v43, 0.0  ;;  %v1631_v6 = vadd.f32 %v1630_v32, %v1566_v9  ;;  %v2263_v45 = vpop.f32.mrf.mxu1 }
 0x136   : > { %v1655_v60 = vadd.f32 %v2263_v45, %v1590_v30  ;;  %v1662_v46 = vmax.f32 %v1644_v12, 0.0 }
 0x137   : > { %v2053_v36 = vpack.c.bf16 %v1661_v44, %v1660_v5  ;;  %v1659_v47 = vmax.f32 %v1631_v6, 0.0  ;;  %v1646_v11 = vpop.f32.mrf.mxu1 }
 0x138   : > { %v1665_v29 = vmax.f32 %v1655_v60, 0.0  ;;  %v1647_v34 = vadd.f32 %v1646_v11, %v1582_v62 }
 0x139   : > { %2065 = vst [vmem:[%s238_s12 + $0x8] sm:$0xff] %v2053_v36   ;;  %v2048_v10 = vpack.c.bf16 %v1659_v47, %v1658_v35 }
 0x13a   : > { %v2063_v23 = vpack.c.bf16 %v1665_v29, %v1664_v27  ;;  %v1663_v37 = vmax.f32 %v1647_v34, 0.0 }
 0x13b   : > { %2049 = vst [vmem:[%s238_s12] sm:$0xff] %v2048_v10  }
 0x13c   : > { %2067 = vst [vmem:[%s238_s12 + $0x18] sm:$0xff] %v2063_v23   ;;  %v2058_v38 = vpack.c.bf16 %v1663_v37, %v1662_v46 }
 0x13e   : > { %2066 = vst [vmem:[%s238_s12 + $0x10] sm:$0xff] %v2058_v38  }
 0x13f PF: > { %s13_s14 = sadd.s32 1, %s2447_s14   ;;  %s2898_s12 = smov %s2443_s13 }
 0x140   : > { %p10_p5 = scmp.ge.s32.totalorder %s13_s14, 4   ;;  %s2899_s13 = smov %s2901_s15 }
 0x142   :  { %12 = sbr.rel (!%p10_p5) target bundleno = 2 (0x2), region = 73 }

// kernel: _lambda_.13
= control target key start
LH: loop header
LB: loop body
LE: loop exit
PB: predicated region body
PF: predicated region fallthrough
CT: control target
= control target key end

     0   :  { %v202_v1 = vmov 0.0   ;;  %vm203_vm0 = vmmov 0   ;;  %s282_s0 = inlined_call_operand.vmem [shape: f32[2,128], index: 0, kind: input, shape index: {}]   ;;  %s283_s1 = inlined_call_operand.vmem [shape: f32[128,128], index: 1, kind: input, shape index: {}]   ;;  %s284_s2 = inlined_call_operand.vmem [shape: f32[1,128], index: 2, kind: input, shape index: {}]   ;;  %s285_s3 = inlined_call_operand.hbm [shape: f32[2,128], index: 3, kind: output, shape index: {}]  }
   0x1   :  { %v31_v0 = vld [vmem:[%s283_s1 + $0x78] sm:$0xff]  ;;  %142 = vmatprep.subr.mxu0 %v202_v1  ;;  %v30_v2 = vld [vmem:[%s283_s1 + $0x70] sm:$0xff]  ;;  %174 = vmatprep.mubr.msk.f32.mxu0 %vm203_vm0, %v202_v1  ;;  %v29_v3 = vld [vmem:[%s283_s1 + $0x68] sm:$0xff] }
   0x2   :  { %143 = vmatpush3.msra.mxu0 %v31_v0  ;;  %v28_v4 = vld [vmem:[%s283_s1 + $0x60] sm:$0xff] }
   0x3   :  { %144 = vmatprep.subr.mxu0 %v202_v1 }
   0x4   :  { %145 = vmatpush3.msra.mxu0 %v30_v2 }
   0x5   :  { %146 = vmatprep.subr.mxu0 %v202_v1 }
   0x6   :  { %147 = vmatpush3.msra.mxu0 %v29_v3 }
   0x7   :  { %8 = vsyncpa [#allocation3], 0  ;;  %148 = vmatprep.subr.mxu0 %v202_v1  ;;  %v27_v5 = vld [vmem:[%s283_s1 + $0x58] sm:$0xff]  ;;  %v26_v6 = vld [vmem:[%s283_s1 + $0x50] sm:$0xff]  ;;  %s204_s21 = smov [#allocation2]  }
   0x8   :  { %149 = vmatpush3.msra.mxu0 %v28_v4  ;;  %v25_v7 = vld [vmem:[%s283_s1 + $0x48] sm:$0xff]  ;;  %v24_v8 = vld [vmem:[%s283_s1 + $0x40] sm:$0xff]  ;;  %v23_v9 = vld [vmem:[%s283_s1 + $0x38] sm:$0xff]  ;;  %s116_s22 = sshll.u32 %s204_s21, 4  ;;  %s117_s22 = int_to_ptr.vmem [resolvable:$true] %s116_s22 }
   0x9   :  { %150 = vmatprep.subr.mxu0 %v202_v1  ;;  %v22_v10 = vld [vmem:[%s283_s1 + $0x30] sm:$0xff]  ;;  %v21_v11 = vld [vmem:[%s283_s1 + $0x28] sm:$0xff]  ;;  %v20_v12 = vld [vmem:[%s283_s1 + $0x20] sm:$0xff]  ;;  %p185_p1 = scmp.lt.s32.totalorder %s117_s22, %s117_s22 }
   0xa   :  { %151 = vmatpush3.msra.mxu0 %v27_v5  ;;  %v19_v13 = vld [vmem:[%s283_s1 + $0x18] sm:$0xff]  ;;  %v18_v14 = vld [vmem:[%s283_s1 + $0x10] sm:$0xff]  ;;  %v17_v15 = vld [vmem:[%s283_s1 + $0x8] sm:$0xff] }
   0xb   :  { %152 = vmatprep.subr.mxu0 %v202_v1  ;;  %v16_v16 = vld [vmem:[%s283_s1] sm:$0xff]  ;;  %s180_s1 = scalar_lea.vmem %s117_s22, 32 }
   0xc   :  { %153 = vmatpush3.msra.mxu0 %v26_v6  ;;  %v15_v17 = vld [vmem:[%s282_s0] sm:$0x3]  ;;  %p181_p0 = scmp.ne.s32.totalorder %s117_s22, %s180_s1  ;;  %p186_p2 = scmp.lt.s32.totalorder %s180_s1, %s180_s1 }
   0xd   :  { %154 = vmatprep.subr.mxu0 %v202_v1  ;;  %v124_v18 = vld [vmem:[%s284_s2] ss:$0 sm:$0xff] }
   0xe   :  { %155 = vmatpush3.msra.mxu0 %v25_v7  ;;  %p187_p3 = por %p186_p2, %p185_p1 }
   0xf   :  { %156 = vmatprep.subr.mxu0 %v202_v1 }
  0x10   :  { %157 = vmatpush3.msra.mxu0 %v24_v8  ;;  %p188_p4 = pnand %p187_p3, %p181_p0 }
  0x11   :  { %158 = vmatprep.subr.mxu0 %v202_v1 }
  0x12   :  { %159 = vmatpush3.msra.mxu0 %v23_v9 }
  0x13   :  { %160 = vmatprep.subr.mxu0 %v202_v1 }
  0x14   :  { %161 = vmatpush3.msra.mxu0 %v22_v10 }
  0x15   :  { %162 = vmatprep.subr.mxu0 %v202_v1 }
  0x16   :  { %163 = vmatpush3.msra.mxu0 %v21_v11 }
  0x17   :  { %164 = vmatprep.subr.mxu0 %v202_v1 }
  0x18   :  { %165 = vmatpush3.msra.mxu0 %v20_v12 }
  0x19   :  { %166 = vmatprep.subr.mxu0 %v202_v1 }
  0x1a   :  { %167 = vmatpush3.msra.mxu0 %v19_v13 }
  0x1b   :  { %168 = vmatprep.subr.mxu0 %v202_v1 }
  0x1c   :  { %169 = vmatpush3.msra.mxu0 %v18_v14 }
  0x1d   :  { %170 = vmatprep.subr.mxu0 %v202_v1 }
  0x1e   :  { %171 = vmatpush3.msra.mxu0 %v17_v15 }
  0x1f   :  { %172 = vmatprep.subr.mxu0 %v202_v1 }
  0x20   :  { %173 = vmatpush3.msra.mxu0 %v16_v16 }
  0x21   :  { %175 = vmatmul.mubr.f32.vlgmr.msra.gmra.mxu0 %v15_v17 }
  0xe1   :  { %v105_v19 = vpop.f32.mrf.mxu0 }
  0xe2   :  { %v106_v20 = vadd.f32 %v124_v18, %v105_v19 }
  0xe3   :  { %v176_v21 = vpop.f32.mrf.mxu0 }
  0xe4   :  { %109 = vst [vmem:[#allocation2] sm:$0x3] %v106_v20 }
  0xe5   :  { %191 = shalt.err (!%p188_p4)
}
  0xe6   :  { %119 = dma.vmem_to_hbm [thread:$0]  %s117_s22, 32, %s285_s3, [#allocation3]  }
  0xe7   :  { %200 = dma.done.wait [#allocation3], 32  }
  0xe8   :  { %201 = vsyncadd [#allocation3], 4294967264 }
  0xe9   :  { %123 = vsyncpa [#allocation3], 1 }

// kernel: _lambda_.12
= control target key start
LH: loop header
LB: loop body
LE: loop exit
PB: predicated region body
PF: predicated region fallthrough
CT: control target
= control target key end

     0   :  { %s2606_s15 = smov 0   ;;  %s2608_s16 = smov 0   ;;  %s3208_s0 = inlined_call_operand.vmem [shape: bf16[2,10,10,128], index: 0, kind: input, shape index: {}]   ;;  %s3209_s1 = inlined_call_operand.vmem [shape: bf16[1152,128], index: 1, kind: input, shape index: {}]   ;;  %s3210_s2 = inlined_call_operand.vmem [shape: f32[1,128], index: 2, kind: input, shape index: {}]   ;;  %s3211_s3 = inlined_call_operand.vmem [shape: bf16[2,64,128], index: 3, kind: input, shape index: {}]   ;;  %s3212_s4 = inlined_call_operand.vmem [shape: f32[2,1,128], index: 4, kind: output, shape index: {}]  }
   0x1   :  { %s2610_s17 = smov 0  }
   0x2 LB: > { %s29_s18 = sadd.s32 1, %s2575_s16  ;;  %p1957_p0 = scmp.ge.s32.totalorder %s2579_s17, 1  ;;  %s2579_s17 = sphi %s2610_s17, %s14_s17   ;;  %s2575_s16 = sphi %s2608_s16, %s3220_s16   ;;  %s2571_s15 = sphi %s2606_s15, %s3219_s15  }
   0x3   : > { %p31_p1 = scmp.ge.s32.totalorder %s29_s18, 2  ;;  %p222_p2 = scmp.lt.s32.totalorder %s2579_s17, 3 }
   0x5   : > { %s3222_s18 = smov (%p31_p1, %s29_s18), 0  ;;  %p223_p3 = pnand %p1957_p0, %p222_p2 }
   0x7   : > { %226 = sbr.rel (%p223_p3) target bundleno = 344 (0x158), region = 36 }
   0xc   : > { %v2425_v0 = vld [vmem:[%s3209_s1 + $0x78] sm:$0xff]   ;;  %v2429_v4 = vld [vmem:[%s3209_s1 + $0x70] sm:$0xff]   ;;  %v2433_v8 = vld [vmem:[%s3209_s1 + $0x68] sm:$0xff]   ;;  %p268_p4 = scmp.lt.s32.totalorder %s2571_s15, 1 }
   0xd   : > { %v2426_v1 = vld [vmem:[%s3209_s1 + $0xf8] sm:$0xff]   ;;  %2188 = vmatprep.subr.bf16.mxu0 %v2425_v0  ;;  %v2430_v5 = vld [vmem:[%s3209_s1 + $0xf0] sm:$0xff]   ;;  %v2434_v9 = vld [vmem:[%s3209_s1 + $0xe8] sm:$0xff]  }
   0xe   : > { %v2427_v2 = vld [vmem:[%s3209_s1 + $0x38] sm:$0xff]   ;;  %2228 = vmatprep.subr.bf16.mxu1 %v2426_v1  ;;  %v2431_v6 = vld [vmem:[%s3209_s1 + $0x30] sm:$0xff]   ;;  %v2435_v10 = vld [vmem:[%s3209_s1 + $0x28] sm:$0xff]   ;;  %s3224_s15 = smov (!%p268_p4, %s2571_s15), 1 }
   0xf   : > { %v2428_v3 = vld [vmem:[%s3209_s1 + $0xb8] sm:$0xff]   ;;  %2189 = vmatpush3.bf16.msra.mxu0 %v2427_v2  ;;  %v2432_v7 = vld [vmem:[%s3209_s1 + $0xb0] sm:$0xff]   ;;  %v2436_v11 = vld [vmem:[%s3209_s1 + $0xa8] sm:$0xff]   ;;  %s2400_s27 = smul.u32 80, %s3224_s15  ;;  %s298_s24 = scalar_lea.vmem %s3212_s4, %s3224_s15 }
  0x10   : > { %2229 = vmatpush3.bf16.msra.mxu1 %v2428_v3  ;;  %2190 = vmatprep.subr.bf16.mxu0 %v2429_v4  ;;  %v2437_v12 = vld [vmem:[%s3209_s1 + $0x60] sm:$0xff]   ;;  %v2441_v16 = vld [vmem:[%s3209_s1 + $0x58] sm:$0xff]   ;;  %v2445_v20 = vld [vmem:[%s3209_s1 + $0x50] sm:$0xff]  }
  0x11   : > { %2230 = vmatprep.subr.bf16.mxu1 %v2430_v5  ;;  %v2438_v13 = vld [vmem:[%s3209_s1 + $0xe0] sm:$0xff]   ;;  %v2442_v17 = vld [vmem:[%s3209_s1 + $0xd8] sm:$0xff]   ;;  %v2446_v21 = vld [vmem:[%s3209_s1 + $0xd0] sm:$0xff]   ;;  %s2724_s12 = scalar_lea.vmem %s3208_s0, %s2400_s27 }
  0x12   : > { %v2439_v14 = vld [vmem:[%s3209_s1 + $0x20] sm:$0xff]   ;;  %v2443_v18 = vld [vmem:[%s3209_s1 + $0x18] sm:$0xff]   ;;  %v2447_v22 = vld [vmem:[%s3209_s1 + $0x10] sm:$0xff]  }
  0x13   : > { %2191 = vmatpush3.bf16.msra.mxu0 %v2431_v6  ;;  %v2440_v15 = vld [vmem:[%s3209_s1 + $0xa0] sm:$0xff]   ;;  %v2444_v19 = vld [vmem:[%s3209_s1 + $0x98] sm:$0xff]   ;;  %v2448_v23 = vld [vmem:[%s3209_s1 + $0x90] sm:$0xff]  }
  0x14   : > { %2231 = vmatpush3.bf16.msra.mxu1 %v2432_v7  ;;  %2192 = vmatprep.subr.bf16.mxu0 %v2433_v8  ;;  %v2449_v24 = vld [vmem:[%s3209_s1 + $0x48] sm:$0xff]   ;;  %v2453_v28 = vld [vmem:[%s3209_s1 + $0x40] sm:$0xff]   ;;  %v2740_v38 = vld [vmem:[%s2724_s12 + $0x10] sm:$0xf] }
  0x15   : > { %2232 = vmatprep.subr.bf16.mxu1 %v2434_v9  ;;  %v2450_v25 = vld [vmem:[%s3209_s1 + $0xc8] sm:$0xff]   ;;  %v2454_v29 = vld [vmem:[%s3209_s1 + $0xc0] sm:$0xff]   ;;  %v2467_v49 = vld [vmem:[%s3209_s1 + $0x178] sm:$0xff]  }
  0x16   : > { %v2451_v26 = vld [vmem:[%s3209_s1 + $0x8] sm:$0xff]   ;;  %v2455_v30 = vld [vmem:[%s3209_s1] sm:$0xff]   ;;  %v2468_v50 = vld [vmem:[%s3209_s1 + $0x1f8] sm:$0xff]  }
  0x17   : > { %2193 = vmatpush3.bf16.msra.mxu0 %v2435_v10  ;;  %v2452_v27 = vld [vmem:[%s3209_s1 + $0x88] sm:$0xff]   ;;  %v2456_v31 = vld [vmem:[%s3209_s1 + $0x80] sm:$0xff]   ;;  %v2469_v55 = vld [vmem:[%s3209_s1 + $0x138] sm:$0xff]  }
  0x18   : > { %2233 = vmatpush3.bf16.msra.mxu1 %v2436_v11  ;;  %2194 = vmatprep.subr.bf16.mxu0 %v2437_v12  ;;  %v300_v32 = vld [vmem:[%s2724_s12] sm:$0xf]  ;;  %v301_v33 = vld [vmem:[%s2724_s12 + $0x8] sm:$0xf]  ;;  %v308_v34 = vld [vmem:[%s2724_s12 + $0x4] sm:$0x1] }
  0x19   : > { %2234 = vmatprep.subr.bf16.mxu1 %v2438_v13  ;;  %v309_v35 = vld [vmem:[%s2724_s12 + $0xc] sm:$0x1]  ;;  %v2009_v36 = vcombine.low %v300_v32, %v308_v34  ;;  %v2737_v37 = vld [vmem:[%s2724_s12 + $0x8] sm:$0xf]  ;;  %v316_v43 = vld [vmem:[%s2724_s12] sm:$0xe]  ;;  %v2058_v57 = vcombine.low %v300_v32, %v301_v33 }
  0x1a   : > { %v2010_v39 = vcombine.low %v301_v33, %v309_v35  ;;  %v2061_v40 = vcombine.low %v2737_v37, %v2740_v38  ;;  %v317_v46 = vld [vmem:[%s2724_s12 + $0x8] sm:$0xe]  ;;  %v2017_v52 = vcombine.low %v316_v43, %v308_v34  ;;  %v2470_v56 = vld [vmem:[%s3209_s1 + $0x1b8] sm:$0xff]   ;;  %v2471_v61 = vld [vmem:[%s3209_s1 + $0x170] sm:$0xff]  }
  0x1b   : > { %2195 = vmatpush3.bf16.msra.mxu0 %v2439_v14  ;;  %v415_v41 = vshrl.u32 %v2009_v36, 16  ;;  %v417_v42 = vshll.u32 %v2009_v36, 16  ;;  %v2018_v53 = vcombine.low %v317_v46, %v309_v35  ;;  %v2472_v63 = vld [vmem:[%s3209_s1 + $0x1f0] sm:$0xff]   ;;  %v303_v3 = vld [vmem:[%s2724_s12 + $0x18] sm:$0xf]  ;;  %v2487_v36 = vld [vmem:[%s3209_s1 + $0x160] sm:$0xff]  }
  0x1c   : > { %2235 = vmatpush3.bf16.msra.mxu1 %v2440_v15  ;;  %2196 = vmatprep.subr.bf16.mxu0 %v2441_v16  ;;  %v422_v44 = vshrl.u32 %v2010_v39, 16  ;;  %v424_v45 = vshll.u32 %v2010_v39, 16  ;;  %v494_v58 = vrot.slane %v2017_v52, 1  ;;  %v2473_v0 = vld [vmem:[%s3209_s1 + $0x130] sm:$0xff]   ;;  %v311_v5 = vld [vmem:[%s2724_s12 + $0x1c] sm:$0x1] }
  0x1d   : > { %2236 = vmatprep.subr.bf16.mxu1 %v2442_v17  ;;  %1558 = vmatprep.mubr.bf16.mxu1 %v2061_v40  ;;  %v419_v47 = vrot.slane %v417_v42, 1  ;;  %v495_v59 = vrot.slane %v2018_v53, 1  ;;  %v2474_v1 = vld [vmem:[%s3209_s1 + $0x1b0] sm:$0xff]   ;;  %v2775_v7 = vld [vmem:[%s2724_s12 + $0x18] sm:$0xf]  ;;  %v2012_v9 = vcombine.low %v303_v3, %v311_v5  ;;  %v2489_v42 = vld [vmem:[%s3209_s1 + $0x120] sm:$0xff]  }
  0x1e   : > { %v426_v48 = vrot.slane %v424_v45, 1  ;;  %v302_v2 = vld [vmem:[%s2724_s12 + $0x10] sm:$0xf]  ;;  %v310_v4 = vld [vmem:[%s2724_s12 + $0x14] sm:$0x1]  ;;  %v2490_v43 = vld [vmem:[%s3209_s1 + $0x1a0] sm:$0xff]  }
  0x1f   : > { %2197 = vmatpush3.bf16.msra.mxu0 %v2443_v18  ;;  %v420_v51 = vor.u32 %v419_v47, %v415_v41  ;;  %v2060_v62 = vcombine.low %v494_v58, %v495_v59  ;;  %v2011_v6 = vcombine.low %v302_v2, %v310_v4  ;;  %v2778_v8 = vld [vmem:[%s2724_s12 + $0x20] sm:$0xf]  ;;  %v318_v11 = vld [vmem:[%s2724_s12 + $0x10] sm:$0xe]  ;;  %v2784_v12 = vld [vmem:[%s2724_s12 + $0xc] sm:$0x1]  ;;  %v2067_v35 = vcombine.low %v302_v2, %v303_v3 }
  0x20   : > { %2237 = vmatpush3.bf16.msra.mxu1 %v2444_v19  ;;  %2198 = vmatprep.subr.bf16.mxu0 %v2445_v20  ;;  %v427_v54 = vor.u32 %v426_v48, %v422_v44  ;;  %v2070_v10 = vcombine.low %v2775_v7, %v2778_v8  ;;  %v319_v15 = vld [vmem:[%s2724_s12 + $0x18] sm:$0xe]  ;;  %v436_v16 = vshrl.u32 %v2012_v9, 16  ;;  %v438_v17 = vshll.u32 %v2012_v9, 16  ;;  %v2483_v20 = vld [vmem:[%s3209_s1 + $0x168] sm:$0xff]  }
  0x21   : > { %2238 = vmatprep.subr.bf16.mxu1 %v2446_v21  ;;  %v429_v13 = vshrl.u32 %v2011_v6, 16  ;;  %v431_v14 = vshll.u32 %v2011_v6, 16  ;;  %v2019_v18 = vcombine.low %v318_v11, %v310_v4  ;;  %v2020_v19 = vcombine.low %v319_v15, %v311_v5  ;;  %v2484_v21 = vld [vmem:[%s3209_s1 + $0x1e8] sm:$0xff]   ;;  %v304_v44 = vld [vmem:[%s2724_s12 + $0x20] sm:$0xf]  ;;  %v2499_v5 = vld [vmem:[%s3209_s1 + $0x158] sm:$0xff]  }
  0x22   : > { %v2059_v60 = vcombine.low %v420_v51, %v427_v54  ;;  %v2804_v32 = vcombine.low %v2737_v37, %v2784_v12  ;;  %v2488_v37 = vld [vmem:[%s3209_s1 + $0x1e0] sm:$0xff]   ;;  %v305_v45 = vld [vmem:[%s2724_s12 + $0x28] sm:$0xf]  ;;  %v2834_v53 = vld [vmem:[%s2724_s12 + $0x1c] sm:$0x1] }
  0x23   : > { %2199 = vmatpush3.bf16.msra.mxu0 %v2447_v22  ;;  %v1970_v22 = vld [vmem:[%s2724_s12 + $0x14] sm:$0x1]  ;;  %v312_v48 = vld [vmem:[%s2724_s12 + $0x24] sm:$0x1]  ;;  %v320_v59 = vld [vmem:[%s2724_s12 + $0x20] sm:$0xe]  ;;  %v2858_v9 = vcombine.low %v2775_v7, %v2834_v53 }
  0x24   : > { %2239 = vmatpush3.bf16.msra.mxu1 %v2448_v23  ;;  %2200 = vmatprep.subr.bf16.mxu0 %v2449_v24  ;;  %v433_v23 = vrot.slane %v431_v14, 1  ;;  %v2485_v24 = vld [vmem:[%s3209_s1 + $0x128] sm:$0xff]   ;;  %v2810_v39 = vcombine.low %v2740_v38, %v1970_v22  ;;  %v543_v41 = vshrl.u32 %v2804_v32, 16  ;;  %v545_v38 = vshll.u32 %v2804_v32, 16  ;;  %v2500_v6 = vld [vmem:[%s3209_s1 + $0x1d8] sm:$0xff]  }
  0x25   : > { %2240 = vmatprep.subr.bf16.mxu1 %v2450_v25  ;;  %1493 = vmatprep.mubr.bf16.mxu0 %v2059_v60  ;;  %v440_v25 = vrot.slane %v438_v17, 1  ;;  %v2013_v54 = vcombine.low %v304_v44, %v312_v48  ;;  %v321_v60 = vld [vmem:[%s2724_s12 + $0x28] sm:$0xe]  ;;  %v2021_v3 = vcombine.low %v320_v59, %v312_v48  ;;  %v2501_v14 = vld [vmem:[%s3209_s1 + $0x118] sm:$0xff]  }
  0x26   : > { %v550_v51 = vshrl.u32 %v2810_v39, 16  ;;  %v552_v52 = vshll.u32 %v2810_v39, 16  ;;  %v2502_v15 = vld [vmem:[%s3209_s1 + $0x198] sm:$0xff]  }
  0x27   : > { %2201 = vmatpush3.bf16.msra.mxu0 %v2451_v26  ;;  %v496_v26 = vrot.slane %v2019_v18, 1  ;;  %v441_v33 = vor.u32 %v440_v25, %v436_v16  ;;  %v2870_v18 = vrot.slane %v545_v38, 1  ;;  %v2904_v38 = vld [vmem:[%s2724_s12 + $0x34] sm:$0x1]  ;;  %v2977_v32 = vld [vmem:[%s2724_s12 + $0x1c] sm:$0x1] }
  0x28   : > { %2241 = vmatpush3.bf16.msra.mxu1 %v2452_v27  ;;  %2202 = vmatprep.subr.bf16.mxu0 %v2453_v28  ;;  %v497_v27 = vrot.slane %v2020_v19, 1  ;;  %v2486_v28 = vld [vmem:[%s3209_s1 + $0x1a8] sm:$0xff]   ;;  %v2076_v19 = vcombine.low %v304_v44, %v305_v45  ;;  %v2882_v25 = vrot.slane %v552_v52, 1 }
  0x29   : > { %2242 = vmatprep.subr.bf16.mxu1 %v2454_v29  ;;  %v434_v29 = vor.u32 %v433_v23, %v429_v13  ;;  %v2877_v23 = vld [vmem:[%s2724_s12 + $0x2c] sm:$0x1] }
  0x2a   : > { %v2069_v34 = vcombine.low %v496_v26, %v497_v27  ;;  %v2505_v26 = vld [vmem:[%s3209_s1 + $0x110] sm:$0xff]  }
  0x2b   : > { %2203 = vmatpush3.bf16.msra.mxu0 %v2455_v30  ;;  %v1977_v30 = vld [vmem:[%s2724_s12 + $0x8] sm:$0xe]  ;;  %v2068_v40 = vcombine.low %v434_v29, %v441_v33  ;;  %v2892_v29 = vld [vmem:[%s2724_s12 + $0x30] sm:$0xf]  ;;  %v315_v33 = vld [vmem:[%s2724_s12 + $0x3c] sm:$0x1] }
  0x2c   : > { %2243 = vmatpush3.bf16.msra.mxu1 %v2456_v31  ;;  %2268 = vmatprep.subr.bf16.mxu0 %v2467_v49  ;;  %v1978_v31 = vld [vmem:[%s2724_s12 + $0x10] sm:$0xe]  ;;  %v2033_v46 = vcombine.low %v1977_v30, %v2784_v12  ;;  %v313_v49 = vld [vmem:[%s2724_s12 + $0x2c] sm:$0x1]  ;;  %v498_v12 = vrot.slane %v2021_v3, 1 }
  0x2d   : > { %2308 = vmatprep.subr.bf16.mxu1 %v2468_v50  ;;  %v2034_v47 = vcombine.low %v1978_v31, %v1970_v22  ;;  %v2829_v50 = vld [vmem:[%s2724_s12 + $0x28] sm:$0xf]  ;;  %v2022_v4 = vcombine.low %v321_v60, %v313_v49  ;;  %v559_v22 = vshll.u32 %v2858_v9, 16  ;;  %v307_v30 = vld [vmem:[%s2724_s12 + $0x38] sm:$0xf] }
  0x2e   : > { %1494 = vmatmul.mubr.bf16.vlgmr.msra.gmra.mxu0 %v2058_v57  ;;  %v2840_v57 = vld [vmem:[%s2724_s12 + $0x24] sm:$0x1]  ;;  %v314_v31 = vld [vmem:[%s2724_s12 + $0x34] sm:$0x1]  ;;  %v2928_v3 = vld [vmem:[%s2724_s12 + $0x3c] sm:$0x1] }
  0x2f   : > { %1559 = vmatmul.mubr.bf16.vlgmr.msra.gmra.mxu1 %v2060_v62  ;;  %2269 = vmatpush3.bf16.msra.mxu0 %v2469_v55  ;;  %v2014_v55 = vcombine.low %v305_v45, %v313_v49  ;;  %v445_v62 = vshll.u32 %v2013_v54, 16  ;;  %v2848_v2 = vrot.slane %v2034_v47, 1  ;;  %v499_v13 = vrot.slane %v2022_v4, 1  ;;  %v322_v45 = vld [vmem:[%s2724_s12 + $0x30] sm:$0xe] }
  0x30   : > { %2309 = vmatpush3.bf16.msra.mxu1 %v2470_v56  ;;  %2270 = vmatprep.subr.bf16.mxu0 %v2471_v61  ;;  %v2837_v56 = vld [vmem:[%s2724_s12 + $0x30] sm:$0xf]  ;;  %v443_v61 = vshrl.u32 %v2013_v54, 16  ;;  %v2868_v16 = vcombine.low %v2778_v8, %v2840_v57  ;;  %v2023_v54 = vcombine.low %v322_v45, %v314_v31  ;;  %v1980_v45 = vld [vmem:[%s2724_s12 + $0x20] sm:$0xe] }
  0x31   : > { %2310 = vmatprep.subr.bf16.mxu1 %v2472_v63  ;;  %1566 = vmatprep.mubr.bf16.mxu1 %v2070_v10  ;;  %v2079_v58 = vcombine.low %v2829_v50, %v2837_v56  ;;  %v450_v63 = vshrl.u32 %v2014_v55, 16  ;;  %v447_v10 = vrot.slane %v445_v62, 1  ;;  %v2516_v62 = vld [vmem:[%s3209_s1 + $0x1c8] sm:$0xff]  }
  0x32   : > { %1501 = vmatprep.mubr.bf16.mxu0 %v2068_v40  ;;  %v566_v27 = vshll.u32 %v2868_v16, 16  ;;  %v1968_v40 = vld [vmem:[%s2724_s12 + $0x40] sm:$0xf]  ;;  %v564_v59 = vshrl.u32 %v2868_v16, 16  ;;  %v500_v4 = vrot.slane %v2023_v54, 1  ;;  %v3035_v16 = vld [vmem:[%s3209_s1 + $0x228] sm:$0xff]  }
  0x33   : > { %2271 = vmatpush3.bf16.msra.mxu0 %v2473_v0  ;;  %v452_v0 = vshll.u32 %v2014_v55, 16  ;;  %v448_v7 = vor.u32 %v447_v10, %v443_v61  ;;  %v3003_v54 = vld [vmem:[%s2724_s12 + $0x28] sm:$0xf] }
  0x34   : > { %2311 = vmatpush3.bf16.msra.mxu1 %v2474_v1  ;;  %2272 = vmatprep.subr.bf16.mxu0 %v2483_v20  ;;  %v2846_v1 = vrot.slane %v2033_v46, 1  ;;  %v2078_v20 = vcombine.low %v498_v12, %v499_v13  ;;  %v323_v46 = vld [vmem:[%s2724_s12 + $0x38] sm:$0xe]  ;;  %v2085_v12 = vcombine.low %v2892_v29, %v307_v30 }
  0x35   : > { %2312 = vmatprep.subr.bf16.mxu1 %v2484_v21  ;;  %v454_v11 = vrot.slane %v452_v0, 1  ;;  %v2503_v21 = vld [vmem:[%s3209_s1 + $0x150] sm:$0xff]   ;;  %v2024_v55 = vcombine.low %v323_v46, %v315_v33 }
  0x36   : > { %1502 = vmatmul.mubr.bf16.gmra.mxu0 %v2067_v35  ;;  %v2016_v35 = vcombine.low %v307_v30, %v315_v33 }
  0x37   : > { %2273 = vmatpush3.bf16.msra.mxu0 %v2485_v24  ;;  %1567 = vmatmul.mubr.bf16.gmra.mxu1 %v2069_v34  ;;  %v455_v17 = vor.u32 %v454_v11, %v450_v63  ;;  %v2504_v24 = vld [vmem:[%s3209_s1 + $0x1d0] sm:$0xff]   ;;  %v2015_v34 = vcombine.low %v2892_v29, %v314_v31  ;;  %v2517_v63 = vld [vmem:[%s3209_s1 + $0x108] sm:$0xff]   ;;  %v2934_v11 = vld [vmem:[%s2724_s12 + $0x44] sm:$0x1] }
  0x38   : > { %2313 = vmatpush3.bf16.msra.mxu1 %v2486_v28  ;;  %2274 = vmatprep.subr.bf16.mxu0 %v2487_v36  ;;  %v2506_v28 = vld [vmem:[%s3209_s1 + $0x190] sm:$0xff]   ;;  %v1967_v36 = vld [vmem:[%s2724_s12 + $0x38] sm:$0xf]  ;;  %v464_v49 = vshrl.u32 %v2016_v35, 16  ;;  %v466_v52 = vshll.u32 %v2016_v35, 16  ;;  %v2974_v30 = vcombine.low %v1968_v40, %v2934_v11 }
  0x39   : > { %2314 = vmatprep.subr.bf16.mxu1 %v2488_v37  ;;  %1574 = vmatprep.mubr.bf16.mxu1 %v2079_v58  ;;  %v2077_v8 = vcombine.low %v448_v7, %v455_v17  ;;  %v557_v37 = vshrl.u32 %v2858_v9, 16  ;;  %v2088_v44 = vcombine.low %v1967_v36, %v1968_v40  ;;  %v457_v47 = vshrl.u32 %v2015_v34, 16  ;;  %v2515_v58 = vld [vmem:[%s3209_s1 + $0x148] sm:$0xff]   ;;  %v2971_v29 = vld [vmem:[%s2724_s12 + $0x14] sm:$0x1] }
  0x3a   : > { %v459_v48 = vshll.u32 %v2015_v34, 16  ;;  %v468_v61 = vrot.slane %v466_v52, 1  ;;  %v1979_v34 = vld [vmem:[%s2724_s12 + $0x18] sm:$0xe]  ;;  %v2036_v52 = vcombine.low %v1980_v45, %v2840_v57  ;;  %v1984_v45 = vld [vmem:[%s2724_s12 + $0x40] sm:$0xe] }
  0x3b   : > { %2275 = vmatpush3.bf16.msra.mxu0 %v2489_v42  ;;  %1509 = vmatprep.mubr.bf16.mxu0 %v2077_v8  ;;  %v2901_v42 = vrot.slane %v559_v22, 1  ;;  %v2951_v8 = vcombine.low %v1967_v36, %v2928_v3  ;;  %v2035_v46 = vcombine.low %v1979_v34, %v2834_v53  ;;  %v3014_v53 = vld [vmem:[%s3209_s1 + $0x230] sm:$0xff]  }
  0x3c   : > { %2315 = vmatpush3.bf16.msra.mxu1 %v2490_v43  ;;  %2276 = vmatprep.subr.bf16.mxu0 %v2499_v5  ;;  %v2908_v43 = vcombine.low %v2829_v50, %v2877_v23  ;;  %v2918_v50 = vcombine.low %v2837_v56, %v2904_v38  ;;  %v461_v60 = vrot.slane %v459_v48, 1  ;;  %v501_v5 = vrot.slane %v2024_v55, 1  ;;  %v2518_v56 = vld [vmem:[%s3209_s1 + $0x188] sm:$0xff]   ;;  %v3006_v55 = vld [vmem:[%s2724_s12 + $0x24] sm:$0x1] }
  0x3d   : > { %2316 = vmatprep.subr.bf16.mxu1 %v2500_v6  ;;  %v469_v10 = vor.u32 %v468_v61, %v464_v49  ;;  %v594_v48 = vshll.u32 %v2974_v30, 16  ;;  %v624_v61 = vrot.slane %v2035_v46, 1 }
  0x3e   : > { %1510 = vmatmul.mubr.bf16.gmra.mxu0 %v2076_v19  ;;  %v573_v0 = vshll.u32 %v2908_v43, 16  ;;  %v462_v6 = vor.u32 %v461_v60, %v457_v47  ;;  %v2087_v13 = vcombine.low %v500_v4, %v501_v5  ;;  %v580_v7 = vshll.u32 %v2918_v50, 16  ;;  %v2520_v19 = vld [vmem:[%s3209_s1 + $0x1c0] sm:$0xff]  }
  0x3f   : > { %2277 = vmatpush3.bf16.msra.mxu0 %v2501_v14  ;;  %1575 = vmatmul.mubr.bf16.gmra.mxu1 %v2078_v20  ;;  %v2519_v14 = vld [vmem:[%s3209_s1 + $0x140] sm:$0xff]   ;;  %v571_v22 = vshrl.u32 %v2908_v43, 16  ;;  %v625_v4 = vrot.slane %v2036_v52, 1 }
  0x40   : > { %2317 = vmatpush3.bf16.msra.mxu1 %v2502_v15  ;;  %2278 = vmatprep.subr.bf16.mxu0 %v2503_v21  ;;  %v568_v15 = vrot.slane %v566_v27, 1  ;;  %v2086_v17 = vcombine.low %v462_v6, %v469_v10  ;;  %v2521_v20 = vld [vmem:[%s3209_s1 + $0x100] sm:$0xff]   ;;  %v2063_v21 = vcombine.low %v2846_v1, %v2848_v2  ;;  %v548_v27 = vor.u32 %v2870_v18, %v543_v41  ;;  %v2965_v2 = vld [vmem:[%s2724_s12 + $0x10] sm:$0xf] }
  0x41   : > { %2318 = vmatprep.subr.bf16.mxu1 %v2504_v24  ;;  %1582 = vmatprep.mubr.bf16.mxu1 %v2088_v44  ;;  %v2522_v24 = vld [vmem:[%s3209_s1 + $0x180] sm:$0xff]   ;;  %v555_v1 = vor.u32 %v2882_v25, %v550_v51  ;;  %v2041_v39 = vcombine.low %v2965_v2, %v2971_v29  ;;  %v2986_v51 = vld [vmem:[%s3209_s1 + $0x238] sm:$0xff]   ;;  %v578_v18 = vshrl.u32 %v2918_v50, 16  ;;  %v587_v25 = vshll.u32 %v2951_v8, 16 }
  0x42   : > { %1517 = vmatprep.mubr.bf16.mxu0 %v2086_v17  ;;  %v2991_v35 = vrot.slane %v580_v7, 1  ;;  %v2998_v47 = vld [vmem:[%s2724_s12 + $0x20] sm:$0xf]  ;;  %v569_v6 = vor.u32 %v568_v15, %v564_v59  ;;  %v1981_v59 = vld [vmem:[%s2724_s12 + $0x28] sm:$0xe] }
  0x43   : > { %2279 = vmatpush3.bf16.msra.mxu0 %v2505_v26  ;;  %v2956_v26 = vrot.slane %v573_v0, 1  ;;  %v671_v31 = vshrl.u32 %v2041_v39, 16  ;;  %v673_v33 = vshll.u32 %v2041_v39, 16  ;;  %v2062_v36 = vcombine.low %v548_v27, %v555_v1  ;;  %v1982_v15 = vld [vmem:[%s2724_s12 + $0x30] sm:$0xe]  ;;  %v3051_v39 = vld [vmem:[%s3209_s1 + $0x220] sm:$0xff]  }
  0x44   : > { %2319 = vmatpush3.bf16.msra.mxu1 %v2506_v28  ;;  %2280 = vmatprep.subr.bf16.mxu0 %v2515_v58  ;;  %v2968_v28 = vld [vmem:[%s2724_s12 + $0x18] sm:$0xf]  ;;  %v562_v58 = vor.u32 %v2901_v42, %v557_v37  ;;  %v2043_v57 = vcombine.low %v2998_v47, %v3006_v55  ;;  %v3024_v37 = vrot.slane %v587_v25, 1  ;;  %v592_v1 = vshrl.u32 %v2974_v30, 16 }
  0x45   : > { %2320 = vmatprep.subr.bf16.mxu1 %v2516_v62  ;;  %v2042_v41 = vcombine.low %v2968_v28, %v2977_v32  ;;  %v675_v49 = vrot.slane %v673_v33, 1  ;;  %v3017_v62 = vld [vmem:[%s2724_s12 + $0x2c] sm:$0x1]  ;;  %v2064_v10 = vcombine.low %v2965_v2, %v2968_v28  ;;  %v3045_v27 = vld [vmem:[%s2724_s12 + $0x38] sm:$0xf] }
  0x46   : > { %1518 = vmatmul.mubr.bf16.gmra.mxu0 %v2085_v12  ;;  %v2044_v9 = vcombine.low %v3003_v54, %v3017_v62  ;;  %v685_v5 = vshrl.u32 %v2043_v57, 16  ;;  %v2072_v12 = vcombine.low %v624_v61, %v625_v4  ;;  %v2071_v28 = vcombine.low %v562_v58, %v569_v6  ;;  %v3076_v58 = vld [vmem:[%s2724_s12 + $0x40] sm:$0xf] }
  0x47   : > { %2281 = vmatpush3.bf16.msra.mxu0 %v2517_v63  ;;  %1583 = vmatmul.mubr.bf16.gmra.mxu1 %v2087_v13  ;;  %v678_v40 = vshrl.u32 %v2042_v41, 16  ;;  %v680_v44 = vshll.u32 %v2042_v41, 16  ;;  %v585_v63 = vshrl.u32 %v2951_v8, 16  ;;  %v676_v0 = vor.u32 %v675_v49, %v671_v31  ;;  %v3054_v41 = vld [vmem:[%s2724_s12 + $0x34] sm:$0x1] }
  0x48   : > { %2321 = vmatpush3.bf16.msra.mxu1 %v2518_v56  ;;  %2282 = vmatprep.subr.bf16.mxu0 %v2519_v14  ;;  %v687_v56 = vshll.u32 %v2043_v57, 16  ;;  %v692_v13 = vshrl.u32 %v2044_v9, 16  ;;  %v694_v14 = vshll.u32 %v2044_v9, 16  ;;  %v2073_v61 = vcombine.low %v2998_v47, %v3003_v54 }
  0x49   : > { %2322 = vmatprep.subr.bf16.mxu1 %v2520_v19  ;;  %1623 = vmatprep.mubr.bf16.mxu0 %v2063_v21  ;;  %v682_v60 = vrot.slane %v680_v44, 1  ;;  %v2038_v21 = vcombine.low %v1982_v15, %v2904_v38  ;;  %v1983_v44 = vld [vmem:[%s2724_s12 + $0x38] sm:$0xe] }
  0x4a   : > { %v689_v17 = vrot.slane %v687_v56, 1  ;;  %v696_v19 = vrot.slane %v694_v14, 1  ;;  %v2039_v50 = vcombine.low %v1983_v44, %v2928_v3 }
  0x4b   : > { %2283 = vmatpush3.bf16.msra.mxu0 %v2521_v20  ;;  %v683_v42 = vor.u32 %v682_v60, %v678_v40  ;;  %v2037_v20 = vcombine.low %v1981_v59, %v2877_v23  ;;  %v3057_v23 = vld [vmem:[%s2724_s12 + $0x3c] sm:$0x1]  ;;  %v627_v31 = vrot.slane %v2038_v21, 1  ;;  %v583_v40 = vor.u32 %v2991_v35, %v578_v18  ;;  %v3079_v60 = vld [vmem:[%s2724_s12 + $0x48] sm:$0xf] }
  0x4c   : > { %2323 = vmatpush3.bf16.msra.mxu1 %v2522_v24  ;;  %2360 = vmatprep.subr.bf16.mxu0 %v2986_v51  ;;  %v3042_v24 = vld [vmem:[%s2724_s12 + $0x30] sm:$0xf]  ;;  %v690_v2 = vor.u32 %v689_v17, %v685_v5  ;;  %v697_v38 = vor.u32 %v696_v19, %v692_v13  ;;  %v2046_v34 = vcombine.low %v3045_v27, %v3057_v23  ;;  %v3084_v18 = vld [vmem:[%s2724_s12 + $0x44] sm:$0x1]  ;;  %v3087_v35 = vld [vmem:[%s2724_s12 + $0x4c] sm:$0x1] }
  0x4d   : > { %2384 = vmatprep.subr.bf16.mxu1 %v2986_v51  ;;  %v2065_v7 = vcombine.low %v676_v0, %v683_v42  ;;  %v626_v25 = vrot.slane %v2037_v20, 1  ;;  %v2045_v33 = vcombine.low %v3042_v24, %v3054_v41  ;;  %v2047_v0 = vcombine.low %v3076_v58, %v3084_v18  ;;  %v2002_v17 = vld [vmem:[%s2724_s12 + $0x18] sm:$0xe] }
  0x4e   : > { %1624 = vmatmul.mubr.bf16.vlgmr.msra.gmra.mxu0 %v2062_v36  ;;  %v576_v36 = vor.u32 %v2956_v26, %v571_v22  ;;  %v706_v43 = vshrl.u32 %v2046_v34, 16  ;;  %v708_v22 = vshll.u32 %v2046_v34, 16  ;;  %v2040_v26 = vcombine.low %v1984_v45, %v2934_v11  ;;  %v2542_v11 = vld [vmem:[%s3209_s1 + $0x218] sm:$0xff]  }
  0x4f   : > { %2361 = vmatpush3.bf16.msra.mxu0 %v2986_v51  ;;  %1631 = vmatprep.mubr.bf16.mxu0 %v2072_v12  ;;  %v2081_v46 = vcombine.low %v626_v25, %v627_v31  ;;  %v699_v49 = vshrl.u32 %v2045_v33, 16  ;;  %v701_v52 = vshll.u32 %v2045_v33, 16  ;;  %v2048_v4 = vcombine.low %v3079_v60, %v3087_v35  ;;  %v2003_v31 = vld [vmem:[%s2724_s12 + $0x20] sm:$0xe]  ;;  %v2004_v33 = vld [vmem:[%s2724_s12 + $0x28] sm:$0xe] }
  0x50   : > { %2362 = vmatprep.subr.bf16.mxu0 %v3014_v53  ;;  %1688 = vmatprep.mubr.bf16.mxu1 %v2065_v7  ;;  %v710_v3 = vrot.slane %v708_v22, 1  ;;  %v628_v9 = vrot.slane %v2039_v50, 1  ;;  %v629_v47 = vrot.slane %v2040_v26, 1  ;;  %v713_v42 = vshrl.u32 %v2047_v0, 16  ;;  %v2001_v7 = vld [vmem:[%s2724_s12 + $0x10] sm:$0xe] }
  0x51   : > { %1689 = vmatmul.mubr.bf16.vlgmr.msra.gmra.mxu1 %v2064_v10  ;;  %v703_v57 = vrot.slane %v701_v52, 1  ;;  %v715_v5 = vshll.u32 %v2047_v0, 16  ;;  %v2080_v6 = vcombine.low %v576_v36, %v583_v40  ;;  %v720_v10 = vshrl.u32 %v2048_v4, 16  ;;  %v2007_v36 = vld [vmem:[%s2724_s12 + $0x40] sm:$0xe] }
  0x52   : > { %2392 = vmatpush3.bf16.msra.mxu1 %v2986_v51  ;;  %v2074_v51 = vcombine.low %v690_v2, %v697_v38  ;;  %v711_v56 = vor.u32 %v710_v3, %v706_v43  ;;  %v722_v12 = vshll.u32 %v2048_v4, 16  ;;  %v2090_v13 = vcombine.low %v628_v9, %v629_v47  ;;  %v2005_v2 = vld [vmem:[%s2724_s12 + $0x30] sm:$0xe]  ;;  %v2008_v40 = vld [vmem:[%s2724_s12 + $0x48] sm:$0xe] }
  0x53   : > { %2363 = vmatpush3.bf16.msra.mxu0 %v3014_v53  ;;  %2385 = vmatprep.subr.bf16.mxu1 %v3014_v53  ;;  %v704_v54 = vor.u32 %v703_v57, %v699_v49  ;;  %v717_v14 = vrot.slane %v715_v5, 1  ;;  %v2049_v19 = vcombine.low %v2001_v7, %v2971_v29  ;;  %v2050_v21 = vcombine.low %v2002_v17, %v2977_v32 }
  0x54   : > { %2364 = vmatprep.subr.bf16.mxu0 %v3035_v16  ;;  %1696 = vmatprep.mubr.bf16.mxu1 %v2074_v51  ;;  %v724_v15 = vrot.slane %v722_v12, 1  ;;  %v590_v38 = vor.u32 %v3024_v37, %v585_v63  ;;  %v2082_v29 = vcombine.low %v3042_v24, %v3045_v27  ;;  %v2053_v63 = vcombine.low %v2005_v2, %v3054_v41  ;;  %v2551_v37 = vld [vmem:[%s3209_s1 + $0x208] sm:$0xff]   ;;  %v2552_v41 = vld [vmem:[%s3209_s1 + $0x200] sm:$0xff]  }
  0x55   : > { %v2083_v59 = vcombine.low %v704_v54, %v711_v56  ;;  %v718_v20 = vor.u32 %v717_v14, %v713_v42  ;;  %v750_v32 = vrot.slane %v2049_v19, 1  ;;  %v751_v34 = vrot.slane %v2050_v21, 1 }
  0x56   : > { %1632 = vmatmul.mubr.bf16.gmra.mxu0 %v2071_v28  ;;  %2393 = vmatpush3.bf16.msra.mxu1 %v3014_v53  ;;  %v596_v53 = vrot.slane %v594_v48, 1  ;;  %v2543_v48 = vld [vmem:[%s3209_s1 + $0x210] sm:$0xff]   ;;  %v2006_v28 = vld [vmem:[%s2724_s12 + $0x38] sm:$0xe]  ;;  %v2051_v24 = vcombine.low %v2003_v31, %v3006_v55  ;;  %v2052_v27 = vcombine.low %v2004_v33, %v3017_v62  ;;  %v2055_v62 = vcombine.low %v2007_v36, %v3084_v18  ;;  %s2168_s12 = sshll.u32 %s3224_s15, 5 }
  0x57   : > { %2365 = vmatpush3.bf16.msra.mxu0 %v3035_v16  ;;  %2386 = vmatprep.subr.bf16.mxu1 %v3035_v16  ;;  %v2054_v30 = vcombine.low %v2006_v28, %v3057_v23  ;;  %v754_v23 = vrot.slane %v2053_v63, 1  ;;  %v2056_v51 = vcombine.low %v2008_v40, %v3087_v35  ;;  %s3167_s21 = scalar_lea.vmem %s3211_s3, %s2168_s12 }
  0x58   : > { %2366 = vmatprep.subr.bf16.mxu0 %v3051_v39  ;;  %1639 = vmatprep.mubr.bf16.mxu0 %v2081_v46  ;;  %v597_v25 = vor.u32 %v596_v53, %v592_v1  ;;  %v752_v45 = vrot.slane %v2051_v24, 1  ;;  %v753_v55 = vrot.slane %v2052_v27, 1  ;;  %v2091_v46 = vcombine.low %v3076_v58, %v3079_v60 }
  0x59   : > { %1697 = vmatmul.mubr.bf16.gmra.mxu1 %v2073_v61  ;;  %v755_v44 = vrot.slane %v2054_v30, 1  ;;  %v756_v43 = vrot.slane %v2055_v62, 1  ;;  %v757_v22 = vrot.slane %v2056_v51, 1 }
  0x5a   : > { %2394 = vmatpush3.bf16.msra.mxu1 %v3035_v16  ;;  %1704 = vmatprep.mubr.bf16.mxu1 %v2083_v59  ;;  %v725_v16 = vor.u32 %v724_v15, %v720_v10  ;;  %v2089_v1 = vcombine.low %v590_v38, %v597_v25  ;;  %v2075_v52 = vcombine.low %v752_v45, %v753_v55 }
  0x5b   : > { %2367 = vmatpush3.bf16.msra.mxu0 %v3051_v39  ;;  %2387 = vmatprep.subr.bf16.mxu1 %v3051_v39  ;;  %v2084_v49 = vcombine.low %v754_v23, %v755_v44  ;;  %v2093_v50 = vcombine.low %v756_v43, %v757_v22  ;;  %v3170_v22 = vld [vmem:[%s3167_s21 + $0x8] sm:$0xff]  }
  0x5c   : > { %2368 = vmatprep.subr.bf16.mxu0 %v2542_v11  ;;  %v2092_v8 = vcombine.low %v718_v20, %v725_v16 }
  0x5e   : > { %1640 = vmatmul.mubr.bf16.gmra.mxu0 %v2080_v6  ;;  %2395 = vmatpush3.bf16.msra.mxu1 %v3051_v39  ;;  %v2066_v39 = vcombine.low %v750_v32, %v751_v34 }
  0x5f   : > { %2369 = vmatpush3.bf16.msra.mxu0 %v2542_v11  ;;  %1647 = vmatprep.mubr.bf16.mxu0 %v2090_v13 }
  0x60   : > { %2370 = vmatprep.subr.bf16.mxu0 %v2543_v48  ;;  %2388 = vmatprep.subr.bf16.mxu1 %v2542_v11 }
  0x61   : > { %1705 = vmatmul.mubr.bf16.gmra.mxu1 %v2082_v29 }
  0x62   : > { %2396 = vmatpush3.bf16.msra.mxu1 %v2542_v11  ;;  %1712 = vmatprep.mubr.bf16.mxu1 %v2092_v8 }
  0x63   : > { %2371 = vmatpush3.bf16.msra.mxu0 %v2543_v48  ;;  %2389 = vmatprep.subr.bf16.mxu1 %v2543_v48 }
  0x64   : > { %2372 = vmatprep.subr.bf16.mxu0 %v2551_v37 }
  0x66   : > { %1648 = vmatmul.mubr.bf16.gmra.mxu0 %v2089_v1  ;;  %2397 = vmatpush3.bf16.msra.mxu1 %v2543_v48 }
  0x67   : > { %2373 = vmatpush3.bf16.msra.mxu0 %v2551_v37  ;;  %2376 = vmatprep.mubr.bf16.mxu0 %v2066_v39 }
  0x68   : > { %2374 = vmatprep.subr.bf16.mxu0 %v2552_v41  ;;  %2390 = vmatprep.subr.bf16.mxu1 %v2551_v37 }
  0x69   : > { %1713 = vmatmul.mubr.bf16.gmra.mxu1 %v2091_v46 }
  0x6a   : > { %2398 = vmatpush3.bf16.msra.mxu1 %v2551_v37  ;;  %2380 = vmatprep.mubr.bf16.mxu1 %v2084_v49 }
  0x6b   : > { %2375 = vmatpush3.bf16.msra.mxu0 %v2552_v41  ;;  %2391 = vmatprep.subr.bf16.mxu1 %v2552_v41 }
  0x6e   : > { %2377 = vmatmul.mubr.bf16.vlgmr.msra.gmra.mxu0 %v2075_v52  ;;  %2399 = vmatpush3.bf16.msra.mxu1 %v2552_v41  ;;  %v2057_v41 = vld [vmem:[%s3210_s2] ss:$0 sm:$0xff] }
  0x71   : > { %2381 = vmatmul.mubr.bf16.vlgmr.msra.gmra.mxu1 %v2093_v50 }
  0xee   : > { %v2204_v26 = vpop.f32.mrf.mxu0 }
  0xef   : > { %v2244_v58 = vpop.f32.mrf.mxu1 }
  0xf0   : > { %v2205_v60 = vpop.f32.mrf.mxu0 }
  0xf1   : > { %v2245_v18 = vpop.f32.mrf.mxu1  ;;  %v2206_v39 = vadd.f32 %v2205_v60, %v2204_v26 }
  0xf2   : > { %v2207_v61 = vpop.f32.mrf.mxu0  ;;  %v2246_v52 = vadd.f32 %v2245_v18, %v2244_v58  ;;  %v2175_v58 = vunpack.c.l.bf16 %v3170_v22 }
  0xf3   : > { %v2247_v35 = vpop.f32.mrf.mxu1  ;;  %v1496_v49 = vadd.f32 %v2206_v39, %v2057_v41 }
  0xf4   : > { %v2208_v0 = vpop.f32.mrf.mxu0 }
  0xf5   : > { %v2248_v57 = vpop.f32.mrf.mxu1  ;;  %v2209_v23 = vadd.f32 %v2208_v0, %v2207_v61  ;;  %v1561_v18 = vadd.f32 %v2246_v52, %v1496_v49 }
  0xf6   : > { %v2210_v11 = vpop.f32.mrf.mxu0  ;;  %v2249_v26 = vadd.f32 %v2248_v57, %v2247_v35 }
  0xf7   : > { %v2250_v4 = vpop.f32.mrf.mxu1  ;;  %v1499_v50 = vadd.f32 %v2209_v23, %v2057_v41 }
  0xf8   : > { %v2211_v9 = vpop.f32.mrf.mxu0 }
  0xf9   : > { %v2251_v3 = vpop.f32.mrf.mxu1  ;;  %v2212_v44 = vadd.f32 %v2211_v9, %v2210_v11  ;;  %v3173_v11 = vld [vmem:[%s3167_s21] sm:$0xff]  }
  0xfa   : > { %v2213_v54 = vpop.f32.mrf.mxu0  ;;  %v2252_v61 = vadd.f32 %v2251_v3, %v2250_v4  ;;  %v2171_v57 = vunpack.c.l.bf16 %v3173_v11  ;;  %v1564_v4 = vadd.f32 %v2249_v26, %v1499_v50 }
  0xfb   : > { %v2253_v47 = vpop.f32.mrf.mxu1  ;;  %v1504_v60 = vadd.f32 %v2212_v44, %v2057_v41 }
  0xfc   : > { %v2214_v5 = vpop.f32.mrf.mxu0 }
  0xfd   : > { %v2254_v42 = vpop.f32.mrf.mxu1  ;;  %v2215_v55 = vadd.f32 %v2214_v5, %v2213_v54  ;;  %v1569_v3 = vadd.f32 %v2252_v61, %v1504_v60  ;;  %v2176_v60 = vunpack.c.h.bf16 %v3170_v22 }
  0xfe   : > { %v2216_v56 = vpop.f32.mrf.mxu0 }
  0xff   : > { %v2256_v53 = vpop.f32.mrf.mxu1  ;;  %v1507_v9 = vadd.f32 %v2215_v55, %v2057_v41 }
 0x100   : > { %v2217_v10 = vpop.f32.mrf.mxu0 }
 0x101   : > { %v2257_v6 = vpop.f32.mrf.mxu1  ;;  %v2218_v51 = vadd.f32 %v2217_v10, %v2216_v56 }
 0x102   : > { %v2219_v13 = vpop.f32.mrf.mxu0  ;;  %v2258_v5 = vadd.f32 %v2257_v6, %v2256_v53 }
 0x103   : > { %v3142_v12 = vpop.f32.mrf.mxu1  ;;  %v1512_v54 = vadd.f32 %v2218_v51, %v2057_v41 }
 0x104   : > { %v2220_v7 = vpop.f32.mrf.mxu0 }
 0x105   : > { %v3144_v14 = vpop.f32.mrf.mxu1  ;;  %v2221_v56 = vadd.f32 %v2220_v7, %v2219_v13  ;;  %v1577_v6 = vadd.f32 %v2258_v5, %v1512_v54 }
 0x106   : > { %v2222_v59 = vpop.f32.mrf.mxu0  ;;  %v2261_v7 = vadd.f32 %v3144_v14, %v3142_v12 }
 0x107   : > { %v3146_v17 = vpop.f32.mrf.mxu1  ;;  %v1515_v13 = vadd.f32 %v2221_v56, %v2057_v41 }
 0x108   : > { %v2223_v15 = vpop.f32.mrf.mxu0 }
 0x109   : > { %v3148_v48 = vpop.f32.mrf.mxu1  ;;  %v2224_v39 = vadd.f32 %v2223_v15, %v2222_v59  ;;  %v1580_v61 = vadd.f32 %v2261_v7, %v1515_v13 }
 0x10a   : > { %v2225_v19 = vpop.f32.mrf.mxu0 }
 0x10b   : > { %v3150_v20 = vpop.f32.mrf.mxu1 }
 0x10c   : > { %v2226_v21 = vpop.f32.mrf.mxu0 }
 0x10d   : > { %v3152_v28 = vpop.f32.mrf.mxu1  ;;  %v2227_v44 = vadd.f32 %v2226_v21, %v2225_v19 }
 0x10e   : > { %v2284_v2 = vpop.f32.mrf.mxu0 }
 0x110   : > { %v2285_v16 = vpop.f32.mrf.mxu0 }
 0x111   : > { %v2324_v25 = vpop.f32.mrf.mxu1 }
 0x112   : > { %v2287_v38 = vpop.f32.mrf.mxu0 }
 0x113   : > { %v2325_v33 = vpop.f32.mrf.mxu1 }
 0x114   : > { %v2288_v31 = vpop.f32.mrf.mxu0 }
 0x115   : > { %v3154_v32 = vpop.f32.mrf.mxu1  ;;  %v2289_v55 = vadd.f32 %v2288_v31, %v2287_v38  ;;  %v1523_v38 = vadd.f32 %v2227_v44, %v2057_v41 }
 0x116   : > { %v2290_v29 = vpop.f32.mrf.mxu0  ;;  %3213 = vst [vmem:[#allocation2_spill] sm:$0xff] %v3154_v32 }
 0x117   : > { %v3156_v8 = vpop.f32.mrf.mxu1  ;;  %v1629_v31 = vadd.f32 %v2289_v55, %v1564_v4 }
 0x118   : > { %v2291_v34 = vpop.f32.mrf.mxu0  ;;  %3214 = vst [vmem:[#allocation3_spill] sm:$0xff] %v3156_v8  ;;  %v2286_v8 = vadd.f32 %v2285_v16, %v2284_v2  ;;  %v2326_v16 = vadd.f32 %v2325_v33, %v2324_v25  ;;  %v2267_v25 = vadd.f32 %v3152_v28, %v3150_v20 }
 0x119   : > { %v2330_v30 = vpop.f32.mrf.mxu1  ;;  %v2292_v23 = vadd.f32 %v2291_v34, %v2290_v29  ;;  %v1520_v29 = vadd.f32 %v2224_v39, %v2057_v41  ;;  %v2264_v34 = vadd.f32 %v3148_v48, %v3146_v17 }
 0x11a   : > { %v2293_v63 = vpop.f32.mrf.mxu0  ;;  %v1626_v2 = vadd.f32 %v2286_v8, %v1561_v18 }
 0x11b   : > { %v2331_v24 = vpop.f32.mrf.mxu1  ;;  %v1634_v49 = vadd.f32 %v2292_v23, %v1569_v3  ;;  %v1585_v41 = vadd.f32 %v2264_v34, %v1520_v29 }
 0x11c   : > { %v2294_v37 = vpop.f32.mrf.mxu0  ;;  %v2332_v19 = vadd.f32 %v2331_v24, %v2330_v30  ;;  %v1691_v52 = vadd.f32 %v2326_v16, %v1626_v2 }
 0x11d   : > { %v3158_v1 = vpop.f32.mrf.mxu1  ;;  %v2295_v51 = vadd.f32 %v2294_v37, %v2293_v63  ;;  %v3216_v33 = vld [vmem:[#allocation2_spill] sm:$0xff] }
 0x11e   : > { %v2296_v27 = vpop.f32.mrf.mxu0  ;;  %3215 = vst [vmem:[#allocation4_spill] sm:$0xff] %v3158_v1  ;;  %v2255_v1 = vadd.f32 %v2254_v42, %v2253_v47  ;;  %v1699_v20 = vadd.f32 %v2332_v19, %v1634_v49 }
 0x11f   : > { %v2334_v40 = vpop.f32.mrf.mxu1  ;;  %v3217_v8 = vld [vmem:[#allocation3_spill] sm:$0xff] }
 0x120   : > { %v2297_v36 = vpop.f32.mrf.mxu0  ;;  %v1572_v42 = vadd.f32 %v2255_v1, %v1507_v9  ;;  %v2329_v63 = vadd.f32 %v3217_v8, %v3216_v33  ;;  %v1588_v9 = vadd.f32 %v2267_v25, %v1523_v38 }
 0x121   : > { %v2336_v62 = vpop.f32.mrf.mxu1  ;;  %v2298_v59 = vadd.f32 %v2297_v36, %v2296_v27 }
 0x122   : > { %v2299_v45 = vpop.f32.mrf.mxu0  ;;  %v1637_v1 = vadd.f32 %v2295_v51, %v1572_v42  ;;  %v1694_v5 = vadd.f32 %v2329_v63, %v1629_v31  ;;  %v2187_v51 = vld [vmem:[%s3167_s21 + $0x18] sm:$0xff]  }
 0x123   : > { %v2337_v43 = vpop.f32.mrf.mxu1  ;;  %v1642_v50 = vadd.f32 %v2298_v59, %v1577_v6  ;;  %v2184_v22 = vunpack.c.h.bf16 %v2187_v51 }
 0x124   : > { %v2300_v46 = vpop.f32.mrf.mxu0  ;;  %v2338_v17 = vadd.f32 %v2337_v43, %v2336_v62 }
 0x125   : > { %v3175_v32 = vpop.f32.mrf.mxu1  ;;  %v3218_v12 = vld [vmem:[#allocation4_spill] sm:$0xff]  ;;  %v2301_v48 = vadd.f32 %v2300_v46, %v2299_v45 }
 0x126   : > { %v2302_v0 = vpop.f32.mrf.mxu0  ;;  %v2335_v14 = vadd.f32 %v2334_v40, %v3218_v12  ;;  %v2172_v40 = vunpack.c.h.bf16 %v3173_v11  ;;  %v2186_v45 = vld [vmem:[%s3167_s21 + $0x10] sm:$0xff]   ;;  %v1707_v23 = vadd.f32 %v2338_v17, %v1642_v50 }
 0x127   : > { %v2340_v35 = vpop.f32.mrf.mxu1  ;;  %v1645_v43 = vadd.f32 %v2301_v48, %v1580_v61  ;;  %v2179_v2 = vunpack.c.l.bf16 %v2186_v45  ;;  %v2180_v59 = vunpack.c.h.bf16 %v2186_v45 }
 0x128   : > { %v2303_v10 = vpop.f32.mrf.mxu0  ;;  %v1702_v46 = vadd.f32 %v2335_v14, %v1637_v1  ;;  %v2341_v18 = vadd.f32 %v2340_v35, %v3175_v32 }
 0x129   : > { %v2342_v53 = vpop.f32.mrf.mxu1  ;;  %v2304_v27 = vadd.f32 %v2303_v10, %v2302_v0 }
 0x12a   : > { %v2305_v47 = vpop.f32.mrf.mxu0  ;;  %v1710_v7 = vadd.f32 %v2341_v18, %v1645_v43 }
 0x12b   : > { %v2343_v21 = vpop.f32.mrf.mxu1  ;;  %v1650_v0 = vadd.f32 %v2304_v27, %v1585_v41 }
 0x12c   : > { %v2306_v15 = vpop.f32.mrf.mxu0  ;;  %v2344_v56 = vadd.f32 %v2343_v21, %v2342_v53 }
 0x12d   : > { %v2345_v36 = vpop.f32.mrf.mxu1  ;;  %v2307_v30 = vadd.f32 %v2306_v15, %v2305_v47 }
 0x12e   : > { %v2378_v37 = vpop.f32.mrf.mxu0  ;;  %v1715_v16 = vadd.f32 %v2344_v56, %v1650_v0 }
 0x12f   : > { %v2346_v26 = vpop.f32.mrf.mxu1  ;;  %v1764_v10 = vadd.f32 %v2378_v37, %v1699_v20  ;;  %v1653_v39 = vadd.f32 %v2307_v30, %v1588_v9 }
 0x130   : > { %v1755_v24 = vpop.f32.mrf.mxu0  ;;  %v2347_v3 = vadd.f32 %v2346_v26, %v2345_v36 }
 0x131   : > { %v1756_v28 = vadd.f32 %v1755_v24, %v1691_v52  ;;  %v2382_v62 = vpop.f32.mrf.mxu1  ;;  %v1804_v11 = vadd.f32 %v2175_v58, %v1764_v10 }
 0x132   : > { %v2379_v54 = vpop.f32.mrf.mxu0  ;;  %v1718_v15 = vadd.f32 %v2347_v3, %v1653_v39  ;;  %v1780_v21 = vadd.f32 %v2382_v62, %v1715_v16 }
 0x133   : > { %v1802_v44 = vadd.f32 %v2171_v57, %v1756_v28  ;;  %v1771_v55 = vpop.f32.mrf.mxu1  ;;  %v1767_v47 = vadd.f32 %v2379_v54, %v1702_v46  ;;  %v2183_v57 = vunpack.c.l.bf16 %v2187_v51  ;;  %v1812_v19 = vmax.f32 %v1804_v11, 0.0 }
 0x134   : > { %v1758_v4 = vpop.f32.mrf.mxu0  ;;  %v1772_v53 = vadd.f32 %v1771_v55, %v1707_v23 }
 0x135   : > { %v1759_v42 = vadd.f32 %v1758_v4, %v1694_v5  ;;  %v2383_v6 = vpop.f32.mrf.mxu1  ;;  %v1810_v32 = vmax.f32 %v1802_v44, 0.0  ;;  %v1805_v35 = vadd.f32 %v2176_v60, %v1767_v47  ;;  %v1808_v63 = vadd.f32 %v2183_v57, %v1780_v21 }
 0x136   : > { %v1806_v38 = vadd.f32 %v2179_v2, %v1772_v53  ;;  %v1783_v31 = vadd.f32 %v2383_v6, %v1718_v15 }
 0x137   : > { %v1803_v13 = vadd.f32 %v2172_v40, %v1759_v42  ;;  %v1774_v34 = vpop.f32.mrf.mxu1  ;;  %v1813_v58 = vmax.f32 %v1805_v35, 0.0  ;;  %v1816_v36 = vmax.f32 %v1808_v63, 0.0 }
 0x138   : > { %v1775_v49 = vadd.f32 %v1774_v34, %v1710_v7  ;;  %v1814_v37 = vmax.f32 %v1806_v38, 0.0  ;;  %v1809_v12 = vadd.f32 %v2184_v22, %v1783_v31 }
 0x139   : > { %v1811_v29 = vmax.f32 %v1803_v13, 0.0 }
 0x13a   : > { %v1807_v8 = vadd.f32 %v2180_v59, %v1775_v49  ;;  %v1817_v50 = vmax.f32 %v1809_v12, 0.0 }
 0x13b   : > { %v1818_v25 = vadd.f32 %v1811_v29, %v1810_v32 }
 0x13c   : > { %v1815_v14 = vmax.f32 %v1807_v8, 0.0 }
 0x13d   : > { %v1819_v33 = vadd.f32 %v1818_v25, %v1812_v19 }
 0x13f   : > { %v1820_v1 = vadd.f32 %v1819_v33, %v1813_v58 }
 0x141   : > { %v1821_v27 = vadd.f32 %v1820_v1, %v1814_v37 }
 0x143   : > { %v1822_v52 = vadd.f32 %v1821_v27, %v1815_v14 }
 0x145   : > { %v1823_v17 = vadd.f32 %v1822_v52, %v1816_v36 }
 0x147   : > { %v1824_v48 = vadd.f32 %v1823_v17, %v1817_v50 }
 0x149   : > { %v1825_v30 = vrot.slane %v1824_v48, 4 }
 0x14b   : > { %v1826_v24 = vadd.f32 %v1825_v30, %v1824_v48 }
 0x14d   : > { %v1827_v41 = vrot.slane %v1826_v24, 2 }
 0x14f   : > { %v1828_v26 = vadd.f32 %v1827_v41, %v1826_v24 }
 0x151   : > { %v1829_v20 = vrot.slane %v1828_v26, 1 }
 0x153   : > { %v1830_v28 = vadd.f32 %v1829_v20, %v1828_v26 }
 0x155   : > { %v1832_v60 = vmul.f32 0.015625, %v1830_v28 }
 0x157   : > { %1833 = vst [vmem:[%s298_s24] sm:$0x1] %v1832_v60 }
 0x158 PF: > { %s14_s17 = sadd.s32 1, %s2579_s17   ;;  %s3219_s15 = smov %s2575_s16 }
 0x159   : > { %p11_p5 = scmp.ge.s32.totalorder %s14_s17, 4   ;;  %s3220_s16 = smov %s3222_s18 }
 0x15b   :  { %13 = sbr.rel (!%p11_p5) target bundleno = 2 (0x2), region = 77 }

</bundles_post_ra>
